<compile_context>
chip_gen: v6e
topology: v6e:2x2x1
jax: 0.10.0
libtpu: 0.0.40
codegen_flags: <defaults>
</compile_context>

<pallas_src>
import functools
import math

import jax
import jax.numpy as jnp
import numpy as np
from jax import lax
from jax.experimental import pallas as pl
from jax.experimental.pallas import tpu as pltpu

EXP_BIT = 4
MAN_BIT = 8


# ----------------------------------------------------------------------------
# Block-floating-point activation quantization: shared exponent over the
# channel (last) axis per location, mantissa rounded/clamped to MAN_BIT bits.
# TODO(synk): original BFPActivation.transform_activation_online source was
# not provided; this implements standard shared-exponent BFP where the block
# max maps into [2^(m-2), 2^(m-1)) (non-saturating for the max element).
# ----------------------------------------------------------------------------
def _bfp_quant(x, exp_bit, man_bit):
    x = x.astype(jnp.float32)
    maxabs = jnp.max(jnp.abs(x), axis=-1, keepdims=True)
    emax = 2 ** (exp_bit - 1) - 1
    emin = -(2 ** (exp_bit - 1))
    # IEEE-754 exponent field == floor(log2(maxabs)) for normal values
    # (maxabs == 0 -> -127, clipped to emin below).  Pure VPU integer ops.
    e = (lax.bitcast_convert_type(maxabs, jnp.int32) >> 23) - 127
    e = jnp.clip(e, emin, emax)
    shift = (man_bit - 2) - e                                          # int32
    scale = lax.bitcast_convert_type((shift + 127) << 23, jnp.float32)      # 2**shift
    inv_scale = lax.bitcast_convert_type((127 - shift) << 23, jnp.float32)  # 2**-shift
    q = jnp.round(x * scale)
    q = jnp.clip(q, float(-(2 ** (man_bit - 1))), float(2 ** (man_bit - 1) - 1))
    return q * inv_scale


# ----------------------------------------------------------------------------
# Pallas kernel: 3-D conv (stride 1, 'same' padding) with fused epilogue.
# grid = (N, depth_blocks). Each step fully computes a (BD, H, W, Cout)
# output block:
#   for each needed input depth plane (BD + 2*pad of them):
#     build the (H, W, K*K*Cin) im2col buffer ONCE (halo zeros via the padded
#     slab scratch), then scatter its K temporal-tap matmuls into the
#     per-depth-block accumulator.
# Epilogue: bias + BFP (+ ReLU, or fused BFP(identity) + add + ReLU).
# ----------------------------------------------------------------------------
def _conv3d_bfp_kernel(x_ref, w_ref, b_ref, *rest,
                       K, pad, D, BD, H, W, Cin, Cout,
                       exp_bit, man_bit, relu_out, fuse_residual):
    if fuse_residual:
        id_ref, o_ref, slab_ref, col_ref, acc_ref = rest
    else:
        o_ref, slab_ref, col_ref, acc_ref = rest

    d0 = pl.program_id(1) * BD

    acc_ref[...] = jnp.zeros_like(acc_ref)
    slab_ref[...] = jnp.zeros_like(slab_ref)   # halo stays zero afterwards

    for li in range(BD + 2 * pad):
        d_in = d0 + (li - pad)                          # global input depth
        gate = jnp.where((d_in >= 0) & (d_in < D), 1.0, 0.0)
        d_cl = jnp.clip(d_in, 0, D - 1)
        plane = x_ref[d_cl].astype(jnp.float32) * gate  # (H, W, Cin), zero if OOB
        slab_ref[pad:pad + H, pad:pad + W, :] = plane

        # Build im2col buffer once per input plane (reused by all K temporal taps).
        for kh in range(K):
            for kw in range(K):
                t = kh * K + kw
                col_ref[:, :, t * Cin:(t + 1) * Cin] = \
                    slab_ref[kh:kh + H, kw:kw + W, :]
        lhs = col_ref[...].reshape(H * W, K * K * Cin)

        for kd in range(K):
            od = li - kd                                 # local output depth
            if 0 <= od < BD:
                acc_ref[od] += jnp.dot(lhs, w_ref[kd],
                                       preferred_element_type=jnp.float32)

    # Fused epilogue.
    # TODO(synk): with small Cout this epilogue/store is lane-sparse; folding
    # W*Cout into the lane dim would help most on v5e (single store slot).
    for od in range(BD):
        y = acc_ref[od] + b_ref[0]
        y = _bfp_quant(y, exp_bit, man_bit).reshape(H, W, Cout)
        if fuse_residual:
            xq = _bfp_quant(id_ref[od].astype(jnp.float32), exp_bit, man_bit)
            y = jnp.maximum(xq + y, 0.0)
        elif relu_out:
            y = jnp.maximum(y, 0.0)
        o_ref[od] = y.astype(o_ref.dtype)


def _pick_block_d(D, cap=8):
    for bd in range(min(D, cap), 0, -1):
        if D % bd == 0:
            return bd
    return 1


def conv3d_bfp_pallas(x, w, b, *, exp_bit=EXP_BIT, man_bit=MAN_BIT,
                      relu=False, identity=None, out_dtype=jnp.float32,
                      block_d=None):
    """3-D conv (stride 1, padding K//2) + bias + BFP, with either a fused
    ReLU or a fused BFP(identity) + residual-add + ReLU epilogue.

    x: (N, D, H, W, Cin); w: (K, K, K, Cin, Cout); b: (Cout,).
    identity (optional): (N, D, H, W, Cout) residual-path input (f32).
    """
    N, D, H, W, Cin = x.shape
    K = w.shape[0]
    Cout = w.shape[-1]
    pad = K // 2
    assert 2 * pad == K - 1, "odd kernel size expected"

    BD = block_d or _pick_block_d(D)
    assert D % BD == 0
    nDB = D // BD
    Hp, Wp = H + 2 * pad, W + 2 * pad

    w2 = w.reshape(K, K * K * Cin, Cout)   # per-temporal-tap im2col weights
    b2 = b.reshape(1, Cout)

    fuse_residual = identity is not None
    kernel = functools.partial(
        _conv3d_bfp_kernel, K=K, pad=pad, D=D, BD=BD, H=H, W=W,
        Cin=Cin, Cout=Cout, exp_bit=exp_bit, man_bit=man_bit,
        relu_out=relu, fuse_residual=fuse_residual)

    in_specs = [
        # Full-depth input resident per batch element: constant block index
        # across the depth-block axis -> each plane is DMA'd exactly once per
        # conv (no temporal overfetch, no whole-tensor pad pass).
        pl.BlockSpec((None, D, H, W, Cin), lambda n, db: (n, 0, 0, 0, 0)),
        # Whole weight resident in VMEM (constant block index -> one fetch).
        pl.BlockSpec((K, K * K * Cin, Cout), lambda n, db: (0, 0, 0)),
        pl.BlockSpec((1, Cout), lambda n, db: (0, 0)),
    ]
    args = [x, w2, b2]
    if fuse_residual:
        in_specs.append(pl.BlockSpec((None, BD, H, W, Cout),
                                     lambda n, db: (n, db, 0, 0, 0)))
        args.append(identity)

    # TODO(synk): for production shapes (large H*W*C) add H/W/Cout tiling and
    # re-derive block sizes for v7x's 64 MiB VMEM; mark the leading axis
    # CORE_PARALLEL on v7x to use both TensorCores.
    return pl.pallas_call(
        kernel,
        out_shape=jax.ShapeDtypeStruct((N, D, H, W, Cout), out_dtype),
        grid=(N, nDB),
        in_specs=in_specs,
        out_specs=pl.BlockSpec((None, BD, H, W, Cout),
                               lambda n, db: (n, db, 0, 0, 0)),
        scratch_shapes=[
            pltpu.VMEM((Hp, Wp, Cin), jnp.float32),        # zero-padded slab
            pltpu.VMEM((H, W, K * K * Cin), jnp.float32),  # im2col buffer
            pltpu.VMEM((BD, H * W, Cout), jnp.float32),    # depth-block accumulator
        ],
        compiler_params=pltpu.CompilerParams(
            dimension_semantics=("parallel", "parallel")),
    )(*args)


# ----------------------------------------------------------------------------
# Full residual block (downsample=False).
# TODO(synk): downsample=True branch (stride-2 convs + 1x1x1 downsampleconv)
# is not implemented.
# ----------------------------------------------------------------------------
def bfp_spatiotemporal_resblock(x_ncdhw, params, kernel_size,
                                exp_bit=EXP_BIT, man_bit=MAN_BIT):
    del kernel_size  # implied by the weight shape
    x = jnp.transpose(x_ncdhw, (0, 2, 3, 4, 1)).astype(jnp.float32)  # -> NDHWC
    # conv1 -> BFP -> ReLU (fused); emitted as bf16: lossless after man_bit=8
    # BFP and halves intermediate HBM traffic.
    r = conv3d_bfp_pallas(x, params["w1"], params["b1"],
                          exp_bit=exp_bit, man_bit=man_bit,
                          relu=True, out_dtype=jnp.bfloat16)
    # conv2 -> BFP, then BFP(identity) + add + ReLU (fused epilogue).
    out = conv3d_bfp_pallas(r, params["w2"], params["b2"],
                            exp_bit=exp_bit, man_bit=man_bit,
                            relu=False, identity=x, out_dtype=jnp.float32)
    return jnp.transpose(out, (0, 4, 1, 2, 3))  # -> NCDHW


def init_params(key, in_channels, out_channels, kernel_size):
    """Deterministic Conv3d-style init (uniform +-1/sqrt(fan_in))."""
    K = kernel_size
    ks = jax.random.split(key, 4)

    def conv_init(kw, kb, cin, cout):
        fan_in = cin * K ** 3
        bound = 1.0 / math.sqrt(fan_in)
        w = jax.random.uniform(kw, (cout, cin, K, K, K), jnp.float32, -bound, bound)
        b = jax.random.uniform(kb, (cout,), jnp.float32, -bound, bound)
        return jnp.transpose(w, (2, 3, 4, 1, 0)), b   # -> (K, K, K, Cin, Cout)

    w1, b1 = conv_init(ks[0], ks[1], in_channels, out_channels)
    w2, b2 = conv_init(ks[2], ks[3], out_channels, out_channels)
    return {"w1": w1, "b1": b1, "w2": w2, "b2": b2}


# ----------------------------------------------------------------------------
# Plain-JAX reference (sanity check of the Pallas kernels).
# ----------------------------------------------------------------------------
def _conv3d_ref(x, w, b, pad):
    out = lax.conv_general_dilated(
        x, w, window_strides=(1, 1, 1), padding=[(pad, pad)] * 3,
        dimension_numbers=("NDHWC", "DHWIO", "NDHWC"))
    return out + b


def _block_ref(x_ncdhw, params, kernel_size, exp_bit, man_bit):
    pad = kernel_size // 2
    x = jnp.transpose(x_ncdhw, (0, 2, 3, 4, 1)).astype(jnp.float32)
    r = _conv3d_ref(x, params["w1"], params["b1"], pad)
    r = jnp.maximum(_bfp_quant(r, exp_bit, man_bit), 0.0)
    r = _conv3d_ref(r, params["w2"], params["b2"], pad)
    r = _bfp_quant(r, exp_bit, man_bit)
    xq = _bfp_quant(x, exp_bit, man_bit)
    out = jnp.maximum(xq + r, 0.0)
    return jnp.transpose(out, (0, 4, 1, 2, 3))


if __name__ == "__main__":
    key = jax.random.PRNGKey(0)
    kx, kp = jax.random.split(key)

    # Small shapes: N=2, Cin=Cout=8, D=4, H=W=8, kernel_size=3
    N, Cin, Cout, D, H, W, K = 2, 8, 8, 4, 8, 8, 3
    x = jax.random.normal(kx, (N, Cin, D, H, W), dtype=jnp.float32)  # NCDHW
    params = init_params(kp, Cin, Cout, K)

    out = bfp_spatiotemporal_resblock(x, params, K, EXP_BIT, MAN_BIT)
    out = jax.block_until_ready(out)
    assert out.shape == (N, Cout, D, H, W)

    ref = jax.block_until_ready(_block_ref(x, params, K, EXP_BIT, MAN_BIT))
    # Tolerance allows a rare BFP LSB flip from f32 accumulation-order
    # differences between the Pallas conv and XLA's conv.
    np.testing.assert_allclose(np.asarray(out), np.asarray(ref),
                               atol=6e-2, rtol=2e-2)
    print("KERNEL_OK")
</pallas_src>

<mosaic_0001>
module attributes {stable_mosaic.version = 11 : i64} {
  func.func @_conv3d_bfp_kernel(%arg0: i32, %arg1: i32, %arg2: memref<1x4x8x8x8xf32, #tpu.memory_space<vmem>>, %arg3: memref<3x72x8xf32, #tpu.memory_space<vmem>>, %arg4: memref<1x8xf32, #tpu.memory_space<vmem>>, %arg5: memref<1x4x8x8x8xbf16, #tpu.memory_space<vmem>>, %arg6: memref<10x10x8xf32, #tpu.memory_space<vmem>>, %arg7: memref<8x8x72xf32, #tpu.memory_space<vmem>>, %arg8: memref<4x64x8xf32, #tpu.memory_space<vmem>>) attributes {dimension_semantics = [#tpu.dimension_semantics<parallel>, #tpu.dimension_semantics<parallel>], iteration_bounds = array<i64: 2, 1>, scalar_prefetch = 0 : i64, scratch_operands = 3 : i64, tpu.core_type = #tpu.core_type<tc>, window_params = [{transform_indices = @transform_0, window_bounds = array<i64: 1, 4, 8, 8, 8>}, {pipeline_mode = #tpu.pipeline_mode<synchronous>, transform_indices = @transform_1, window_bounds = array<i64: 3, 72, 8>}, {pipeline_mode = #tpu.pipeline_mode<synchronous>, transform_indices = @transform_2, window_bounds = array<i64: 1, 8>}, {transform_indices = @transform_3, window_bounds = array<i64: 1, 4, 8, 8, 8>}]} {
    %c4_i32 = arith.constant 4 : i32
    %0 = arith.muli %arg1, %c4_i32 : i32
    %cst = arith.constant 0.000000e+00 : f32
    %1 = vector.broadcast %cst : f32 to vector<4x64x8xf32>
    %c0 = arith.constant 0 : index
    %c0_0 = arith.constant 0 : index
    %c0_1 = arith.constant 0 : index
    %2 = vector.load %arg8[%c0, %c0_0, %c0_1] : memref<4x64x8xf32, #tpu.memory_space<vmem>>, vector<4x64x8xf32>
    tpu.vector_store %arg8[%c0, %c0_0, %c0_1], %1 {strides = array<i32>} : memref<4x64x8xf32, #tpu.memory_space<vmem>>, vector<4x64x8xf32>,
    %cst_2 = arith.constant 0.000000e+00 : f32
    %3 = vector.broadcast %cst_2 : f32 to vector<10x10x8xf32>
    %c0_3 = arith.constant 0 : index
    %c0_4 = arith.constant 0 : index
    %c0_5 = arith.constant 0 : index
    %4 = vector.load %arg6[%c0_3, %c0_4, %c0_5] : memref<10x10x8xf32, #tpu.memory_space<vmem>>, vector<10x10x8xf32>
    tpu.vector_store %arg6[%c0_3, %c0_4, %c0_5], %3 {strides = array<i32>} : memref<10x10x8xf32, #tpu.memory_space<vmem>>, vector<10x10x8xf32>,
    %c-1_i32 = arith.constant -1 : i32
    %5 = arith.addi %0, %c-1_i32 : i32
    %c0_i32 = arith.constant 0 : i32
    %6 = arith.cmpi sge, %5, %c0_i32 : i32
    %c4_i32_6 = arith.constant 4 : i32
    %7 = arith.cmpi slt, %5, %c4_i32_6 : i32
    %8 = arith.andi %6, %7 : i1
    %cst_7 = arith.constant 1.000000e+00 : f32
    %cst_8 = arith.constant 0.000000e+00 : f32
    %9 = arith.select %8, %cst_7, %cst_8 : f32
    %c0_i32_9 = arith.constant 0 : i32
    %c3_i32 = arith.constant 3 : i32
    %10 = arith.maxsi %c0_i32_9, %5 : i32
    %11 = arith.minsi %c3_i32, %10 : i32
    %c0_10 = arith.constant 0 : index
    %12 = arith.index_cast %11 : i32 to index
    %c0_11 = arith.constant 0 : index
    %c0_12 = arith.constant 0 : index
    %c0_13 = arith.constant 0 : index
    %13 = vector.load %arg2[%c0_10, %12, %c0_11, %c0_12, %c0_13] : memref<1x4x8x8x8xf32, #tpu.memory_space<vmem>>, vector<1x1x8x8x8xf32>
    %14 = vector.shape_cast %13 : vector<1x1x8x8x8xf32> to vector<8x8x8xf32>
    %15 = vector.broadcast %9 : f32 to vector<8x8x8xf32>
    %16 = arith.mulf %14, %15 : vector<8x8x8xf32>
    %c1 = arith.constant 1 : index
    %c1_14 = arith.constant 1 : index
    %c0_15 = arith.constant 0 : index
    %17 = vector.load %arg6[%c1, %c1_14, %c0_15] : memref<10x10x8xf32, #tpu.memory_space<vmem>>, vector<8x8x8xf32>
    tpu.vector_store %arg6[%c1, %c1_14, %c0_15], %16 {strides = array<i32>} : memref<10x10x8xf32, #tpu.memory_space<vmem>>, vector<8x8x8xf32>,
    %c0_16 = arith.constant 0 : index
    %c0_17 = arith.constant 0 : index
    %c0_18 = arith.constant 0 : index
    %18 = vector.load %arg6[%c0_16, %c0_17, %c0_18] : memref<10x10x8xf32, #tpu.memory_space<vmem>>, vector<8x8x8xf32>
    %c0_19 = arith.constant 0 : index
    %c0_20 = arith.constant 0 : index
    %c0_21 = arith.constant 0 : index
    %19 = vector.load %arg7[%c0_19, %c0_20, %c0_21] : memref<8x8x72xf32, #tpu.memory_space<vmem>>, vector<8x8x8xf32>
    tpu.vector_store %arg7[%c0_19, %c0_20, %c0_21], %18 {strides = array<i32>} : memref<8x8x72xf32, #tpu.memory_space<vmem>>, vector<8x8x8xf32>,
    %c0_22 = arith.constant 0 : index
    %c1_23 = arith.constant 1 : index
    %c0_24 = arith.constant 0 : index
    %20 = vector.load %arg6[%c0_22, %c1_23, %c0_24] : memref<10x10x8xf32, #tpu.memory_space<vmem>>, vector<8x8x8xf32>
    %c0_25 = arith.constant 0 : index
    %c0_26 = arith.constant 0 : index
    %c8 = arith.constant 8 : index
    %21 = vector.load %arg7[%c0_25, %c0_26, %c8] : memref<8x8x72xf32, #tpu.memory_space<vmem>>, vector<8x8x8xf32>
    tpu.vector_store %arg7[%c0_25, %c0_26, %c8], %20 {strides = array<i32>} : memref<8x8x72xf32, #tpu.memory_space<vmem>>, vector<8x8x8xf32>,
    %c0_27 = arith.constant 0 : index
    %c2 = arith.constant 2 : index
    %c0_28 = arith.constant 0 : index
    %22 = vector.load %arg6[%c0_27, %c2, %c0_28] : memref<10x10x8xf32, #tpu.memory_space<vmem>>, vector<8x8x8xf32>
    %c0_29 = arith.constant 0 : index
    %c0_30 = arith.constant 0 : index
    %c16 = arith.constant 16 : index
    %23 = vector.load %arg7[%c0_29, %c0_30, %c16] : memref<8x8x72xf32, #tpu.memory_space<vmem>>, vector<8x8x8xf32>
    tpu.vector_store %arg7[%c0_29, %c0_30, %c16], %22 {strides = array<i32>} : memref<8x8x72xf32, #tpu.memory_space<vmem>>, vector<8x8x8xf32>,
    %c1_31 = arith.constant 1 : index
    %c0_32 = arith.constant 0 : index
    %c0_33 = arith.constant 0 : index
    %24 = vector.load %arg6[%c1_31, %c0_32, %c0_33] : memref<10x10x8xf32, #tpu.memory_space<vmem>>, vector<8x8x8xf32>
    %c0_34 = arith.constant 0 : index
    %c0_35 = arith.constant 0 : index
    %c24 = arith.constant 24 : index
    %25 = vector.load %arg7[%c0_34, %c0_35, %c24] : memref<8x8x72xf32, #tpu.memory_space<vmem>>, vector<8x8x8xf32>
    tpu.vector_store %arg7[%c0_34, %c0_35, %c24], %24 {strides = array<i32>} : memref<8x8x72xf32, #tpu.memory_space<vmem>>, vector<8x8x8xf32>,
    %c1_36 = arith.constant 1 : index
    %c1_37 = arith.constant 1 : index
    %c0_38 = arith.constant 0 : index
    %26 = vector.load %arg6[%c1_36, %c1_37, %c0_38] : memref<10x10x8xf32, #tpu.memory_space<vmem>>, vector<8x8x8xf32>
    %c0_39 = arith.constant 0 : index
    %c0_40 = arith.constant 0 : index
    %c32 = arith.constant 32 : index
    %27 = vector.load %arg7[%c0_39, %c0_40, %c32] : memref<8x8x72xf32, #tpu.memory_space<vmem>>, vector<8x8x8xf32>
    tpu.vector_store %arg7[%c0_39, %c0_40, %c32], %26 {strides = array<i32>} : memref<8x8x72xf32, #tpu.memory_space<vmem>>, vector<8x8x8xf32>,
    %c1_41 = arith.constant 1 : index
    %c2_42 = arith.constant 2 : index
    %c0_43 = arith.constant 0 : index
    %28 = vector.load %arg6[%c1_41, %c2_42, %c0_43] : memref<10x10x8xf32, #tpu.memory_space<vmem>>, vector<8x8x8xf32>
    %c0_44 = arith.constant 0 : index
    %c0_45 = arith.constant 0 : index
    %c40 = arith.constant 40 : index
    %29 = vector.load %arg7[%c0_44, %c0_45, %c40] : memref<8x8x72xf32, #tpu.memory_space<vmem>>, vector<8x8x8xf32>
    tpu.vector_store %arg7[%c0_44, %c0_45, %c40], %28 {strides = array<i32>} : memref<8x8x72xf32, #tpu.memory_space<vmem>>, vector<8x8x8xf32>,
    %c2_46 = arith.constant 2 : index
    %c0_47 = arith.constant 0 : index
    %c0_48 = arith.constant 0 : index
    %30 = vector.load %arg6[%c2_46, %c0_47, %c0_48] : memref<10x10x8xf32, #tpu.memory_space<vmem>>, vector<8x8x8xf32>
    %c0_49 = arith.constant 0 : index
    %c0_50 = arith.constant 0 : index
    %c48 = arith.constant 48 : index
    %31 = vector.load %arg7[%c0_49, %c0_50, %c48] : memref<8x8x72xf32, #tpu.memory_space<vmem>>, vector<8x8x8xf32>
    tpu.vector_store %arg7[%c0_49, %c0_50, %c48], %30 {strides = array<i32>} : memref<8x8x72xf32, #tpu.memory_space<vmem>>, vector<8x8x8xf32>,
    %c2_51 = arith.constant 2 : index
    %c1_52 = arith.constant 1 : index
    %c0_53 = arith.constant 0 : index
    %32 = vector.load %arg6[%c2_51, %c1_52, %c0_53] : memref<10x10x8xf32, #tpu.memory_space<vmem>>, vector<8x8x8xf32>
    %c0_54 = arith.constant 0 : index
    %c0_55 = arith.constant 0 : index
    %c56 = arith.constant 56 : index
    %33 = vector.load %arg7[%c0_54, %c0_55, %c56] : memref<8x8x72xf32, #tpu.memory_space<vmem>>, vector<8x8x8xf32>
    tpu.vector_store %arg7[%c0_54, %c0_55, %c56], %32 {strides = array<i32>} : memref<8x8x72xf32, #tpu.memory_space<vmem>>, vector<8x8x8xf32>,
    %c2_56 = arith.constant 2 : index
    %c2_57 = arith.constant 2 : index
    %c0_58 = arith.constant 0 : index
    %34 = vector.load %arg6[%c2_56, %c2_57, %c0_58] : memref<10x10x8xf32, #tpu.memory_space<vmem>>, vector<8x8x8xf32>
    %c0_59 = arith.constant 0 : index
    %c0_60 = arith.constant 0 : index
    %c64 = arith.constant 64 : index
    %35 = vector.load %arg7[%c0_59, %c0_60, %c64] : memref<8x8x72xf32, #tpu.memory_space<vmem>>, vector<8x8x8xf32>
    tpu.vector_store %arg7[%c0_59, %c0_60, %c64], %34 {strides = array<i32>} : memref<8x8x72xf32, #tpu.memory_space<vmem>>, vector<8x8x8xf32>,
    %c0_61 = arith.constant 0 : index
    %c0_62 = arith.constant 0 : index
    %c0_63 = arith.constant 0 : index
    %36 = vector.load %arg7[%c0_61, %c0_62, %c0_63] : memref<8x8x72xf32, #tpu.memory_space<vmem>>, vector<8x8x72xf32>
    %37 = vector.shape_cast %36 : vector<8x8x72xf32> to vector<64x72xf32>
    %c0_64 = arith.constant 0 : index
    %c0_65 = arith.constant 0 : index
    %c0_66 = arith.constant 0 : index
    %38 = vector.load %arg8[%c0_64, %c0_65, %c0_66] : memref<4x64x8xf32, #tpu.memory_space<vmem>>, vector<1x64x8xf32>
    %39 = vector.shape_cast %38 : vector<1x64x8xf32> to vector<64x8xf32>
    %c0_67 = arith.constant 0 : index
    %c0_68 = arith.constant 0 : index
    %c0_69 = arith.constant 0 : index
    %40 = vector.load %arg3[%c0_67, %c0_68, %c0_69] : memref<3x72x8xf32, #tpu.memory_space<vmem>>, vector<1x72x8xf32>
    %41 = vector.shape_cast %40 : vector<1x72x8xf32> to vector<72x8xf32>
    %cst_70 = arith.constant dense<0.000000e+00> : vector<64x8xf32>
    %42 = tpu.matmul %37, %41, %cst_70 {dimension_numbers = #tpu.dot_dimension_numbers<[1], [0], [0], [1], [0, 0, 1, 1], [], []>} : vector<64x72xf32>, vector<72x8xf32>, vector<64x8xf32> -> vector<64x8xf32>
    %43 = arith.addf %39, %42 : vector<64x8xf32>
    %c0_71 = arith.constant 0 : index
    %c0_72 = arith.constant 0 : index
    %c0_73 = arith.constant 0 : index
    %44 = vector.load %arg8[%c0_71, %c0_72, %c0_73] : memref<4x64x8xf32, #tpu.memory_space<vmem>>, vector<1x64x8xf32>
    %45 = vector.shape_cast %44 : vector<1x64x8xf32> to vector<64x8xf32>
    %46 = vector.shape_cast %43 : vector<64x8xf32> to vector<1x64x8xf32>
    tpu.vector_store %arg8[%c0_71, %c0_72, %c0_73], %46 {strides = array<i32>} : memref<4x64x8xf32, #tpu.memory_space<vmem>>, vector<1x64x8xf32>,
    %c0_i32_74 = arith.constant 0 : i32
    %47 = arith.addi %0, %c0_i32_74 : i32
    %c0_i32_75 = arith.constant 0 : i32
    %48 = arith.cmpi sge, %47, %c0_i32_75 : i32
    %c4_i32_76 = arith.constant 4 : i32
    %49 = arith.cmpi slt, %47, %c4_i32_76 : i32
    %50 = arith.andi %48, %49 : i1
    %cst_77 = arith.constant 1.000000e+00 : f32
    %cst_78 = arith.constant 0.000000e+00 : f32
    %51 = arith.select %50, %cst_77, %cst_78 : f32
    %c0_i32_79 = arith.constant 0 : i32
    %c3_i32_80 = arith.constant 3 : i32
    %52 = arith.maxsi %c0_i32_79, %47 : i32
    %53 = arith.minsi %c3_i32_80, %52 : i32
    %c0_81 = arith.constant 0 : index
    %54 = arith.index_cast %53 : i32 to index
    %c0_82 = arith.constant 0 : index
    %c0_83 = arith.constant 0 : index
    %c0_84 = arith.constant 0 : index
    %55 = vector.load %arg2[%c0_81, %54, %c0_82, %c0_83, %c0_84] : memref<1x4x8x8x8xf32, #tpu.memory_space<vmem>>, vector<1x1x8x8x8xf32>
    %56 = vector.shape_cast %55 : vector<1x1x8x8x8xf32> to vector<8x8x8xf32>
    %57 = vector.broadcast %51 : f32 to vector<8x8x8xf32>
    %58 = arith.mulf %56, %57 : vector<8x8x8xf32>
    %c1_85 = arith.constant 1 : index
    %c1_86 = arith.constant 1 : index
    %c0_87 = arith.constant 0 : index
    %59 = vector.load %arg6[%c1_85, %c1_86, %c0_87] : memref<10x10x8xf32, #tpu.memory_space<vmem>>, vector<8x8x8xf32>
    tpu.vector_store %arg6[%c1_85, %c1_86, %c0_87], %58 {strides = array<i32>} : memref<10x10x8xf32, #tpu.memory_space<vmem>>, vector<8x8x8xf32>,
    %c0_88 = arith.constant 0 : index
    %c0_89 = arith.constant 0 : index
    %c0_90 = arith.constant 0 : index
    %60 = vector.load %arg6[%c0_88, %c0_89, %c0_90] : memref<10x10x8xf32, #tpu.memory_space<vmem>>, vector<8x8x8xf32>
    %c0_91 = arith.constant 0 : index
    %c0_92 = arith.constant 0 : index
    %c0_93 = arith.constant 0 : index
    %61 = vector.load %arg7[%c0_91, %c0_92, %c0_93] : memref<8x8x72xf32, #tpu.memory_space<vmem>>, vector<8x8x8xf32>
    tpu.vector_store %arg7[%c0_91, %c0_92, %c0_93], %60 {strides = array<i32>} : memref<8x8x72xf32, #tpu.memory_space<vmem>>, vector<8x8x8xf32>,
    %c0_94 = arith.constant 0 : index
    %c1_95 = arith.constant 1 : index
    %c0_96 = arith.constant 0 : index
    %62 = vector.load %arg6[%c0_94, %c1_95, %c0_96] : memref<10x10x8xf32, #tpu.memory_space<vmem>>, vector<8x8x8xf32>
    %c0_97 = arith.constant 0 : index
    %c0_98 = arith.constant 0 : index
    %c8_99 = arith.constant 8 : index
    %63 = vector.load %arg7[%c0_97, %c0_98, %c8_99] : memref<8x8x72xf32, #tpu.memory_space<vmem>>, vector<8x8x8xf32>
    tpu.vector_store %arg7[%c0_97, %c0_98, %c8_99], %62 {strides = array<i32>} : memref<8x8x72xf32, #tpu.memory_space<vmem>>, vector<8x8x8xf32>,
    %c0_100 = arith.constant 0 : index
    %c2_101 = arith.constant 2 : index
    %c0_102 = arith.constant 0 : index
    %64 = vector.load %arg6[%c0_100, %c2_101, %c0_102] : memref<10x10x8xf32, #tpu.memory_space<vmem>>, vector<8x8x8xf32>
    %c0_103 = arith.constant 0 : index
    %c0_104 = arith.constant 0 : index
    %c16_105 = arith.constant 16 : index
    %65 = vector.load %arg7[%c0_103, %c0_104, %c16_105] : memref<8x8x72xf32, #tpu.memory_space<vmem>>, vector<8x8x8xf32>
    tpu.vector_store %arg7[%c0_103, %c0_104, %c16_105], %64 {strides = array<i32>} : memref<8x8x72xf32, #tpu.memory_space<vmem>>, vector<8x8x8xf32>,
    %c1_106 = arith.constant 1 : index
    %c0_107 = arith.constant 0 : index
    %c0_108 = arith.constant 0 : index
    %66 = vector.load %arg6[%c1_106, %c0_107, %c0_108] : memref<10x10x8xf32, #tpu.memory_space<vmem>>, vector<8x8x8xf32>
    %c0_109 = arith.constant 0 : index
    %c0_110 = arith.constant 0 : index
    %c24_111 = arith.constant 24 : index
    %67 = vector.load %arg7[%c0_109, %c0_110, %c24_111] : memref<8x8x72xf32, #tpu.memory_space<vmem>>, vector<8x8x8xf32>
    tpu.vector_store %arg7[%c0_109, %c0_110, %c24_111], %66 {strides = array<i32>} : memref<8x8x72xf32, #tpu.memory_space<vmem>>, vector<8x8x8xf32>,
    %c1_112 = arith.constant 1 : index
    %c1_113 = arith.constant 1 : index
    %c0_114 = arith.constant 0 : index
    %68 = vector.load %arg6[%c1_112, %c1_113, %c0_114] : memref<10x10x8xf32, #tpu.memory_space<vmem>>, vector<8x8x8xf32>
    %c0_115 = arith.constant 0 : index
    %c0_116 = arith.constant 0 : index
    %c32_117 = arith.constant 32 : index
    %69 = vector.load %arg7[%c0_115, %c0_116, %c32_117] : memref<8x8x72xf32, #tpu.memory_space<vmem>>, vector<8x8x8xf32>
    tpu.vector_store %arg7[%c0_115, %c0_116, %c32_117], %68 {strides = array<i32>} : memref<8x8x72xf32, #tpu.memory_space<vmem>>, vector<8x8x8xf32>,
    %c1_118 = arith.constant 1 : index
    %c2_119 = arith.constant 2 : index
    %c0_120 = arith.constant 0 : index
    %70 = vector.load %arg6[%c1_118, %c2_119, %c0_120] : memref<10x10x8xf32, #tpu.memory_space<vmem>>, vector<8x8x8xf32>
    %c0_121 = arith.constant 0 : index
    %c0_122 = arith.constant 0 : index
    %c40_123 = arith.constant 40 : index
    %71 = vector.load %arg7[%c0_121, %c0_122, %c40_123] : memref<8x8x72xf32, #tpu.memory_space<vmem>>, vector<8x8x8xf32>
    tpu.vector_store %arg7[%c0_121, %c0_122, %c40_123], %70 {strides = array<i32>} : memref<8x8x72xf32, #tpu.memory_space<vmem>>, vector<8x8x8xf32>,
    %c2_124 = arith.constant 2 : index
    %c0_125 = arith.constant 0 : index
    %c0_126 = arith.constant 0 : index
    %72 = vector.load %arg6[%c2_124, %c0_125, %c0_126] : memref<10x10x8xf32, #tpu.memory_space<vmem>>, vector<8x8x8xf32>
    %c0_127 = arith.constant 0 : index
    %c0_128 = arith.constant 0 : index
    %c48_129 = arith.constant 48 : index
    %73 = vector.load %arg7[%c0_127, %c0_128, %c48_129] : memref<8x8x72xf32, #tpu.memory_space<vmem>>, vector<8x8x8xf32>
    tpu.vector_store %arg7[%c0_127, %c0_128, %c48_129], %72 {strides = array<i32>} : memref<8x8x72xf32, #tpu.memory_space<vmem>>, vector<8x8x8xf32>,
    %c2_130 = arith.constant 2 : index
    %c1_131 = arith.constant 1 : index
    %c0_132 = arith.constant 0 : index
    %74 = vector.load %arg6[%c2_130, %c1_131, %c0_132] : memref<10x10x8xf32, #tpu.memory_space<vmem>>, vector<8x8x8xf32>
    %c0_133 = arith.constant 0 : index
    %c0_134 = arith.constant 0 : index
    %c56_135 = arith.constant 56 : index
    %75 = vector.load %arg7[%c0_133, %c0_134, %c56_135] : memref<8x8x72xf32, #tpu.memory_space<vmem>>, vector<8x8x8xf32>
    tpu.vector_store %arg7[%c0_133, %c0_134, %c56_135], %74 {strides = array<i32>} : memref<8x8x72xf32, #tpu.memory_space<vmem>>, vector<8x8x8xf32>,
    %c2_136 = arith.constant 2 : index
    %c2_137 = arith.constant 2 : index
    %c0_138 = arith.constant 0 : index
    %76 = vector.load %arg6[%c2_136, %c2_137, %c0_138] : memref<10x10x8xf32, #tpu.memory_space<vmem>>, vector<8x8x8xf32>
    %c0_139 = arith.constant 0 : index
    %c0_140 = arith.constant 0 : index
    %c64_141 = arith.constant 64 : index
    %77 = vector.load %arg7[%c0_139, %c0_140, %c64_141] : memref<8x8x72xf32, #tpu.memory_space<vmem>>, vector<8x8x8xf32>
    tpu.vector_store %arg7[%c0_139, %c0_140, %c64_141], %76 {strides = array<i32>} : memref<8x8x72xf32, #tpu.memory_space<vmem>>, vector<8x8x8xf32>,
    %c0_142 = arith.constant 0 : index
    %c0_143 = arith.constant 0 : index
    %c0_144 = arith.constant 0 : index
    %78 = vector.load %arg7[%c0_142, %c0_143, %c0_144] : memref<8x8x72xf32, #tpu.memory_space<vmem>>, vector<8x8x72xf32>
    %79 = vector.shape_cast %78 : vector<8x8x72xf32> to vector<64x72xf32>
    %c1_145 = arith.constant 1 : index
    %c0_146 = arith.constant 0 : index
    %c0_147 = arith.constant 0 : index
    %80 = vector.load %arg8[%c1_145, %c0_146, %c0_147] : memref<4x64x8xf32, #tpu.memory_space<vmem>>, vector<1x64x8xf32>
    %81 = vector.shape_cast %80 : vector<1x64x8xf32> to vector<64x8xf32>
    %c0_148 = arith.constant 0 : index
    %c0_149 = arith.constant 0 : index
    %c0_150 = arith.constant 0 : index
    %82 = vector.load %arg3[%c0_148, %c0_149, %c0_150] : memref<3x72x8xf32, #tpu.memory_space<vmem>>, vector<1x72x8xf32>
    %83 = vector.shape_cast %82 : vector<1x72x8xf32> to vector<72x8xf32>
    %cst_151 = arith.constant dense<0.000000e+00> : vector<64x8xf32>
    %84 = tpu.matmul %79, %83, %cst_151 {dimension_numbers = #tpu.dot_dimension_numbers<[1], [0], [0], [1], [0, 0, 1, 1], [], []>} : vector<64x72xf32>, vector<72x8xf32>, vector<64x8xf32> -> vector<64x8xf32>
    %85 = arith.addf %81, %84 : vector<64x8xf32>
    %c1_152 = arith.constant 1 : index
    %c0_153 = arith.constant 0 : index
    %c0_154 = arith.constant 0 : index
    %86 = vector.load %arg8[%c1_152, %c0_153, %c0_154] : memref<4x64x8xf32, #tpu.memory_space<vmem>>, vector<1x64x8xf32>
    %87 = vector.shape_cast %86 : vector<1x64x8xf32> to vector<64x8xf32>
    %88 = vector.shape_cast %85 : vector<64x8xf32> to vector<1x64x8xf32>
    tpu.vector_store %arg8[%c1_152, %c0_153, %c0_154], %88 {strides = array<i32>} : memref<4x64x8xf32, #tpu.memory_space<vmem>>, vector<1x64x8xf32>,
    %c0_155 = arith.constant 0 : index
    %c0_156 = arith.constant 0 : index
    %c0_157 = arith.constant 0 : index
    %89 = vector.load %arg8[%c0_155, %c0_156, %c0_157] : memref<4x64x8xf32, #tpu.memory_space<vmem>>, vector<1x64x8xf32>
    %90 = vector.shape_cast %89 : vector<1x64x8xf32> to vector<64x8xf32>
    %c1_158 = arith.constant 1 : index
    %c0_159 = arith.constant 0 : index
    %c0_160 = arith.constant 0 : index
    %91 = vector.load %arg3[%c1_158, %c0_159, %c0_160] : memref<3x72x8xf32, #tpu.memory_space<vmem>>, vector<1x72x8xf32>
    %92 = vector.shape_cast %91 : vector<1x72x8xf32> to vector<72x8xf32>
    %cst_161 = arith.constant dense<0.000000e+00> : vector<64x8xf32>
    %93 = tpu.matmul %79, %92, %cst_161 {dimension_numbers = #tpu.dot_dimension_numbers<[1], [0], [0], [1], [0, 0, 1, 1], [], []>} : vector<64x72xf32>, vector<72x8xf32>, vector<64x8xf32> -> vector<64x8xf32>
    %94 = arith.addf %90, %93 : vector<64x8xf32>
    %c0_162 = arith.constant 0 : index
    %c0_163 = arith.constant 0 : index
    %c0_164 = arith.constant 0 : index
    %95 = vector.load %arg8[%c0_162, %c0_163, %c0_164] : memref<4x64x8xf32, #tpu.memory_space<vmem>>, vector<1x64x8xf32>
    %96 = vector.shape_cast %95 : vector<1x64x8xf32> to vector<64x8xf32>
    %97 = vector.shape_cast %94 : vector<64x8xf32> to vector<1x64x8xf32>
    tpu.vector_store %arg8[%c0_162, %c0_163, %c0_164], %97 {strides = array<i32>} : memref<4x64x8xf32, #tpu.memory_space<vmem>>, vector<1x64x8xf32>,
    %c1_i32 = arith.constant 1 : i32
    %98 = arith.addi %0, %c1_i32 : i32
    %c0_i32_165 = arith.constant 0 : i32
    %99 = arith.cmpi sge, %98, %c0_i32_165 : i32
    %c4_i32_166 = arith.constant 4 : i32
    %100 = arith.cmpi slt, %98, %c4_i32_166 : i32
    %101 = arith.andi %99, %100 : i1
    %cst_167 = arith.constant 1.000000e+00 : f32
    %cst_168 = arith.constant 0.000000e+00 : f32
    %102 = arith.select %101, %cst_167, %cst_168 : f32
    %c0_i32_169 = arith.constant 0 : i32
    %c3_i32_170 = arith.constant 3 : i32
    %103 = arith.maxsi %c0_i32_169, %98 : i32
    %104 = arith.minsi %c3_i32_170, %103 : i32
    %c0_171 = arith.constant 0 : index
    %105 = arith.index_cast %104 : i32 to index
    %c0_172 = arith.constant 0 : index
    %c0_173 = arith.constant 0 : index
    %c0_174 = arith.constant 0 : index
    %106 = vector.load %arg2[%c0_171, %105, %c0_172, %c0_173, %c0_174] : memref<1x4x8x8x8xf32, #tpu.memory_space<vmem>>, vector<1x1x8x8x8xf32>
    %107 = vector.shape_cast %106 : vector<1x1x8x8x8xf32> to vector<8x8x8xf32>
    %108 = vector.broadcast %102 : f32 to vector<8x8x8xf32>
    %109 = arith.mulf %107, %108 : vector<8x8x8xf32>
    %c1_175 = arith.constant 1 : index
    %c1_176 = arith.constant 1 : index
    %c0_177 = arith.constant 0 : index
    %110 = vector.load %arg6[%c1_175, %c1_176, %c0_177] : memref<10x10x8xf32, #tpu.memory_space<vmem>>, vector<8x8x8xf32>
    tpu.vector_store %arg6[%c1_175, %c1_176, %c0_177], %109 {strides = array<i32>} : memref<10x10x8xf32, #tpu.memory_space<vmem>>, vector<8x8x8xf32>,
    %c0_178 = arith.constant 0 : index
    %c0_179 = arith.constant 0 : index
    %c0_180 = arith.constant 0 : index
    %111 = vector.load %arg6[%c0_178, %c0_179, %c0_180] : memref<10x10x8xf32, #tpu.memory_space<vmem>>, vector<8x8x8xf32>
    %c0_181 = arith.constant 0 : index
    %c0_182 = arith.constant 0 : index
    %c0_183 = arith.constant 0 : index
    %112 = vector.load %arg7[%c0_181, %c0_182, %c0_183] : memref<8x8x72xf32, #tpu.memory_space<vmem>>, vector<8x8x8xf32>
    tpu.vector_store %arg7[%c0_181, %c0_182, %c0_183], %111 {strides = array<i32>} : memref<8x8x72xf32, #tpu.memory_space<vmem>>, vector<8x8x8xf32>,
    %c0_184 = arith.constant 0 : index
    %c1_185 = arith.constant 1 : index
    %c0_186 = arith.constant 0 : index
    %113 = vector.load %arg6[%c0_184, %c1_185, %c0_186] : memref<10x10x8xf32, #tpu.memory_space<vmem>>, vector<8x8x8xf32>
    %c0_187 = arith.constant 0 : index
    %c0_188 = arith.constant 0 : index
    %c8_189 = arith.constant 8 : index
    %114 = vector.load %arg7[%c0_187, %c0_188, %c8_189] : memref<8x8x72xf32, #tpu.memory_space<vmem>>, vector<8x8x8xf32>
    tpu.vector_store %arg7[%c0_187, %c0_188, %c8_189], %113 {strides = array<i32>} : memref<8x8x72xf32, #tpu.memory_space<vmem>>, vector<8x8x8xf32>,
    %c0_190 = arith.constant 0 : index
    %c2_191 = arith.constant 2 : index
    %c0_192 = arith.constant 0 : index
    %115 = vector.load %arg6[%c0_190, %c2_191, %c0_192] : memref<10x10x8xf32, #tpu.memory_space<vmem>>, vector<8x8x8xf32>
    %c0_193 = arith.constant 0 : index
    %c0_194 = arith.constant 0 : index
    %c16_195 = arith.constant 16 : index
    %116 = vector.load %arg7[%c0_193, %c0_194, %c16_195] : memref<8x8x72xf32, #tpu.memory_space<vmem>>, vector<8x8x8xf32>
    tpu.vector_store %arg7[%c0_193, %c0_194, %c16_195], %115 {strides = array<i32>} : memref<8x8x72xf32, #tpu.memory_space<vmem>>, vector<8x8x8xf32>,
    %c1_196 = arith.constant 1 : index
    %c0_197 = arith.constant 0 : index
    %c0_198 = arith.constant 0 : index
    %117 = vector.load %arg6[%c1_196, %c0_197, %c0_198] : memref<10x10x8xf32, #tpu.memory_space<vmem>>, vector<8x8x8xf32>
    %c0_199 = arith.constant 0 : index
    %c0_200 = arith.constant 0 : index
    %c24_201 = arith.constant 24 : index
    %118 = vector.load %arg7[%c0_199, %c0_200, %c24_201] : memref<8x8x72xf32, #tpu.memory_space<vmem>>, vector<8x8x8xf32>
    tpu.vector_store %arg7[%c0_199, %c0_200, %c24_201], %117 {strides = array<i32>} : memref<8x8x72xf32, #tpu.memory_space<vmem>>, vector<8x8x8xf32>,
    %c1_202 = arith.constant 1 : index
    %c1_203 = arith.constant 1 : index
    %c0_204 = arith.constant 0 : index
    %119 = vector.load %arg6[%c1_202, %c1_203, %c0_204] : memref<10x10x8xf32, #tpu.memory_space<vmem>>, vector<8x8x8xf32>
    %c0_205 = arith.constant 0 : index
    %c0_206 = arith.constant 0 : index
    %c32_207 = arith.constant 32 : index
    %120 = vector.load %arg7[%c0_205, %c0_206, %c32_207] : memref<8x8x72xf32, #tpu.memory_space<vmem>>, vector<8x8x8xf32>
    tpu.vector_store %arg7[%c0_205, %c0_206, %c32_207], %119 {strides = array<i32>} : memref<8x8x72xf32, #tpu.memory_space<vmem>>, vector<8x8x8xf32>,
    %c1_208 = arith.constant 1 : index
    %c2_209 = arith.constant 2 : index
    %c0_210 = arith.constant 0 : index
    %121 = vector.load %arg6[%c1_208, %c2_209, %c0_210] : memref<10x10x8xf32, #tpu.memory_space<vmem>>, vector<8x8x8xf32>
    %c0_211 = arith.constant 0 : index
    %c0_212 = arith.constant 0 : index
    %c40_213 = arith.constant 40 : index
    %122 = vector.load %arg7[%c0_211, %c0_212, %c40_213] : memref<8x8x72xf32, #tpu.memory_space<vmem>>, vector<8x8x8xf32>
    tpu.vector_store %arg7[%c0_211, %c0_212, %c40_213], %121 {strides = array<i32>} : memref<8x8x72xf32, #tpu.memory_space<vmem>>, vector<8x8x8xf32>,
    %c2_214 = arith.constant 2 : index
    %c0_215 = arith.constant 0 : index
    %c0_216 = arith.constant 0 : index
    %123 = vector.load %arg6[%c2_214, %c0_215, %c0_216] : memref<10x10x8xf32, #tpu.memory_space<vmem>>, vector<8x8x8xf32>
    %c0_217 = arith.constant 0 : index
    %c0_218 = arith.constant 0 : index
    %c48_219 = arith.constant 48 : index
    %124 = vector.load %arg7[%c0_217, %c0_218, %c48_219] : memref<8x8x72xf32, #tpu.memory_space<vmem>>, vector<8x8x8xf32>
    tpu.vector_store %arg7[%c0_217, %c0_218, %c48_219], %123 {strides = array<i32>} : memref<8x8x72xf32, #tpu.memory_space<vmem>>, vector<8x8x8xf32>,
    %c2_220 = arith.constant 2 : index
    %c1_221 = arith.constant 1 : index
    %c0_222 = arith.constant 0 : index
    %125 = vector.load %arg6[%c2_220, %c1_221, %c0_222] : memref<10x10x8xf32, #tpu.memory_space<vmem>>, vector<8x8x8xf32>
    %c0_223 = arith.constant 0 : index
    %c0_224 = arith.constant 0 : index
    %c56_225 = arith.constant 56 : index
    %126 = vector.load %arg7[%c0_223, %c0_224, %c56_225] : memref<8x8x72xf32, #tpu.memory_space<vmem>>, vector<8x8x8xf32>
    tpu.vector_store %arg7[%c0_223, %c0_224, %c56_225], %125 {strides = array<i32>} : memref<8x8x72xf32, #tpu.memory_space<vmem>>, vector<8x8x8xf32>,
    %c2_226 = arith.constant 2 : index
    %c2_227 = arith.constant 2 : index
    %c0_228 = arith.constant 0 : index
    %127 = vector.load %arg6[%c2_226, %c2_227, %c0_228] : memref<10x10x8xf32, #tpu.memory_space<vmem>>, vector<8x8x8xf32>
    %c0_229 = arith.constant 0 : index
    %c0_230 = arith.constant 0 : index
    %c64_231 = arith.constant 64 : index
    %128 = vector.load %arg7[%c0_229, %c0_230, %c64_231] : memref<8x8x72xf32, #tpu.memory_space<vmem>>, vector<8x8x8xf32>
    tpu.vector_store %arg7[%c0_229, %c0_230, %c64_231], %127 {strides = array<i32>} : memref<8x8x72xf32, #tpu.memory_space<vmem>>, vector<8x8x8xf32>,
    %c0_232 = arith.constant 0 : index
    %c0_233 = arith.constant 0 : index
    %c0_234 = arith.constant 0 : index
    %129 = vector.load %arg7[%c0_232, %c0_233, %c0_234] : memref<8x8x72xf32, #tpu.memory_space<vmem>>, vector<8x8x72xf32>
    %130 = vector.shape_cast %129 : vector<8x8x72xf32> to vector<64x72xf32>
    %c2_235 = arith.constant 2 : index
    %c0_236 = arith.constant 0 : index
    %c0_237 = arith.constant 0 : index
    %131 = vector.load %arg8[%c2_235, %c0_236, %c0_237] : memref<4x64x8xf32, #tpu.memory_space<vmem>>, vector<1x64x8xf32>
    %132 = vector.shape_cast %131 : vector<1x64x8xf32> to vector<64x8xf32>
    %c0_238 = arith.constant 0 : index
    %c0_239 = arith.constant 0 : index
    %c0_240 = arith.constant 0 : index
    %133 = vector.load %arg3[%c0_238, %c0_239, %c0_240] : memref<3x72x8xf32, #tpu.memory_space<vmem>>, vector<1x72x8xf32>
    %134 = vector.shape_cast %133 : vector<1x72x8xf32> to vector<72x8xf32>
    %cst_241 = arith.constant dense<0.000000e+00> : vector<64x8xf32>
    %135 = tpu.matmul %130, %134, %cst_241 {dimension_numbers = #tpu.dot_dimension_numbers<[1], [0], [0], [1], [0, 0, 1, 1], [], []>} : vector<64x72xf32>, vector<72x8xf32>, vector<64x8xf32> -> vector<64x8xf32>
    %136 = arith.addf %132, %135 : vector<64x8xf32>
    %c2_242 = arith.constant 2 : index
    %c0_243 = arith.constant 0 : index
    %c0_244 = arith.constant 0 : index
    %137 = vector.load %arg8[%c2_242, %c0_243, %c0_244] : memref<4x64x8xf32, #tpu.memory_space<vmem>>, vector<1x64x8xf32>
    %138 = vector.shape_cast %137 : vector<1x64x8xf32> to vector<64x8xf32>
    %139 = vector.shape_cast %136 : vector<64x8xf32> to vector<1x64x8xf32>
    tpu.vector_store %arg8[%c2_242, %c0_243, %c0_244], %139 {strides = array<i32>} : memref<4x64x8xf32, #tpu.memory_space<vmem>>, vector<1x64x8xf32>,
    %c1_245 = arith.constant 1 : index
    %c0_246 = arith.constant 0 : index
    %c0_247 = arith.constant 0 : index
    %140 = vector.load %arg8[%c1_245, %c0_246, %c0_247] : memref<4x64x8xf32, #tpu.memory_space<vmem>>, vector<1x64x8xf32>
    %141 = vector.shape_cast %140 : vector<1x64x8xf32> to vector<64x8xf32>
    %c1_248 = arith.constant 1 : index
    %c0_249 = arith.constant 0 : index
    %c0_250 = arith.constant 0 : index
    %142 = vector.load %arg3[%c1_248, %c0_249, %c0_250] : memref<3x72x8xf32, #tpu.memory_space<vmem>>, vector<1x72x8xf32>
    %143 = vector.shape_cast %142 : vector<1x72x8xf32> to vector<72x8xf32>
    %cst_251 = arith.constant dense<0.000000e+00> : vector<64x8xf32>
    %144 = tpu.matmul %130, %143, %cst_251 {dimension_numbers = #tpu.dot_dimension_numbers<[1], [0], [0], [1], [0, 0, 1, 1], [], []>} : vector<64x72xf32>, vector<72x8xf32>, vector<64x8xf32> -> vector<64x8xf32>
    %145 = arith.addf %141, %144 : vector<64x8xf32>
    %c1_252 = arith.constant 1 : index
    %c0_253 = arith.constant 0 : index
    %c0_254 = arith.constant 0 : index
    %146 = vector.load %arg8[%c1_252, %c0_253, %c0_254] : memref<4x64x8xf32, #tpu.memory_space<vmem>>, vector<1x64x8xf32>
    %147 = vector.shape_cast %146 : vector<1x64x8xf32> to vector<64x8xf32>
    %148 = vector.shape_cast %145 : vector<64x8xf32> to vector<1x64x8xf32>
    tpu.vector_store %arg8[%c1_252, %c0_253, %c0_254], %148 {strides = array<i32>} : memref<4x64x8xf32, #tpu.memory_space<vmem>>, vector<1x64x8xf32>,
    %c0_255 = arith.constant 0 : index
    %c0_256 = arith.constant 0 : index
    %c0_257 = arith.constant 0 : index
    %149 = vector.load %arg8[%c0_255, %c0_256, %c0_257] : memref<4x64x8xf32, #tpu.memory_space<vmem>>, vector<1x64x8xf32>
    %150 = vector.shape_cast %149 : vector<1x64x8xf32> to vector<64x8xf32>
    %c2_258 = arith.constant 2 : index
    %c0_259 = arith.constant 0 : index
    %c0_260 = arith.constant 0 : index
    %151 = vector.load %arg3[%c2_258, %c0_259, %c0_260] : memref<3x72x8xf32, #tpu.memory_space<vmem>>, vector<1x72x8xf32>
    %152 = vector.shape_cast %151 : vector<1x72x8xf32> to vector<72x8xf32>
    %cst_261 = arith.constant dense<0.000000e+00> : vector<64x8xf32>
    %153 = tpu.matmul %130, %152, %cst_261 {dimension_numbers = #tpu.dot_dimension_numbers<[1], [0], [0], [1], [0, 0, 1, 1], [], []>} : vector<64x72xf32>, vector<72x8xf32>, vector<64x8xf32> -> vector<64x8xf32>
    %154 = arith.addf %150, %153 : vector<64x8xf32>
    %c0_262 = arith.constant 0 : index
    %c0_263 = arith.constant 0 : index
    %c0_264 = arith.constant 0 : index
    %155 = vector.load %arg8[%c0_262, %c0_263, %c0_264] : memref<4x64x8xf32, #tpu.memory_space<vmem>>, vector<1x64x8xf32>
    %156 = vector.shape_cast %155 : vector<1x64x8xf32> to vector<64x8xf32>
    %157 = vector.shape_cast %154 : vector<64x8xf32> to vector<1x64x8xf32>
    tpu.vector_store %arg8[%c0_262, %c0_263, %c0_264], %157 {strides = array<i32>} : memref<4x64x8xf32, #tpu.memory_space<vmem>>, vector<1x64x8xf32>,
    %c2_i32 = arith.constant 2 : i32
    %158 = arith.addi %0, %c2_i32 : i32
    %c0_i32_265 = arith.constant 0 : i32
    %159 = arith.cmpi sge, %158, %c0_i32_265 : i32
    %c4_i32_266 = arith.constant 4 : i32
    %160 = arith.cmpi slt, %158, %c4_i32_266 : i32
    %161 = arith.andi %159, %160 : i1
    %cst_267 = arith.constant 1.000000e+00 : f32
    %cst_268 = arith.constant 0.000000e+00 : f32
    %162 = arith.select %161, %cst_267, %cst_268 : f32
    %c0_i32_269 = arith.constant 0 : i32
    %c3_i32_270 = arith.constant 3 : i32
    %163 = arith.maxsi %c0_i32_269, %158 : i32
    %164 = arith.minsi %c3_i32_270, %163 : i32
    %c0_271 = arith.constant 0 : index
    %165 = arith.index_cast %164 : i32 to index
    %c0_272 = arith.constant 0 : index
    %c0_273 = arith.constant 0 : index
    %c0_274 = arith.constant 0 : index
    %166 = vector.load %arg2[%c0_271, %165, %c0_272, %c0_273, %c0_274] : memref<1x4x8x8x8xf32, #tpu.memory_space<vmem>>, vector<1x1x8x8x8xf32>
    %167 = vector.shape_cast %166 : vector<1x1x8x8x8xf32> to vector<8x8x8xf32>
    %168 = vector.broadcast %162 : f32 to vector<8x8x8xf32>
    %169 = arith.mulf %167, %168 : vector<8x8x8xf32>
    %c1_275 = arith.constant 1 : index
    %c1_276 = arith.constant 1 : index
    %c0_277 = arith.constant 0 : index
    %170 = vector.load %arg6[%c1_275, %c1_276, %c0_277] : memref<10x10x8xf32, #tpu.memory_space<vmem>>, vector<8x8x8xf32>
    tpu.vector_store %arg6[%c1_275, %c1_276, %c0_277], %169 {strides = array<i32>} : memref<10x10x8xf32, #tpu.memory_space<vmem>>, vector<8x8x8xf32>,
    %c0_278 = arith.constant 0 : index
    %c0_279 = arith.constant 0 : index
    %c0_280 = arith.constant 0 : index
    %171 = vector.load %arg6[%c0_278, %c0_279, %c0_280] : memref<10x10x8xf32, #tpu.memory_space<vmem>>, vector<8x8x8xf32>
    %c0_281 = arith.constant 0 : index
    %c0_282 = arith.constant 0 : index
    %c0_283 = arith.constant 0 : index
    %172 = vector.load %arg7[%c0_281, %c0_282, %c0_283] : memref<8x8x72xf32, #tpu.memory_space<vmem>>, vector<8x8x8xf32>
    tpu.vector_store %arg7[%c0_281, %c0_282, %c0_283], %171 {strides = array<i32>} : memref<8x8x72xf32, #tpu.memory_space<vmem>>, vector<8x8x8xf32>,
    %c0_284 = arith.constant 0 : index
    %c1_285 = arith.constant 1 : index
    %c0_286 = arith.constant 0 : index
    %173 = vector.load %arg6[%c0_284, %c1_285, %c0_286] : memref<10x10x8xf32, #tpu.memory_space<vmem>>, vector<8x8x8xf32>
    %c0_287 = arith.constant 0 : index
    %c0_288 = arith.constant 0 : index
    %c8_289 = arith.constant 8 : index
    %174 = vector.load %arg7[%c0_287, %c0_288, %c8_289] : memref<8x8x72xf32, #tpu.memory_space<vmem>>, vector<8x8x8xf32>
    tpu.vector_store %arg7[%c0_287, %c0_288, %c8_289], %173 {strides = array<i32>} : memref<8x8x72xf32, #tpu.memory_space<vmem>>, vector<8x8x8xf32>,
    %c0_290 = arith.constant 0 : index
    %c2_291 = arith.constant 2 : index
    %c0_292 = arith.constant 0 : index
    %175 = vector.load %arg6[%c0_290, %c2_291, %c0_292] : memref<10x10x8xf32, #tpu.memory_space<vmem>>, vector<8x8x8xf32>
    %c0_293 = arith.constant 0 : index
    %c0_294 = arith.constant 0 : index
    %c16_295 = arith.constant 16 : index
    %176 = vector.load %arg7[%c0_293, %c0_294, %c16_295] : memref<8x8x72xf32, #tpu.memory_space<vmem>>, vector<8x8x8xf32>
    tpu.vector_store %arg7[%c0_293, %c0_294, %c16_295], %175 {strides = array<i32>} : memref<8x8x72xf32, #tpu.memory_space<vmem>>, vector<8x8x8xf32>,
    %c1_296 = arith.constant 1 : index
    %c0_297 = arith.constant 0 : index
    %c0_298 = arith.constant 0 : index
    %177 = vector.load %arg6[%c1_296, %c0_297, %c0_298] : memref<10x10x8xf32, #tpu.memory_space<vmem>>, vector<8x8x8xf32>
    %c0_299 = arith.constant 0 : index
    %c0_300 = arith.constant 0 : index
    %c24_301 = arith.constant 24 : index
    %178 = vector.load %arg7[%c0_299, %c0_300, %c24_301] : memref<8x8x72xf32, #tpu.memory_space<vmem>>, vector<8x8x8xf32>
    tpu.vector_store %arg7[%c0_299, %c0_300, %c24_301], %177 {strides = array<i32>} : memref<8x8x72xf32, #tpu.memory_space<vmem>>, vector<8x8x8xf32>,
    %c1_302 = arith.constant 1 : index
    %c1_303 = arith.constant 1 : index
    %c0_304 = arith.constant 0 : index
    %179 = vector.load %arg6[%c1_302, %c1_303, %c0_304] : memref<10x10x8xf32, #tpu.memory_space<vmem>>, vector<8x8x8xf32>
    %c0_305 = arith.constant 0 : index
    %c0_306 = arith.constant 0 : index
    %c32_307 = arith.constant 32 : index
    %180 = vector.load %arg7[%c0_305, %c0_306, %c32_307] : memref<8x8x72xf32, #tpu.memory_space<vmem>>, vector<8x8x8xf32>
    tpu.vector_store %arg7[%c0_305, %c0_306, %c32_307], %179 {strides = array<i32>} : memref<8x8x72xf32, #tpu.memory_space<vmem>>, vector<8x8x8xf32>,
    %c1_308 = arith.constant 1 : index
    %c2_309 = arith.constant 2 : index
    %c0_310 = arith.constant 0 : index
    %181 = vector.load %arg6[%c1_308, %c2_309, %c0_310] : memref<10x10x8xf32, #tpu.memory_space<vmem>>, vector<8x8x8xf32>
    %c0_311 = arith.constant 0 : index
    %c0_312 = arith.constant 0 : index
    %c40_313 = arith.constant 40 : index
    %182 = vector.load %arg7[%c0_311, %c0_312, %c40_313] : memref<8x8x72xf32, #tpu.memory_space<vmem>>, vector<8x8x8xf32>
    tpu.vector_store %arg7[%c0_311, %c0_312, %c40_313], %181 {strides = array<i32>} : memref<8x8x72xf32, #tpu.memory_space<vmem>>, vector<8x8x8xf32>,
    %c2_314 = arith.constant 2 : index
    %c0_315 = arith.constant 0 : index
    %c0_316 = arith.constant 0 : index
    %183 = vector.load %arg6[%c2_314, %c0_315, %c0_316] : memref<10x10x8xf32, #tpu.memory_space<vmem>>, vector<8x8x8xf32>
    %c0_317 = arith.constant 0 : index
    %c0_318 = arith.constant 0 : index
    %c48_319 = arith.constant 48 : index
    %184 = vector.load %arg7[%c0_317, %c0_318, %c48_319] : memref<8x8x72xf32, #tpu.memory_space<vmem>>, vector<8x8x8xf32>
    tpu.vector_store %arg7[%c0_317, %c0_318, %c48_319], %183 {strides = array<i32>} : memref<8x8x72xf32, #tpu.memory_space<vmem>>, vector<8x8x8xf32>,
    %c2_320 = arith.constant 2 : index
    %c1_321 = arith.constant 1 : index
    %c0_322 = arith.constant 0 : index
    %185 = vector.load %arg6[%c2_320, %c1_321, %c0_322] : memref<10x10x8xf32, #tpu.memory_space<vmem>>, vector<8x8x8xf32>
    %c0_323 = arith.constant 0 : index
    %c0_324 = arith.constant 0 : index
    %c56_325 = arith.constant 56 : index
    %186 = vector.load %arg7[%c0_323, %c0_324, %c56_325] : memref<8x8x72xf32, #tpu.memory_space<vmem>>, vector<8x8x8xf32>
    tpu.vector_store %arg7[%c0_323, %c0_324, %c56_325], %185 {strides = array<i32>} : memref<8x8x72xf32, #tpu.memory_space<vmem>>, vector<8x8x8xf32>,
    %c2_326 = arith.constant 2 : index
    %c2_327 = arith.constant 2 : index
    %c0_328 = arith.constant 0 : index
    %187 = vector.load %arg6[%c2_326, %c2_327, %c0_328] : memref<10x10x8xf32, #tpu.memory_space<vmem>>, vector<8x8x8xf32>
    %c0_329 = arith.constant 0 : index
    %c0_330 = arith.constant 0 : index
    %c64_331 = arith.constant 64 : index
    %188 = vector.load %arg7[%c0_329, %c0_330, %c64_331] : memref<8x8x72xf32, #tpu.memory_space<vmem>>, vector<8x8x8xf32>
    tpu.vector_store %arg7[%c0_329, %c0_330, %c64_331], %187 {strides = array<i32>} : memref<8x8x72xf32, #tpu.memory_space<vmem>>, vector<8x8x8xf32>,
    %c0_332 = arith.constant 0 : index
    %c0_333 = arith.constant 0 : index
    %c0_334 = arith.constant 0 : index
    %189 = vector.load %arg7[%c0_332, %c0_333, %c0_334] : memref<8x8x72xf32, #tpu.memory_space<vmem>>, vector<8x8x72xf32>
    %190 = vector.shape_cast %189 : vector<8x8x72xf32> to vector<64x72xf32>
    %c3 = arith.constant 3 : index
    %c0_335 = arith.constant 0 : index
    %c0_336 = arith.constant 0 : index
    %191 = vector.load %arg8[%c3, %c0_335, %c0_336] : memref<4x64x8xf32, #tpu.memory_space<vmem>>, vector<1x64x8xf32>
    %192 = vector.shape_cast %191 : vector<1x64x8xf32> to vector<64x8xf32>
    %c0_337 = arith.constant 0 : index
    %c0_338 = arith.constant 0 : index
    %c0_339 = arith.constant 0 : index
    %193 = vector.load %arg3[%c0_337, %c0_338, %c0_339] : memref<3x72x8xf32, #tpu.memory_space<vmem>>, vector<1x72x8xf32>
    %194 = vector.shape_cast %193 : vector<1x72x8xf32> to vector<72x8xf32>
    %cst_340 = arith.constant dense<0.000000e+00> : vector<64x8xf32>
    %195 = tpu.matmul %190, %194, %cst_340 {dimension_numbers = #tpu.dot_dimension_numbers<[1], [0], [0], [1], [0, 0, 1, 1], [], []>} : vector<64x72xf32>, vector<72x8xf32>, vector<64x8xf32> -> vector<64x8xf32>
    %196 = arith.addf %192, %195 : vector<64x8xf32>
    %c3_341 = arith.constant 3 : index
    %c0_342 = arith.constant 0 : index
    %c0_343 = arith.constant 0 : index
    %197 = vector.load %arg8[%c3_341, %c0_342, %c0_343] : memref<4x64x8xf32, #tpu.memory_space<vmem>>, vector<1x64x8xf32>
    %198 = vector.shape_cast %197 : vector<1x64x8xf32> to vector<64x8xf32>
    %199 = vector.shape_cast %196 : vector<64x8xf32> to vector<1x64x8xf32>
    tpu.vector_store %arg8[%c3_341, %c0_342, %c0_343], %199 {strides = array<i32>} : memref<4x64x8xf32, #tpu.memory_space<vmem>>, vector<1x64x8xf32>,
    %c2_344 = arith.constant 2 : index
    %c0_345 = arith.constant 0 : index
    %c0_346 = arith.constant 0 : index
    %200 = vector.load %arg8[%c2_344, %c0_345, %c0_346] : memref<4x64x8xf32, #tpu.memory_space<vmem>>, vector<1x64x8xf32>
    %201 = vector.shape_cast %200 : vector<1x64x8xf32> to vector<64x8xf32>
    %c1_347 = arith.constant 1 : index
    %c0_348 = arith.constant 0 : index
    %c0_349 = arith.constant 0 : index
    %202 = vector.load %arg3[%c1_347, %c0_348, %c0_349] : memref<3x72x8xf32, #tpu.memory_space<vmem>>, vector<1x72x8xf32>
    %203 = vector.shape_cast %202 : vector<1x72x8xf32> to vector<72x8xf32>
    %cst_350 = arith.constant dense<0.000000e+00> : vector<64x8xf32>
    %204 = tpu.matmul %190, %203, %cst_350 {dimension_numbers = #tpu.dot_dimension_numbers<[1], [0], [0], [1], [0, 0, 1, 1], [], []>} : vector<64x72xf32>, vector<72x8xf32>, vector<64x8xf32> -> vector<64x8xf32>
    %205 = arith.addf %201, %204 : vector<64x8xf32>
    %c2_351 = arith.constant 2 : index
    %c0_352 = arith.constant 0 : index
    %c0_353 = arith.constant 0 : index
    %206 = vector.load %arg8[%c2_351, %c0_352, %c0_353] : memref<4x64x8xf32, #tpu.memory_space<vmem>>, vector<1x64x8xf32>
    %207 = vector.shape_cast %206 : vector<1x64x8xf32> to vector<64x8xf32>
    %208 = vector.shape_cast %205 : vector<64x8xf32> to vector<1x64x8xf32>
    tpu.vector_store %arg8[%c2_351, %c0_352, %c0_353], %208 {strides = array<i32>} : memref<4x64x8xf32, #tpu.memory_space<vmem>>, vector<1x64x8xf32>,
    %c1_354 = arith.constant 1 : index
    %c0_355 = arith.constant 0 : index
    %c0_356 = arith.constant 0 : index
    %209 = vector.load %arg8[%c1_354, %c0_355, %c0_356] : memref<4x64x8xf32, #tpu.memory_space<vmem>>, vector<1x64x8xf32>
    %210 = vector.shape_cast %209 : vector<1x64x8xf32> to vector<64x8xf32>
    %c2_357 = arith.constant 2 : index
    %c0_358 = arith.constant 0 : index
    %c0_359 = arith.constant 0 : index
    %211 = vector.load %arg3[%c2_357, %c0_358, %c0_359] : memref<3x72x8xf32, #tpu.memory_space<vmem>>, vector<1x72x8xf32>
    %212 = vector.shape_cast %211 : vector<1x72x8xf32> to vector<72x8xf32>
    %cst_360 = arith.constant dense<0.000000e+00> : vector<64x8xf32>
    %213 = tpu.matmul %190, %212, %cst_360 {dimension_numbers = #tpu.dot_dimension_numbers<[1], [0], [0], [1], [0, 0, 1, 1], [], []>} : vector<64x72xf32>, vector<72x8xf32>, vector<64x8xf32> -> vector<64x8xf32>
    %214 = arith.addf %210, %213 : vector<64x8xf32>
    %c1_361 = arith.constant 1 : index
    %c0_362 = arith.constant 0 : index
    %c0_363 = arith.constant 0 : index
    %215 = vector.load %arg8[%c1_361, %c0_362, %c0_363] : memref<4x64x8xf32, #tpu.memory_space<vmem>>, vector<1x64x8xf32>
    %216 = vector.shape_cast %215 : vector<1x64x8xf32> to vector<64x8xf32>
    %217 = vector.shape_cast %214 : vector<64x8xf32> to vector<1x64x8xf32>
    tpu.vector_store %arg8[%c1_361, %c0_362, %c0_363], %217 {strides = array<i32>} : memref<4x64x8xf32, #tpu.memory_space<vmem>>, vector<1x64x8xf32>,
    %c3_i32_364 = arith.constant 3 : i32
    %218 = arith.addi %0, %c3_i32_364 : i32
    %c0_i32_365 = arith.constant 0 : i32
    %219 = arith.cmpi sge, %218, %c0_i32_365 : i32
    %c4_i32_366 = arith.constant 4 : i32
    %220 = arith.cmpi slt, %218, %c4_i32_366 : i32
    %221 = arith.andi %219, %220 : i1
    %cst_367 = arith.constant 1.000000e+00 : f32
    %cst_368 = arith.constant 0.000000e+00 : f32
    %222 = arith.select %221, %cst_367, %cst_368 : f32
    %c0_i32_369 = arith.constant 0 : i32
    %c3_i32_370 = arith.constant 3 : i32
    %223 = arith.maxsi %c0_i32_369, %218 : i32
    %224 = arith.minsi %c3_i32_370, %223 : i32
    %c0_371 = arith.constant 0 : index
    %225 = arith.index_cast %224 : i32 to index
    %c0_372 = arith.constant 0 : index
    %c0_373 = arith.constant 0 : index
    %c0_374 = arith.constant 0 : index
    %226 = vector.load %arg2[%c0_371, %225, %c0_372, %c0_373, %c0_374] : memref<1x4x8x8x8xf32, #tpu.memory_space<vmem>>, vector<1x1x8x8x8xf32>
    %227 = vector.shape_cast %226 : vector<1x1x8x8x8xf32> to vector<8x8x8xf32>
    %228 = vector.broadcast %222 : f32 to vector<8x8x8xf32>
    %229 = arith.mulf %227, %228 : vector<8x8x8xf32>
    %c1_375 = arith.constant 1 : index
    %c1_376 = arith.constant 1 : index
    %c0_377 = arith.constant 0 : index
    %230 = vector.load %arg6[%c1_375, %c1_376, %c0_377] : memref<10x10x8xf32, #tpu.memory_space<vmem>>, vector<8x8x8xf32>
    tpu.vector_store %arg6[%c1_375, %c1_376, %c0_377], %229 {strides = array<i32>} : memref<10x10x8xf32, #tpu.memory_space<vmem>>, vector<8x8x8xf32>,
    %c0_378 = arith.constant 0 : index
    %c0_379 = arith.constant 0 : index
    %c0_380 = arith.constant 0 : index
    %231 = vector.load %arg6[%c0_378, %c0_379, %c0_380] : memref<10x10x8xf32, #tpu.memory_space<vmem>>, vector<8x8x8xf32>
    %c0_381 = arith.constant 0 : index
    %c0_382 = arith.constant 0 : index
    %c0_383 = arith.constant 0 : index
    %232 = vector.load %arg7[%c0_381, %c0_382, %c0_383] : memref<8x8x72xf32, #tpu.memory_space<vmem>>, vector<8x8x8xf32>
    tpu.vector_store %arg7[%c0_381, %c0_382, %c0_383], %231 {strides = array<i32>} : memref<8x8x72xf32, #tpu.memory_space<vmem>>, vector<8x8x8xf32>,
    %c0_384 = arith.constant 0 : index
    %c1_385 = arith.constant 1 : index
    %c0_386 = arith.constant 0 : index
    %233 = vector.load %arg6[%c0_384, %c1_385, %c0_386] : memref<10x10x8xf32, #tpu.memory_space<vmem>>, vector<8x8x8xf32>
    %c0_387 = arith.constant 0 : index
    %c0_388 = arith.constant 0 : index
    %c8_389 = arith.constant 8 : index
    %234 = vector.load %arg7[%c0_387, %c0_388, %c8_389] : memref<8x8x72xf32, #tpu.memory_space<vmem>>, vector<8x8x8xf32>
    tpu.vector_store %arg7[%c0_387, %c0_388, %c8_389], %233 {strides = array<i32>} : memref<8x8x72xf32, #tpu.memory_space<vmem>>, vector<8x8x8xf32>,
    %c0_390 = arith.constant 0 : index
    %c2_391 = arith.constant 2 : index
    %c0_392 = arith.constant 0 : index
    %235 = vector.load %arg6[%c0_390, %c2_391, %c0_392] : memref<10x10x8xf32, #tpu.memory_space<vmem>>, vector<8x8x8xf32>
    %c0_393 = arith.constant 0 : index
    %c0_394 = arith.constant 0 : index
    %c16_395 = arith.constant 16 : index
    %236 = vector.load %arg7[%c0_393, %c0_394, %c16_395] : memref<8x8x72xf32, #tpu.memory_space<vmem>>, vector<8x8x8xf32>
    tpu.vector_store %arg7[%c0_393, %c0_394, %c16_395], %235 {strides = array<i32>} : memref<8x8x72xf32, #tpu.memory_space<vmem>>, vector<8x8x8xf32>,
    %c1_396 = arith.constant 1 : index
    %c0_397 = arith.constant 0 : index
    %c0_398 = arith.constant 0 : index
    %237 = vector.load %arg6[%c1_396, %c0_397, %c0_398] : memref<10x10x8xf32, #tpu.memory_space<vmem>>, vector<8x8x8xf32>
    %c0_399 = arith.constant 0 : index
    %c0_400 = arith.constant 0 : index
    %c24_401 = arith.constant 24 : index
    %238 = vector.load %arg7[%c0_399, %c0_400, %c24_401] : memref<8x8x72xf32, #tpu.memory_space<vmem>>, vector<8x8x8xf32>
    tpu.vector_store %arg7[%c0_399, %c0_400, %c24_401], %237 {strides = array<i32>} : memref<8x8x72xf32, #tpu.memory_space<vmem>>, vector<8x8x8xf32>,
    %c1_402 = arith.constant 1 : index
    %c1_403 = arith.constant 1 : index
    %c0_404 = arith.constant 0 : index
    %239 = vector.load %arg6[%c1_402, %c1_403, %c0_404] : memref<10x10x8xf32, #tpu.memory_space<vmem>>, vector<8x8x8xf32>
    %c0_405 = arith.constant 0 : index
    %c0_406 = arith.constant 0 : index
    %c32_407 = arith.constant 32 : index
    %240 = vector.load %arg7[%c0_405, %c0_406, %c32_407] : memref<8x8x72xf32, #tpu.memory_space<vmem>>, vector<8x8x8xf32>
    tpu.vector_store %arg7[%c0_405, %c0_406, %c32_407], %239 {strides = array<i32>} : memref<8x8x72xf32, #tpu.memory_space<vmem>>, vector<8x8x8xf32>,
    %c1_408 = arith.constant 1 : index
    %c2_409 = arith.constant 2 : index
    %c0_410 = arith.constant 0 : index
    %241 = vector.load %arg6[%c1_408, %c2_409, %c0_410] : memref<10x10x8xf32, #tpu.memory_space<vmem>>, vector<8x8x8xf32>
    %c0_411 = arith.constant 0 : index
    %c0_412 = arith.constant 0 : index
    %c40_413 = arith.constant 40 : index
    %242 = vector.load %arg7[%c0_411, %c0_412, %c40_413] : memref<8x8x72xf32, #tpu.memory_space<vmem>>, vector<8x8x8xf32>
    tpu.vector_store %arg7[%c0_411, %c0_412, %c40_413], %241 {strides = array<i32>} : memref<8x8x72xf32, #tpu.memory_space<vmem>>, vector<8x8x8xf32>,
    %c2_414 = arith.constant 2 : index
    %c0_415 = arith.constant 0 : index
    %c0_416 = arith.constant 0 : index
    %243 = vector.load %arg6[%c2_414, %c0_415, %c0_416] : memref<10x10x8xf32, #tpu.memory_space<vmem>>, vector<8x8x8xf32>
    %c0_417 = arith.constant 0 : index
    %c0_418 = arith.constant 0 : index
    %c48_419 = arith.constant 48 : index
    %244 = vector.load %arg7[%c0_417, %c0_418, %c48_419] : memref<8x8x72xf32, #tpu.memory_space<vmem>>, vector<8x8x8xf32>
    tpu.vector_store %arg7[%c0_417, %c0_418, %c48_419], %243 {strides = array<i32>} : memref<8x8x72xf32, #tpu.memory_space<vmem>>, vector<8x8x8xf32>,
    %c2_420 = arith.constant 2 : index
    %c1_421 = arith.constant 1 : index
    %c0_422 = arith.constant 0 : index
    %245 = vector.load %arg6[%c2_420, %c1_421, %c0_422] : memref<10x10x8xf32, #tpu.memory_space<vmem>>, vector<8x8x8xf32>
    %c0_423 = arith.constant 0 : index
    %c0_424 = arith.constant 0 : index
    %c56_425 = arith.constant 56 : index
    %246 = vector.load %arg7[%c0_423, %c0_424, %c56_425] : memref<8x8x72xf32, #tpu.memory_space<vmem>>, vector<8x8x8xf32>
    tpu.vector_store %arg7[%c0_423, %c0_424, %c56_425], %245 {strides = array<i32>} : memref<8x8x72xf32, #tpu.memory_space<vmem>>, vector<8x8x8xf32>,
    %c2_426 = arith.constant 2 : index
    %c2_427 = arith.constant 2 : index
    %c0_428 = arith.constant 0 : index
    %247 = vector.load %arg6[%c2_426, %c2_427, %c0_428] : memref<10x10x8xf32, #tpu.memory_space<vmem>>, vector<8x8x8xf32>
    %c0_429 = arith.constant 0 : index
    %c0_430 = arith.constant 0 : index
    %c64_431 = arith.constant 64 : index
    %248 = vector.load %arg7[%c0_429, %c0_430, %c64_431] : memref<8x8x72xf32, #tpu.memory_space<vmem>>, vector<8x8x8xf32>
    tpu.vector_store %arg7[%c0_429, %c0_430, %c64_431], %247 {strides = array<i32>} : memref<8x8x72xf32, #tpu.memory_space<vmem>>, vector<8x8x8xf32>,
    %c0_432 = arith.constant 0 : index
    %c0_433 = arith.constant 0 : index
    %c0_434 = arith.constant 0 : index
    %249 = vector.load %arg7[%c0_432, %c0_433, %c0_434] : memref<8x8x72xf32, #tpu.memory_space<vmem>>, vector<8x8x72xf32>
    %250 = vector.shape_cast %249 : vector<8x8x72xf32> to vector<64x72xf32>
    %c3_435 = arith.constant 3 : index
    %c0_436 = arith.constant 0 : index
    %c0_437 = arith.constant 0 : index
    %251 = vector.load %arg8[%c3_435, %c0_436, %c0_437] : memref<4x64x8xf32, #tpu.memory_space<vmem>>, vector<1x64x8xf32>
    %252 = vector.shape_cast %251 : vector<1x64x8xf32> to vector<64x8xf32>
    %c1_438 = arith.constant 1 : index
    %c0_439 = arith.constant 0 : index
    %c0_440 = arith.constant 0 : index
    %253 = vector.load %arg3[%c1_438, %c0_439, %c0_440] : memref<3x72x8xf32, #tpu.memory_space<vmem>>, vector<1x72x8xf32>
    %254 = vector.shape_cast %253 : vector<1x72x8xf32> to vector<72x8xf32>
    %cst_441 = arith.constant dense<0.000000e+00> : vector<64x8xf32>
    %255 = tpu.matmul %250, %254, %cst_441 {dimension_numbers = #tpu.dot_dimension_numbers<[1], [0], [0], [1], [0, 0, 1, 1], [], []>} : vector<64x72xf32>, vector<72x8xf32>, vector<64x8xf32> -> vector<64x8xf32>
    %256 = arith.addf %252, %255 : vector<64x8xf32>
    %c3_442 = arith.constant 3 : index
    %c0_443 = arith.constant 0 : index
    %c0_444 = arith.constant 0 : index
    %257 = vector.load %arg8[%c3_442, %c0_443, %c0_444] : memref<4x64x8xf32, #tpu.memory_space<vmem>>, vector<1x64x8xf32>
    %258 = vector.shape_cast %257 : vector<1x64x8xf32> to vector<64x8xf32>
    %259 = vector.shape_cast %256 : vector<64x8xf32> to vector<1x64x8xf32>
    tpu.vector_store %arg8[%c3_442, %c0_443, %c0_444], %259 {strides = array<i32>} : memref<4x64x8xf32, #tpu.memory_space<vmem>>, vector<1x64x8xf32>,
    %c2_445 = arith.constant 2 : index
    %c0_446 = arith.constant 0 : index
    %c0_447 = arith.constant 0 : index
    %260 = vector.load %arg8[%c2_445, %c0_446, %c0_447] : memref<4x64x8xf32, #tpu.memory_space<vmem>>, vector<1x64x8xf32>
    %261 = vector.shape_cast %260 : vector<1x64x8xf32> to vector<64x8xf32>
    %c2_448 = arith.constant 2 : index
    %c0_449 = arith.constant 0 : index
    %c0_450 = arith.constant 0 : index
    %262 = vector.load %arg3[%c2_448, %c0_449, %c0_450] : memref<3x72x8xf32, #tpu.memory_space<vmem>>, vector<1x72x8xf32>
    %263 = vector.shape_cast %262 : vector<1x72x8xf32> to vector<72x8xf32>
    %cst_451 = arith.constant dense<0.000000e+00> : vector<64x8xf32>
    %264 = tpu.matmul %250, %263, %cst_451 {dimension_numbers = #tpu.dot_dimension_numbers<[1], [0], [0], [1], [0, 0, 1, 1], [], []>} : vector<64x72xf32>, vector<72x8xf32>, vector<64x8xf32> -> vector<64x8xf32>
    %265 = arith.addf %261, %264 : vector<64x8xf32>
    %c2_452 = arith.constant 2 : index
    %c0_453 = arith.constant 0 : index
    %c0_454 = arith.constant 0 : index
    %266 = vector.load %arg8[%c2_452, %c0_453, %c0_454] : memref<4x64x8xf32, #tpu.memory_space<vmem>>, vector<1x64x8xf32>
    %267 = vector.shape_cast %266 : vector<1x64x8xf32> to vector<64x8xf32>
    %268 = vector.shape_cast %265 : vector<64x8xf32> to vector<1x64x8xf32>
    tpu.vector_store %arg8[%c2_452, %c0_453, %c0_454], %268 {strides = array<i32>} : memref<4x64x8xf32, #tpu.memory_space<vmem>>, vector<1x64x8xf32>,
    %c4_i32_455 = arith.constant 4 : i32
    %269 = arith.addi %0, %c4_i32_455 : i32
    %c0_i32_456 = arith.constant 0 : i32
    %270 = arith.cmpi sge, %269, %c0_i32_456 : i32
    %c4_i32_457 = arith.constant 4 : i32
    %271 = arith.cmpi slt, %269, %c4_i32_457 : i32
    %272 = arith.andi %270, %271 : i1
    %cst_458 = arith.constant 1.000000e+00 : f32
    %cst_459 = arith.constant 0.000000e+00 : f32
    %273 = arith.select %272, %cst_458, %cst_459 : f32
    %c0_i32_460 = arith.constant 0 : i32
    %c3_i32_461 = arith.constant 3 : i32
    %274 = arith.maxsi %c0_i32_460, %269 : i32
    %275 = arith.minsi %c3_i32_461, %274 : i32
    %c0_462 = arith.constant 0 : index
    %276 = arith.index_cast %275 : i32 to index
    %c0_463 = arith.constant 0 : index
    %c0_464 = arith.constant 0 : index
    %c0_465 = arith.constant 0 : index
    %277 = vector.load %arg2[%c0_462, %276, %c0_463, %c0_464, %c0_465] : memref<1x4x8x8x8xf32, #tpu.memory_space<vmem>>, vector<1x1x8x8x8xf32>
    %278 = vector.shape_cast %277 : vector<1x1x8x8x8xf32> to vector<8x8x8xf32>
    %279 = vector.broadcast %273 : f32 to vector<8x8x8xf32>
    %280 = arith.mulf %278, %279 : vector<8x8x8xf32>
    %c1_466 = arith.constant 1 : index
    %c1_467 = arith.constant 1 : index
    %c0_468 = arith.constant 0 : index
    %281 = vector.load %arg6[%c1_466, %c1_467, %c0_468] : memref<10x10x8xf32, #tpu.memory_space<vmem>>, vector<8x8x8xf32>
    tpu.vector_store %arg6[%c1_466, %c1_467, %c0_468], %280 {strides = array<i32>} : memref<10x10x8xf32, #tpu.memory_space<vmem>>, vector<8x8x8xf32>,
    %c0_469 = arith.constant 0 : index
    %c0_470 = arith.constant 0 : index
    %c0_471 = arith.constant 0 : index
    %282 = vector.load %arg6[%c0_469, %c0_470, %c0_471] : memref<10x10x8xf32, #tpu.memory_space<vmem>>, vector<8x8x8xf32>
    %c0_472 = arith.constant 0 : index
    %c0_473 = arith.constant 0 : index
    %c0_474 = arith.constant 0 : index
    %283 = vector.load %arg7[%c0_472, %c0_473, %c0_474] : memref<8x8x72xf32, #tpu.memory_space<vmem>>, vector<8x8x8xf32>
    tpu.vector_store %arg7[%c0_472, %c0_473, %c0_474], %282 {strides = array<i32>} : memref<8x8x72xf32, #tpu.memory_space<vmem>>, vector<8x8x8xf32>,
    %c0_475 = arith.constant 0 : index
    %c1_476 = arith.constant 1 : index
    %c0_477 = arith.constant 0 : index
    %284 = vector.load %arg6[%c0_475, %c1_476, %c0_477] : memref<10x10x8xf32, #tpu.memory_space<vmem>>, vector<8x8x8xf32>
    %c0_478 = arith.constant 0 : index
    %c0_479 = arith.constant 0 : index
    %c8_480 = arith.constant 8 : index
    %285 = vector.load %arg7[%c0_478, %c0_479, %c8_480] : memref<8x8x72xf32, #tpu.memory_space<vmem>>, vector<8x8x8xf32>
    tpu.vector_store %arg7[%c0_478, %c0_479, %c8_480], %284 {strides = array<i32>} : memref<8x8x72xf32, #tpu.memory_space<vmem>>, vector<8x8x8xf32>,
    %c0_481 = arith.constant 0 : index
    %c2_482 = arith.constant 2 : index
    %c0_483 = arith.constant 0 : index
    %286 = vector.load %arg6[%c0_481, %c2_482, %c0_483] : memref<10x10x8xf32, #tpu.memory_space<vmem>>, vector<8x8x8xf32>
    %c0_484 = arith.constant 0 : index
    %c0_485 = arith.constant 0 : index
    %c16_486 = arith.constant 16 : index
    %287 = vector.load %arg7[%c0_484, %c0_485, %c16_486] : memref<8x8x72xf32, #tpu.memory_space<vmem>>, vector<8x8x8xf32>
    tpu.vector_store %arg7[%c0_484, %c0_485, %c16_486], %286 {strides = array<i32>} : memref<8x8x72xf32, #tpu.memory_space<vmem>>, vector<8x8x8xf32>,
    %c1_487 = arith.constant 1 : index
    %c0_488 = arith.constant 0 : index
    %c0_489 = arith.constant 0 : index
    %288 = vector.load %arg6[%c1_487, %c0_488, %c0_489] : memref<10x10x8xf32, #tpu.memory_space<vmem>>, vector<8x8x8xf32>
    %c0_490 = arith.constant 0 : index
    %c0_491 = arith.constant 0 : index
    %c24_492 = arith.constant 24 : index
    %289 = vector.load %arg7[%c0_490, %c0_491, %c24_492] : memref<8x8x72xf32, #tpu.memory_space<vmem>>, vector<8x8x8xf32>
    tpu.vector_store %arg7[%c0_490, %c0_491, %c24_492], %288 {strides = array<i32>} : memref<8x8x72xf32, #tpu.memory_space<vmem>>, vector<8x8x8xf32>,
    %c1_493 = arith.constant 1 : index
    %c1_494 = arith.constant 1 : index
    %c0_495 = arith.constant 0 : index
    %290 = vector.load %arg6[%c1_493, %c1_494, %c0_495] : memref<10x10x8xf32, #tpu.memory_space<vmem>>, vector<8x8x8xf32>
    %c0_496 = arith.constant 0 : index
    %c0_497 = arith.constant 0 : index
    %c32_498 = arith.constant 32 : index
    %291 = vector.load %arg7[%c0_496, %c0_497, %c32_498] : memref<8x8x72xf32, #tpu.memory_space<vmem>>, vector<8x8x8xf32>
    tpu.vector_store %arg7[%c0_496, %c0_497, %c32_498], %290 {strides = array<i32>} : memref<8x8x72xf32, #tpu.memory_space<vmem>>, vector<8x8x8xf32>,
    %c1_499 = arith.constant 1 : index
    %c2_500 = arith.constant 2 : index
    %c0_501 = arith.constant 0 : index
    %292 = vector.load %arg6[%c1_499, %c2_500, %c0_501] : memref<10x10x8xf32, #tpu.memory_space<vmem>>, vector<8x8x8xf32>
    %c0_502 = arith.constant 0 : index
    %c0_503 = arith.constant 0 : index
    %c40_504 = arith.constant 40 : index
    %293 = vector.load %arg7[%c0_502, %c0_503, %c40_504] : memref<8x8x72xf32, #tpu.memory_space<vmem>>, vector<8x8x8xf32>
    tpu.vector_store %arg7[%c0_502, %c0_503, %c40_504], %292 {strides = array<i32>} : memref<8x8x72xf32, #tpu.memory_space<vmem>>, vector<8x8x8xf32>,
    %c2_505 = arith.constant 2 : index
    %c0_506 = arith.constant 0 : index
    %c0_507 = arith.constant 0 : index
    %294 = vector.load %arg6[%c2_505, %c0_506, %c0_507] : memref<10x10x8xf32, #tpu.memory_space<vmem>>, vector<8x8x8xf32>
    %c0_508 = arith.constant 0 : index
    %c0_509 = arith.constant 0 : index
    %c48_510 = arith.constant 48 : index
    %295 = vector.load %arg7[%c0_508, %c0_509, %c48_510] : memref<8x8x72xf32, #tpu.memory_space<vmem>>, vector<8x8x8xf32>
    tpu.vector_store %arg7[%c0_508, %c0_509, %c48_510], %294 {strides = array<i32>} : memref<8x8x72xf32, #tpu.memory_space<vmem>>, vector<8x8x8xf32>,
    %c2_511 = arith.constant 2 : index
    %c1_512 = arith.constant 1 : index
    %c0_513 = arith.constant 0 : index
    %296 = vector.load %arg6[%c2_511, %c1_512, %c0_513] : memref<10x10x8xf32, #tpu.memory_space<vmem>>, vector<8x8x8xf32>
    %c0_514 = arith.constant 0 : index
    %c0_515 = arith.constant 0 : index
    %c56_516 = arith.constant 56 : index
    %297 = vector.load %arg7[%c0_514, %c0_515, %c56_516] : memref<8x8x72xf32, #tpu.memory_space<vmem>>, vector<8x8x8xf32>
    tpu.vector_store %arg7[%c0_514, %c0_515, %c56_516], %296 {strides = array<i32>} : memref<8x8x72xf32, #tpu.memory_space<vmem>>, vector<8x8x8xf32>,
    %c2_517 = arith.constant 2 : index
    %c2_518 = arith.constant 2 : index
    %c0_519 = arith.constant 0 : index
    %298 = vector.load %arg6[%c2_517, %c2_518, %c0_519] : memref<10x10x8xf32, #tpu.memory_space<vmem>>, vector<8x8x8xf32>
    %c0_520 = arith.constant 0 : index
    %c0_521 = arith.constant 0 : index
    %c64_522 = arith.constant 64 : index
    %299 = vector.load %arg7[%c0_520, %c0_521, %c64_522] : memref<8x8x72xf32, #tpu.memory_space<vmem>>, vector<8x8x8xf32>
    tpu.vector_store %arg7[%c0_520, %c0_521, %c64_522], %298 {strides = array<i32>} : memref<8x8x72xf32, #tpu.memory_space<vmem>>, vector<8x8x8xf32>,
    %c0_523 = arith.constant 0 : index
    %c0_524 = arith.constant 0 : index
    %c0_525 = arith.constant 0 : index
    %300 = vector.load %arg7[%c0_523, %c0_524, %c0_525] : memref<8x8x72xf32, #tpu.memory_space<vmem>>, vector<8x8x72xf32>
    %301 = vector.shape_cast %300 : vector<8x8x72xf32> to vector<64x72xf32>
    %c3_526 = arith.constant 3 : index
    %c0_527 = arith.constant 0 : index
    %c0_528 = arith.constant 0 : index
    %302 = vector.load %arg8[%c3_526, %c0_527, %c0_528] : memref<4x64x8xf32, #tpu.memory_space<vmem>>, vector<1x64x8xf32>
    %303 = vector.shape_cast %302 : vector<1x64x8xf32> to vector<64x8xf32>
    %c2_529 = arith.constant 2 : index
    %c0_530 = arith.constant 0 : index
    %c0_531 = arith.constant 0 : index
    %304 = vector.load %arg3[%c2_529, %c0_530, %c0_531] : memref<3x72x8xf32, #tpu.memory_space<vmem>>, vector<1x72x8xf32>
    %305 = vector.shape_cast %304 : vector<1x72x8xf32> to vector<72x8xf32>
    %cst_532 = arith.constant dense<0.000000e+00> : vector<64x8xf32>
    %306 = tpu.matmul %301, %305, %cst_532 {dimension_numbers = #tpu.dot_dimension_numbers<[1], [0], [0], [1], [0, 0, 1, 1], [], []>} : vector<64x72xf32>, vector<72x8xf32>, vector<64x8xf32> -> vector<64x8xf32>
    %307 = arith.addf %303, %306 : vector<64x8xf32>
    %c3_533 = arith.constant 3 : index
    %c0_534 = arith.constant 0 : index
    %c0_535 = arith.constant 0 : index
    %308 = vector.load %arg8[%c3_533, %c0_534, %c0_535] : memref<4x64x8xf32, #tpu.memory_space<vmem>>, vector<1x64x8xf32>
    %309 = vector.shape_cast %308 : vector<1x64x8xf32> to vector<64x8xf32>
    %310 = vector.shape_cast %307 : vector<64x8xf32> to vector<1x64x8xf32>
    tpu.vector_store %arg8[%c3_533, %c0_534, %c0_535], %310 {strides = array<i32>} : memref<4x64x8xf32, #tpu.memory_space<vmem>>, vector<1x64x8xf32>,
    %c0_536 = arith.constant 0 : index
    %c0_537 = arith.constant 0 : index
    %c0_538 = arith.constant 0 : index
    %311 = vector.load %arg8[%c0_536, %c0_537, %c0_538] : memref<4x64x8xf32, #tpu.memory_space<vmem>>, vector<1x64x8xf32>
    %312 = vector.shape_cast %311 : vector<1x64x8xf32> to vector<64x8xf32>
    %c0_539 = arith.constant 0 : index
    %c0_540 = arith.constant 0 : index
    %313 = vector.load %arg4[%c0_539, %c0_540] : memref<1x8xf32, #tpu.memory_space<vmem>>, vector<1x8xf32>
    %314 = vector.shape_cast %313 : vector<1x8xf32> to vector<8xf32>
    %315 = vector.shape_cast %314 : vector<8xf32> to vector<1x8xf32>
    %316 = vector.broadcast %315 : vector<1x8xf32> to vector<64x8xf32>
    %317 = arith.addf %312, %316 : vector<64x8xf32>
    %318 = math.absf %317 : vector<64x8xf32>
    %cst_541 = arith.constant dense<0xFF800000> : vector<64xf32>
    %319 = vector.multi_reduction <maximumf>, %318, %cst_541 [1] : vector<64x8xf32> to vector<64xf32>
    %320 = vector.shape_cast %319 : vector<64xf32> to vector<64x1xf32>
    %321 = tpu.bitcast %320 : vector<64x1xf32> -> vector<64x1xi32>
    %c23_i32 = arith.constant 23 : i32
    %322 = vector.broadcast %c23_i32 : i32 to vector<64x1xi32>
    %323 = arith.shrsi %321, %322 : vector<64x1xi32>
    %c127_i32 = arith.constant 127 : i32
    %324 = vector.broadcast %c127_i32 : i32 to vector<64x1xi32>
    %325 = arith.subi %323, %324 : vector<64x1xi32>
    %c-8_i32 = arith.constant -8 : i32
    %c7_i32 = arith.constant 7 : i32
    %326 = vector.broadcast %c-8_i32 : i32 to vector<64x1xi32>
    %327 = arith.maxsi %326, %325 : vector<64x1xi32>
    %328 = vector.broadcast %c7_i32 : i32 to vector<64x1xi32>
    %329 = arith.minsi %328, %327 : vector<64x1xi32>
    %c6_i32 = arith.constant 6 : i32
    %330 = vector.broadcast %c6_i32 : i32 to vector<64x1xi32>
    %331 = arith.subi %330, %329 : vector<64x1xi32>
    %c127_i32_542 = arith.constant 127 : i32
    %332 = vector.broadcast %c127_i32_542 : i32 to vector<64x1xi32>
    %333 = arith.addi %331, %332 : vector<64x1xi32>
    %c23_i32_543 = arith.constant 23 : i32
    %334 = vector.broadcast %c23_i32_543 : i32 to vector<64x1xi32>
    %335 = arith.shli %333, %334 : vector<64x1xi32>
    %336 = tpu.bitcast %335 : vector<64x1xi32> -> vector<64x1xf32>
    %c127_i32_544 = arith.constant 127 : i32
    %337 = vector.broadcast %c127_i32_544 : i32 to vector<64x1xi32>
    %338 = arith.subi %337, %331 : vector<64x1xi32>
    %c23_i32_545 = arith.constant 23 : i32
    %339 = vector.broadcast %c23_i32_545 : i32 to vector<64x1xi32>
    %340 = arith.shli %338, %339 : vector<64x1xi32>
    %341 = tpu.bitcast %340 : vector<64x1xi32> -> vector<64x1xf32>
    %342 = vector.broadcast %336 : vector<64x1xf32> to vector<64x8xf32>
    %343 = arith.mulf %317, %342 : vector<64x8xf32>
    %344 = math.roundeven %343 : vector<64x8xf32>
    %cst_546 = arith.constant -1.280000e+02 : f32
    %cst_547 = arith.constant 1.270000e+02 : f32
    %345 = vector.broadcast %cst_546 : f32 to vector<64x8xf32>
    %346 = arith.maximumf %345, %344 : vector<64x8xf32>
    %347 = vector.broadcast %cst_547 : f32 to vector<64x8xf32>
    %348 = arith.minimumf %347, %346 : vector<64x8xf32>
    %349 = vector.broadcast %341 : vector<64x1xf32> to vector<64x8xf32>
    %350 = arith.mulf %348, %349 : vector<64x8xf32>
    %351 = vector.shape_cast %350 : vector<64x8xf32> to vector<8x8x8xf32>
    %cst_548 = arith.constant 0.000000e+00 : f32
    %352 = vector.broadcast %cst_548 : f32 to vector<8x8x8xf32>
    %353 = arith.maximumf %351, %352 : vector<8x8x8xf32>
    %354 = arith.truncf %353 : vector<8x8x8xf32> to vector<8x8x8xbf16>
    %c0_549 = arith.constant 0 : index
    %c0_550 = arith.constant 0 : index
    %c0_551 = arith.constant 0 : index
    %c0_552 = arith.constant 0 : index
    %c0_553 = arith.constant 0 : index
    %355 = vector.load %arg5[%c0_549, %c0_550, %c0_551, %c0_552, %c0_553] : memref<1x4x8x8x8xbf16, #tpu.memory_space<vmem>>, vector<1x1x8x8x8xbf16>
    %356 = vector.shape_cast %355 : vector<1x1x8x8x8xbf16> to vector<8x8x8xbf16>
    %357 = vector.shape_cast %354 : vector<8x8x8xbf16> to vector<1x1x8x8x8xbf16>
    tpu.vector_store %arg5[%c0_549, %c0_550, %c0_551, %c0_552, %c0_553], %357 {strides = array<i32>} : memref<1x4x8x8x8xbf16, #tpu.memory_space<vmem>>, vector<1x1x8x8x8xbf16>,
    %c1_554 = arith.constant 1 : index
    %c0_555 = arith.constant 0 : index
    %c0_556 = arith.constant 0 : index
    %358 = vector.load %arg8[%c1_554, %c0_555, %c0_556] : memref<4x64x8xf32, #tpu.memory_space<vmem>>, vector<1x64x8xf32>
    %359 = vector.shape_cast %358 : vector<1x64x8xf32> to vector<64x8xf32>
    %c0_557 = arith.constant 0 : index
    %c0_558 = arith.constant 0 : index
    %360 = vector.load %arg4[%c0_557, %c0_558] : memref<1x8xf32, #tpu.memory_space<vmem>>, vector<1x8xf32>
    %361 = vector.shape_cast %360 : vector<1x8xf32> to vector<8xf32>
    %362 = vector.shape_cast %361 : vector<8xf32> to vector<1x8xf32>
    %363 = vector.broadcast %362 : vector<1x8xf32> to vector<64x8xf32>
    %364 = arith.addf %359, %363 : vector<64x8xf32>
    %365 = math.absf %364 : vector<64x8xf32>
    %cst_559 = arith.constant dense<0xFF800000> : vector<64xf32>
    %366 = vector.multi_reduction <maximumf>, %365, %cst_559 [1] : vector<64x8xf32> to vector<64xf32>
    %367 = vector.shape_cast %366 : vector<64xf32> to vector<64x1xf32>
    %368 = tpu.bitcast %367 : vector<64x1xf32> -> vector<64x1xi32>
    %c23_i32_560 = arith.constant 23 : i32
    %369 = vector.broadcast %c23_i32_560 : i32 to vector<64x1xi32>
    %370 = arith.shrsi %368, %369 : vector<64x1xi32>
    %c127_i32_561 = arith.constant 127 : i32
    %371 = vector.broadcast %c127_i32_561 : i32 to vector<64x1xi32>
    %372 = arith.subi %370, %371 : vector<64x1xi32>
    %c-8_i32_562 = arith.constant -8 : i32
    %c7_i32_563 = arith.constant 7 : i32
    %373 = vector.broadcast %c-8_i32_562 : i32 to vector<64x1xi32>
    %374 = arith.maxsi %373, %372 : vector<64x1xi32>
    %375 = vector.broadcast %c7_i32_563 : i32 to vector<64x1xi32>
    %376 = arith.minsi %375, %374 : vector<64x1xi32>
    %c6_i32_564 = arith.constant 6 : i32
    %377 = vector.broadcast %c6_i32_564 : i32 to vector<64x1xi32>
    %378 = arith.subi %377, %376 : vector<64x1xi32>
    %c127_i32_565 = arith.constant 127 : i32
    %379 = vector.broadcast %c127_i32_565 : i32 to vector<64x1xi32>
    %380 = arith.addi %378, %379 : vector<64x1xi32>
    %c23_i32_566 = arith.constant 23 : i32
    %381 = vector.broadcast %c23_i32_566 : i32 to vector<64x1xi32>
    %382 = arith.shli %380, %381 : vector<64x1xi32>
    %383 = tpu.bitcast %382 : vector<64x1xi32> -> vector<64x1xf32>
    %c127_i32_567 = arith.constant 127 : i32
    %384 = vector.broadcast %c127_i32_567 : i32 to vector<64x1xi32>
    %385 = arith.subi %384, %378 : vector<64x1xi32>
    %c23_i32_568 = arith.constant 23 : i32
    %386 = vector.broadcast %c23_i32_568 : i32 to vector<64x1xi32>
    %387 = arith.shli %385, %386 : vector<64x1xi32>
    %388 = tpu.bitcast %387 : vector<64x1xi32> -> vector<64x1xf32>
    %389 = vector.broadcast %383 : vector<64x1xf32> to vector<64x8xf32>
    %390 = arith.mulf %364, %389 : vector<64x8xf32>
    %391 = math.roundeven %390 : vector<64x8xf32>
    %cst_569 = arith.constant -1.280000e+02 : f32
    %cst_570 = arith.constant 1.270000e+02 : f32
    %392 = vector.broadcast %cst_569 : f32 to vector<64x8xf32>
    %393 = arith.maximumf %392, %391 : vector<64x8xf32>
    %394 = vector.broadcast %cst_570 : f32 to vector<64x8xf32>
    %395 = arith.minimumf %394, %393 : vector<64x8xf32>
    %396 = vector.broadcast %388 : vector<64x1xf32> to vector<64x8xf32>
    %397 = arith.mulf %395, %396 : vector<64x8xf32>
    %398 = vector.shape_cast %397 : vector<64x8xf32> to vector<8x8x8xf32>
    %cst_571 = arith.constant 0.000000e+00 : f32
    %399 = vector.broadcast %cst_571 : f32 to vector<8x8x8xf32>
    %400 = arith.maximumf %398, %399 : vector<8x8x8xf32>
    %401 = arith.truncf %400 : vector<8x8x8xf32> to vector<8x8x8xbf16>
    %c0_572 = arith.constant 0 : index
    %c1_573 = arith.constant 1 : index
    %c0_574 = arith.constant 0 : index
    %c0_575 = arith.constant 0 : index
    %c0_576 = arith.constant 0 : index
    %402 = vector.load %arg5[%c0_572, %c1_573, %c0_574, %c0_575, %c0_576] : memref<1x4x8x8x8xbf16, #tpu.memory_space<vmem>>, vector<1x1x8x8x8xbf16>
    %403 = vector.shape_cast %402 : vector<1x1x8x8x8xbf16> to vector<8x8x8xbf16>
    %404 = vector.shape_cast %401 : vector<8x8x8xbf16> to vector<1x1x8x8x8xbf16>
    tpu.vector_store %arg5[%c0_572, %c1_573, %c0_574, %c0_575, %c0_576], %404 {strides = array<i32>} : memref<1x4x8x8x8xbf16, #tpu.memory_space<vmem>>, vector<1x1x8x8x8xbf16>,
    %c2_577 = arith.constant 2 : index
    %c0_578 = arith.constant 0 : index
    %c0_579 = arith.constant 0 : index
    %405 = vector.load %arg8[%c2_577, %c0_578, %c0_579] : memref<4x64x8xf32, #tpu.memory_space<vmem>>, vector<1x64x8xf32>
    %406 = vector.shape_cast %405 : vector<1x64x8xf32> to vector<64x8xf32>
    %c0_580 = arith.constant 0 : index
    %c0_581 = arith.constant 0 : index
    %407 = vector.load %arg4[%c0_580, %c0_581] : memref<1x8xf32, #tpu.memory_space<vmem>>, vector<1x8xf32>
    %408 = vector.shape_cast %407 : vector<1x8xf32> to vector<8xf32>
    %409 = vector.shape_cast %408 : vector<8xf32> to vector<1x8xf32>
    %410 = vector.broadcast %409 : vector<1x8xf32> to vector<64x8xf32>
    %411 = arith.addf %406, %410 : vector<64x8xf32>
    %412 = math.absf %411 : vector<64x8xf32>
    %cst_582 = arith.constant dense<0xFF800000> : vector<64xf32>
    %413 = vector.multi_reduction <maximumf>, %412, %cst_582 [1] : vector<64x8xf32> to vector<64xf32>
    %414 = vector.shape_cast %413 : vector<64xf32> to vector<64x1xf32>
    %415 = tpu.bitcast %414 : vector<64x1xf32> -> vector<64x1xi32>
    %c23_i32_583 = arith.constant 23 : i32
    %416 = vector.broadcast %c23_i32_583 : i32 to vector<64x1xi32>
    %417 = arith.shrsi %415, %416 : vector<64x1xi32>
    %c127_i32_584 = arith.constant 127 : i32
    %418 = vector.broadcast %c127_i32_584 : i32 to vector<64x1xi32>
    %419 = arith.subi %417, %418 : vector<64x1xi32>
    %c-8_i32_585 = arith.constant -8 : i32
    %c7_i32_586 = arith.constant 7 : i32
    %420 = vector.broadcast %c-8_i32_585 : i32 to vector<64x1xi32>
    %421 = arith.maxsi %420, %419 : vector<64x1xi32>
    %422 = vector.broadcast %c7_i32_586 : i32 to vector<64x1xi32>
    %423 = arith.minsi %422, %421 : vector<64x1xi32>
    %c6_i32_587 = arith.constant 6 : i32
    %424 = vector.broadcast %c6_i32_587 : i32 to vector<64x1xi32>
    %425 = arith.subi %424, %423 : vector<64x1xi32>
    %c127_i32_588 = arith.constant 127 : i32
    %426 = vector.broadcast %c127_i32_588 : i32 to vector<64x1xi32>
    %427 = arith.addi %425, %426 : vector<64x1xi32>
    %c23_i32_589 = arith.constant 23 : i32
    %428 = vector.broadcast %c23_i32_589 : i32 to vector<64x1xi32>
    %429 = arith.shli %427, %428 : vector<64x1xi32>
    %430 = tpu.bitcast %429 : vector<64x1xi32> -> vector<64x1xf32>
    %c127_i32_590 = arith.constant 127 : i32
    %431 = vector.broadcast %c127_i32_590 : i32 to vector<64x1xi32>
    %432 = arith.subi %431, %425 : vector<64x1xi32>
    %c23_i32_591 = arith.constant 23 : i32
    %433 = vector.broadcast %c23_i32_591 : i32 to vector<64x1xi32>
    %434 = arith.shli %432, %433 : vector<64x1xi32>
    %435 = tpu.bitcast %434 : vector<64x1xi32> -> vector<64x1xf32>
    %436 = vector.broadcast %430 : vector<64x1xf32> to vector<64x8xf32>
    %437 = arith.mulf %411, %436 : vector<64x8xf32>
    %438 = math.roundeven %437 : vector<64x8xf32>
    %cst_592 = arith.constant -1.280000e+02 : f32
    %cst_593 = arith.constant 1.270000e+02 : f32
    %439 = vector.broadcast %cst_592 : f32 to vector<64x8xf32>
    %440 = arith.maximumf %439, %438 : vector<64x8xf32>
    %441 = vector.broadcast %cst_593 : f32 to vector<64x8xf32>
    %442 = arith.minimumf %441, %440 : vector<64x8xf32>
    %443 = vector.broadcast %435 : vector<64x1xf32> to vector<64x8xf32>
    %444 = arith.mulf %442, %443 : vector<64x8xf32>
    %445 = vector.shape_cast %444 : vector<64x8xf32> to vector<8x8x8xf32>
    %cst_594 = arith.constant 0.000000e+00 : f32
    %446 = vector.broadcast %cst_594 : f32 to vector<8x8x8xf32>
    %447 = arith.maximumf %445, %446 : vector<8x8x8xf32>
    %448 = arith.truncf %447 : vector<8x8x8xf32> to vector<8x8x8xbf16>
    %c0_595 = arith.constant 0 : index
    %c2_596 = arith.constant 2 : index
    %c0_597 = arith.constant 0 : index
    %c0_598 = arith.constant 0 : index
    %c0_599 = arith.constant 0 : index
    %449 = vector.load %arg5[%c0_595, %c2_596, %c0_597, %c0_598, %c0_599] : memref<1x4x8x8x8xbf16, #tpu.memory_space<vmem>>, vector<1x1x8x8x8xbf16>
    %450 = vector.shape_cast %449 : vector<1x1x8x8x8xbf16> to vector<8x8x8xbf16>
    %451 = vector.shape_cast %448 : vector<8x8x8xbf16> to vector<1x1x8x8x8xbf16>
    tpu.vector_store %arg5[%c0_595, %c2_596, %c0_597, %c0_598, %c0_599], %451 {strides = array<i32>} : memref<1x4x8x8x8xbf16, #tpu.memory_space<vmem>>, vector<1x1x8x8x8xbf16>,
    %c3_600 = arith.constant 3 : index
    %c0_601 = arith.constant 0 : index
    %c0_602 = arith.constant 0 : index
    %452 = vector.load %arg8[%c3_600, %c0_601, %c0_602] : memref<4x64x8xf32, #tpu.memory_space<vmem>>, vector<1x64x8xf32>
    %453 = vector.shape_cast %452 : vector<1x64x8xf32> to vector<64x8xf32>
    %c0_603 = arith.constant 0 : index
    %c0_604 = arith.constant 0 : index
    %454 = vector.load %arg4[%c0_603, %c0_604] : memref<1x8xf32, #tpu.memory_space<vmem>>, vector<1x8xf32>
    %455 = vector.shape_cast %454 : vector<1x8xf32> to vector<8xf32>
    %456 = vector.shape_cast %455 : vector<8xf32> to vector<1x8xf32>
    %457 = vector.broadcast %456 : vector<1x8xf32> to vector<64x8xf32>
    %458 = arith.addf %453, %457 : vector<64x8xf32>
    %459 = math.absf %458 : vector<64x8xf32>
    %cst_605 = arith.constant dense<0xFF800000> : vector<64xf32>
    %460 = vector.multi_reduction <maximumf>, %459, %cst_605 [1] : vector<64x8xf32> to vector<64xf32>
    %461 = vector.shape_cast %460 : vector<64xf32> to vector<64x1xf32>
    %462 = tpu.bitcast %461 : vector<64x1xf32> -> vector<64x1xi32>
    %c23_i32_606 = arith.constant 23 : i32
    %463 = vector.broadcast %c23_i32_606 : i32 to vector<64x1xi32>
    %464 = arith.shrsi %462, %463 : vector<64x1xi32>
    %c127_i32_607 = arith.constant 127 : i32
    %465 = vector.broadcast %c127_i32_607 : i32 to vector<64x1xi32>
    %466 = arith.subi %464, %465 : vector<64x1xi32>
    %c-8_i32_608 = arith.constant -8 : i32
    %c7_i32_609 = arith.constant 7 : i32
    %467 = vector.broadcast %c-8_i32_608 : i32 to vector<64x1xi32>
    %468 = arith.maxsi %467, %466 : vector<64x1xi32>
    %469 = vector.broadcast %c7_i32_609 : i32 to vector<64x1xi32>
    %470 = arith.minsi %469, %468 : vector<64x1xi32>
    %c6_i32_610 = arith.constant 6 : i32
    %471 = vector.broadcast %c6_i32_610 : i32 to vector<64x1xi32>
    %472 = arith.subi %471, %470 : vector<64x1xi32>
    %c127_i32_611 = arith.constant 127 : i32
    %473 = vector.broadcast %c127_i32_611 : i32 to vector<64x1xi32>
    %474 = arith.addi %472, %473 : vector<64x1xi32>
    %c23_i32_612 = arith.constant 23 : i32
    %475 = vector.broadcast %c23_i32_612 : i32 to vector<64x1xi32>
    %476 = arith.shli %474, %475 : vector<64x1xi32>
    %477 = tpu.bitcast %476 : vector<64x1xi32> -> vector<64x1xf32>
    %c127_i32_613 = arith.constant 127 : i32
    %478 = vector.broadcast %c127_i32_613 : i32 to vector<64x1xi32>
    %479 = arith.subi %478, %472 : vector<64x1xi32>
    %c23_i32_614 = arith.constant 23 : i32
    %480 = vector.broadcast %c23_i32_614 : i32 to vector<64x1xi32>
    %481 = arith.shli %479, %480 : vector<64x1xi32>
    %482 = tpu.bitcast %481 : vector<64x1xi32> -> vector<64x1xf32>
    %483 = vector.broadcast %477 : vector<64x1xf32> to vector<64x8xf32>
    %484 = arith.mulf %458, %483 : vector<64x8xf32>
    %485 = math.roundeven %484 : vector<64x8xf32>
    %cst_615 = arith.constant -1.280000e+02 : f32
    %cst_616 = arith.constant 1.270000e+02 : f32
    %486 = vector.broadcast %cst_615 : f32 to vector<64x8xf32>
    %487 = arith.maximumf %486, %485 : vector<64x8xf32>
    %488 = vector.broadcast %cst_616 : f32 to vector<64x8xf32>
    %489 = arith.minimumf %488, %487 : vector<64x8xf32>
    %490 = vector.broadcast %482 : vector<64x1xf32> to vector<64x8xf32>
    %491 = arith.mulf %489, %490 : vector<64x8xf32>
    %492 = vector.shape_cast %491 : vector<64x8xf32> to vector<8x8x8xf32>
    %cst_617 = arith.constant 0.000000e+00 : f32
    %493 = vector.broadcast %cst_617 : f32 to vector<8x8x8xf32>
    %494 = arith.maximumf %492, %493 : vector<8x8x8xf32>
    %495 = arith.truncf %494 : vector<8x8x8xf32> to vector<8x8x8xbf16>
    %c0_618 = arith.constant 0 : index
    %c3_619 = arith.constant 3 : index
    %c0_620 = arith.constant 0 : index
    %c0_621 = arith.constant 0 : index
    %c0_622 = arith.constant 0 : index
    %496 = vector.load %arg5[%c0_618, %c3_619, %c0_620, %c0_621, %c0_622] : memref<1x4x8x8x8xbf16, #tpu.memory_space<vmem>>, vector<1x1x8x8x8xbf16>
    %497 = vector.shape_cast %496 : vector<1x1x8x8x8xbf16> to vector<8x8x8xbf16>
    %498 = vector.shape_cast %495 : vector<8x8x8xbf16> to vector<1x1x8x8x8xbf16>
    tpu.vector_store %arg5[%c0_618, %c3_619, %c0_620, %c0_621, %c0_622], %498 {strides = array<i32>} : memref<1x4x8x8x8xbf16, #tpu.memory_space<vmem>>, vector<1x1x8x8x8xbf16>,
    return
  }
  func.func @transform_0(%arg0: i32, %arg1: i32) -> (i32, i32, i32, i32, i32) {
    %c0_i32 = arith.constant 0 : i32
    %c0_i32_0 = arith.constant 0 : i32
    %c0_i32_1 = arith.constant 0 : i32
    %c0_i32_2 = arith.constant 0 : i32
    %c0_i32_3 = arith.constant 0 : i32
    return %arg0, %c0_i32, %c0_i32_0, %c0_i32_1, %c0_i32_2 : i32, i32, i32, i32, i32
  }
  func.func @transform_1(%arg0: i32, %arg1: i32) -> (i32, i32, i32) {
    %c0_i32 = arith.constant 0 : i32
    %c0_i32_0 = arith.constant 0 : i32
    %c0_i32_1 = arith.constant 0 : i32
    %c0_i32_2 = arith.constant 0 : i32
    return %c0_i32, %c0_i32_0, %c0_i32_1 : i32, i32, i32
  }
  func.func @transform_2(%arg0: i32, %arg1: i32) -> (i32, i32) {
    %c0_i32 = arith.constant 0 : i32
    %c0_i32_0 = arith.constant 0 : i32
    %c0_i32_1 = arith.constant 0 : i32
    return %c0_i32, %c0_i32_0 : i32, i32
  }
  func.func @transform_3(%arg0: i32, %arg1: i32) -> (i32, i32, i32, i32, i32) {
    %c0_i32 = arith.constant 0 : i32
    %c0_i32_0 = arith.constant 0 : i32
    %c0_i32_1 = arith.constant 0 : i32
    %c0_i32_2 = arith.constant 0 : i32
    return %arg0, %arg1, %c0_i32, %c0_i32_0, %c0_i32_1 : i32, i32, i32, i32, i32
  }
}

</mosaic_0001>

<bundles_post_ra>
// kernel: tpu_custom_call.1
= control target key start
LH: loop header
LB: loop body
LE: loop exit
PB: predicated region body
PF: predicated region fallthrough
CT: control target
= control target key end

     0   :  { %8 = vsyncpa [#allocation6], 0  ;;  %s9961_s0 = inlined_call_operand.hbm [shape: f32[2,4,8,8,8], index: 0, kind: input, shape index: {}]   ;;  %s9962_s1 = inlined_call_operand.vmem [shape: f32[3,72,8], index: 1, kind: input, shape index: {}]   ;;  %s9963_s2 = inlined_call_operand.vmem [shape: f32[1,8], index: 2, kind: input, shape index: {}]   ;;  %s9964_s3 = inlined_call_operand.hbm [shape: bf16[2,4,8,8,8], index: 3, kind: output, shape index: {}]  }
   0x1   :  { %10 = vsyncpa [#allocation6 + $0x1], 0 }
   0x2   :  { %11 = vsyncpa [#allocation7], 0 }
   0x3   :  { %13 = vsyncpa [#allocation7 + $0x1], 0  ;;  %s7101_s12 = smov 0   ;;  %s7103_s13 = smov 0  }
   0x4   :  { %s7105_s14 = smov 0   ;;  %s7107_s15 = smov 0  }
   0x5   :  { %s7109_s16 = smov 0   ;;  %s7111_s17 = smov 0  }
   0x6 LB: > { %s5785_s18 = sadd.s32 4294967295, %s7065_s17   ;;  %s5786_s19 = sadd.s32 4294967294, %s7065_s17   ;;  %s7065_s17 = sphi %s7111_s17, %s19_s17   ;;  %s7061_s16 = sphi %s7109_s16, %s9985_s16   ;;  %s7057_s15 = sphi %s7107_s15, %s9984_s15   ;;  %s7053_s14 = sphi %s7105_s14, %s9983_s14   ;;  %s7049_s13 = sphi %s7103_s13, %s9982_s13   ;;  %s7045_s12 = sphi %s7101_s12, %s9981_s12  }
   0x7   : > { %s31_s20 = sadd.s32 1, %s7061_s16  ;;  %s38_s21 = sadd.s32 1, %s7053_s14 }
   0x8   : > { %p33_p0 = scmp.ge.s32.totalorder %s31_s20, 2  ;;  %p45_p1 = scmp.ne.s32.totalorder %s7053_s14, %s7049_s13 }
   0x9   : > { %p46_p2 = scmp.eq.s32.totalorder %s7065_s17, 0  ;;  %p51_p3 = scmp.ne.s32.totalorder %s7049_s13, %s7045_s12 }
   0xa   : > { %s9987_s20 = smov (%p33_p0, %s31_s20), 0  ;;  %p52_p5 = scmp.eq.s32.totalorder %s5785_s18, 0 }
   0xb   : > { %p7142_p4 = por %p46_p2, %p45_p1  ;;  %s35_s23 = ssub.s32 %s7061_s16, %s9987_s20 }
   0xc   : > { %p119_p6 = scmp.eq.s32.totalorder %s5785_s18, 1  ;;  %p36_p7 = scmp.eq.s32.totalorder %s35_s23, 0 }
   0xd   : > { %p7148_p8 = por %p52_p5, %p51_p3  ;;  %p125_p10 = scmp.eq.s32.totalorder %s5786_s19, 1 }
   0xe   : > { %p7152_p9 = por %p119_p6, %p45_p1  ;;  %p6894_p13 = scmp.lt.s32.totalorder %s7065_s17, 2 }
   0xf   : > { %s7157_s26 = scalar_select %p36_p7, %s7053_s14, %s38_s21  }
  0x10   : > { %p7159_p11 = por %p125_p10, %p51_p3  ;;  %s151_s28 = sand.u32 1, %s7053_s14  }
  0x11   : > { %s5789_s29 = sshll.u32 %s151_s28, 8  ;;  %s6060_s30 = sshll.u32 %s7061_s16, 12 }
  0x12   : > { %s161_s6 = scalar_lea.hbm %s9961_s0, %s6060_s30  ;;  %s155_s7 = scalar_lea.vmem [#allocation5], %s5789_s29 }
  0x13   : > { %s162_s8 = sshll.u32 %s155_s7, 4  ;;  %p7172_p0 = pnand %p6894_p13, %p7142_p4  ;;  %s163_s8 = int_to_ptr.vmem [resolvable:$true] %s162_s8 }
  0x14   : > { %p5792_p1 = scmp.ge.s32.totalorder %s7065_s17, 1  ;;  %s152_s10 = scalar_lea.sflag [#allocation6], %s151_s28 }
  0x15   : > { %p6959_p2 = pneg %p7172_p0  ;;  %s6970_s11 = scalar_lea.vmem %s163_s8, 4096 }
  0x16   : > { %p6971_p3 = scmp.ne.s32.totalorder %s163_s8, %s6970_s11  ;;  %s7067_s18 = smov [#allocation5]  }
  0x17   : > { %s6975_s19 = sshll.u32 %s7067_s18, 4  ;;  %s6976_s19 = int_to_ptr.vmem [resolvable:$false] %s6975_s19 }
  0x18   : > { %p6973_p5 = pnand %p6971_p3, %p6959_p2  ;;  %s6977_s21 = scalar_lea.vmem %s6976_s19, 8192 }
  0x19   : > { %p6978_p7 = scmp.lt.s32.totalorder %s163_s8, %s6976_s19  ;;  %p6979_p10 = scmp.lt.s32.totalorder %s6977_s21, %s6970_s11 }
  0x1a   : > { %p6974_p6 = pneg %p6973_p5 }
  0x1b   : > { %p6980_p12 = por %p6979_p10, %p6978_p7 }
  0x1d   : > { %p6981_p4 = pnand %p6980_p12, %p6974_p6 }
  0x1f   : > { %6984 = shalt.err (!%p6981_p4)
}
  0x20   : > { %s7068_s22 = smov 128   ;;  %s7069_s23 = smov 8  }
  0x21   : > { %6889 = dma.hbm_to_vmem [thread:$0]  (!%p7172_p0), %s161_s6, 4096, %s163_s8, %s152_s10, %s7068_s22, %s7068_s22, %s7069_s23  }
  0x22   : > { %p170_p13 = scmp.lt.s32.totalorder %s7065_s17, 3 }
  0x24   : > { %p171_p2 = pnand %p5792_p1, %p170_p13 }
  0x25   : > { %s7185_s28 = sand.u32 (!%p171_p2), 1, %s7049_s13  }
  0x26   : > { %174 = sbr.rel (%p171_p2) target bundleno = 1368 (0x558), region = 32  ;;  %s5793_s29 = sshll.u32 (!%p171_p2), %s7185_s28, 8 }
  0x27   : > { %s177_s30 = scalar_lea.sflag (!%p171_p2), [#allocation6], %s7185_s28  ;;  %s7189_s4 = scalar_lea.vmem (!%p171_p2), [#allocation5], %s5793_s29 }
  0x2b   : > { %7036 = dma.done.wait (%p7148_p8), %s177_s30, 4096  }
  0x2c   : > { %7038 = vsyncadd (%p7148_p8), %s177_s30, 4294963200  ;;  %vm205_vm0 = vcmask 64512   ;;  %vm239_vm1 = vcmask 58368   ;;  %v7070_v0 = vmov 0.0   ;;  %v272_v1 = vld [vmem:[%s7189_s4 + $0x8] sm:$0xff]  ;;  %v271_v2 = vld [vmem:[%s7189_s4] sm:$0xff] }
  0x2d   : > { %238 = vst.msk [vmem:[#allocation2] sm:$0xff] %vm205_vm0, %v7070_v0  ;;  %206 = vst.msk [vmem:[#allocation4] sm:$0xff] %vm205_vm0, %v7070_v0  ;;  %v273_v3 = vld [vmem:[%s7189_s4 + $0x10] sm:$0xff]  ;;  %v281_v5 = vmul.f32 0.0, %v272_v1  ;;  %v280_v6 = vmul.f32 0.0, %v271_v2  ;;  %v7253_v8 = vld [vmem:[%s7189_s4 + $0x18] sm:$0xff] }
  0x2e   : > { %240 = vst.msk [vmem:[#allocation2 + $0x8] sm:$0x3] %vm239_vm1, %v7070_v0  ;;  %244 = vst.msk [vmem:[#allocation2 + $0x28] sm:$0x3] %vm239_vm1, %v7070_v0  ;;  %v282_v7 = vmul.f32 0.0, %v273_v3  ;;  %s7071_s24 = smov 8  }
  0x2f   : > { %246 = vst.msk [vmem:[#allocation2 + $0x38] sm:$0x3] %vm239_vm1, %v7070_v0  ;;  %248 = vst.msk [vmem:[#allocation2 + $0x48] sm:$0x3] %vm239_vm1, %v7070_v0  ;;  %v283_v9 = vmul.f32 0.0, %v7253_v8  ;;  %v275_v10 = vld [vmem:[%s7189_s4 + $0x20] sm:$0xff] }
  0x30   : > { %250 = vst.msk [vmem:[#allocation2 + $0x58] sm:$0x3] %vm239_vm1, %v7070_v0  ;;  %252 = vst.msk [vmem:[#allocation2 + $0x68] sm:$0x3] %vm239_vm1, %v7070_v0  ;;  %v276_v11 = vld [vmem:[%s7189_s4 + $0x28] sm:$0xff]  ;;  %v277_v12 = vld [vmem:[%s7189_s4 + $0x30] sm:$0xff] }
  0x31   : > { %254 = vst.msk [vmem:[#allocation2 + $0x78] sm:$0x3] %vm239_vm1, %v7070_v0  ;;  %256 = vst.msk [vmem:[#allocation2 + $0x88] sm:$0x3] %vm239_vm1, %v7070_v0  ;;  %v284_v14 = vmul.f32 0.0, %v275_v10  ;;  %v285_v15 = vmul.f32 0.0, %v276_v11 }
  0x32   : > { %207 = vst.msk [vmem:[#allocation4 + $0x8] sm:$0xff] %vm205_vm0, %v7070_v0  ;;  %208 = vst.msk [vmem:[#allocation4 + $0x10] sm:$0xff] %vm205_vm0, %v7070_v0  ;;  %v286_v16 = vmul.f32 0.0, %v277_v12  ;;  %v278_v17 = vld [vmem:[%s7189_s4 + $0x38] sm:$0xff]  ;;  %s7072_s5 = smov 16   ;;  %s7073_s6 = smov 24  }
  0x33   : > { %209 = vst.msk [vmem:[#allocation4 + $0x18] sm:$0xff] %vm205_vm0, %v7070_v0  ;;  %210 = vst.msk [vmem:[#allocation4 + $0x20] sm:$0xff] %vm205_vm0, %v7070_v0  ;;  %v287_v19 = vmul.f32 0.0, %v278_v17  ;;  %s7074_s7 = smov 32   ;;  %s7075_s8 = smov 40   ;;  %v730_v44 = vld [vmem:[%s9962_s1 + $0x40] sm:$0xff] }
  0x34   : > { %211 = vst.msk [vmem:[#allocation4 + $0x28] sm:$0xff] %vm205_vm0, %v7070_v0  ;;  %212 = vst.msk [vmem:[#allocation4 + $0x30] sm:$0xff] %vm205_vm0, %v7070_v0  ;;  %v7267_v18 = vld [vmem:[#allocation2] sm:$0xff]  ;;  %s7076_s9 = smov 48   ;;  %s7077_s10 = smov 56   ;;  %6266 = vmatprep.subr.mxu0 %v730_v44  ;;  %6296 = vmatprep.subr.mxu1 %v730_v44  ;;  %v729_v46 = vld [vmem:[%s9962_s1 + $0x38] sm:$0xff] }
  0x35   : > { %213 = vst.msk [vmem:[#allocation4 + $0x38] sm:$0xff] %vm205_vm0, %v7070_v0  ;;  %214 = vst.msk [vmem:[#allocation4 + $0x40] sm:$0xff] %vm205_vm0, %v7070_v0  ;;  %v7250_v4 = vld [vmem:[#allocation2 + $0x1] sm:$0xff]  ;;  %6267 = vmatpush3.msra.mxu0 %v730_v44  ;;  %6297 = vmatpush3.msra.mxu1 %v730_v44  ;;  %v728_v47 = vld [vmem:[%s9962_s1 + $0x30] sm:$0xff]  ;;  %vm353_vm2 = vcmask 130112   ;;  %s7078_s29 = smov 64  }
  0x36   : > { %215 = vst.msk [vmem:[#allocation4 + $0x48] sm:$0xff] %vm205_vm0, %v7070_v0  ;;  %216 = vst.msk [vmem:[#allocation4 + $0x50] sm:$0xff] %vm205_vm0, %v7070_v0  ;;  %329 = vrot.lane.b32.xlu0 %v7250_v4, %s7071_s24  ;;  %v7261_v13 = vld [vmem:[#allocation2 + $0x2] sm:$0xff]  ;;  %6268 = vmatprep.subr.mxu0 %v729_v46  ;;  %v725_v50 = vld [vmem:[%s9962_s1 + $0x18] sm:$0xff]  ;;  %vm402_vm3 = vcmask 195712   ;;  %vm451_vm4 = vcmask 261312  }
  0x37   : > { %217 = vst.msk [vmem:[#allocation4 + $0x58] sm:$0xff] %vm205_vm0, %v7070_v0  ;;  %218 = vst.msk [vmem:[#allocation4 + $0x60] sm:$0xff] %vm205_vm0, %v7070_v0  ;;  %6298 = vmatprep.subr.mxu1 %v729_v46  ;;  %6269 = vmatpush3.msra.mxu0 %v729_v46  ;;  %v727_v48 = vld [vmem:[%s9962_s1 + $0x28] sm:$0xff]  ;;  %v726_v49 = vld [vmem:[%s9962_s1 + $0x20] sm:$0xff]  ;;  %vm500_vm5 = vcmask 326912   ;;  %vm549_vm6 = vcmask 392512  }
  0x38   : > { %219 = vst.msk [vmem:[#allocation4 + $0x68] sm:$0xff] %vm205_vm0, %v7070_v0  ;;  %220 = vst.msk [vmem:[#allocation4 + $0x70] sm:$0xff] %vm205_vm0, %v7070_v0  ;;  %6299 = vmatpush3.msra.mxu1 %v729_v46  ;;  %6270 = vmatprep.subr.mxu0 %v728_v47  ;;  %v724_v51 = vld [vmem:[%s9962_s1 + $0x10] sm:$0xff]  ;;  %v723_v52 = vld [vmem:[%s9962_s1 + $0x8] sm:$0xff]  ;;  %vm599_vm7 = vcmask 458112   ;;  %vm648_vm8 = vcmask 523712  }
  0x39   : > { %221 = vst.msk [vmem:[#allocation4 + $0x78] sm:$0xff] %vm205_vm0, %v7070_v0  ;;  %222 = vst.msk [vmem:[#allocation4 + $0x80] sm:$0xff] %vm205_vm0, %v7070_v0  ;;  %6300 = vmatprep.subr.mxu1 %v728_v47  ;;  %6271 = vmatpush3.msra.mxu0 %v728_v47  ;;  %v722_v55 = vld [vmem:[%s9962_s1] sm:$0xff]  ;;  %v5829_v62 = vld [vmem:[%s7189_s4 + $0x48] sm:$0xff]  ;;  %vm697_vm9 = vcmask 589312   ;;  %vm731_vm10 = vcmask 588800  }
  0x3a   : > { %223 = vst.msk [vmem:[#allocation4 + $0x88] sm:$0xff] %vm205_vm0, %v7070_v0  ;;  %224 = vst.msk [vmem:[#allocation4 + $0x90] sm:$0xff] %vm205_vm0, %v7070_v0  ;;  %378 = vrot.lane.b32.xlu0 %v7261_v13, %s7072_s5  ;;  %6301 = vmatpush3.msra.mxu1 %v728_v47  ;;  %s6061_s21 = sshll.u32 %s7057_s15, 11  ;;  %s5673_s15 = scalar_lea.sflag [#allocation7], %s7185_s28 }
  0x3b   : > { %225 = vst.msk [vmem:[#allocation4 + $0x98] sm:$0xff] %vm205_vm0, %v7070_v0  ;;  %226 = vst.msk [vmem:[#allocation4 + $0xa0] sm:$0xff] %vm205_vm0, %v7070_v0  ;;  %6272 = vmatprep.subr.mxu0 %v727_v48  ;;  %6302 = vmatprep.subr.mxu1 %v727_v48  ;;  %s9905_s30 = scalar_lea.hbm %s9964_s3, %s6061_s21  ;;  %s7079_s18 = smov [#allocation8]  }
  0x3c   : > { %227 = vst.msk [vmem:[#allocation4 + $0xa8] sm:$0xff] %vm205_vm0, %v7070_v0  ;;  %228 = vst.msk [vmem:[#allocation4 + $0xb0] sm:$0xff] %vm205_vm0, %v7070_v0  ;;  %6273 = vmatpush3.msra.mxu0 %v727_v48  ;;  %6303 = vmatpush3.msra.mxu1 %v727_v48 }
  0x3d   : > { %229 = vst.msk [vmem:[#allocation4 + $0xb8] sm:$0xff] %vm205_vm0, %v7070_v0  ;;  %230 = vst.msk [vmem:[#allocation4 + $0xc0] sm:$0xff] %vm205_vm0, %v7070_v0  ;;  %6274 = vmatprep.subr.mxu0 %v726_v49  ;;  %6304 = vmatprep.subr.mxu1 %v726_v49 }
  0x3e   : > { %231 = vst.msk [vmem:[#allocation4 + $0xc8] sm:$0xff] %vm205_vm0, %v7070_v0  ;;  %232 = vst.msk [vmem:[#allocation4 + $0xd0] sm:$0xff] %vm205_vm0, %v7070_v0  ;;  %6275 = vmatpush3.msra.mxu0 %v726_v49  ;;  %6305 = vmatpush3.msra.mxu1 %v726_v49 }
  0x3f   : > { %233 = vst.msk [vmem:[#allocation4 + $0xd8] sm:$0xff] %vm205_vm0, %v7070_v0  ;;  %234 = vst.msk [vmem:[#allocation4 + $0xe0] sm:$0xff] %vm205_vm0, %v7070_v0  ;;  %6276 = vmatprep.subr.mxu0 %v725_v50  ;;  %6306 = vmatprep.subr.mxu1 %v725_v50 }
  0x40   : > { %235 = vst.msk [vmem:[#allocation4 + $0xe8] sm:$0xff] %vm205_vm0, %v7070_v0  ;;  %236 = vst.msk [vmem:[#allocation4 + $0xf0] sm:$0xff] %vm205_vm0, %v7070_v0  ;;  %6277 = vmatpush3.msra.mxu0 %v725_v50  ;;  %6307 = vmatpush3.msra.mxu1 %v725_v50 }
  0x41   : > { %237 = vst.msk [vmem:[#allocation4 + $0xf8] sm:$0xff] %vm205_vm0, %v7070_v0  ;;  %241 = vst.msk [vmem:[#allocation2 + $0x10] sm:$0xff] %vm205_vm0, %v7070_v0  ;;  %6278 = vmatprep.subr.mxu0 %v724_v51  ;;  %6308 = vmatprep.subr.mxu1 %v724_v51 }
  0x42   : > { %242 = vst.msk [vmem:[#allocation2 + $0x18] sm:$0x3] %vm239_vm1, %v7070_v0  ;;  %258 = vst.msk [vmem:[#allocation2 + $0x98] sm:$0x3] %vm239_vm1, %v7070_v0  ;;  %6279 = vmatpush3.msra.mxu0 %v724_v51  ;;  %6309 = vmatpush3.msra.mxu1 %v724_v51 }
  0x43   : > { %243 = vst.msk [vmem:[#allocation2 + $0x20] sm:$0xff] %vm205_vm0, %v7070_v0  ;;  %245 = vst.msk [vmem:[#allocation2 + $0x30] sm:$0xff] %vm205_vm0, %v7070_v0  ;;  %6280 = vmatprep.subr.mxu0 %v723_v52  ;;  %6310 = vmatprep.subr.mxu1 %v723_v52 }
  0x44   : > { %247 = vst.msk [vmem:[#allocation2 + $0x40] sm:$0xff] %vm205_vm0, %v7070_v0  ;;  %249 = vst.msk [vmem:[#allocation2 + $0x50] sm:$0xff] %vm205_vm0, %v7070_v0  ;;  %6281 = vmatpush3.msra.mxu0 %v723_v52  ;;  %6311 = vmatpush3.msra.mxu1 %v723_v52 }
  0x45   : > { %251 = vst.msk [vmem:[#allocation2 + $0x60] sm:$0xff] %vm205_vm0, %v7070_v0  ;;  %253 = vst.msk [vmem:[#allocation2 + $0x70] sm:$0xff] %vm205_vm0, %v7070_v0  ;;  %6282 = vmatprep.subr.mxu0 %v722_v55  ;;  %6312 = vmatprep.subr.mxu1 %v722_v55 }
  0x46   : > { %255 = vst.msk [vmem:[#allocation2 + $0x80] sm:$0xff] %vm205_vm0, %v7070_v0  ;;  %257 = vst.msk [vmem:[#allocation2 + $0x90] sm:$0xff] %vm205_vm0, %v7070_v0  ;;  %6283 = vmatpush3.msra.mxu0 %v722_v55  ;;  %6313 = vmatpush3.msra.mxu1 %v722_v55 }
  0x47   : > { %290 = vst.msk [vmem:[#allocation2 + $0x21] sm:$0xff] %vm205_vm0, %v281_v5  ;;  %289 = vst.msk [vmem:[#allocation2 + $0x11] sm:$0xff] %vm205_vm0, %v280_v6 }
  0x48   : > { %291 = vst.msk [vmem:[#allocation2 + $0x31] sm:$0xff] %vm205_vm0, %v282_v7  ;;  %292 = vst.msk [vmem:[#allocation2 + $0x41] sm:$0xff] %vm205_vm0, %v283_v9  ;;  %v5831_v9 = vld [vmem:[%s7189_s4 + $0x58] sm:$0xff] }
  0x49   : > { %305 = vst.msk [vmem:[#allocation3] sm:$0xff] %vm205_vm0, %v7267_v18  ;;  %293 = vst.msk [vmem:[#allocation2 + $0x51] sm:$0xff] %vm205_vm0, %v284_v14 }
  0x4a   : > { %294 = vst.msk [vmem:[#allocation2 + $0x61] sm:$0xff] %vm205_vm0, %v285_v15  ;;  %295 = vst.msk [vmem:[#allocation2 + $0x71] sm:$0xff] %vm205_vm0, %v286_v16 }
  0x4b   : > { %296 = vst.msk [vmem:[#allocation2 + $0x81] sm:$0xff] %vm205_vm0, %v287_v19 }
  0x4d   : > { %v7408_v45 = vld [vmem:[#allocation2 + $0x90] sm:$0xff] }
  0x4e   : > { %v7278_v20 = vld [vmem:[#allocation2 + $0x21] sm:$0xff]  ;;  %v314_v21 = vld [vmem:[#allocation2 + $0x11] sm:$0xff] }
  0x4f   : > { %333 = vrot.lane.b32.xlu1 %v7278_v20, %s7071_s24  ;;  %331 = vrot.lane.b32.xlu0 %v314_v21, %s7071_s24  ;;  %v7283_v22 = vld [vmem:[#allocation2 + $0x31] sm:$0xff]  ;;  %v7285_v23 = vld [vmem:[#allocation2 + $0x41] sm:$0xff] }
  0x50   : > { %v7287_v24 = vld [vmem:[#allocation2 + $0x51] sm:$0xff]  ;;  %v7289_v25 = vld [vmem:[#allocation2 + $0x22] sm:$0xff] }
  0x51   : > { %v363_v26 = vld [vmem:[#allocation2 + $0x12] sm:$0xff]  ;;  %v7293_v28 = vld [vmem:[#allocation2 + $0x61] sm:$0xff] }
  0x52   : > { %v7291_v27 = vld [vmem:[#allocation2 + $0x32] sm:$0xff]  ;;  %v7297_v30 = vld [vmem:[#allocation2 + $0x42] sm:$0xff] }
  0x53   : > { %v7295_v29 = vld [vmem:[#allocation2 + $0x71] sm:$0xff]  ;;  %v7299_v31 = vld [vmem:[#allocation2 + $0x62] sm:$0xff]  ;;  %335 = vrot.lane.b32.xlu1 %v7283_v22, %s7071_s24  ;;  %337 = vrot.lane.b32.xlu0 %v7285_v23, %s7071_s24 }
  0x54   : > { %v7301_v32 = vld [vmem:[#allocation2 + $0x52] sm:$0xff]  ;;  %v412_v36 = vld [vmem:[#allocation2 + $0x20] sm:$0xff] }
  0x55   : > { %v411_v33 = vld [vmem:[#allocation2 + $0x10] sm:$0xff]  ;;  %v414_v38 = vld [vmem:[#allocation2 + $0x40] sm:$0xff]  ;;  %307 = vst.msk [vmem:[#allocation3 + $0x10] sm:$0xff] %vm205_vm0, %v412_v36  ;;  %906 = vst.msk [vmem:[#allocation2 + $0x21] sm:$0xff] %vm205_vm0, %v272_v1 }
  0x56   : > { %v7303_v34 = vld [vmem:[#allocation2 + $0x72] sm:$0xff]  ;;  %306 = vst.msk [vmem:[#allocation3 + $0x8] sm:$0xff] %vm205_vm0, %v411_v33  ;;  %905 = vst.msk [vmem:[#allocation2 + $0x11] sm:$0xff] %vm205_vm0, %v271_v2  ;;  %v416_v40 = vld [vmem:[#allocation2 + $0x60] sm:$0xff] }
  0x57   : > { %v7309_v35 = vld [vmem:[#allocation2 + $0x30] sm:$0xff]  ;;  %v418_v41 = vld [vmem:[#allocation2 + $0x80] sm:$0xff]  ;;  %309 = vst.msk [vmem:[#allocation3 + $0x20] sm:$0xff] %vm205_vm0, %v414_v38  ;;  %311 = vst.msk [vmem:[#allocation3 + $0x30] sm:$0xff] %vm205_vm0, %v416_v40  ;;  %339 = vrot.lane.b32.xlu1 %v7287_v24, %s7071_s24  ;;  %341 = vrot.lane.b32.xlu0 %v7293_v28, %s7071_s24 }
  0x58   : > { %v7311_v37 = vld [vmem:[#allocation2 + $0x50] sm:$0xff]  ;;  %308 = vst.msk [vmem:[#allocation3 + $0x18] sm:$0xff] %vm205_vm0, %v7309_v35  ;;  %907 = vst.msk [vmem:[#allocation2 + $0x31] sm:$0xff] %vm205_vm0, %v273_v3  ;;  %v7323_v42 = vld [vmem:[#allocation2 + $0x81] sm:$0xff] }
  0x59   : > { %v417_v39 = vld [vmem:[#allocation2 + $0x70] sm:$0xff]  ;;  %310 = vst.msk [vmem:[#allocation3 + $0x28] sm:$0xff] %vm205_vm0, %v7311_v37  ;;  %909 = vst.msk [vmem:[#allocation2 + $0x51] sm:$0xff] %vm205_vm0, %v275_v10  ;;  %v7325_v43 = vld [vmem:[#allocation2 + $0x82] sm:$0xff] }
  0x5a   : > { %312 = vst.msk [vmem:[#allocation3 + $0x38] sm:$0xff] %vm205_vm0, %v417_v39  ;;  %908 = vst.msk [vmem:[#allocation2 + $0x41] sm:$0xff] %vm205_vm0, %v7253_v8  ;;  %v7447_v54 = vld [vmem:[#allocation2 + $0x91] sm:$0xff]  ;;  %v5828_v8 = vld [vmem:[%s7189_s4 + $0x40] sm:$0xff] }
  0x5b   : > { %910 = vst.msk [vmem:[#allocation2 + $0x61] sm:$0xff] %vm205_vm0, %v276_v11  ;;  %911 = vst.msk [vmem:[#allocation2 + $0x71] sm:$0xff] %vm205_vm0, %v277_v12  ;;  %343 = vrot.lane.b32.xlu1 %v7295_v29, %s7071_s24  ;;  %382 = vrot.lane.b32.xlu0 %v7289_v25, %s7072_s5  ;;  %v7498_v10 = vld [vmem:[#allocation2 + $0x92] sm:$0xff] }
  0x5c   : > { %912 = vst.msk [vmem:[#allocation2 + $0x81] sm:$0xff] %vm205_vm0, %v278_v17  ;;  %v7462_v59 = vld [vmem:[#allocation2 + $0x21] sm:$0xff] }
  0x5d   : > { %v7466_v60 = vld [vmem:[#allocation2 + $0x22] sm:$0xff]  ;;  %v7476_v63 = vld [vmem:[#allocation2 + $0x11] sm:$0xff] }
  0x5e   : > { %v7468_v61 = vld [vmem:[#allocation2 + $0x20] sm:$0xff]  ;;  %v7480_v3 = vld [vmem:[#allocation2 + $0x12] sm:$0xff] }
  0x5f   : > { %380 = vrot.lane.b32.xlu1 %v363_v26, %s7072_s5  ;;  %386 = vrot.lane.b32.xlu0 %v7297_v30, %s7072_s5  ;;  %1653 = vst.msk [vmem:[#allocation2 + $0x21] sm:$0xff] %vm205_vm0, %v5829_v62  ;;  %v7484_v6 = vld [vmem:[#allocation2 + $0x10] sm:$0xff] }
  0x60   : > { %1652 = vst.msk [vmem:[#allocation2 + $0x11] sm:$0xff] %vm205_vm0, %v5828_v8  ;;  %v7500_v11 = vld [vmem:[#allocation2 + $0x31] sm:$0xff] }
  0x61   : > { %v7478_v0 = vld [vmem:[#allocation2 + $0x41] sm:$0xff]  ;;  %v7504_v16 = vld [vmem:[#allocation2 + $0x32] sm:$0xff] }
  0x62   : > { %v7482_v5 = vld [vmem:[#allocation2 + $0x42] sm:$0xff]  ;;  %v7508_v19 = vld [vmem:[#allocation2 + $0x30] sm:$0xff] }
  0x63   : > { %384 = vrot.lane.b32.xlu1 %v7291_v27, %s7072_s5  ;;  %390 = vrot.lane.b32.xlu0 %v7299_v31, %s7072_s5  ;;  %v7488_v7 = vld [vmem:[#allocation2 + $0x40] sm:$0xff] }
  0x64   : > { %1655 = vst.msk [vmem:[#allocation2 + $0x41] sm:$0xff] %vm205_vm0, %v5831_v9  ;;  %v7502_v12 = vld [vmem:[#allocation2 + $0x61] sm:$0xff] }
  0x65   : > { %v7506_v17 = vld [vmem:[#allocation2 + $0x62] sm:$0xff] }
  0x66   : > { %v7592_v50 = vld [vmem:[#allocation2 + $0x80] sm:$0xff] }
  0x67   : > { %388 = vrot.lane.b32.xlu1 %v7301_v32, %s7072_s5  ;;  %427 = vrot.lane.b32.xlu0 %v411_v33, %s7073_s6  ;;  %v5834_v33 = vld [vmem:[%s7189_s4 + $0x70] sm:$0xff]  ;;  %v7596_v51 = vld [vmem:[#allocation2 + $0x81] sm:$0xff] }
  0x68   : > { %v7598_v52 = vld [vmem:[#allocation2 + $0x82] sm:$0xff] }
  0x6b   : > { %392 = vrot.lane.b32.xlu1 %v7303_v34, %s7072_s5  ;;  %431 = vrot.lane.b32.xlu0 %v7309_v35, %s7073_s6 }
  0x6f   : > { %429 = vrot.lane.b32.xlu1 %v412_v36, %s7073_s6  ;;  %435 = vrot.lane.b32.xlu0 %v7311_v37, %s7073_s6 }
  0x73   : > { %433 = vrot.lane.b32.xlu1 %v414_v38, %s7073_s6  ;;  %439 = vrot.lane.b32.xlu0 %v417_v39, %s7073_s6 }
  0x77   : > { %437 = vrot.lane.b32.xlu1 %v416_v40, %s7073_s6  ;;  %476 = vrot.lane.b32.xlu0 %v314_v21, %s7074_s7  ;;  %v5833_v21 = vld [vmem:[%s7189_s4 + $0x68] sm:$0xff] }
  0x7b   : > { %441 = vrot.lane.b32.xlu1 %v418_v41, %s7073_s6  ;;  %480 = vrot.lane.b32.xlu0 %v7283_v22, %s7074_s7 }
  0x7f   : > { %478 = vrot.lane.b32.xlu1 %v7278_v20, %s7074_s7  ;;  %484 = vrot.lane.b32.xlu0 %v7287_v24, %s7074_s7 }
  0x83   : > { %482 = vrot.lane.b32.xlu1 %v7285_v23, %s7074_s7  ;;  %488 = vrot.lane.b32.xlu0 %v7295_v29, %s7074_s7 }
  0x87   : > { %486 = vrot.lane.b32.xlu1 %v7293_v28, %s7074_s7  ;;  %525 = vrot.lane.b32.xlu0 %v363_v26, %s7075_s8  ;;  %v7528_v26 = vld [vmem:[#allocation2 + $0x50] sm:$0xff] }
  0x8b   : > { %490 = vrot.lane.b32.xlu1 %v7323_v42, %s7074_s7  ;;  %529 = vrot.lane.b32.xlu0 %v7291_v27, %s7075_s8 }
  0x8f   : > { %527 = vrot.lane.b32.xlu1 %v7289_v25, %s7075_s8  ;;  %533 = vrot.lane.b32.xlu0 %v7301_v32, %s7075_s8 }
  0x93   : > { %531 = vrot.lane.b32.xlu1 %v7297_v30, %s7075_s8  ;;  %537 = vrot.lane.b32.xlu0 %v7303_v34, %s7075_s8 }
  0x97   : > { %535 = vrot.lane.b32.xlu1 %v7299_v31, %s7075_s8  ;;  %575 = vrot.lane.b32.xlu0 %v412_v36, %s7076_s9 }
  0x9b   : > { %539 = vrot.lane.b32.xlu1 %v7325_v43, %s7075_s8  ;;  %579 = vrot.lane.b32.xlu0 %v414_v38, %s7076_s9 }
  0x9f   : > { %577 = vrot.lane.b32.xlu1 %v7309_v35, %s7076_s9  ;;  %583 = vrot.lane.b32.xlu0 %v416_v40, %s7076_s9 }
  0xa3   : > { %581 = vrot.lane.b32.xlu1 %v7311_v37, %s7076_s9  ;;  %587 = vrot.lane.b32.xlu0 %v418_v41, %s7076_s9 }
  0xa7   : > { %585 = vrot.lane.b32.xlu1 %v417_v39, %s7076_s9  ;;  %624 = vrot.lane.b32.xlu0 %v7278_v20, %s7077_s10  ;;  %v5830_v20 = vld [vmem:[%s7189_s4 + $0x50] sm:$0xff] }
  0xa8   : > { %v330_v53 = vpop.permute.xlu0 %329  ;;  %1654 = vst.msk [vmem:[#allocation2 + $0x31] sm:$0xff] %vm205_vm0, %v5830_v20 }
  0xa9   : > { %354 = vst.msk [vmem:[#allocation3] sm:$0xff] %vm353_vm2, %v330_v53  ;;  %v5835_v53 = vld [vmem:[%s7189_s4 + $0x78] sm:$0xff] }
  0xaa   : > { %1659 = vst.msk [vmem:[#allocation2 + $0x81] sm:$0xff] %vm205_vm0, %v5835_v53  ;;  %v7786_v53 = vld [vmem:[#allocation2 + $0x12] sm:$0xff] }
  0xab   : > { %589 = vrot.lane.b32.xlu1 %v7408_v45, %s7076_s9  ;;  %628 = vrot.lane.b32.xlu0 %v7285_v23, %s7077_s10 }
  0xac   : > { %v379_v56 = vpop.permute.xlu0 %378 }
  0xad   : > { %403 = vst.msk [vmem:[#allocation3] sm:$0xff] %vm402_vm3, %v379_v56 }
  0xaf   : > { %626 = vrot.lane.b32.xlu1 %v7283_v22, %s7077_s10  ;;  %632 = vrot.lane.b32.xlu0 %v7293_v28, %s7077_s10 }
  0xb3   : > { %630 = vrot.lane.b32.xlu1 %v7287_v24, %s7077_s10  ;;  %636 = vrot.lane.b32.xlu0 %v7323_v42, %s7077_s10  ;;  %v7522_v24 = vld [vmem:[#allocation2 + $0x51] sm:$0xff] }
  0xb7   : > { %634 = vrot.lane.b32.xlu1 %v7295_v29, %s7077_s10  ;;  %673 = vrot.lane.b32.xlu0 %v7289_v25, %s7078_s29  ;;  %v7526_v25 = vld [vmem:[#allocation2 + $0x52] sm:$0xff] }
  0xbb   : > { %638 = vrot.lane.b32.xlu1 %v7447_v54, %s7077_s10  ;;  %677 = vrot.lane.b32.xlu0 %v7297_v30, %s7078_s29  ;;  %v7536_v30 = vld [vmem:[#allocation2 + $0x71] sm:$0xff] }
  0xbf   : > { %675 = vrot.lane.b32.xlu1 %v7291_v27, %s7078_s29  ;;  %681 = vrot.lane.b32.xlu0 %v7299_v31, %s7078_s29  ;;  %v5832_v27 = vld [vmem:[%s7189_s4 + $0x60] sm:$0xff]  ;;  %v7540_v31 = vld [vmem:[#allocation2 + $0x72] sm:$0xff] }
  0xc0   : > { %1656 = vst.msk [vmem:[#allocation2 + $0x51] sm:$0xff] %vm205_vm0, %v5832_v27 }
  0xc1   : > { %v334_v57 = vpop.permute.xlu1 %333  ;;  %v332_v58 = vpop.permute.xlu0 %331 }
  0xc2   : > { %356 = vst.msk [vmem:[#allocation3 + $0x10] sm:$0xff] %vm353_vm2, %v334_v57  ;;  %355 = vst.msk [vmem:[#allocation3 + $0x8] sm:$0xff] %vm353_vm2, %v332_v58 }
  0xc3   : > { %679 = vrot.lane.b32.xlu1 %v7301_v32, %s7078_s29  ;;  %685 = vrot.lane.b32.xlu0 %v7325_v43, %s7078_s29  ;;  %v7542_v32 = vld [vmem:[#allocation2 + $0x70] sm:$0xff] }
  0xc4   : > { %1658 = vst.msk [vmem:[#allocation2 + $0x71] sm:$0xff] %vm205_vm0, %v5834_v33 }
  0xc5   : > { %v336_v1 = vpop.permute.xlu1 %335  ;;  %v338_v2 = vpop.permute.xlu0 %337 }
  0xc6   : > { %357 = vst.msk [vmem:[#allocation3 + $0x18] sm:$0xff] %vm353_vm2, %v336_v1  ;;  %358 = vst.msk [vmem:[#allocation3 + $0x20] sm:$0xff] %vm353_vm2, %v338_v2 }
  0xc7   : > { %683 = vrot.lane.b32.xlu1 %v7303_v34, %s7078_s29  ;;  %945 = vrot.lane.b32.xlu0 %v7250_v4, %s7071_s24  ;;  %v7512_v4 = vld [vmem:[#allocation2 + $0x60] sm:$0xff] }
  0xc8   : > { %1657 = vst.msk [vmem:[#allocation2 + $0x61] sm:$0xff] %vm205_vm0, %v5833_v21 }
  0xc9   : > { %v340_v14 = vpop.permute.xlu1 %339  ;;  %v342_v15 = vpop.permute.xlu0 %341 }
  0xca   : > { %359 = vst.msk [vmem:[#allocation3 + $0x28] sm:$0xff] %vm353_vm2, %v340_v14  ;;  %360 = vst.msk [vmem:[#allocation3 + $0x30] sm:$0xff] %vm353_vm2, %v342_v15 }
  0xcb   : > { %687 = vrot.lane.b32.xlu1 %v7498_v10, %s7078_s29  ;;  %949 = vrot.lane.b32.xlu0 %v7462_v59, %s7071_s24 }
  0xcd   : > { %v344_v22 = vpop.permute.xlu1 %343  ;;  %v383_v23 = vpop.permute.xlu0 %382 }
  0xce   : > { %361 = vst.msk [vmem:[#allocation3 + $0x38] sm:$0xff] %vm353_vm2, %v344_v22 }
  0xcf   : > { %405 = vst.msk [vmem:[#allocation3 + $0x10] sm:$0xff] %vm402_vm3, %v383_v23  ;;  %947 = vrot.lane.b32.xlu1 %v7476_v63, %s7071_s24  ;;  %953 = vrot.lane.b32.xlu0 %v7478_v0, %s7071_s24 }
  0xd1   : > { %v381_v28 = vpop.permute.xlu1 %380  ;;  %v387_v29 = vpop.permute.xlu0 %386 }
  0xd2   : > { %404 = vst.msk [vmem:[#allocation3 + $0x8] sm:$0xff] %vm402_vm3, %v381_v28  ;;  %407 = vst.msk [vmem:[#allocation3 + $0x20] sm:$0xff] %vm402_vm3, %v387_v29 }
  0xd3   : > { %951 = vrot.lane.b32.xlu1 %v7500_v11, %s7071_s24  ;;  %957 = vrot.lane.b32.xlu0 %v7502_v12, %s7071_s24 }
  0xd5   : > { %v385_v34 = vpop.permute.xlu1 %384  ;;  %v391_v35 = vpop.permute.xlu0 %390 }
  0xd6   : > { %406 = vst.msk [vmem:[#allocation3 + $0x18] sm:$0xff] %vm402_vm3, %v385_v34  ;;  %409 = vst.msk [vmem:[#allocation3 + $0x30] sm:$0xff] %vm402_vm3, %v391_v35 }
  0xd7   : > { %955 = vrot.lane.b32.xlu1 %v7522_v24, %s7071_s24  ;;  %993 = vrot.lane.b32.xlu0 %v7261_v13, %s7072_s5 }
  0xd9   : > { %v389_v36 = vpop.permute.xlu1 %388  ;;  %v428_v37 = vpop.permute.xlu0 %427 }
  0xda   : > { %408 = vst.msk [vmem:[#allocation3 + $0x28] sm:$0xff] %vm402_vm3, %v389_v36 }
  0xdb   : > { %452 = vst.msk [vmem:[#allocation3] sm:$0xff] %vm451_vm4, %v428_v37  ;;  %959 = vrot.lane.b32.xlu1 %v7536_v30, %s7071_s24  ;;  %997 = vrot.lane.b32.xlu0 %v7466_v60, %s7072_s5 }
  0xdd   : > { %v393_v38 = vpop.permute.xlu1 %392  ;;  %v432_v39 = vpop.permute.xlu0 %431 }
  0xde   : > { %410 = vst.msk [vmem:[#allocation3 + $0x38] sm:$0xff] %vm402_vm3, %v393_v38 }
  0xdf   : > { %454 = vst.msk [vmem:[#allocation3 + $0x10] sm:$0xff] %vm451_vm4, %v432_v39  ;;  %995 = vrot.lane.b32.xlu1 %v7480_v3, %s7072_s5  ;;  %1001 = vrot.lane.b32.xlu0 %v7482_v5, %s7072_s5  ;;  %v7687_v39 = vld [vmem:[%s9962_s1 + $0x88] sm:$0xff] }
  0xe0   : > { %6326 = vmatprep.subr.mxu0 %v7687_v39 }
  0xe1   : > { %v430_v13 = vpop.permute.xlu1 %429  ;;  %v436_v40 = vpop.permute.xlu0 %435 }
  0xe2   : > { %453 = vst.msk [vmem:[#allocation3 + $0x8] sm:$0xff] %vm451_vm4, %v430_v13  ;;  %456 = vst.msk [vmem:[#allocation3 + $0x20] sm:$0xff] %vm451_vm4, %v436_v40 }
  0xe3   : > { %999 = vrot.lane.b32.xlu1 %v7504_v16, %s7072_s5  ;;  %1005 = vrot.lane.b32.xlu0 %v7506_v17, %s7072_s5 }
  0xe5   : > { %v434_v41 = vpop.permute.xlu1 %433  ;;  %v440_v42 = vpop.permute.xlu0 %439 }
  0xe6   : > { %455 = vst.msk [vmem:[#allocation3 + $0x18] sm:$0xff] %vm451_vm4, %v434_v41  ;;  %458 = vst.msk [vmem:[#allocation3 + $0x30] sm:$0xff] %vm451_vm4, %v440_v42 }
  0xe7   : > { %1003 = vrot.lane.b32.xlu1 %v7526_v25, %s7072_s5  ;;  %1041 = vrot.lane.b32.xlu0 %v7484_v6, %s7073_s6 }
  0xe9   : > { %v438_v43 = vpop.permute.xlu1 %437  ;;  %v477_v44 = vpop.permute.xlu0 %476 }
  0xea   : > { %457 = vst.msk [vmem:[#allocation3 + $0x28] sm:$0xff] %vm451_vm4, %v438_v43 }
  0xeb   : > { %501 = vst.msk [vmem:[#allocation3] sm:$0xff] %vm500_vm5, %v477_v44  ;;  %1007 = vrot.lane.b32.xlu1 %v7540_v31, %s7072_s5  ;;  %1045 = vrot.lane.b32.xlu0 %v7508_v19, %s7073_s6 }
  0xed   : > { %v442_v46 = vpop.permute.xlu1 %441  ;;  %v481_v47 = vpop.permute.xlu0 %480 }
  0xee   : > { %459 = vst.msk [vmem:[#allocation3 + $0x38] sm:$0xff] %vm451_vm4, %v442_v46 }
  0xef   : > { %503 = vst.msk [vmem:[#allocation3 + $0x10] sm:$0xff] %vm500_vm5, %v481_v47  ;;  %1043 = vrot.lane.b32.xlu1 %v7468_v61, %s7073_s6  ;;  %1049 = vrot.lane.b32.xlu0 %v7528_v26, %s7073_s6 }
  0xf1   : > { %v479_v48 = vpop.permute.xlu1 %478  ;;  %v485_v49 = vpop.permute.xlu0 %484 }
  0xf2   : > { %502 = vst.msk [vmem:[#allocation3 + $0x8] sm:$0xff] %vm500_vm5, %v479_v48  ;;  %505 = vst.msk [vmem:[#allocation3 + $0x20] sm:$0xff] %vm500_vm5, %v485_v49  ;;  %v7758_v48 = vld [vmem:[#allocation2 + $0x22] sm:$0xff] }
  0xf3   : > { %1047 = vrot.lane.b32.xlu1 %v7488_v7, %s7073_s6  ;;  %1053 = vrot.lane.b32.xlu0 %v7542_v32, %s7073_s6  ;;  %v5879_v49 = vld [vmem:[%s7189_s4 + $0x88] sm:$0xff] }
  0xf5   : > { %v483_v55 = vpop.permute.xlu1 %482  ;;  %v489_v56 = vpop.permute.xlu0 %488 }
  0xf6   : > { %504 = vst.msk [vmem:[#allocation3 + $0x18] sm:$0xff] %vm500_vm5, %v483_v55  ;;  %507 = vst.msk [vmem:[#allocation3 + $0x30] sm:$0xff] %vm500_vm5, %v489_v56  ;;  %v7788_v55 = vld [vmem:[#allocation2 + $0x42] sm:$0xff] }
  0xf7   : > { %1051 = vrot.lane.b32.xlu1 %v7512_v4, %s7073_s6  ;;  %1089 = vrot.lane.b32.xlu0 %v7476_v63, %s7074_s7 }
  0xf9   : > { %v487_v57 = vpop.permute.xlu1 %486  ;;  %v526_v58 = vpop.permute.xlu0 %525 }
  0xfa   : > { %506 = vst.msk [vmem:[#allocation3 + $0x28] sm:$0xff] %vm500_vm5, %v487_v57  ;;  %v7791_v57 = vld [vmem:[#allocation2 + $0x10] sm:$0xff] }
  0xfb   : > { %550 = vst.msk [vmem:[#allocation3] sm:$0xff] %vm549_vm6, %v526_v58  ;;  %1055 = vrot.lane.b32.xlu1 %v7592_v50, %s7073_s6  ;;  %1093 = vrot.lane.b32.xlu0 %v7500_v11, %s7074_s7  ;;  %v7793_v58 = vld [vmem:[#allocation2 + $0x40] sm:$0xff] }
  0xfd   : > { %v491_v62 = vpop.permute.xlu1 %490  ;;  %v530_v1 = vpop.permute.xlu0 %529 }
  0xfe   : > { %508 = vst.msk [vmem:[#allocation3 + $0x38] sm:$0xff] %vm500_vm5, %v491_v62  ;;  %v7804_v62 = vld [vmem:[%s9962_s1 + $0x68] sm:$0xff] }
  0xff   : > { %552 = vst.msk [vmem:[#allocation3 + $0x10] sm:$0xff] %vm549_vm6, %v530_v1  ;;  %1091 = vrot.lane.b32.xlu1 %v7462_v59, %s7074_s7  ;;  %1097 = vrot.lane.b32.xlu0 %v7522_v24, %s7074_s7  ;;  %v5878_v1 = vld [vmem:[%s7189_s4 + $0x80] sm:$0xff] }
 0x101   : > { %v528_v63 = vpop.permute.xlu1 %527  ;;  %v534_v2 = vpop.permute.xlu0 %533 }
 0x102   : > { %551 = vst.msk [vmem:[#allocation3 + $0x8] sm:$0xff] %vm549_vm6, %v528_v63  ;;  %554 = vst.msk [vmem:[#allocation3 + $0x20] sm:$0xff] %vm549_vm6, %v534_v2  ;;  %v5881_v63 = vld [vmem:[%s7189_s4 + $0x98] sm:$0xff] }
 0x103   : > { %1095 = vrot.lane.b32.xlu1 %v7478_v0, %s7074_s7  ;;  %1101 = vrot.lane.b32.xlu0 %v7536_v30, %s7074_s7  ;;  %v7814_v2 = vld [vmem:[#allocation2 + $0x31] sm:$0xff] }
 0x105   : > { %v532_v8 = vpop.permute.xlu1 %531  ;;  %v538_v9 = vpop.permute.xlu0 %537 }
 0x106   : > { %553 = vst.msk [vmem:[#allocation3 + $0x18] sm:$0xff] %vm549_vm6, %v532_v8  ;;  %556 = vst.msk [vmem:[#allocation3 + $0x30] sm:$0xff] %vm549_vm6, %v538_v9  ;;  %v7817_v9 = vld [vmem:[#allocation2 + $0x61] sm:$0xff] }
 0x107   : > { %1099 = vrot.lane.b32.xlu1 %v7502_v12, %s7074_s7  ;;  %1137 = vrot.lane.b32.xlu0 %v7480_v3, %s7075_s8 }
 0x109   : > { %v536_v14 = vpop.permute.xlu1 %535  ;;  %v576_v15 = vpop.permute.xlu0 %575 }
 0x10a   : > { %555 = vst.msk [vmem:[#allocation3 + $0x28] sm:$0xff] %vm549_vm6, %v536_v14  ;;  %v7819_v14 = vld [vmem:[#allocation2 + $0x32] sm:$0xff] }
 0x10b   : > { %600 = vst.msk [vmem:[#allocation3] sm:$0xff] %vm599_vm7, %v576_v15  ;;  %1103 = vrot.lane.b32.xlu1 %v7596_v51, %s7074_s7  ;;  %1141 = vrot.lane.b32.xlu0 %v7504_v16, %s7075_s8  ;;  %v7829_v15 = vld [vmem:[#allocation2 + $0x62] sm:$0xff] }
 0x10d   : > { %v540_v20 = vpop.permute.xlu1 %539  ;;  %v580_v21 = vpop.permute.xlu0 %579 }
 0x10e   : > { %557 = vst.msk [vmem:[#allocation3 + $0x38] sm:$0xff] %vm549_vm6, %v540_v20  ;;  %v7831_v20 = vld [vmem:[#allocation2 + $0x30] sm:$0xff] }
 0x10f   : > { %602 = vst.msk [vmem:[#allocation3 + $0x10] sm:$0xff] %vm599_vm7, %v580_v21  ;;  %1139 = vrot.lane.b32.xlu1 %v7466_v60, %s7075_s8  ;;  %1145 = vrot.lane.b32.xlu0 %v7526_v25, %s7075_s8  ;;  %v5880_v21 = vld [vmem:[%s7189_s4 + $0x90] sm:$0xff] }
 0x110   : > { %2539 = vst.msk [vmem:[#allocation2 + $0x31] sm:$0xff] %vm205_vm0, %v5880_v21 }
 0x111   : > { %v578_v3 = vpop.permute.xlu1 %577  ;;  %v584_v22 = vpop.permute.xlu0 %583 }
 0x112   : > { %601 = vst.msk [vmem:[#allocation3 + $0x8] sm:$0xff] %vm599_vm7, %v578_v3  ;;  %604 = vst.msk [vmem:[#allocation3 + $0x20] sm:$0xff] %vm599_vm7, %v584_v22  ;;  %v7839_v3 = vld [vmem:[#allocation2 + $0x60] sm:$0xff]  ;;  %v7844_v22 = vld [vmem:[%s9962_s1 + $0x58] sm:$0xff] }
 0x113   : > { %1143 = vrot.lane.b32.xlu1 %v7482_v5, %s7075_s8  ;;  %1149 = vrot.lane.b32.xlu0 %v7540_v31, %s7075_s8 }
 0x115   : > { %v582_v23 = vpop.permute.xlu1 %581  ;;  %v588_v27 = vpop.permute.xlu0 %587 }
 0x116   : > { %603 = vst.msk [vmem:[#allocation3 + $0x18] sm:$0xff] %vm599_vm7, %v582_v23  ;;  %606 = vst.msk [vmem:[#allocation3 + $0x30] sm:$0xff] %vm599_vm7, %v588_v27  ;;  %v5883_v23 = vld [vmem:[%s7189_s4 + $0xa8] sm:$0xff] }
 0x117   : > { %1147 = vrot.lane.b32.xlu1 %v7506_v17, %s7075_s8  ;;  %1185 = vrot.lane.b32.xlu0 %v7468_v61, %s7076_s9  ;;  %2542 = vst.msk [vmem:[#allocation2 + $0x61] sm:$0xff] %vm205_vm0, %v5883_v23 }
 0x119   : > { %v586_v28 = vpop.permute.xlu1 %585  ;;  %v625_v29 = vpop.permute.xlu0 %624 }
 0x11a   : > { %605 = vst.msk [vmem:[#allocation3 + $0x28] sm:$0xff] %vm599_vm7, %v586_v28  ;;  %v7850_v28 = vld [vmem:[#allocation2 + $0x51] sm:$0xff] }
 0x11b   : > { %649 = vst.msk [vmem:[#allocation3] sm:$0xff] %vm648_vm8, %v625_v29  ;;  %1151 = vrot.lane.b32.xlu1 %v7598_v52, %s7075_s8  ;;  %1189 = vrot.lane.b32.xlu0 %v7488_v7, %s7076_s9  ;;  %v7852_v29 = vld [vmem:[#allocation2 + $0x52] sm:$0xff] }
 0x11d   : > { %v590_v33 = vpop.permute.xlu1 %589  ;;  %v629_v34 = vpop.permute.xlu0 %628 }
 0x11e   : > { %607 = vst.msk [vmem:[#allocation3 + $0x38] sm:$0xff] %vm599_vm7, %v590_v33  ;;  %v7857_v33 = vld [vmem:[#allocation2 + $0x50] sm:$0xff] }
 0x11f   : > { %651 = vst.msk [vmem:[#allocation3 + $0x10] sm:$0xff] %vm648_vm8, %v629_v34  ;;  %1187 = vrot.lane.b32.xlu1 %v7508_v19, %s7076_s9  ;;  %1193 = vrot.lane.b32.xlu0 %v7512_v4, %s7076_s9  ;;  %v7863_v34 = vld [vmem:[%s9962_s1 + $0x50] sm:$0xff] }
 0x121   : > { %v627_v35 = vpop.permute.xlu1 %626  ;;  %v633_v36 = vpop.permute.xlu0 %632 }
 0x122   : > { %650 = vst.msk [vmem:[#allocation3 + $0x8] sm:$0xff] %vm648_vm8, %v627_v35  ;;  %653 = vst.msk [vmem:[#allocation3 + $0x20] sm:$0xff] %vm648_vm8, %v633_v36  ;;  %v5882_v35 = vld [vmem:[%s7189_s4 + $0xa0] sm:$0xff] }
 0x123   : > { %1191 = vrot.lane.b32.xlu1 %v7528_v26, %s7076_s9  ;;  %1197 = vrot.lane.b32.xlu0 %v7592_v50, %s7076_s9  ;;  %v7778_v50 = vld [vmem:[#allocation2 + $0x1] sm:$0xff]  ;;  %2541 = vst.msk [vmem:[#allocation2 + $0x51] sm:$0xff] %vm205_vm0, %v5882_v35 }
 0x125   : > { %v631_v37 = vpop.permute.xlu1 %630  ;;  %v637_v38 = vpop.permute.xlu0 %636 }
 0x126   : > { %652 = vst.msk [vmem:[#allocation3 + $0x18] sm:$0xff] %vm648_vm8, %v631_v37  ;;  %655 = vst.msk [vmem:[#allocation3 + $0x30] sm:$0xff] %vm648_vm8, %v637_v38  ;;  %v7872_v38 = vld [vmem:[#allocation2 + $0x71] sm:$0xff] }
 0x127   : > { %1195 = vrot.lane.b32.xlu1 %v7542_v32, %s7076_s9  ;;  %1233 = vrot.lane.b32.xlu0 %v7462_v59, %s7077_s10 }
 0x129   : > { %v635_v13 = vpop.permute.xlu1 %634  ;;  %v674_v40 = vpop.permute.xlu0 %673 }
 0x12a   : > { %654 = vst.msk [vmem:[#allocation3 + $0x28] sm:$0xff] %vm648_vm8, %v635_v13  ;;  %v7878_v13 = vld [vmem:[%s9962_s1 + $0x48] sm:$0xff] }
 0x12b   : > { %698 = vst.msk [vmem:[#allocation3] sm:$0xff] %vm697_vm9, %v674_v40  ;;  %1199 = vrot.lane.b32.xlu1 %v7408_v45, %s7076_s9  ;;  %1237 = vrot.lane.b32.xlu0 %v7478_v0, %s7077_s10  ;;  %v7882_v40 = vld [vmem:[#allocation2 + $0x72] sm:$0xff] }
 0x12d   : > { %v639_v59 = vpop.permute.xlu1 %638  ;;  %v678_v41 = vpop.permute.xlu0 %677 }
 0x12e   : > { %656 = vst.msk [vmem:[#allocation3 + $0x38] sm:$0xff] %vm648_vm8, %v639_v59  ;;  %v7884_v59 = vld [vmem:[#allocation2 + $0x70] sm:$0xff] }
 0x12f   : > { %700 = vst.msk [vmem:[#allocation3 + $0x10] sm:$0xff] %vm697_vm9, %v678_v41  ;;  %1235 = vrot.lane.b32.xlu1 %v7500_v11, %s7077_s10  ;;  %1241 = vrot.lane.b32.xlu0 %v7502_v12, %s7077_s10  ;;  %v5884_v41 = vld [vmem:[%s7189_s4 + $0xb0] sm:$0xff] }
 0x130   : > { %2543 = vst.msk [vmem:[#allocation2 + $0x71] sm:$0xff] %vm205_vm0, %v5884_v41 }
 0x131   : > { %v676_v42 = vpop.permute.xlu1 %675  ;;  %v682_v43 = vpop.permute.xlu0 %681 }
 0x132   : > { %v706_v44 = vld [vmem:[#allocation3] sm:$0xff]  ;;  %699 = vst.msk [vmem:[#allocation3 + $0x8] sm:$0xff] %vm697_vm9, %v676_v42  ;;  %702 = vst.msk [vmem:[#allocation3 + $0x20] sm:$0xff] %vm697_vm9, %v682_v43 }
 0x133   : > { %6284 = vmatprep.mubr.msk.f32.mxu0 %vm731_vm10, %v706_v44  ;;  %921 = vst.msk [vmem:[#allocation3] sm:$0xff] %vm205_vm0, %v7267_v18  ;;  %1239 = vrot.lane.b32.xlu1 %v7522_v24, %s7077_s10  ;;  %v7893_v42 = vld [vmem:[#allocation2 + $0x2] sm:$0xff] }
 0x134   : > { %1245 = vrot.lane.b32.xlu0 %v7596_v51, %s7077_s10  ;;  %v7784_v51 = vld [vmem:[#allocation2 + $0x41] sm:$0xff] }
 0x135   : > { %v680_v45 = vpop.permute.xlu1 %679  ;;  %v686_v0 = vpop.permute.xlu0 %685  ;;  %2540 = vst.msk [vmem:[#allocation2 + $0x41] sm:$0xff] %vm205_vm0, %v5881_v63 }
 0x136   : > { %v708_v11 = vld [vmem:[#allocation3 + $0x10] sm:$0xff]  ;;  %701 = vst.msk [vmem:[#allocation3 + $0x18] sm:$0xff] %vm697_vm9, %v680_v45  ;;  %704 = vst.msk [vmem:[#allocation3 + $0x30] sm:$0xff] %vm697_vm9, %v686_v0 }
 0x137   : > { %923 = vst.msk [vmem:[#allocation3 + $0x10] sm:$0xff] %vm205_vm0, %v7468_v61  ;;  %1243 = vrot.lane.b32.xlu1 %v7536_v30, %s7077_s10 }
 0x138   : > { %1281 = vrot.lane.b32.xlu0 %v7466_v60, %s7078_s29  ;;  %v7729_v60 = vld [vmem:[%s9962_s1 + $0x80] sm:$0xff] }
 0x139   : > { %v684_v18 = vpop.permute.xlu1 %683  ;;  %v946_v12 = vpop.permute.xlu0 %945  ;;  %v707_v24 = vld [vmem:[#allocation3 + $0x8] sm:$0xff]  ;;  %v710_v46 = vld [vmem:[#allocation3 + $0x20] sm:$0xff] }
 0x13a   : > { %703 = vst.msk [vmem:[#allocation3 + $0x28] sm:$0xff] %vm697_vm9, %v684_v18  ;;  %6285 = vmatmul.mubr.msk.f32.vlgmr.msra.gmra.mxu0 %vm731_vm10, %v707_v24 }
 0x13b   : > { %969 = vst.msk [vmem:[#allocation3] sm:$0xff] %vm353_vm2, %v946_v12  ;;  %1247 = vrot.lane.b32.xlu1 %v7447_v54, %s7077_s10  ;;  %6287 = vmatprep.mubr.msk.f32.mxu0 %vm731_vm10, %v708_v11  ;;  %v7748_v54 = vld [vmem:[%s9962_s1 + $0x78] sm:$0xff] }
 0x13c   : > { %922 = vst.msk [vmem:[#allocation3 + $0x8] sm:$0xff] %vm205_vm0, %v7484_v6  ;;  %925 = vst.msk [vmem:[#allocation3 + $0x20] sm:$0xff] %vm205_vm0, %v7488_v7  ;;  %1285 = vrot.lane.b32.xlu0 %v7482_v5, %s7078_s29  ;;  %6327 = vmatpush3.msra.mxu0 %v7687_v39 }
 0x13d   : > { %v688_v61 = vpop.permute.xlu1 %687  ;;  %v950_v6 = vpop.permute.xlu0 %949  ;;  %v709_v30 = vld [vmem:[#allocation3 + $0x18] sm:$0xff]  ;;  %v712_v47 = vld [vmem:[#allocation3 + $0x30] sm:$0xff]  ;;  %6328 = vmatprep.subr.mxu0 %v7729_v60 }
 0x13e   : > { %705 = vst.msk [vmem:[#allocation3 + $0x38] sm:$0xff] %vm697_vm9, %v688_v61  ;;  %6288 = vmatmul.mubr.msk.f32.gmra.mxu0 %vm731_vm10, %v709_v30 }
 0x13f   : > { %971 = vst.msk [vmem:[#allocation3 + $0x10] sm:$0xff] %vm353_vm2, %v950_v6  ;;  %1283 = vrot.lane.b32.xlu1 %v7504_v16, %s7078_s29  ;;  %6290 = vmatprep.mubr.msk.f32.mxu0 %vm731_vm10, %v710_v46  ;;  %v7766_v16 = vld [vmem:[#allocation2 + $0x20] sm:$0xff] }
 0x140   : > { %924 = vst.msk [vmem:[#allocation3 + $0x18] sm:$0xff] %vm205_vm0, %v7508_v19  ;;  %927 = vst.msk [vmem:[#allocation3 + $0x30] sm:$0xff] %vm205_vm0, %v7512_v4  ;;  %1289 = vrot.lane.b32.xlu0 %v7506_v17, %s7078_s29  ;;  %6329 = vmatpush3.msra.mxu0 %v7729_v60  ;;  %v7756_v4 = vld [vmem:[#allocation2 + $0x21] sm:$0xff]  ;;  %v7771_v17 = vld [vmem:[%s9962_s1 + $0x70] sm:$0xff] }
 0x141   : > { %v948_v5 = vpop.permute.xlu1 %947  ;;  %v954_v7 = vpop.permute.xlu0 %953  ;;  %v711_v19 = vld [vmem:[#allocation3 + $0x28] sm:$0xff]  ;;  %6330 = vmatprep.subr.mxu0 %v7748_v54  ;;  %2538 = vst.msk [vmem:[#allocation2 + $0x21] sm:$0xff] %vm205_vm0, %v5879_v49 }
 0x142   : > { %970 = vst.msk [vmem:[#allocation3 + $0x8] sm:$0xff] %vm353_vm2, %v948_v5  ;;  %973 = vst.msk [vmem:[#allocation3 + $0x20] sm:$0xff] %vm353_vm2, %v954_v7  ;;  %6291 = vmatmul.mubr.msk.f32.gmra.mxu0 %vm731_vm10, %v711_v19 }
 0x143   : > { %926 = vst.msk [vmem:[#allocation3 + $0x28] sm:$0xff] %vm205_vm0, %v7528_v26  ;;  %1287 = vrot.lane.b32.xlu1 %v7526_v25, %s7078_s29  ;;  %6293 = vmatprep.mubr.msk.f32.mxu0 %vm731_vm10, %v712_v47  ;;  %v7782_v26 = vld [vmem:[#allocation2 + $0x11] sm:$0xff] }
 0x144   : > { %1293 = vrot.lane.b32.xlu0 %v7598_v52, %s7078_s29  ;;  %6331 = vmatpush3.msra.mxu0 %v7748_v54  ;;  %2537 = vst.msk [vmem:[#allocation2 + $0x11] sm:$0xff] %vm205_vm0, %v5878_v1 }
 0x145   : > { %v952_v25 = vpop.permute.xlu1 %951  ;;  %v958_v52 = vpop.permute.xlu0 %957  ;;  %v713_v56 = vld [vmem:[#allocation3 + $0x38] sm:$0xff]  ;;  %6332 = vmatprep.subr.mxu0 %v7771_v17 }
 0x146   : > { %972 = vst.msk [vmem:[#allocation3 + $0x18] sm:$0xff] %vm353_vm2, %v952_v25  ;;  %975 = vst.msk [vmem:[#allocation3 + $0x30] sm:$0xff] %vm353_vm2, %v958_v52  ;;  %6294 = vmatmul.mubr.msk.f32.gmra.mxu0 %vm731_vm10, %v713_v56  ;;  %v7952_v52 = vld [vmem:[#allocation2 + $0x80] sm:$0xff] }
 0x147   : > { %928 = vst.msk [vmem:[#allocation3 + $0x38] sm:$0xff] %vm205_vm0, %v7542_v32  ;;  %1291 = vrot.lane.b32.xlu1 %v7540_v31, %s7078_s29  ;;  %6333 = vmatpush3.msra.mxu0 %v7771_v17  ;;  %v7825_v31 = vld [vmem:[%s9962_s1 + $0x60] sm:$0xff] }
 0x148   : > { %1692 = vrot.lane.b32.xlu0 %v7778_v50, %s7071_s24  ;;  %6334 = vmatprep.subr.mxu0 %v7804_v62 }
 0x149   : > { %v956_v32 = vpop.permute.xlu1 %955  ;;  %v994_v8 = vpop.permute.xlu0 %993  ;;  %6335 = vmatpush3.msra.mxu0 %v7804_v62 }
 0x14a   : > { %974 = vst.msk [vmem:[#allocation3 + $0x28] sm:$0xff] %vm353_vm2, %v956_v32  ;;  %6336 = vmatprep.subr.mxu0 %v7825_v31 }
 0x14b   : > { %1017 = vst.msk [vmem:[#allocation3] sm:$0xff] %vm402_vm3, %v994_v8  ;;  %1295 = vrot.lane.b32.xlu1 %v7498_v10, %s7078_s29  ;;  %6337 = vmatpush3.msra.mxu0 %v7825_v31 }
 0x14c   : > { %1696 = vrot.lane.b32.xlu0 %v7756_v4, %s7071_s24  ;;  %6338 = vmatprep.subr.mxu0 %v7844_v22 }
 0x14d   : > { %v960_v27 = vpop.permute.xlu1 %959  ;;  %v998_v10 = vpop.permute.xlu0 %997  ;;  %6339 = vmatpush3.msra.mxu0 %v7844_v22 }
 0x14e   : > { %976 = vst.msk [vmem:[#allocation3 + $0x38] sm:$0xff] %vm353_vm2, %v960_v27  ;;  %6340 = vmatprep.subr.mxu0 %v7863_v34  ;;  %v7978_v27 = vld [vmem:[#allocation2 + $0x81] sm:$0xff] }
 0x14f   : > { %1019 = vst.msk [vmem:[#allocation3 + $0x10] sm:$0xff] %vm402_vm3, %v998_v10  ;;  %1694 = vrot.lane.b32.xlu1 %v7782_v26, %s7071_s24  ;;  %6341 = vmatpush3.msra.mxu0 %v7863_v34 }
 0x150   : > { %1700 = vrot.lane.b32.xlu0 %v7784_v51, %s7071_s24  ;;  %6342 = vmatprep.subr.mxu0 %v7878_v13 }
 0x151   : > { %v996_v36 = vpop.permute.xlu1 %995  ;;  %v1002_v37 = vpop.permute.xlu0 %1001  ;;  %6343 = vmatpush3.msra.mxu0 %v7878_v13 }
 0x152   : > { %1018 = vst.msk [vmem:[#allocation3 + $0x8] sm:$0xff] %vm402_vm3, %v996_v36  ;;  %1021 = vst.msk [vmem:[#allocation3 + $0x20] sm:$0xff] %vm402_vm3, %v1002_v37  ;;  %6386 = vmatprep.subr.mxu0 %v7687_v39 }
 0x153   : > { %1698 = vrot.lane.b32.xlu1 %v7814_v2, %s7071_s24 }
 0x154   : > { %1704 = vrot.lane.b32.xlu0 %v7817_v9, %s7071_s24 }
 0x155   : > { %v1000_v43 = vpop.permute.xlu1 %999  ;;  %v1006_v44 = vpop.permute.xlu0 %1005 }
 0x156   : > { %1020 = vst.msk [vmem:[#allocation3 + $0x18] sm:$0xff] %vm402_vm3, %v1000_v43  ;;  %1023 = vst.msk [vmem:[#allocation3 + $0x30] sm:$0xff] %vm402_vm3, %v1006_v44 }
 0x157   : > { %1702 = vrot.lane.b32.xlu1 %v7850_v28, %s7071_s24 }
 0x158   : > { %1740 = vrot.lane.b32.xlu0 %v7893_v42, %s7072_s5 }
 0x159   : > { %v1004_v45 = vpop.permute.xlu1 %1003  ;;  %v1042_v0 = vpop.permute.xlu0 %1041 }
 0x15a   : > { %1022 = vst.msk [vmem:[#allocation3 + $0x28] sm:$0xff] %vm402_vm3, %v1004_v45  ;;  %v8004_v45 = vld [vmem:[#allocation2 + $0x82] sm:$0xff] }
 0x15b   : > { %1065 = vst.msk [vmem:[#allocation3] sm:$0xff] %vm451_vm4, %v1042_v0  ;;  %1706 = vrot.lane.b32.xlu1 %v7872_v38, %s7071_s24 }
 0x15c   : > { %1744 = vrot.lane.b32.xlu0 %v7758_v48, %s7072_s5 }
 0x15d   : > { %v1008_v11 = vpop.permute.xlu1 %1007  ;;  %v1046_v18 = vpop.permute.xlu0 %1045 }
 0x15e   : > { %1024 = vst.msk [vmem:[#allocation3 + $0x38] sm:$0xff] %vm402_vm3, %v1008_v11 }
 0x15f   : > { %1067 = vst.msk [vmem:[#allocation3 + $0x10] sm:$0xff] %vm451_vm4, %v1046_v18  ;;  %1742 = vrot.lane.b32.xlu1 %v7786_v53, %s7072_s5 }
 0x160   : > { %1748 = vrot.lane.b32.xlu0 %v7788_v55, %s7072_s5 }
 0x161   : > { %v1044_v12 = vpop.permute.xlu1 %1043  ;;  %v1050_v24 = vpop.permute.xlu0 %1049 }
 0x162   : > { %1066 = vst.msk [vmem:[#allocation3 + $0x8] sm:$0xff] %vm451_vm4, %v1044_v12  ;;  %1069 = vst.msk [vmem:[#allocation3 + $0x20] sm:$0xff] %vm451_vm4, %v1050_v24 }
 0x163   : > { %1746 = vrot.lane.b32.xlu1 %v7819_v14, %s7072_s5 }
 0x164   : > { %1752 = vrot.lane.b32.xlu0 %v7829_v15, %s7072_s5 }
 0x165   : > { %v1048_v46 = vpop.permute.xlu1 %1047  ;;  %v1054_v61 = vpop.permute.xlu0 %1053 }
 0x166   : > { %1068 = vst.msk [vmem:[#allocation3 + $0x18] sm:$0xff] %vm451_vm4, %v1048_v46  ;;  %1071 = vst.msk [vmem:[#allocation3 + $0x30] sm:$0xff] %vm451_vm4, %v1054_v61  ;;  %v5885_v61 = vld [vmem:[%s7189_s4 + $0xb8] sm:$0xff] }
 0x167   : > { %1750 = vrot.lane.b32.xlu1 %v7852_v29, %s7072_s5  ;;  %2544 = vst.msk [vmem:[#allocation2 + $0x81] sm:$0xff] %vm205_vm0, %v5885_v61  ;;  %v8252_v61 = vld [vmem:[#allocation2 + $0x71] sm:$0xff] }
 0x168   : > { %1788 = vrot.lane.b32.xlu0 %v7791_v57, %s7073_s6 }
 0x169   : > { %v1052_v6 = vpop.permute.xlu1 %1051  ;;  %v1090_v30 = vpop.permute.xlu0 %1089 }
 0x16a   : > { %1070 = vst.msk [vmem:[#allocation3 + $0x28] sm:$0xff] %vm451_vm4, %v1052_v6 }
 0x16b   : > { %1113 = vst.msk [vmem:[#allocation3] sm:$0xff] %vm500_vm5, %v1090_v30  ;;  %1754 = vrot.lane.b32.xlu1 %v7882_v40, %s7072_s5 }
 0x16c   : > { %1792 = vrot.lane.b32.xlu0 %v7831_v20, %s7073_s6 }
 0x16d   : > { %v1056_v47 = vpop.permute.xlu1 %1055  ;;  %v1094_v5 = vpop.permute.xlu0 %1093 }
 0x16e   : > { %1072 = vst.msk [vmem:[#allocation3 + $0x38] sm:$0xff] %vm451_vm4, %v1056_v47  ;;  %v8031_v47 = vld [vmem:[%s9962_s1 + $0x40] sm:$0xff] }
 0x16f   : > { %1115 = vst.msk [vmem:[#allocation3 + $0x10] sm:$0xff] %vm500_vm5, %v1094_v5  ;;  %1790 = vrot.lane.b32.xlu1 %v7766_v16, %s7073_s6  ;;  %v1923_v5 = vld [vmem:[#allocation2 + $0x90] sm:$0xff]  ;;  %6356 = vmatprep.subr.mxu1 %v8031_v47 }
 0x170   : > { %1796 = vrot.lane.b32.xlu0 %v7857_v33, %s7073_s6 }
 0x171   : > { %v1092_v7 = vpop.permute.xlu1 %1091  ;;  %v1098_v19 = vpop.permute.xlu0 %1097 }
 0x172   : > { %1114 = vst.msk [vmem:[#allocation3 + $0x8] sm:$0xff] %vm500_vm5, %v1092_v7  ;;  %1117 = vst.msk [vmem:[#allocation3 + $0x20] sm:$0xff] %vm500_vm5, %v1098_v19 }
 0x173   : > { %1794 = vrot.lane.b32.xlu1 %v7793_v58, %s7073_s6 }
 0x174   : > { %1800 = vrot.lane.b32.xlu0 %v7884_v59, %s7073_s6 }
 0x175   : > { %v1096_v49 = vpop.permute.xlu1 %1095  ;;  %v1102_v25 = vpop.permute.xlu0 %1101 }
 0x176   : > { %1116 = vst.msk [vmem:[#allocation3 + $0x18] sm:$0xff] %vm500_vm5, %v1096_v49  ;;  %1119 = vst.msk [vmem:[#allocation3 + $0x30] sm:$0xff] %vm500_vm5, %v1102_v25 }
 0x177   : > { %1798 = vrot.lane.b32.xlu1 %v7839_v3, %s7073_s6 }
 0x178   : > { %1836 = vrot.lane.b32.xlu0 %v7782_v26, %s7074_s7 }
 0x179   : > { %v1100_v56 = vpop.permute.xlu1 %1099  ;;  %v1138_v1 = vpop.permute.xlu0 %1137 }
 0x17a   : > { %1118 = vst.msk [vmem:[#allocation3 + $0x28] sm:$0xff] %vm500_vm5, %v1100_v56 }
 0x17b   : > { %1161 = vst.msk [vmem:[#allocation3] sm:$0xff] %vm549_vm6, %v1138_v1  ;;  %1802 = vrot.lane.b32.xlu1 %v7952_v52, %s7073_s6 }
 0x17c   : > { %1840 = vrot.lane.b32.xlu0 %v7814_v2, %s7074_s7 }
 0x17d   : > { %v1104_v63 = vpop.permute.xlu1 %1103  ;;  %v1142_v32 = vpop.permute.xlu0 %1141 }
 0x17e   : > { %1120 = vst.msk [vmem:[#allocation3 + $0x38] sm:$0xff] %vm500_vm5, %v1104_v63  ;;  %v8071_v63 = vld [vmem:[#allocation2 + $0x11] sm:$0xff] }
 0x17f   : > { %1163 = vst.msk [vmem:[#allocation3 + $0x10] sm:$0xff] %vm549_vm6, %v1142_v32  ;;  %1838 = vrot.lane.b32.xlu1 %v7756_v4, %s7074_s7  ;;  %v8073_v32 = vld [vmem:[#allocation2 + $0x12] sm:$0xff] }
 0x180   : > { %1844 = vrot.lane.b32.xlu0 %v7850_v28, %s7074_s7 }
 0x181   : > { %v1140_v26 = vpop.permute.xlu1 %1139  ;;  %v1146_v8 = vpop.permute.xlu0 %1145 }
 0x182   : > { %1162 = vst.msk [vmem:[#allocation3 + $0x8] sm:$0xff] %vm549_vm6, %v1140_v26  ;;  %1165 = vst.msk [vmem:[#allocation3 + $0x20] sm:$0xff] %vm549_vm6, %v1146_v8  ;;  %v8075_v26 = vld [vmem:[#allocation2 + $0x10] sm:$0xff]  ;;  %v8078_v8 = vld [vmem:[%s7189_s4 + $0xc0] sm:$0xff] }
 0x183   : > { %1842 = vrot.lane.b32.xlu1 %v7784_v51, %s7074_s7  ;;  %3421 = vst.msk [vmem:[#allocation2 + $0x11] sm:$0xff] %vm205_vm0, %v8078_v8 }
 0x184   : > { %1848 = vrot.lane.b32.xlu0 %v7872_v38, %s7074_s7 }
 0x185   : > { %v1144_v21 = vpop.permute.xlu1 %1143  ;;  %v1150_v23 = vpop.permute.xlu0 %1149 }
 0x186   : > { %1164 = vst.msk [vmem:[#allocation3 + $0x18] sm:$0xff] %vm549_vm6, %v1144_v21  ;;  %1167 = vst.msk [vmem:[#allocation3 + $0x30] sm:$0xff] %vm549_vm6, %v1150_v23 }
 0x187   : > { %1846 = vrot.lane.b32.xlu1 %v7817_v9, %s7074_s7 }
 0x188   : > { %1884 = vrot.lane.b32.xlu0 %v7786_v53, %s7075_s8 }
 0x189   : > { %v1148_v10 = vpop.permute.xlu1 %1147  ;;  %v1186_v35 = vpop.permute.xlu0 %1185 }
 0x18a   : > { %1166 = vst.msk [vmem:[#allocation3 + $0x28] sm:$0xff] %vm549_vm6, %v1148_v10 }
 0x18b   : > { %1209 = vst.msk [vmem:[#allocation3] sm:$0xff] %vm599_vm7, %v1186_v35  ;;  %1850 = vrot.lane.b32.xlu1 %v7978_v27, %s7074_s7 }
 0x18c   : > { %1888 = vrot.lane.b32.xlu0 %v7819_v14, %s7075_s8 }
 0x18d   : > { %v1152_v36 = vpop.permute.xlu1 %1151  ;;  %v1190_v37 = vpop.permute.xlu0 %1189 }
 0x18e   : > { %1168 = vst.msk [vmem:[#allocation3 + $0x38] sm:$0xff] %vm549_vm6, %v1152_v36 }
 0x18f   : > { %1211 = vst.msk [vmem:[#allocation3 + $0x10] sm:$0xff] %vm599_vm7, %v1190_v37  ;;  %1886 = vrot.lane.b32.xlu1 %v7758_v48, %s7075_s8  ;;  %v8179_v37 = vld [vmem:[%s7189_s4 + $0xc8] sm:$0xff] }
 0x190   : > { %1892 = vrot.lane.b32.xlu0 %v7852_v29, %s7075_s8 }
 0x191   : > { %v1188_v53 = vpop.permute.xlu1 %1187  ;;  %v1194_v41 = vpop.permute.xlu0 %1193 }
 0x192   : > { %1210 = vst.msk [vmem:[#allocation3 + $0x8] sm:$0xff] %vm599_vm7, %v1188_v53  ;;  %1213 = vst.msk [vmem:[#allocation3 + $0x20] sm:$0xff] %vm599_vm7, %v1194_v41  ;;  %v8181_v53 = vld [vmem:[#allocation2 + $0x41] sm:$0xff] }
 0x193   : > { %1890 = vrot.lane.b32.xlu1 %v7788_v55, %s7075_s8 }
 0x194   : > { %1896 = vrot.lane.b32.xlu0 %v7882_v40, %s7075_s8 }
 0x195   : > { %v1192_v43 = vpop.permute.xlu1 %1191  ;;  %v1198_v44 = vpop.permute.xlu0 %1197 }
 0x196   : > { %1212 = vst.msk [vmem:[#allocation3 + $0x18] sm:$0xff] %vm599_vm7, %v1192_v43  ;;  %1215 = vst.msk [vmem:[#allocation3 + $0x30] sm:$0xff] %vm599_vm7, %v1198_v44  ;;  %v8192_v44 = vld [vmem:[%s9962_s1 + $0x18] sm:$0xff] }
 0x197   : > { %1894 = vrot.lane.b32.xlu1 %v7829_v15, %s7075_s8 }
 0x198   : > { %1932 = vrot.lane.b32.xlu0 %v7766_v16, %s7076_s9 }
 0x199   : > { %v1196_v0 = vpop.permute.xlu1 %1195  ;;  %v1234_v11 = vpop.permute.xlu0 %1233 }
 0x19a   : > { %1214 = vst.msk [vmem:[#allocation3 + $0x28] sm:$0xff] %vm599_vm7, %v1196_v0  ;;  %v8209_v0 = vld [vmem:[#allocation2 + $0x61] sm:$0xff] }
 0x19b   : > { %1257 = vst.msk [vmem:[#allocation3] sm:$0xff] %vm648_vm8, %v1234_v11  ;;  %1898 = vrot.lane.b32.xlu1 %v8004_v45, %s7075_s8 }
 0x19c   : > { %1936 = vrot.lane.b32.xlu0 %v7793_v58, %s7076_s9 }
 0x19d   : > { %v1200_v18 = vpop.permute.xlu1 %1199  ;;  %v1238_v12 = vpop.permute.xlu0 %1237 }
 0x19e   : > { %1216 = vst.msk [vmem:[#allocation3 + $0x38] sm:$0xff] %vm599_vm7, %v1200_v18  ;;  %v8222_v18 = vld [vmem:[%s9962_s1 + $0x8] sm:$0xff] }
 0x19f   : > { %1259 = vst.msk [vmem:[#allocation3 + $0x10] sm:$0xff] %vm648_vm8, %v1238_v12  ;;  %1934 = vrot.lane.b32.xlu1 %v7831_v20, %s7076_s9 }
 0x1a0   : > { %1940 = vrot.lane.b32.xlu0 %v7839_v3, %s7076_s9 }
 0x1a1   : > { %v1236_v24 = vpop.permute.xlu1 %1235  ;;  %v1242_v46 = vpop.permute.xlu0 %1241 }
 0x1a2   : > { %1258 = vst.msk [vmem:[#allocation3 + $0x8] sm:$0xff] %vm648_vm8, %v1236_v24  ;;  %1261 = vst.msk [vmem:[#allocation3 + $0x20] sm:$0xff] %vm648_vm8, %v1242_v46  ;;  %v8237_v46 = vld [vmem:[%s9962_s1] sm:$0xff] }
 0x1a3   : > { %1938 = vrot.lane.b32.xlu1 %v7857_v33, %s7076_s9 }
 0x1a4   : > { %1944 = vrot.lane.b32.xlu0 %v7952_v52, %s7076_s9 }
 0x1a5   : > { %v1240_v6 = vpop.permute.xlu1 %1239 }
 0x1a6   : > { %v1246_v30 = vpop.permute.xlu0 %1245  ;;  %1260 = vst.msk [vmem:[#allocation3 + $0x18] sm:$0xff] %vm648_vm8, %v1240_v6 }
 0x1a7   : > { %1263 = vst.msk [vmem:[#allocation3 + $0x30] sm:$0xff] %vm648_vm8, %v1246_v30  ;;  %1942 = vrot.lane.b32.xlu1 %v7884_v59, %s7076_s9  ;;  %v8268_v30 = vld [vmem:[#allocation2 + $0x30] sm:$0xff] }
 0x1a8   : > { %1980 = vrot.lane.b32.xlu0 %v7756_v4, %s7077_s10  ;;  %v8049_v4 = vld [vmem:[#allocation2] sm:$0xff] }
 0x1a9   : > { %v1244_v7 = vpop.permute.xlu1 %1243 }
 0x1aa   : > { %v1282_v19 = vpop.permute.xlu0 %1281  ;;  %1262 = vst.msk [vmem:[#allocation3 + $0x28] sm:$0xff] %vm648_vm8, %v1244_v7 }
 0x1ab   : > { %1305 = vst.msk [vmem:[#allocation3] sm:$0xff] %vm697_vm9, %v1282_v19  ;;  %1946 = vrot.lane.b32.xlu1 %v1923_v5, %s7076_s9  ;;  %v8271_v5 = vld [vmem:[%s7189_s4 + $0xd0] sm:$0xff] }
 0x1ac   : > { %1984 = vrot.lane.b32.xlu0 %v7784_v51, %s7077_s10 }
 0x1ad   : > { %v1248_v49 = vpop.permute.xlu1 %1247 }
 0x1ae   : > { %v1286_v25 = vpop.permute.xlu0 %1285  ;;  %1264 = vst.msk [vmem:[#allocation3 + $0x38] sm:$0xff] %vm648_vm8, %v1248_v49 }
 0x1af   : > { %1307 = vst.msk [vmem:[#allocation3 + $0x10] sm:$0xff] %vm697_vm9, %v1286_v25  ;;  %1982 = vrot.lane.b32.xlu1 %v7814_v2, %s7077_s10 }
 0x1b0   : > { %1988 = vrot.lane.b32.xlu0 %v7817_v9, %s7077_s10 }
 0x1b1   : > { %v1284_v52 = vpop.permute.xlu1 %1283 }
 0x1b2   : > { %v1290_v56 = vpop.permute.xlu0 %1289  ;;  %v1313_v1 = vld [vmem:[#allocation3] sm:$0xff]  ;;  %1306 = vst.msk [vmem:[#allocation3 + $0x8] sm:$0xff] %vm697_vm9, %v1284_v52  ;;  %v8289_v52 = vld [vmem:[#allocation2 + $0x52] sm:$0xff] }
 0x1b3   : > { %1309 = vst.msk [vmem:[#allocation3 + $0x20] sm:$0xff] %vm697_vm9, %v1290_v56  ;;  %6314 = vmatprep.mubr.msk.f32.mxu1 %vm731_vm10, %v1313_v1  ;;  %6344 = vmatprep.mubr.msk.f32.mxu0 %vm731_vm10, %v1313_v1 }
 0x1b4   : > { %1668 = vst.msk [vmem:[#allocation3] sm:$0xff] %vm205_vm0, %v8049_v4  ;;  %1986 = vrot.lane.b32.xlu1 %v7850_v28, %s7077_s10  ;;  %1992 = vrot.lane.b32.xlu0 %v7978_v27, %s7077_s10  ;;  %v8069_v28 = vld [vmem:[#allocation2 + $0x91] sm:$0xff] }
 0x1b5   : > { %v1288_v51 = vpop.permute.xlu1 %1287 }
 0x1b6   : > { %v1294_v2 = vpop.permute.xlu0 %1293  ;;  %v1315_v9 = vld [vmem:[#allocation3 + $0x10] sm:$0xff]  ;;  %1308 = vst.msk [vmem:[#allocation3 + $0x18] sm:$0xff] %vm697_vm9, %v1288_v51 }
 0x1b7   : > { %1311 = vst.msk [vmem:[#allocation3 + $0x30] sm:$0xff] %vm697_vm9, %v1294_v2 }
 0x1b8   : > { %1670 = vst.msk [vmem:[#allocation3 + $0x10] sm:$0xff] %vm205_vm0, %v7766_v16  ;;  %1990 = vrot.lane.b32.xlu1 %v7872_v38, %s7077_s10  ;;  %2028 = vrot.lane.b32.xlu0 %v7758_v48, %s7078_s29 }
 0x1b9   : > { %v1292_v21 = vpop.permute.xlu1 %1291  ;;  %v1314_v27 = vld [vmem:[#allocation3 + $0x8] sm:$0xff] }
 0x1ba   : > { %v1693_v23 = vpop.permute.xlu0 %1692  ;;  %v1317_v16 = vld [vmem:[#allocation3 + $0x20] sm:$0xff]  ;;  %1310 = vst.msk [vmem:[#allocation3 + $0x28] sm:$0xff] %vm697_vm9, %v1292_v21  ;;  %6315 = vmatmul.mubr.msk.f32.vlgmr.msra.gmra.mxu1 %vm731_vm10, %v1314_v27  ;;  %6345 = vmatmul.mubr.msk.f32.vlgmr.msra.gmra.mxu0 %vm731_vm10, %v1314_v27  ;;  %v8306_v21 = vld [vmem:[%s7189_s4 + $0xd8] sm:$0xff] }
 0x1bb   : > { %1716 = vst.msk [vmem:[#allocation3] sm:$0xff] %vm353_vm2, %v1693_v23  ;;  %6317 = vmatprep.mubr.msk.f32.mxu1 %vm731_vm10, %v1315_v9  ;;  %6347 = vmatprep.mubr.msk.f32.mxu0 %vm731_vm10, %v1315_v9  ;;  %v8303_v9 = vld [vmem:[#allocation2 + $0x40] sm:$0xff] }
 0x1bc   : > { %1669 = vst.msk [vmem:[#allocation3 + $0x8] sm:$0xff] %vm205_vm0, %v7791_v57  ;;  %1672 = vst.msk [vmem:[#allocation3 + $0x20] sm:$0xff] %vm205_vm0, %v7793_v58  ;;  %1994 = vrot.lane.b32.xlu1 %v8069_v28, %s7077_s10  ;;  %2032 = vrot.lane.b32.xlu0 %v7788_v55, %s7078_s29  ;;  %v8109_v55 = vld [vmem:[%s9962_s1 + $0x38] sm:$0xff] }
 0x1bd   : > { %v1296_v48 = vpop.permute.xlu1 %1295  ;;  %v1316_v10 = vld [vmem:[#allocation3 + $0x18] sm:$0xff]  ;;  %6357 = vmatpush3.msra.mxu1 %v8031_v47  ;;  %6387 = vmatpush3.msra.mxu0 %v7687_v39 }
 0x1be   : > { %v1697_v38 = vpop.permute.xlu0 %1696  ;;  %v1319_v35 = vld [vmem:[#allocation3 + $0x30] sm:$0xff]  ;;  %1312 = vst.msk [vmem:[#allocation3 + $0x38] sm:$0xff] %vm697_vm9, %v1296_v48  ;;  %6318 = vmatmul.mubr.msk.f32.gmra.mxu1 %vm731_vm10, %v1316_v10  ;;  %6348 = vmatmul.mubr.msk.f32.gmra.mxu0 %vm731_vm10, %v1316_v10 }
 0x1bf   : > { %1718 = vst.msk [vmem:[#allocation3 + $0x10] sm:$0xff] %vm353_vm2, %v1697_v38  ;;  %6320 = vmatprep.mubr.msk.f32.mxu1 %vm731_vm10, %v1317_v16  ;;  %6350 = vmatprep.mubr.msk.f32.mxu0 %vm731_vm10, %v1317_v16  ;;  %v715_v38 = vld [vmem:[#allocation4 + $0x8] sm:$0xff]  ;;  %v8328_v10 = vld [vmem:[#allocation2 + $0x50] sm:$0xff] }
 0x1c0   : > { %1671 = vst.msk [vmem:[#allocation3 + $0x18] sm:$0xff] %vm205_vm0, %v7831_v20  ;;  %1674 = vst.msk [vmem:[#allocation3 + $0x30] sm:$0xff] %vm205_vm0, %v7839_v3  ;;  %2030 = vrot.lane.b32.xlu1 %v7819_v14, %s7078_s29  ;;  %2036 = vrot.lane.b32.xlu0 %v7829_v15, %s7078_s29  ;;  %v8135_v3 = vld [vmem:[%s9962_s1 + $0x30] sm:$0xff] }
 0x1c1   : > { %v1695_v39 = vpop.permute.xlu1 %1694  ;;  %v1318_v58 = vld [vmem:[#allocation3 + $0x28] sm:$0xff]  ;;  %6358 = vmatprep.subr.mxu1 %v8109_v55  ;;  %6388 = vmatprep.subr.mxu0 %v7729_v60 }
 0x1c2   : > { %v1701_v57 = vpop.permute.xlu0 %1700  ;;  %1717 = vst.msk [vmem:[#allocation3 + $0x8] sm:$0xff] %vm353_vm2, %v1695_v39  ;;  %6321 = vmatmul.mubr.msk.f32.gmra.mxu1 %vm731_vm10, %v1318_v58  ;;  %6351 = vmatmul.mubr.msk.f32.gmra.mxu0 %vm731_vm10, %v1318_v58 }
 0x1c3   : > { %1720 = vst.msk [vmem:[#allocation3 + $0x20] sm:$0xff] %vm353_vm2, %v1701_v57  ;;  %6323 = vmatprep.mubr.msk.f32.mxu1 %vm731_vm10, %v1319_v35  ;;  %6353 = vmatprep.mubr.msk.f32.mxu0 %vm731_vm10, %v1319_v35  ;;  %v8331_v35 = vld [vmem:[%s7189_s4 + $0xe0] sm:$0xff] }
 0x1c4   : > { %1673 = vst.msk [vmem:[#allocation3 + $0x28] sm:$0xff] %vm205_vm0, %v7857_v33  ;;  %2034 = vrot.lane.b32.xlu1 %v7852_v29, %s7078_s29  ;;  %2040 = vrot.lane.b32.xlu0 %v8004_v45, %s7078_s29  ;;  %v8153_v29 = vld [vmem:[#allocation2 + $0x92] sm:$0xff]  ;;  %v8155_v33 = vld [vmem:[#allocation2 + $0x21] sm:$0xff] }
 0x1c5   : > { %v1699_v14 = vpop.permute.xlu1 %1698  ;;  %v1320_v20 = vld [vmem:[#allocation3 + $0x38] sm:$0xff]  ;;  %6359 = vmatpush3.msra.mxu1 %v8109_v55  ;;  %6389 = vmatpush3.msra.mxu0 %v7729_v60  ;;  %v8151_v60 = vld [vmem:[%s9962_s1 + $0x28] sm:$0xff] }
 0x1c6   : > { %v1705_v15 = vpop.permute.xlu0 %1704  ;;  %1719 = vst.msk [vmem:[#allocation3 + $0x18] sm:$0xff] %vm353_vm2, %v1699_v14  ;;  %6324 = vmatmul.mubr.msk.f32.gmra.mxu1 %vm731_vm10, %v1320_v20  ;;  %6354 = vmatmul.mubr.msk.f32.gmra.mxu0 %vm731_vm10, %v1320_v20  ;;  %v8207_v45 = vld [vmem:[#allocation2 + $0x31] sm:$0xff]  ;;  %v714_v14 = vld [vmem:[#allocation4] sm:$0xff] }
 0x1c7   : > { %1722 = vst.msk [vmem:[#allocation3 + $0x30] sm:$0xff] %vm353_vm2, %v1705_v15  ;;  %6360 = vmatprep.subr.mxu1 %v8135_v3  ;;  %6390 = vmatprep.subr.mxu0 %v7748_v54 }
 0x1c8   : > { %1675 = vst.msk [vmem:[#allocation3 + $0x38] sm:$0xff] %vm205_vm0, %v7884_v59  ;;  %2038 = vrot.lane.b32.xlu1 %v7882_v40, %s7078_s29  ;;  %2577 = vrot.lane.b32.xlu0 %v7778_v50, %s7071_s24  ;;  %v8168_v50 = vld [vmem:[%s9962_s1 + $0x20] sm:$0xff] }
 0x1c9   : > { %v1703_v59 = vpop.permute.xlu1 %1702  ;;  %6361 = vmatpush3.msra.mxu1 %v8135_v3  ;;  %6391 = vmatpush3.msra.mxu0 %v7748_v54  ;;  %v8174_v54 = vld [vmem:[#allocation2 + $0x22] sm:$0xff] }
 0x1ca   : > { %v1741_v36 = vpop.permute.xlu0 %1740  ;;  %1721 = vst.msk [vmem:[#allocation3 + $0x28] sm:$0xff] %vm353_vm2, %v1703_v59  ;;  %6362 = vmatprep.subr.mxu1 %v8151_v60  ;;  %6392 = vmatprep.subr.mxu0 %v7771_v17  ;;  %v8176_v40 = vld [vmem:[#allocation2 + $0x20] sm:$0xff] }
 0x1cb   : > { %1764 = vst.msk [vmem:[#allocation3] sm:$0xff] %vm402_vm3, %v1741_v36  ;;  %6363 = vmatpush3.msra.mxu1 %v8151_v60  ;;  %6393 = vmatpush3.msra.mxu0 %v7771_v17  ;;  %v8205_v17 = vld [vmem:[%s9962_s1 + $0x10] sm:$0xff] }
 0x1cc   : > { %2042 = vrot.lane.b32.xlu1 %v8153_v29, %s7078_s29  ;;  %2581 = vrot.lane.b32.xlu0 %v8155_v33, %s7071_s24  ;;  %3422 = vst.msk [vmem:[#allocation2 + $0x21] sm:$0xff] %vm205_vm0, %v8179_v37 }
 0x1cd   : > { %v1707_v41 = vpop.permute.xlu1 %1706  ;;  %6364 = vmatprep.subr.mxu1 %v8168_v50  ;;  %6394 = vmatprep.subr.mxu0 %v7804_v62 }
 0x1ce   : > { %v1745_v43 = vpop.permute.xlu0 %1744  ;;  %1723 = vst.msk [vmem:[#allocation3 + $0x38] sm:$0xff] %vm353_vm2, %v1707_v41  ;;  %6365 = vmatpush3.msra.mxu1 %v8168_v50  ;;  %6395 = vmatpush3.msra.mxu0 %v7804_v62 }
 0x1cf   : > { %1766 = vst.msk [vmem:[#allocation3 + $0x10] sm:$0xff] %vm402_vm3, %v1745_v43  ;;  %6366 = vmatprep.subr.mxu1 %v8192_v44  ;;  %6396 = vmatprep.subr.mxu0 %v7825_v31  ;;  %v716_v43 = vld [vmem:[#allocation4 + $0x10] sm:$0xff] }
 0x1d0   : > { %2579 = vrot.lane.b32.xlu1 %v8071_v63, %s7071_s24  ;;  %2585 = vrot.lane.b32.xlu0 %v8181_v53, %s7071_s24 }
 0x1d1   : > { %v1743_v62 = vpop.permute.xlu1 %1742  ;;  %6367 = vmatpush3.msra.mxu1 %v8192_v44  ;;  %6397 = vmatpush3.msra.mxu0 %v7825_v31  ;;  %v8228_v31 = vld [vmem:[#allocation2 + $0x51] sm:$0xff] }
 0x1d2   : > { %v1749_v11 = vpop.permute.xlu0 %1748  ;;  %1765 = vst.msk [vmem:[#allocation3 + $0x8] sm:$0xff] %vm402_vm3, %v1743_v62  ;;  %6368 = vmatprep.subr.mxu1 %v8205_v17  ;;  %6398 = vmatprep.subr.mxu0 %v7844_v22 }
 0x1d3   : > { %1768 = vst.msk [vmem:[#allocation3 + $0x20] sm:$0xff] %vm402_vm3, %v1749_v11  ;;  %6369 = vmatpush3.msra.mxu1 %v8205_v17  ;;  %6399 = vmatpush3.msra.mxu0 %v7844_v22  ;;  %v8250_v22 = vld [vmem:[%s9962_s1 + $0xd0] sm:$0xff] }
 0x1d4   : > { %2583 = vrot.lane.b32.xlu1 %v8207_v45, %s7071_s24  ;;  %2589 = vrot.lane.b32.xlu0 %v8209_v0, %s7071_s24  ;;  %3425 = vst.msk [vmem:[#allocation2 + $0x51] sm:$0xff] %vm205_vm0, %v8331_v35 }
 0x1d5   : > { %v1747_v12 = vpop.permute.xlu1 %1746  ;;  %6370 = vmatprep.subr.mxu1 %v8222_v18  ;;  %6400 = vmatprep.subr.mxu0 %v7863_v34 }
 0x1d6   : > { %v1753_v24 = vpop.permute.xlu0 %1752  ;;  %1767 = vst.msk [vmem:[#allocation3 + $0x18] sm:$0xff] %vm402_vm3, %v1747_v12  ;;  %6371 = vmatpush3.msra.mxu1 %v8222_v18  ;;  %6401 = vmatpush3.msra.mxu0 %v7863_v34  ;;  %v719_v12 = vld [vmem:[#allocation4 + $0x28] sm:$0xff] }
 0x1d7   : > { %1770 = vst.msk [vmem:[#allocation3 + $0x30] sm:$0xff] %vm402_vm3, %v1753_v24  ;;  %6372 = vmatprep.subr.mxu1 %v8237_v46  ;;  %6402 = vmatprep.subr.mxu0 %v7878_v13 }
 0x1d8   : > { %2587 = vrot.lane.b32.xlu1 %v8228_v31, %s7071_s24  ;;  %2625 = vrot.lane.b32.xlu0 %v7893_v42, %s7072_s5  ;;  %v8266_v42 = vld [vmem:[#allocation2 + $0x32] sm:$0xff] }
 0x1d9   : > { %v1751_v6 = vpop.permute.xlu1 %1750  ;;  %6373 = vmatpush3.msra.mxu1 %v8237_v46  ;;  %6403 = vmatpush3.msra.mxu0 %v7878_v13  ;;  %v8273_v13 = vld [vmem:[#allocation2 + $0x42] sm:$0xff]  ;;  %3423 = vst.msk [vmem:[#allocation2 + $0x31] sm:$0xff] %vm205_vm0, %v8271_v5 }
 0x1da   : > { %v1789_v34 = vpop.permute.xlu0 %1788  ;;  %1769 = vst.msk [vmem:[#allocation3 + $0x28] sm:$0xff] %vm402_vm3, %v1751_v6  ;;  %6416 = vmatprep.subr.mxu1 %v8250_v22  ;;  %6446 = vmatprep.subr.mxu0 %v8031_v47 }
 0x1db   : > { %1812 = vst.msk [vmem:[#allocation3] sm:$0xff] %vm451_vm4, %v1789_v34 }
 0x1dc   : > { %2591 = vrot.lane.b32.xlu1 %v8252_v61, %s7071_s24  ;;  %2629 = vrot.lane.b32.xlu0 %v8174_v54, %s7072_s5  ;;  %3424 = vst.msk [vmem:[#allocation2 + $0x41] sm:$0xff] %vm205_vm0, %v8306_v21 }
 0x1dd   : > { %v1755_v7 = vpop.permute.xlu1 %1754 }
 0x1de   : > { %v1793_v19 = vpop.permute.xlu0 %1792  ;;  %1771 = vst.msk [vmem:[#allocation3 + $0x38] sm:$0xff] %vm402_vm3, %v1755_v7 }
 0x1df   : > { %1814 = vst.msk [vmem:[#allocation3 + $0x10] sm:$0xff] %vm451_vm4, %v1793_v19  ;;  %v718_v19 = vld [vmem:[#allocation4 + $0x20] sm:$0xff] }
 0x1e0   : > { %2627 = vrot.lane.b32.xlu1 %v8073_v32, %s7072_s5  ;;  %2633 = vrot.lane.b32.xlu0 %v8273_v13, %s7072_s5 }
 0x1e1   : > { %v1791_v49 = vpop.permute.xlu1 %1790 }
 0x1e2   : > { %v1797_v25 = vpop.permute.xlu0 %1796  ;;  %1813 = vst.msk [vmem:[#allocation3 + $0x8] sm:$0xff] %vm451_vm4, %v1791_v49 }
 0x1e3   : > { %1816 = vst.msk [vmem:[#allocation3 + $0x20] sm:$0xff] %vm451_vm4, %v1797_v25  ;;  %v721_v25 = vld [vmem:[#allocation4 + $0x38] sm:$0xff] }
 0x1e4   : > { %2631 = vrot.lane.b32.xlu1 %v8266_v42, %s7072_s5  ;;  %2673 = vrot.lane.b32.xlu0 %v8075_v26, %s7073_s6 }
 0x1e5   : > { %v1795_v56 = vpop.permute.xlu1 %1794 }
 0x1e6   : > { %v1801_v1 = vpop.permute.xlu0 %1800  ;;  %1815 = vst.msk [vmem:[#allocation3 + $0x18] sm:$0xff] %vm451_vm4, %v1795_v56 }
 0x1e7   : > { %1818 = vst.msk [vmem:[#allocation3 + $0x30] sm:$0xff] %vm451_vm4, %v1801_v1 }
 0x1e8   : > { %2635 = vrot.lane.b32.xlu1 %v8289_v52, %s7072_s5  ;;  %2721 = vrot.lane.b32.xlu0 %v8071_v63, %s7074_s7 }
 0x1e9   : > { %v1799_v51 = vpop.permute.xlu1 %1798 }
 0x1ea   : > { %v1837_v2 = vpop.permute.xlu0 %1836  ;;  %1817 = vst.msk [vmem:[#allocation3 + $0x28] sm:$0xff] %vm451_vm4, %v1799_v51 }
 0x1eb   : > { %1860 = vst.msk [vmem:[#allocation3] sm:$0xff] %vm500_vm5, %v1837_v2 }
 0x1ec   : > { %2675 = vrot.lane.b32.xlu1 %v8176_v40, %s7073_s6  ;;  %2769 = vrot.lane.b32.xlu0 %v8073_v32, %s7075_s8 }
 0x1ed   : > { %v1803_v23 = vpop.permute.xlu1 %1802 }
 0x1ee   : > { %v1841_v27 = vpop.permute.xlu0 %1840  ;;  %1819 = vst.msk [vmem:[#allocation3 + $0x38] sm:$0xff] %vm451_vm4, %v1803_v23  ;;  %v720_v23 = vld [vmem:[#allocation4 + $0x30] sm:$0xff] }
 0x1ef   : > { %1862 = vst.msk [vmem:[#allocation3 + $0x10] sm:$0xff] %vm500_vm5, %v1841_v27 }
 0x1f0   : > { %2723 = vrot.lane.b32.xlu1 %v8155_v33, %s7074_s7  ;;  %2817 = vrot.lane.b32.xlu0 %v8176_v40, %s7076_s9 }
 0x1f1   : > { %v1839_v63 = vpop.permute.xlu1 %1838 }
 0x1f2   : > { %v1845_v32 = vpop.permute.xlu0 %1844  ;;  %1861 = vst.msk [vmem:[#allocation3 + $0x8] sm:$0xff] %vm500_vm5, %v1839_v63  ;;  %v8367_v63 = vld [vmem:[#allocation2 + $0x62] sm:$0xff] }
 0x1f3   : > { %1864 = vst.msk [vmem:[#allocation3 + $0x20] sm:$0xff] %vm500_vm5, %v1845_v32  ;;  %v8370_v32 = vld [vmem:[%s7189_s4 + $0xe8] sm:$0xff] }
 0x1f4   : > { %2771 = vrot.lane.b32.xlu1 %v8174_v54, %s7075_s8  ;;  %2865 = vrot.lane.b32.xlu0 %v8155_v33, %s7077_s10  ;;  %v717_v33 = vld [vmem:[#allocation4 + $0x18] sm:$0xff] }
 0x1f5   : > { %v1843_v16 = vpop.permute.xlu1 %1842 }
 0x1f6   : > { %v1849_v48 = vpop.permute.xlu0 %1848  ;;  %1863 = vst.msk [vmem:[#allocation3 + $0x18] sm:$0xff] %vm500_vm5, %v1843_v16 }
 0x1f7   : > { %1866 = vst.msk [vmem:[#allocation3 + $0x30] sm:$0xff] %vm500_vm5, %v1849_v48 }
 0x1f8   : > { %2819 = vrot.lane.b32.xlu1 %v8268_v30, %s7076_s9  ;;  %2913 = vrot.lane.b32.xlu0 %v8174_v54, %s7078_s29 }
 0x1f9   : > { %v1847_v39 = vpop.permute.xlu1 %1846 }
 0x1fa   : > { %v1885_v57 = vpop.permute.xlu0 %1884  ;;  %1865 = vst.msk [vmem:[#allocation3 + $0x28] sm:$0xff] %vm500_vm5, %v1847_v39  ;;  %v6286_v58 = vpop.f32.mrf.mxu0 }
 0x1fb   : > { %1908 = vst.msk [vmem:[#allocation3] sm:$0xff] %vm549_vm6, %v1885_v57  ;;  %v862_v15 = vadd.f32 %v6286_v58, %v715_v38 }
 0x1fc   : > { %2867 = vrot.lane.b32.xlu1 %v8207_v45, %s7077_s10  ;;  %2915 = vrot.lane.b32.xlu0 %v8266_v42, %s7078_s29  ;;  %v822_v20 = vpop.f32.mrf.mxu0 }
 0x1fd   : > { %870 = vst.msk [vmem:[#allocation4 + $0x8] sm:$0xff] %vm205_vm0, %v862_v15  ;;  %v861_v59 = vadd.f32 %v822_v20, %v714_v14  ;;  %v1851_v36 = vpop.permute.xlu1 %1850 }
 0x1fe   : > { %v1889_v54 = vpop.permute.xlu0 %1888  ;;  %1867 = vst.msk [vmem:[#allocation3 + $0x38] sm:$0xff] %vm500_vm5, %v1851_v36  ;;  %v6289_v41 = vpop.f32.mrf.mxu0  ;;  %v8402_v36 = vld [vmem:[#allocation2 + $0x70] sm:$0xff] }
 0x1ff   : > { %1910 = vst.msk [vmem:[#allocation3 + $0x10] sm:$0xff] %vm549_vm6, %v1889_v54  ;;  %v864_v62 = vadd.f32 %v6289_v41, %v717_v33 }
 0x200   : > { %869 = vst.msk [vmem:[#allocation4] sm:$0xff] %vm205_vm0, %v861_v59  ;;  %2677 = vrot.lane.b32.xlu1 %v8268_v30, %s7073_s6  ;;  %2725 = vrot.lane.b32.xlu0 %v8207_v45, %s7074_s7  ;;  %v832_v11 = vpop.f32.mrf.mxu0  ;;  %v8400_v59 = vld [vmem:[#allocation2 + $0x72] sm:$0xff] }
 0x201   : > { %872 = vst.msk [vmem:[#allocation4 + $0x18] sm:$0xff] %vm205_vm0, %v864_v62  ;;  %v863_v24 = vadd.f32 %v832_v11, %v716_v43  ;;  %v1887_v6 = vpop.permute.xlu1 %1886 }
 0x202   : > { %v1893_v34 = vpop.permute.xlu0 %1892  ;;  %1909 = vst.msk [vmem:[#allocation3 + $0x8] sm:$0xff] %vm549_vm6, %v1887_v6  ;;  %v6292_v7 = vpop.f32.mrf.mxu0  ;;  %v8437_v6 = vld [vmem:[#allocation2 + $0x82] sm:$0xff] }
 0x203   : > { %1912 = vst.msk [vmem:[#allocation3 + $0x20] sm:$0xff] %vm549_vm6, %v1893_v34  ;;  %v866_v49 = vadd.f32 %v6292_v7, %v719_v12  ;;  %v8440_v34 = vld [vmem:[%s7189_s4 + $0xf8] sm:$0xff] }
 0x204   : > { %871 = vst.msk [vmem:[#allocation4 + $0x10] sm:$0xff] %vm205_vm0, %v863_v24  ;;  %2679 = vrot.lane.b32.xlu1 %v8303_v9, %s7073_s6  ;;  %2773 = vrot.lane.b32.xlu0 %v8266_v42, %s7075_s8  ;;  %v842_v45 = vpop.f32.mrf.mxu0  ;;  %v8365_v42 = vld [vmem:[#allocation2 + $0x60] sm:$0xff] }
 0x205   : > { %874 = vst.msk [vmem:[#allocation4 + $0x28] sm:$0xff] %vm205_vm0, %v866_v49  ;;  %v865_v56 = vadd.f32 %v842_v45, %v718_v19  ;;  %v1891_v1 = vpop.permute.xlu1 %1890  ;;  %3426 = vst.msk [vmem:[#allocation2 + $0x61] sm:$0xff] %vm205_vm0, %v8370_v32  ;;  %v8435_v24 = vld [vmem:[#allocation2 + $0x81] sm:$0xff] }
 0x206   : > { %v1897_v51 = vpop.permute.xlu0 %1896  ;;  %1911 = vst.msk [vmem:[#allocation3 + $0x18] sm:$0xff] %vm549_vm6, %v1891_v1  ;;  %v6295_v2 = vpop.f32.mrf.mxu0 }
 0x207   : > { %1914 = vst.msk [vmem:[#allocation3 + $0x30] sm:$0xff] %vm549_vm6, %v1897_v51  ;;  %v868_v27 = vadd.f32 %v6295_v2, %v721_v25 }
 0x208   : > { %873 = vst.msk [vmem:[#allocation4 + $0x20] sm:$0xff] %vm205_vm0, %v865_v56  ;;  %2727 = vrot.lane.b32.xlu1 %v8181_v53, %s7074_s7  ;;  %2821 = vrot.lane.b32.xlu0 %v8303_v9, %s7076_s9  ;;  %v852_v16 = vpop.f32.mrf.mxu0 }
 0x209   : > { %876 = vst.msk [vmem:[#allocation4 + $0x38] sm:$0xff] %vm205_vm0, %v868_v27  ;;  %v867_v48 = vadd.f32 %v852_v16, %v720_v23  ;;  %v1895_v38 = vpop.permute.xlu1 %1894  ;;  %v8485_v27 = vld [vmem:[%s9962_s1 + $0xc8] sm:$0xff] }
 0x20a   : > { %v1933_v39 = vpop.permute.xlu0 %1932  ;;  %1913 = vst.msk [vmem:[#allocation3 + $0x28] sm:$0xff] %vm549_vm6, %v1895_v38  ;;  %v8510_v38 = vld [vmem:[#allocation2 + $0x12] sm:$0xff] }
 0x20b   : > { %1956 = vst.msk [vmem:[#allocation3] sm:$0xff] %vm599_vm7, %v1933_v39  ;;  %v8512_v39 = vld [vmem:[#allocation2 + $0x10] sm:$0xff] }
 0x20c   : > { %875 = vst.msk [vmem:[#allocation4 + $0x30] sm:$0xff] %vm205_vm0, %v867_v48  ;;  %2775 = vrot.lane.b32.xlu1 %v8273_v13, %s7075_s8  ;;  %2823 = vrot.lane.b32.xlu0 %v8328_v10, %s7076_s9  ;;  %v8508_v48 = vld [vmem:[#allocation2 + $0x11] sm:$0xff] }
 0x20d   : > { %v1899_v57 = vpop.permute.xlu1 %1898 }
 0x20e   : > { %v1937_v58 = vpop.permute.xlu0 %1936  ;;  %1915 = vst.msk [vmem:[#allocation3 + $0x38] sm:$0xff] %vm549_vm6, %v1899_v57  ;;  %v8523_v57 = vld [vmem:[#allocation2 + $0x1] sm:$0xff] }
 0x20f   : > { %1958 = vst.msk [vmem:[#allocation3 + $0x10] sm:$0xff] %vm599_vm7, %v1937_v58 }
 0x210   : > { %2681 = vrot.lane.b32.xlu1 %v8328_v10, %s7073_s6  ;;  %2683 = vrot.lane.b32.xlu0 %v8365_v42, %s7073_s6 }
 0x211   : > { %v1935_v14 = vpop.permute.xlu1 %1934 }
 0x212   : > { %v1941_v15 = vpop.permute.xlu0 %1940  ;;  %1957 = vst.msk [vmem:[#allocation3 + $0x8] sm:$0xff] %vm599_vm7, %v1935_v14  ;;  %v8535_v14 = vld [vmem:[%s9962_s1 + $0xb8] sm:$0xff] }
 0x213   : > { %1960 = vst.msk [vmem:[#allocation3 + $0x20] sm:$0xff] %vm599_vm7, %v1941_v15  ;;  %v8551_v15 = vld [vmem:[%s9962_s1 + $0xb0] sm:$0xff] }
 0x214   : > { %2869 = vrot.lane.b32.xlu1 %v8181_v53, %s7077_s10  ;;  %2871 = vrot.lane.b32.xlu0 %v8228_v31, %s7077_s10  ;;  %v8405_v53 = vld [vmem:[%s7189_s4 + $0xf0] sm:$0xff] }
 0x215   : > { %v1939_v20 = vpop.permute.xlu1 %1938  ;;  %3427 = vst.msk [vmem:[#allocation2 + $0x71] sm:$0xff] %vm205_vm0, %v8405_v53 }
 0x216   : > { %v1945_v33 = vpop.permute.xlu0 %1944  ;;  %1959 = vst.msk [vmem:[#allocation3 + $0x18] sm:$0xff] %vm599_vm7, %v1939_v20 }
 0x217   : > { %1962 = vst.msk [vmem:[#allocation3 + $0x30] sm:$0xff] %vm599_vm7, %v1945_v33  ;;  %v8568_v33 = vld [vmem:[#allocation2 + $0x90] sm:$0xff] }
 0x218   : > { %2729 = vrot.lane.b32.xlu1 %v8228_v31, %s7074_s7  ;;  %2731 = vrot.lane.b32.xlu0 %v8209_v0, %s7074_s7 }
 0x219   : > { %v1943_v54 = vpop.permute.xlu1 %1942 }
 0x21a   : > { %v1981_v41 = vpop.permute.xlu0 %1980  ;;  %1961 = vst.msk [vmem:[#allocation3 + $0x28] sm:$0xff] %vm599_vm7, %v1943_v54  ;;  %v8585_v54 = vld [vmem:[%s9962_s1 + $0xa0] sm:$0xff] }
 0x21b   : > { %2004 = vst.msk [vmem:[#allocation3] sm:$0xff] %vm648_vm8, %v1981_v41 }
 0x21c   : > { %2917 = vrot.lane.b32.xlu1 %v8273_v13, %s7078_s29  ;;  %2919 = vrot.lane.b32.xlu0 %v8289_v52, %s7078_s29 }
 0x21d   : > { %v1947_v31 = vpop.permute.xlu1 %1946 }
 0x21e   : > { %v1985_v43 = vpop.permute.xlu0 %1984  ;;  %1963 = vst.msk [vmem:[#allocation3 + $0x38] sm:$0xff] %vm599_vm7, %v1947_v31 }
 0x21f   : > { %2006 = vst.msk [vmem:[#allocation3 + $0x10] sm:$0xff] %vm648_vm8, %v1985_v43  ;;  %v8599_v43 = vld [vmem:[#allocation2 + $0x2] sm:$0xff] }
 0x220   : > { %2777 = vrot.lane.b32.xlu1 %v8289_v52, %s7075_s8  ;;  %2779 = vrot.lane.b32.xlu0 %v8367_v63, %s7075_s8  ;;  %v8429_v52 = vld [vmem:[#allocation2 + $0x80] sm:$0xff] }
 0x221   : > { %v1983_v62 = vpop.permute.xlu1 %1982  ;;  %3428 = vst.msk [vmem:[#allocation2 + $0x81] sm:$0xff] %vm205_vm0, %v8440_v34 }
 0x222   : > { %v1989_v11 = vpop.permute.xlu0 %1988  ;;  %2005 = vst.msk [vmem:[#allocation3 + $0x8] sm:$0xff] %vm648_vm8, %v1983_v62  ;;  %v8607_v62 = vld [vmem:[%s9962_s1 + $0x98] sm:$0xff] }
 0x223   : > { %2008 = vst.msk [vmem:[#allocation3 + $0x20] sm:$0xff] %vm648_vm8, %v1989_v11 }
 0x224   : > { %2637 = vrot.lane.b32.xlu1 %v8367_v63, %s7072_s5  ;;  %2639 = vrot.lane.b32.xlu0 %v8400_v59, %s7072_s5 }
 0x226   : > { %v1987_v13 = vpop.permute.xlu1 %1986  ;;  %v1993_v12 = vpop.permute.xlu0 %1992 }
 0x227   : > { %2007 = vst.msk [vmem:[#allocation3 + $0x18] sm:$0xff] %vm648_vm8, %v1987_v13  ;;  %2010 = vst.msk [vmem:[#allocation3 + $0x30] sm:$0xff] %vm648_vm8, %v1993_v12  ;;  %v8620_v13 = vld [vmem:[%s9962_s1 + $0x90] sm:$0xff]  ;;  %v4159_v12 = vmul.f32 0.0, %v8179_v37 }
 0x228   : > { %2825 = vrot.lane.b32.xlu1 %v8365_v42, %s7076_s9  ;;  %2827 = vrot.lane.b32.xlu0 %v8402_v36, %s7076_s9 }
 0x22a   : > { %v1991_v7 = vpop.permute.xlu1 %1990  ;;  %v2029_v19 = vpop.permute.xlu0 %2028 }
 0x22b   : > { %2009 = vst.msk [vmem:[#allocation3 + $0x28] sm:$0xff] %vm648_vm8, %v1991_v7  ;;  %v8629_v7 = vld [vmem:[#allocation2 + $0x21] sm:$0xff] }
 0x22c   : > { %2052 = vst.msk [vmem:[#allocation3] sm:$0xff] %vm697_vm9, %v2029_v19  ;;  %2685 = vrot.lane.b32.xlu1 %v8402_v36, %s7073_s6  ;;  %2687 = vrot.lane.b32.xlu0 %v8429_v52, %s7073_s6  ;;  %v8631_v19 = vld [vmem:[#allocation2 + $0x22] sm:$0xff] }
 0x22e   : > { %v1995_v49 = vpop.permute.xlu1 %1994  ;;  %v2033_v45 = vpop.permute.xlu0 %2032 }
 0x22f   : > { %2011 = vst.msk [vmem:[#allocation3 + $0x38] sm:$0xff] %vm648_vm8, %v1995_v49 }
 0x230   : > { %2054 = vst.msk [vmem:[#allocation3 + $0x10] sm:$0xff] %vm697_vm9, %v2033_v45  ;;  %2873 = vrot.lane.b32.xlu1 %v8209_v0, %s7077_s10  ;;  %2875 = vrot.lane.b32.xlu0 %v8252_v61, %s7077_s10  ;;  %v8641_v45 = vld [vmem:[%s9962_s1 + $0x88] sm:$0xff] }
 0x232   : > { %v2031_v25 = vpop.permute.xlu1 %2030  ;;  %v2037_v56 = vpop.permute.xlu0 %2036 }
 0x233   : > { %v8456_v1 = vld [vmem:[#allocation3] sm:$0xff]  ;;  %2053 = vst.msk [vmem:[#allocation3 + $0x8] sm:$0xff] %vm697_vm9, %v2031_v25  ;;  %2056 = vst.msk [vmem:[#allocation3 + $0x20] sm:$0xff] %vm697_vm9, %v2037_v56 }
 0x234   : > { %6374 = vmatprep.mubr.msk.f32.mxu1 %vm731_vm10, %v8456_v1  ;;  %6404 = vmatprep.mubr.msk.f32.mxu0 %vm731_vm10, %v8456_v1  ;;  %2553 = vst.msk [vmem:[#allocation3] sm:$0xff] %vm205_vm0, %v8049_v4  ;;  %v8656_v25 = vld [vmem:[%s9962_s1 + $0x80] sm:$0xff] }
 0x235   : > { %2733 = vrot.lane.b32.xlu1 %v8252_v61, %s7074_s7  ;;  %2735 = vrot.lane.b32.xlu0 %v8435_v24, %s7074_s7 }
 0x236   : > { %v2035_v0 = vpop.permute.xlu1 %2034  ;;  %v2041_v51 = vpop.permute.xlu0 %2040 }
 0x237   : > { %v8470_v2 = vld [vmem:[#allocation3 + $0x10] sm:$0xff]  ;;  %2055 = vst.msk [vmem:[#allocation3 + $0x18] sm:$0xff] %vm697_vm9, %v2035_v0  ;;  %2058 = vst.msk [vmem:[#allocation3 + $0x30] sm:$0xff] %vm697_vm9, %v2041_v51 }
 0x238   : > { %2555 = vst.msk [vmem:[#allocation3 + $0x10] sm:$0xff] %vm205_vm0, %v8176_v40  ;;  %v8498_v40 = vld [vmem:[%s9962_s1 + $0xc0] sm:$0xff]  ;;  %v8684_v0 = vld [vmem:[%s9962_s1 + $0x70] sm:$0xff] }
 0x239   : > { %2921 = vrot.lane.b32.xlu1 %v8367_v63, %s7078_s29  ;;  %2923 = vrot.lane.b32.xlu0 %v8400_v59, %s7078_s29  ;;  %v4158_v63 = vmul.f32 0.0, %v8078_v8  ;;  %v8691_v51 = vld [vmem:[#allocation2 + $0x31] sm:$0xff] }
 0x23a   : > { %v2039_v4 = vpop.permute.xlu1 %2038  ;;  %v2578_v61 = vpop.permute.xlu0 %2577  ;;  %v8480_v23 = vld [vmem:[#allocation3 + $0x8] sm:$0xff]  ;;  %v8487_v16 = vld [vmem:[#allocation3 + $0x20] sm:$0xff] }
 0x23b   : > { %2057 = vst.msk [vmem:[#allocation3 + $0x28] sm:$0xff] %vm697_vm9, %v2039_v4  ;;  %6375 = vmatmul.mubr.msk.f32.vlgmr.msra.gmra.mxu1 %vm731_vm10, %v8480_v23  ;;  %6405 = vmatmul.mubr.msk.f32.vlgmr.msra.gmra.mxu0 %vm731_vm10, %v8480_v23  ;;  %v8701_v4 = vld [vmem:[#allocation2 + $0x32] sm:$0xff] }
 0x23c   : > { %2601 = vst.msk [vmem:[#allocation3] sm:$0xff] %vm353_vm2, %v2578_v61  ;;  %6417 = vmatpush3.msra.mxu1 %v8250_v22  ;;  %6377 = vmatprep.mubr.msk.f32.mxu1 %vm731_vm10, %v8470_v2  ;;  %v8722_v61 = vld [vmem:[%s9962_s1 + $0x60] sm:$0xff] }
 0x23d   : > { %2554 = vst.msk [vmem:[#allocation3 + $0x8] sm:$0xff] %vm205_vm0, %v8075_v26  ;;  %2557 = vst.msk [vmem:[#allocation3 + $0x20] sm:$0xff] %vm205_vm0, %v8303_v9  ;;  %2781 = vrot.lane.b32.xlu1 %v8400_v59, %s7075_s8  ;;  %2783 = vrot.lane.b32.xlu0 %v8437_v6, %s7075_s8  ;;  %v8573_v59 = vld [vmem:[%s9962_s1 + $0xa8] sm:$0xff] }
 0x23e   : > { %6418 = vmatprep.subr.mxu1 %v8485_v27  ;;  %4166 = vst.msk [vmem:[#allocation2 + $0x11] sm:$0xff] %vm205_vm0, %v4158_v63  ;;  %v2043_v26 = vpop.permute.xlu1 %2042  ;;  %v2582_v8 = vpop.permute.xlu0 %2581  ;;  %v8521_v9 = vld [vmem:[#allocation3 + $0x18] sm:$0xff]  ;;  %v8525_v58 = vld [vmem:[#allocation3 + $0x30] sm:$0xff]  ;;  %6407 = vmatprep.mubr.msk.f32.mxu0 %vm731_vm10, %v8470_v2 }
 0x23f   : > { %6419 = vmatpush3.msra.mxu1 %v8485_v27  ;;  %2059 = vst.msk [vmem:[#allocation3 + $0x38] sm:$0xff] %vm697_vm9, %v2043_v26  ;;  %6408 = vmatmul.mubr.msk.f32.gmra.mxu0 %vm731_vm10, %v8521_v9  ;;  %v8735_v63 = vld [vmem:[%s9962_s1 + $0x58] sm:$0xff] }
 0x240   : > { %6420 = vmatprep.subr.mxu1 %v8498_v40  ;;  %2603 = vst.msk [vmem:[#allocation3 + $0x10] sm:$0xff] %vm353_vm2, %v2582_v8  ;;  %6378 = vmatmul.mubr.msk.f32.gmra.mxu1 %vm731_vm10, %v8521_v9  ;;  %v4161_v8 = vmul.f32 0.0, %v8306_v21 }
 0x241   : > { %2556 = vst.msk [vmem:[#allocation3 + $0x18] sm:$0xff] %vm205_vm0, %v8268_v30  ;;  %2559 = vst.msk [vmem:[#allocation3 + $0x30] sm:$0xff] %vm205_vm0, %v8365_v42  ;;  %6421 = vmatpush3.msra.mxu1 %v8498_v40  ;;  %3461 = vrot.lane.b32.xlu1 %v8523_v57, %s7071_s24 }
 0x242   : > { %3463 = vrot.lane.b32.xlu0 %v8508_v48, %s7071_s24  ;;  %6422 = vmatprep.subr.mxu1 %v8535_v14  ;;  %v2580_v30 = vpop.permute.xlu1 %2579  ;;  %v2586_v42 = vpop.permute.xlu0 %2585  ;;  %v8556_v20 = vld [vmem:[#allocation3 + $0x28] sm:$0xff] }
 0x243   : > { %6423 = vmatpush3.msra.mxu1 %v8535_v14  ;;  %2602 = vst.msk [vmem:[#allocation3 + $0x8] sm:$0xff] %vm353_vm2, %v2580_v30  ;;  %6380 = vmatprep.mubr.msk.f32.mxu1 %vm731_vm10, %v8487_v16  ;;  %2605 = vst.msk [vmem:[#allocation3 + $0x20] sm:$0xff] %vm353_vm2, %v2586_v42 }
 0x244   : > { %2558 = vst.msk [vmem:[#allocation3 + $0x28] sm:$0xff] %vm205_vm0, %v8328_v10  ;;  %6410 = vmatprep.mubr.msk.f32.mxu0 %vm731_vm10, %v8487_v16  ;;  %6424 = vmatprep.subr.mxu1 %v8551_v15 }
 0x245   : > { %6381 = vmatmul.mubr.msk.f32.gmra.mxu1 %vm731_vm10, %v8556_v20  ;;  %6411 = vmatmul.mubr.msk.f32.gmra.mxu0 %vm731_vm10, %v8556_v20 }
 0x246   : > { %6425 = vmatpush3.msra.mxu1 %v8551_v15  ;;  %2829 = vrot.lane.b32.xlu1 %v8429_v52, %s7076_s9  ;;  %v2584_v10 = vpop.permute.xlu1 %2583  ;;  %v2590_v41 = vpop.permute.xlu0 %2589  ;;  %v8587_v31 = vld [vmem:[#allocation3 + $0x38] sm:$0xff]  ;;  %v8627_v52 = vld [vmem:[#allocation2 + $0x20] sm:$0xff] }
 0x247   : > { %2831 = vrot.lane.b32.xlu0 %v8568_v33, %s7076_s9  ;;  %6426 = vmatprep.subr.mxu1 %v8573_v59  ;;  %2604 = vst.msk [vmem:[#allocation3 + $0x18] sm:$0xff] %vm353_vm2, %v2584_v10  ;;  %2607 = vst.msk [vmem:[#allocation3 + $0x30] sm:$0xff] %vm353_vm2, %v2590_v41 }
 0x248   : > { %2560 = vst.msk [vmem:[#allocation3 + $0x38] sm:$0xff] %vm205_vm0, %v8402_v36  ;;  %6427 = vmatpush3.msra.mxu1 %v8573_v59  ;;  %6383 = vmatprep.mubr.msk.f32.mxu1 %vm731_vm10, %v8525_v58  ;;  %4167 = vst.msk [vmem:[#allocation2 + $0x21] sm:$0xff] %vm205_vm0, %v4159_v12  ;;  %v8832_v12 = vld [vmem:[#allocation2 + $0x51] sm:$0xff] }
 0x249   : > { %6413 = vmatprep.mubr.msk.f32.mxu0 %vm731_vm10, %v8525_v58  ;;  %6428 = vmatprep.subr.mxu1 %v8585_v54 }
 0x24a   : > { %6384 = vmatmul.mubr.msk.f32.gmra.mxu1 %vm731_vm10, %v8587_v31  ;;  %6414 = vmatmul.mubr.msk.f32.gmra.mxu0 %vm731_vm10, %v8587_v31  ;;  %v2588_v36 = vpop.permute.xlu1 %2587  ;;  %v2626_v11 = vpop.permute.xlu0 %2625 }
 0x24b   : > { %6429 = vmatpush3.msra.mxu1 %v8585_v54  ;;  %3509 = vrot.lane.b32.xlu1 %v8599_v43, %s7072_s5  ;;  %2606 = vst.msk [vmem:[#allocation3 + $0x28] sm:$0xff] %vm353_vm2, %v2588_v36 }
 0x24c   : > { %2649 = vst.msk [vmem:[#allocation3] sm:$0xff] %vm402_vm3, %v2626_v11  ;;  %3511 = vrot.lane.b32.xlu0 %v8510_v38, %s7072_s5  ;;  %6430 = vmatprep.subr.mxu1 %v8607_v62  ;;  %v4162_v11 = vmul.f32 0.0, %v8331_v35 }
 0x24d   : > { %6434 = vmatprep.mubr.msk.f32.mxu1 %vm731_vm10, %v8456_v1  ;;  %6431 = vmatpush3.msra.mxu1 %v8607_v62 }
 0x24e   : > { %6432 = vmatprep.subr.mxu1 %v8620_v13  ;;  %v2592_v37 = vpop.permute.xlu1 %2591  ;;  %v2630_v49 = vpop.permute.xlu0 %2629  ;;  %6447 = vmatpush3.msra.mxu0 %v8031_v47 }
 0x24f   : > { %6433 = vmatpush3.msra.mxu1 %v8620_v13  ;;  %2877 = vrot.lane.b32.xlu1 %v8435_v24, %s7077_s10  ;;  %2608 = vst.msk [vmem:[#allocation3 + $0x38] sm:$0xff] %vm353_vm2, %v2592_v37  ;;  %v8836_v37 = vld [vmem:[#allocation2 + $0x50] sm:$0xff] }
 0x250   : > { %2651 = vst.msk [vmem:[#allocation3 + $0x10] sm:$0xff] %vm402_vm3, %v2630_v49  ;;  %2879 = vrot.lane.b32.xlu0 %v8069_v28, %s7077_s10  ;;  %6435 = vmatmul.mubr.msk.f32.vlgmr.msra.gmra.mxu1 %vm731_vm10, %v8480_v23  ;;  %v8671_v28 = vld [vmem:[%s9962_s1 + $0x78] sm:$0xff] }
 0x251   : > { %6437 = vmatprep.mubr.msk.f32.mxu1 %vm731_vm10, %v8470_v2  ;;  %6476 = vmatprep.subr.mxu1 %v8641_v45  ;;  %v4160_v2 = vmul.f32 0.0, %v8271_v5 }
 0x252   : > { %v2628_v47 = vpop.permute.xlu1 %2627  ;;  %v2634_v24 = vpop.permute.xlu0 %2633  ;;  %6477 = vmatpush3.msra.mxu1 %v8641_v45  ;;  %6448 = vmatprep.subr.mxu0 %v8109_v55 }
 0x253   : > { %3557 = vrot.lane.b32.xlu1 %v8512_v39, %s7073_s6  ;;  %2650 = vst.msk [vmem:[#allocation3 + $0x8] sm:$0xff] %vm402_vm3, %v2628_v47  ;;  %2653 = vst.msk [vmem:[#allocation3 + $0x20] sm:$0xff] %vm402_vm3, %v2634_v24  ;;  %6478 = vmatprep.subr.mxu1 %v8656_v25  ;;  %v1485_v47 = vld [vmem:[#allocation4 + $0x8] sm:$0xff] }
 0x254   : > { %3559 = vrot.lane.b32.xlu0 %v8627_v52, %s7073_s6  ;;  %6438 = vmatmul.mubr.msk.f32.gmra.mxu1 %vm731_vm10, %v8521_v9  ;;  %v8782_v9 = vld [vmem:[#allocation2 + $0x41] sm:$0xff] }
 0x255   : > { %6440 = vmatprep.mubr.msk.f32.mxu1 %vm731_vm10, %v8487_v16  ;;  %6479 = vmatpush3.msra.mxu1 %v8656_v25 }
 0x256   : > { %v2632_v56 = vpop.permute.xlu1 %2631  ;;  %v2674_v1 = vpop.permute.xlu0 %2673  ;;  %6480 = vmatprep.subr.mxu1 %v8671_v28  ;;  %6449 = vmatpush3.msra.mxu0 %v8109_v55  ;;  %v8699_v55 = vld [vmem:[#allocation2 + $0x30] sm:$0xff] }
 0x257   : > { %2925 = vrot.lane.b32.xlu1 %v8437_v6, %s7078_s29  ;;  %2652 = vst.msk [vmem:[#allocation3 + $0x18] sm:$0xff] %vm402_vm3, %v2632_v56  ;;  %6481 = vmatpush3.msra.mxu1 %v8671_v28  ;;  %v8706_v6 = vld [vmem:[%s9962_s1 + $0x68] sm:$0xff]  ;;  %v1322_v56 = vld [vmem:[#allocation4 + $0x40] sm:$0xff] }
 0x258   : > { %2697 = vst.msk [vmem:[#allocation3] sm:$0xff] %vm451_vm4, %v2674_v1  ;;  %2927 = vrot.lane.b32.xlu0 %v8153_v29, %s7078_s29  ;;  %6441 = vmatmul.mubr.msk.f32.gmra.mxu1 %vm731_vm10, %v8556_v20 }
 0x259   : > { %6443 = vmatprep.mubr.msk.f32.mxu1 %vm731_vm10, %v8525_v58  ;;  %6482 = vmatprep.subr.mxu1 %v8684_v0  ;;  %4168 = vst.msk [vmem:[#allocation2 + $0x31] sm:$0xff] %vm205_vm0, %v4160_v2  ;;  %v8784_v58 = vld [vmem:[#allocation2 + $0x42] sm:$0xff] }
 0x25a   : > { %v2636_v29 = vpop.permute.xlu1 %2635  ;;  %v2722_v5 = vpop.permute.xlu0 %2721  ;;  %6483 = vmatpush3.msra.mxu1 %v8684_v0  ;;  %6450 = vmatprep.subr.mxu0 %v8135_v3  ;;  %v1484_v2 = vld [vmem:[#allocation4] sm:$0xff] }
 0x25b   : > { %3605 = vrot.lane.b32.xlu1 %v8508_v48, %s7074_s7  ;;  %2654 = vst.msk [vmem:[#allocation3 + $0x28] sm:$0xff] %vm402_vm3, %v2636_v29  ;;  %6484 = vmatprep.subr.mxu1 %v8706_v6  ;;  %v1325_v29 = vld [vmem:[#allocation4 + $0x58] sm:$0xff] }
 0x25c   : > { %2745 = vst.msk [vmem:[#allocation3] sm:$0xff] %vm500_vm5, %v2722_v5  ;;  %3653 = vrot.lane.b32.xlu0 %v8510_v38, %s7075_s8  ;;  %6444 = vmatmul.mubr.msk.f32.gmra.mxu1 %vm731_vm10, %v8587_v31 }
 0x25d   : > { %6451 = vmatpush3.msra.mxu0 %v8135_v3  ;;  %6485 = vmatpush3.msra.mxu1 %v8706_v6  ;;  %v8750_v3 = vld [vmem:[%s9962_s1 + $0x50] sm:$0xff] }
 0x25e   : > { %v2676_v23 = vpop.permute.xlu1 %2675  ;;  %v2770_v16 = vpop.permute.xlu0 %2769  ;;  %6452 = vmatprep.subr.mxu0 %v8151_v60  ;;  %6486 = vmatprep.subr.mxu1 %v8722_v61 }
 0x25f   : > { %3607 = vrot.lane.b32.xlu1 %v8629_v7, %s7074_s7  ;;  %2698 = vst.msk [vmem:[#allocation3 + $0x8] sm:$0xff] %vm451_vm4, %v2676_v23  ;;  %6453 = vmatpush3.msra.mxu0 %v8151_v60  ;;  %v8762_v60 = vld [vmem:[%s9962_s1 + $0x48] sm:$0xff] }
 0x260   : > { %2793 = vst.msk [vmem:[#allocation3] sm:$0xff] %vm549_vm6, %v2770_v16  ;;  %3655 = vrot.lane.b32.xlu0 %v8631_v19, %s7075_s8  ;;  %6487 = vmatpush3.msra.mxu1 %v8722_v61 }
 0x261   : > { %6454 = vmatprep.subr.mxu0 %v8168_v50  ;;  %6488 = vmatprep.subr.mxu1 %v8735_v63 }
 0x262   : > { %v2724_v48 = vpop.permute.xlu1 %2723  ;;  %v2818_v38 = vpop.permute.xlu0 %2817  ;;  %6455 = vmatpush3.msra.mxu0 %v8168_v50  ;;  %6489 = vmatpush3.msra.mxu1 %v8735_v63 }
 0x263   : > { %3465 = vrot.lane.b32.xlu1 %v8629_v7, %s7071_s24  ;;  %2746 = vst.msk [vmem:[#allocation3 + $0x8] sm:$0xff] %vm500_vm5, %v2724_v48  ;;  %6456 = vmatprep.subr.mxu0 %v8192_v44 }
 0x264   : > { %2841 = vst.msk [vmem:[#allocation3] sm:$0xff] %vm599_vm7, %v2818_v38  ;;  %3467 = vrot.lane.b32.xlu0 %v8691_v51, %s7071_s24  ;;  %6490 = vmatprep.subr.mxu1 %v8750_v3  ;;  %v1487_v38 = vld [vmem:[#allocation4 + $0x18] sm:$0xff] }
 0x265   : > { %6457 = vmatpush3.msra.mxu0 %v8192_v44  ;;  %6491 = vmatpush3.msra.mxu1 %v8750_v3  ;;  %v8779_v44 = vld [vmem:[#allocation2 + $0x40] sm:$0xff] }
 0x266   : > { %v2772_v50 = vpop.permute.xlu1 %2771  ;;  %v2866_v26 = vpop.permute.xlu0 %2865  ;;  %6458 = vmatprep.subr.mxu0 %v8205_v17  ;;  %6492 = vmatprep.subr.mxu1 %v8762_v60  ;;  %4169 = vst.msk [vmem:[#allocation2 + $0x41] sm:$0xff] %vm205_vm0, %v4161_v8 }
 0x267   : > { %3701 = vrot.lane.b32.xlu1 %v8627_v52, %s7076_s9  ;;  %2794 = vst.msk [vmem:[#allocation3 + $0x8] sm:$0xff] %vm549_vm6, %v2772_v50  ;;  %6459 = vmatpush3.msra.mxu0 %v8205_v17  ;;  %v1324_v50 = vld [vmem:[#allocation4 + $0x50] sm:$0xff] }
 0x268   : > { %2889 = vst.msk [vmem:[#allocation3] sm:$0xff] %vm648_vm8, %v2866_v26  ;;  %3703 = vrot.lane.b32.xlu0 %v8699_v55, %s7076_s9  ;;  %6493 = vmatpush3.msra.mxu1 %v8762_v60 }
 0x269   : > { %6460 = vmatprep.subr.mxu0 %v8222_v18  ;;  %6536 = vmatprep.subr.mxu1 %v8641_v45 }
 0x26a   : > { %v2820_v17 = vpop.permute.xlu1 %2819  ;;  %v2914_v30 = vpop.permute.xlu0 %2913  ;;  %6461 = vmatpush3.msra.mxu0 %v8222_v18  ;;  %v8805_v18 = vld [vmem:[#allocation2] sm:$0xff] }
 0x26b   : > { %3513 = vrot.lane.b32.xlu1 %v8631_v19, %s7072_s5  ;;  %2842 = vst.msk [vmem:[#allocation3 + $0x8] sm:$0xff] %vm599_vm7, %v2820_v17  ;;  %6462 = vmatprep.subr.mxu0 %v8237_v46  ;;  %v1486_v17 = vld [vmem:[#allocation4 + $0x10] sm:$0xff] }
 0x26c   : > { %2937 = vst.msk [vmem:[#allocation3] sm:$0xff] %vm697_vm9, %v2914_v30  ;;  %3515 = vrot.lane.b32.xlu0 %v8701_v4, %s7072_s5  ;;  %6463 = vmatpush3.msra.mxu0 %v8237_v46 }
 0x26d   : > { %6506 = vmatprep.subr.mxu0 %v8250_v22 }
 0x26e   : > { %v2868_v21 = vpop.permute.xlu1 %2867  ;;  %v2916_v42 = vpop.permute.xlu0 %2915 }
 0x26f   : > { %3749 = vrot.lane.b32.xlu1 %v8629_v7, %s7077_s10  ;;  %2890 = vst.msk [vmem:[#allocation3 + $0x8] sm:$0xff] %vm648_vm8, %v2868_v21  ;;  %v8834_v7 = vld [vmem:[#allocation2 + $0x52] sm:$0xff]  ;;  %v1327_v21 = vld [vmem:[#allocation4 + $0x68] sm:$0xff] }
 0x270   : > { %3751 = vrot.lane.b32.xlu0 %v8691_v51, %s7077_s10  ;;  %2938 = vst.msk [vmem:[#allocation3 + $0x8] sm:$0xff] %vm697_vm9, %v2916_v42 }
 0x271   : > { %4170 = vst.msk [vmem:[#allocation2 + $0x51] sm:$0xff] %vm205_vm0, %v4162_v11  ;;  %v1326_v11 = vld [vmem:[#allocation4 + $0x60] sm:$0xff] }
 0x272   : > { %v2678_v20 = vpop.permute.xlu1 %2677  ;;  %v2726_v10 = vpop.permute.xlu0 %2725 }
 0x273   : > { %v8807_v41 = vld [vmem:[#allocation3] sm:$0xff]  ;;  %3561 = vrot.lane.b32.xlu1 %v8699_v55, %s7073_s6  ;;  %2699 = vst.msk [vmem:[#allocation3 + $0x10] sm:$0xff] %vm451_vm4, %v2678_v20 }
 0x274   : > { %6494 = vmatprep.mubr.msk.f32.mxu1 %vm731_vm10, %v8807_v41  ;;  %3437 = vst.msk [vmem:[#allocation3] sm:$0xff] %vm205_vm0, %v8805_v18  ;;  %3563 = vrot.lane.b32.xlu0 %v8779_v44, %s7073_s6 }
 0x275   : > { %2747 = vst.msk [vmem:[#allocation3 + $0x10] sm:$0xff] %vm500_vm5, %v2726_v10  ;;  %6464 = vmatprep.mubr.msk.f32.mxu0 %vm731_vm10, %v8807_v41 }
 0x276   : > { %v2680_v46 = vpop.permute.xlu1 %2679  ;;  %v2774_v31 = vpop.permute.xlu0 %2773 }
 0x277   : > { %3797 = vrot.lane.b32.xlu1 %v8631_v19, %s7078_s29  ;;  %2700 = vst.msk [vmem:[#allocation3 + $0x18] sm:$0xff] %vm451_vm4, %v2680_v46  ;;  %v8825_v36 = vld [vmem:[#allocation3 + $0x8] sm:$0xff] }
 0x278   : > { %2795 = vst.msk [vmem:[#allocation3 + $0x10] sm:$0xff] %vm549_vm6, %v2774_v31  ;;  %3799 = vrot.lane.b32.xlu0 %v8701_v4, %s7078_s29  ;;  %6495 = vmatmul.mubr.msk.f32.vlgmr.msra.gmra.mxu1 %vm731_vm10, %v8825_v36  ;;  %v1323_v19 = vld [vmem:[#allocation4 + $0x48] sm:$0xff] }
 0x279   : > { %3438 = vst.msk [vmem:[#allocation3 + $0x8] sm:$0xff] %vm205_vm0, %v8512_v39  ;;  %6465 = vmatmul.mubr.msk.f32.vlgmr.msra.gmra.mxu0 %vm731_vm10, %v8825_v36  ;;  %6537 = vmatpush3.msra.mxu1 %v8641_v45 }
 0x27a   : > { %v2728_v35 = vpop.permute.xlu1 %2727  ;;  %v2822_v49 = vpop.permute.xlu0 %2821  ;;  %6507 = vmatpush3.msra.mxu0 %v8250_v22  ;;  %6538 = vmatprep.subr.mxu1 %v8656_v25 }
 0x27b   : > { %3609 = vrot.lane.b32.xlu1 %v8691_v51, %s7074_s7  ;;  %2748 = vst.msk [vmem:[#allocation3 + $0x18] sm:$0xff] %vm500_vm5, %v2728_v35  ;;  %v6316_v39 = vpop.f32.mrf.mxu1  ;;  %v6346_v24 = vpop.f32.mrf.mxu0  ;;  %6508 = vmatprep.subr.mxu0 %v8485_v27  ;;  %v1488_v35 = vld [vmem:[#allocation4 + $0x20] sm:$0xff] }
 0x27c   : > { %2843 = vst.msk [vmem:[#allocation3 + $0x10] sm:$0xff] %vm599_vm7, %v2822_v49  ;;  %3611 = vrot.lane.b32.xlu0 %v8782_v9, %s7074_s7  ;;  %v1469_v45 = vadd.f32 %v6316_v39, %v1323_v19  ;;  %v1608_v22 = vadd.f32 %v6346_v24, %v1485_v47  ;;  %6509 = vmatpush3.msra.mxu0 %v8485_v27  ;;  %v1329_v39 = vld [vmem:[#allocation4 + $0x78] sm:$0xff] }
 0x27d   : > { %v1429_v1 = vpop.f32.mrf.mxu1  ;;  %v1568_v51 = vpop.f32.mrf.mxu0  ;;  %6510 = vmatprep.subr.mxu0 %v8498_v40  ;;  %6539 = vmatpush3.msra.mxu1 %v8656_v25 }
 0x27e   : > { %1477 = vst.msk [vmem:[#allocation4 + $0x48] sm:$0xff] %vm205_vm0, %v1469_v45  ;;  %1616 = vst.msk [vmem:[#allocation4 + $0x8] sm:$0xff] %vm205_vm0, %v1608_v22  ;;  %v1468_v5 = vadd.f32 %v1429_v1, %v1322_v56  ;;  %v1607_v23 = vadd.f32 %v1568_v51, %v1484_v2  ;;  %v2776_v16 = vpop.permute.xlu1 %2775  ;;  %v2824_v48 = vpop.permute.xlu0 %2823  ;;  %6511 = vmatpush3.msra.mxu0 %v8498_v40  ;;  %6540 = vmatprep.subr.mxu1 %v8671_v28  ;;  %v1328_v1 = vld [vmem:[#allocation4 + $0x70] sm:$0xff]  ;;  %v8896_v2 = vld [vmem:[#allocation2 + $0x60] sm:$0xff]  ;;  %v4163_v51 = vmul.f32 0.0, %v8370_v32 }
 0x27f   : > { %3469 = vrot.lane.b32.xlu1 %v8782_v9, %s7071_s24  ;;  %2796 = vst.msk [vmem:[#allocation3 + $0x18] sm:$0xff] %vm549_vm6, %v2776_v16  ;;  %v6319_v27 = vpop.f32.mrf.mxu1  ;;  %v6349_v25 = vpop.f32.mrf.mxu0  ;;  %6512 = vmatprep.subr.mxu0 %v8535_v14  ;;  %v8912_v16 = vld [vmem:[%s9962_s1 + $0xd0] sm:$0xff] }
 0x280   : > { %3471 = vrot.lane.b32.xlu0 %v8832_v12, %s7071_s24  ;;  %1476 = vst.msk [vmem:[#allocation4 + $0x40] sm:$0xff] %vm205_vm0, %v1468_v5  ;;  %1615 = vst.msk [vmem:[#allocation4] sm:$0xff] %vm205_vm0, %v1607_v23  ;;  %v1471_v40 = vadd.f32 %v6319_v27, %v1325_v29  ;;  %v1610_v26 = vadd.f32 %v6349_v25, %v1487_v38  ;;  %6513 = vmatpush3.msra.mxu0 %v8535_v14  ;;  %v8904_v5 = vld [vmem:[#allocation2 + $0x61] sm:$0xff] }
 0x281   : > { %2844 = vst.msk [vmem:[#allocation3 + $0x18] sm:$0xff] %vm599_vm7, %v2824_v48  ;;  %v1439_v8 = vpop.f32.mrf.mxu1  ;;  %v1578_v30 = vpop.f32.mrf.mxu0  ;;  %6514 = vmatprep.subr.mxu0 %v8551_v15  ;;  %6541 = vmatpush3.msra.mxu1 %v8671_v28  ;;  %v1489_v28 = vld [vmem:[#allocation4 + $0x28] sm:$0xff]  ;;  %v1490_v48 = vld [vmem:[#allocation4 + $0x30] sm:$0xff] }
 0x282   : > { %1479 = vst.msk [vmem:[#allocation4 + $0x58] sm:$0xff] %vm205_vm0, %v1471_v40  ;;  %1618 = vst.msk [vmem:[#allocation4 + $0x18] sm:$0xff] %vm205_vm0, %v1610_v26  ;;  %v1470_v42 = vadd.f32 %v1439_v8, %v1324_v50  ;;  %v1609_v20 = vadd.f32 %v1578_v30, %v1486_v17  ;;  %v2682_v10 = vpop.permute.xlu1 %2681  ;;  %v2684_v46 = vpop.permute.xlu0 %2683  ;;  %6515 = vmatpush3.msra.mxu0 %v8551_v15  ;;  %6542 = vmatprep.subr.mxu1 %v8684_v0  ;;  %v8906_v23 = vld [vmem:[#allocation2 + $0x62] sm:$0xff]  ;;  %v8971_v17 = vld [vmem:[#allocation2 + $0x70] sm:$0xff] }
 0x283   : > { %3657 = vrot.lane.b32.xlu1 %v8701_v4, %s7075_s8  ;;  %2701 = vst.msk [vmem:[#allocation3 + $0x20] sm:$0xff] %vm451_vm4, %v2682_v10  ;;  %2702 = vst.msk [vmem:[#allocation3 + $0x28] sm:$0xff] %vm451_vm4, %v2684_v46  ;;  %v6322_v14 = vpop.f32.mrf.mxu1  ;;  %v6352_v31 = vpop.f32.mrf.mxu0  ;;  %6516 = vmatprep.subr.mxu0 %v8573_v59  ;;  %v4165_v10 = vmul.f32 0.0, %v8440_v34  ;;  %v9002_v46 = vld [vmem:[#allocation2 + $0x81] sm:$0xff] }
 0x284   : > { %3659 = vrot.lane.b32.xlu0 %v8784_v58, %s7075_s8  ;;  %1478 = vst.msk [vmem:[#allocation4 + $0x50] sm:$0xff] %vm205_vm0, %v1470_v42  ;;  %1617 = vst.msk [vmem:[#allocation4 + $0x10] sm:$0xff] %vm205_vm0, %v1609_v20  ;;  %v1473_v15 = vadd.f32 %v6322_v14, %v1327_v21  ;;  %v1612_v19 = vadd.f32 %v6352_v31, %v1489_v28  ;;  %6517 = vmatpush3.msra.mxu0 %v8573_v59  ;;  %v9004_v14 = vld [vmem:[#allocation2 + $0x82] sm:$0xff] }
 0x285   : > { %v1449_v4 = vpop.f32.mrf.mxu1  ;;  %v1588_v49 = vpop.f32.mrf.mxu0  ;;  %6518 = vmatprep.subr.mxu0 %v8585_v54  ;;  %6543 = vmatpush3.msra.mxu1 %v8684_v0  ;;  %v1491_v0 = vld [vmem:[#allocation4 + $0x38] sm:$0xff]  ;;  %4171 = vst.msk [vmem:[#allocation2 + $0x61] sm:$0xff] %vm205_vm0, %v4163_v51 }
 0x286   : > { %1481 = vst.msk [vmem:[#allocation4 + $0x68] sm:$0xff] %vm205_vm0, %v1473_v15  ;;  %1620 = vst.msk [vmem:[#allocation4 + $0x28] sm:$0xff] %vm205_vm0, %v1612_v19  ;;  %v1472_v47 = vadd.f32 %v1449_v4, %v1326_v11  ;;  %v1611_v24 = vadd.f32 %v1588_v49, %v1488_v35  ;;  %v2870_v56 = vpop.permute.xlu1 %2869  ;;  %v2872_v45 = vpop.permute.xlu0 %2871  ;;  %6519 = vmatpush3.msra.mxu0 %v8585_v54  ;;  %6544 = vmatprep.subr.mxu1 %v8706_v6  ;;  %v9072_v51 = vld [vmem:[#allocation2 + $0x91] sm:$0xff] }
 0x287   : > { %3517 = vrot.lane.b32.xlu1 %v8784_v58, %s7072_s5  ;;  %2891 = vst.msk [vmem:[#allocation3 + $0x10] sm:$0xff] %vm648_vm8, %v2870_v56  ;;  %2892 = vst.msk [vmem:[#allocation3 + $0x18] sm:$0xff] %vm648_vm8, %v2872_v45  ;;  %v6325_v59 = vpop.f32.mrf.mxu1  ;;  %v6355_v22 = vpop.f32.mrf.mxu0  ;;  %6520 = vmatprep.subr.mxu0 %v8607_v62 }
 0x288   : > { %3519 = vrot.lane.b32.xlu0 %v8834_v7, %s7072_s5  ;;  %1480 = vst.msk [vmem:[#allocation4 + $0x60] sm:$0xff] %vm205_vm0, %v1472_v47  ;;  %1619 = vst.msk [vmem:[#allocation4 + $0x20] sm:$0xff] %vm205_vm0, %v1611_v24  ;;  %v1475_v54 = vadd.f32 %v6325_v59, %v1329_v39  ;;  %v1614_v29 = vadd.f32 %v6355_v22, %v1491_v0  ;;  %6521 = vmatpush3.msra.mxu0 %v8607_v62  ;;  %v4191_v24 = vld [vmem:[#allocation2 + $0x11] sm:$0xff] }
 0x289   : > { %v1459_v32 = vpop.f32.mrf.mxu1  ;;  %v1598_v27 = vpop.f32.mrf.mxu0  ;;  %6522 = vmatprep.subr.mxu0 %v8620_v13  ;;  %6545 = vmatpush3.msra.mxu1 %v8706_v6  ;;  %v9064_v22 = vld [vmem:[#allocation2 + $0x12] sm:$0xff] }
 0x28a   : > { %1483 = vst.msk [vmem:[#allocation4 + $0x78] sm:$0xff] %vm205_vm0, %v1475_v54  ;;  %1622 = vst.msk [vmem:[#allocation4 + $0x38] sm:$0xff] %vm205_vm0, %v1614_v29  ;;  %v1474_v38 = vadd.f32 %v1459_v32, %v1328_v1  ;;  %v1613_v62 = vadd.f32 %v1598_v27, %v1490_v48  ;;  %v2730_v25 = vpop.permute.xlu1 %2729  ;;  %v2732_v50 = vpop.permute.xlu0 %2731  ;;  %6523 = vmatpush3.msra.mxu0 %v8620_v13  ;;  %6546 = vmatprep.subr.mxu1 %v8722_v61  ;;  %v9080_v54 = vld [vmem:[#allocation2 + $0x10] sm:$0xff] }
 0x28b   : > { %3705 = vrot.lane.b32.xlu1 %v8779_v44, %s7076_s9  ;;  %2749 = vst.msk [vmem:[#allocation3 + $0x20] sm:$0xff] %vm500_vm5, %v2730_v25  ;;  %2750 = vst.msk [vmem:[#allocation3 + $0x28] sm:$0xff] %vm500_vm5, %v2732_v50  ;;  %6566 = vmatprep.subr.mxu0 %v8912_v16 }
 0x28c   : > { %3707 = vrot.lane.b32.xlu0 %v8836_v37, %s7076_s9  ;;  %1482 = vst.msk [vmem:[#allocation4 + $0x70] sm:$0xff] %vm205_vm0, %v1474_v38  ;;  %1621 = vst.msk [vmem:[#allocation4 + $0x30] sm:$0xff] %vm205_vm0, %v1613_v62  ;;  %6547 = vmatpush3.msra.mxu1 %v8722_v61  ;;  %v9111_v38 = vld [vmem:[%s9962_s1 + $0xc8] sm:$0xff] }
 0x28d   : > { %6548 = vmatprep.subr.mxu1 %v8735_v63  ;;  %v9117_v62 = vld [vmem:[#allocation2 + $0x21] sm:$0xff] }
 0x28e   : > { %v2918_v13 = vpop.permute.xlu1 %2917  ;;  %v2920_v6 = vpop.permute.xlu0 %2919  ;;  %6549 = vmatpush3.msra.mxu1 %v8735_v63 }
 0x28f   : > { %3565 = vrot.lane.b32.xlu1 %v8836_v37, %s7073_s6  ;;  %2939 = vst.msk [vmem:[#allocation3 + $0x10] sm:$0xff] %vm697_vm9, %v2918_v13  ;;  %2940 = vst.msk [vmem:[#allocation3 + $0x18] sm:$0xff] %vm697_vm9, %v2920_v6  ;;  %6550 = vmatprep.subr.mxu1 %v8750_v3  ;;  %v9135_v13 = vld [vmem:[#allocation2 + $0x31] sm:$0xff] }
 0x290   : > { %3567 = vrot.lane.b32.xlu0 %v8896_v2, %s7073_s6  ;;  %6551 = vmatpush3.msra.mxu1 %v8750_v3 }
 0x291   : > { %6552 = vmatprep.subr.mxu1 %v8762_v60 }
 0x292   : > { %v2778_v61 = vpop.permute.xlu1 %2777  ;;  %v2780_v40 = vpop.permute.xlu0 %2779  ;;  %6553 = vmatpush3.msra.mxu1 %v8762_v60  ;;  %v4164_v60 = vmul.f32 0.0, %v8405_v53 }
 0x293   : > { %3753 = vrot.lane.b32.xlu1 %v8782_v9, %s7077_s10  ;;  %2797 = vst.msk [vmem:[#allocation3 + $0x20] sm:$0xff] %vm549_vm6, %v2778_v61  ;;  %2798 = vst.msk [vmem:[#allocation3 + $0x28] sm:$0xff] %vm549_vm6, %v2780_v40  ;;  %6596 = vmatprep.subr.mxu1 %v8912_v16  ;;  %v3452_v9 = vld [vmem:[#allocation2 + $0x71] sm:$0xff] }
 0x294   : > { %3755 = vrot.lane.b32.xlu0 %v8832_v12, %s7077_s10  ;;  %v9148_v61 = vld [vmem:[%s9962_s1 + $0xb8] sm:$0xff] }
 0x296   : > { %v2638_v63 = vpop.permute.xlu1 %2637  ;;  %v2640_v3 = vpop.permute.xlu0 %2639  ;;  %v8950_v26 = vld [vmem:[#allocation3 + $0x10] sm:$0xff]  ;;  %v8952_v8 = vld [vmem:[#allocation3 + $0x18] sm:$0xff] }
 0x297   : > { %3613 = vrot.lane.b32.xlu1 %v8832_v12, %s7074_s7  ;;  %2655 = vst.msk [vmem:[#allocation3 + $0x30] sm:$0xff] %vm402_vm3, %v2638_v63  ;;  %2656 = vst.msk [vmem:[#allocation3 + $0x38] sm:$0xff] %vm402_vm3, %v2640_v3  ;;  %6467 = vmatprep.mubr.msk.f32.mxu0 %vm731_vm10, %v8950_v26  ;;  %v8969_v12 = vld [vmem:[#allocation2 + $0x72] sm:$0xff]  ;;  %v9153_v63 = vld [vmem:[#allocation2 + $0x22] sm:$0xff] }
 0x298   : > { %3439 = vst.msk [vmem:[#allocation3 + $0x10] sm:$0xff] %vm205_vm0, %v8627_v52  ;;  %3440 = vst.msk [vmem:[#allocation3 + $0x18] sm:$0xff] %vm205_vm0, %v8699_v55  ;;  %3473 = vrot.lane.b32.xlu0 %v8904_v5, %s7071_s24  ;;  %6497 = vmatprep.mubr.msk.f32.mxu1 %vm731_vm10, %v8950_v26 }
 0x299   : > { %6498 = vmatmul.mubr.msk.f32.gmra.mxu1 %vm731_vm10, %v8952_v8  ;;  %6468 = vmatmul.mubr.msk.f32.gmra.mxu0 %vm731_vm10, %v8952_v8  ;;  %4172 = vst.msk [vmem:[#allocation2 + $0x71] sm:$0xff] %vm205_vm0, %v4164_v60 }
 0x29a   : > { %v2826_v53 = vpop.permute.xlu1 %2825  ;;  %v2828_v52 = vpop.permute.xlu0 %2827 }
 0x29b   : > { %3801 = vrot.lane.b32.xlu1 %v8784_v58, %s7078_s29  ;;  %2845 = vst.msk [vmem:[#allocation3 + $0x20] sm:$0xff] %vm599_vm7, %v2826_v53  ;;  %2846 = vst.msk [vmem:[#allocation3 + $0x28] sm:$0xff] %vm599_vm7, %v2828_v52  ;;  %v9195_v53 = vld [vmem:[%s9962_s1 + $0x98] sm:$0xff] }
 0x29c   : > { %3661 = vrot.lane.b32.xlu0 %v8834_v7, %s7075_s8 }
 0x29e   : > { %v2686_v55 = vpop.permute.xlu1 %2685  ;;  %v2688_v30 = vpop.permute.xlu0 %2687 }
 0x29f   : > { %3615 = vrot.lane.b32.xlu1 %v8904_v5, %s7074_s7  ;;  %2703 = vst.msk [vmem:[#allocation3 + $0x30] sm:$0xff] %vm451_vm4, %v2686_v55  ;;  %2704 = vst.msk [vmem:[#allocation3 + $0x38] sm:$0xff] %vm451_vm4, %v2688_v30  ;;  %v9197_v55 = vld [vmem:[#allocation2 + $0x30] sm:$0xff] }
 0x2a0   : > { %3475 = vrot.lane.b32.xlu0 %v3452_v9, %s7071_s24 }
 0x2a2   : > { %v2874_v21 = vpop.permute.xlu1 %2873  ;;  %v2876_v58 = vpop.permute.xlu0 %2875 }
 0x2a3   : > { %3803 = vrot.lane.b32.xlu1 %v8834_v7, %s7078_s29  ;;  %2893 = vst.msk [vmem:[#allocation3 + $0x20] sm:$0xff] %vm648_vm8, %v2874_v21  ;;  %2894 = vst.msk [vmem:[#allocation3 + $0x28] sm:$0xff] %vm648_vm8, %v2876_v58  ;;  %v3548_v7 = vld [vmem:[#allocation2 + $0x80] sm:$0xff]  ;;  %v9205_v21 = vld [vmem:[%s9962_s1 + $0x90] sm:$0xff] }
 0x2a4   : > { %3663 = vrot.lane.b32.xlu0 %v8906_v23, %s7075_s8  ;;  %4173 = vst.msk [vmem:[#allocation2 + $0x81] sm:$0xff] %vm205_vm0, %v4165_v10 }
 0x2a7   : > { %v2734_v42 = vpop.permute.xlu1 %2733  ;;  %v2736_v20 = vpop.permute.xlu0 %2735  ;;  %3521 = vrot.lane.b32.xlu1 %v8906_v23, %s7072_s5 }
 0x2a8   : > { %2751 = vst.msk [vmem:[#allocation3 + $0x30] sm:$0xff] %vm500_vm5, %v2734_v42  ;;  %2752 = vst.msk [vmem:[#allocation3 + $0x38] sm:$0xff] %vm500_vm5, %v2736_v20  ;;  %3523 = vrot.lane.b32.xlu0 %v8969_v12, %s7072_s5  ;;  %v9214_v42 = vld [vmem:[#allocation2 + $0x40] sm:$0xff] }
 0x2ab   : > { %v2922_v28 = vpop.permute.xlu1 %2921  ;;  %v2924_v31 = vpop.permute.xlu0 %2923  ;;  %3709 = vrot.lane.b32.xlu1 %v8896_v2, %s7076_s9 }
 0x2ac   : > { %2941 = vst.msk [vmem:[#allocation3 + $0x20] sm:$0xff] %vm697_vm9, %v2922_v28  ;;  %2942 = vst.msk [vmem:[#allocation3 + $0x28] sm:$0xff] %vm697_vm9, %v2924_v31  ;;  %3711 = vrot.lane.b32.xlu0 %v8971_v17, %s7076_s9  ;;  %v9238_v31 = vld [vmem:[#allocation2 + $0x41] sm:$0xff] }
 0x2af   : > { %v2782_v34 = vpop.permute.xlu1 %2781  ;;  %3569 = vrot.lane.b32.xlu1 %v8971_v17, %s7073_s6  ;;  %v2784_v11 = vpop.permute.xlu0 %2783 }
 0x2b0   : > { %2799 = vst.msk [vmem:[#allocation3 + $0x30] sm:$0xff] %vm549_vm6, %v2782_v34  ;;  %3571 = vrot.lane.b32.xlu0 %v3548_v7, %s7073_s6  ;;  %2800 = vst.msk [vmem:[#allocation3 + $0x38] sm:$0xff] %vm549_vm6, %v2784_v11  ;;  %v2070_v11 = vld [vmem:[#allocation4 + $0x88] sm:$0xff] }
 0x2b3   : > { %v9018_v15 = vld [vmem:[#allocation3 + $0x20] sm:$0xff]  ;;  %v9020_v19 = vld [vmem:[#allocation3 + $0x28] sm:$0xff]  ;;  %3757 = vrot.lane.b32.xlu1 %v8904_v5, %s7077_s10  ;;  %v3462_v4 = vpop.permute.xlu1 %3461 }
 0x2b4   : > { %6470 = vmatprep.mubr.msk.f32.mxu0 %vm731_vm10, %v9018_v15  ;;  %3441 = vst.msk [vmem:[#allocation3 + $0x20] sm:$0xff] %vm205_vm0, %v8779_v44  ;;  %3442 = vst.msk [vmem:[#allocation3 + $0x28] sm:$0xff] %vm205_vm0, %v8836_v37  ;;  %3759 = vrot.lane.b32.xlu0 %v3452_v9, %s7077_s10  ;;  %v3464_v35 = vpop.permute.xlu0 %3463  ;;  %v9082_v5 = vld [vmem:[#allocation2 + $0x20] sm:$0xff] }
 0x2b5   : > { %3485 = vst.msk [vmem:[#allocation3] sm:$0xff] %vm353_vm2, %v3462_v4  ;;  %6500 = vmatprep.mubr.msk.f32.mxu1 %vm731_vm10, %v9018_v15  ;;  %3486 = vst.msk [vmem:[#allocation3 + $0x8] sm:$0xff] %vm353_vm2, %v3464_v35  ;;  %6471 = vmatmul.mubr.msk.f32.gmra.mxu0 %vm731_vm10, %v9020_v19  ;;  %v2069_v35 = vld [vmem:[#allocation4 + $0x80] sm:$0xff] }
 0x2b6   : > { %6501 = vmatmul.mubr.msk.f32.gmra.mxu1 %vm731_vm10, %v9020_v19 }
 0x2b7   : > { %3617 = vrot.lane.b32.xlu1 %v3452_v9, %s7074_s7  ;;  %v9175_v9 = vld [vmem:[#allocation2 + $0x32] sm:$0xff] }
 0x2b8   : > { %3619 = vrot.lane.b32.xlu0 %v9002_v46, %s7074_s7  ;;  %v2830_v44 = vpop.permute.xlu1 %2829 }
 0x2b9   : > { %2847 = vst.msk [vmem:[#allocation3 + $0x30] sm:$0xff] %vm599_vm7, %v2830_v44  ;;  %v2832_v37 = vpop.permute.xlu0 %2831 }
 0x2ba   : > { %2848 = vst.msk [vmem:[#allocation3 + $0x38] sm:$0xff] %vm599_vm7, %v2832_v37 }
 0x2bb   : > { %3805 = vrot.lane.b32.xlu1 %v8906_v23, %s7078_s29 }
 0x2bc   : > { %3807 = vrot.lane.b32.xlu0 %v8969_v12, %s7078_s29 }
 0x2bd   : > { %v3510_v49 = vpop.permute.xlu1 %3509 }
 0x2be   : > { %3533 = vst.msk [vmem:[#allocation3] sm:$0xff] %vm402_vm3, %v3510_v49  ;;  %v3512_v39 = vpop.permute.xlu0 %3511 }
 0x2bf   : > { %3534 = vst.msk [vmem:[#allocation3 + $0x8] sm:$0xff] %vm402_vm3, %v3512_v39  ;;  %3665 = vrot.lane.b32.xlu1 %v8969_v12, %s7075_s8  ;;  %v9260_v39 = vld [vmem:[#allocation2 + $0x51] sm:$0xff] }
 0x2c0   : > { %3667 = vrot.lane.b32.xlu0 %v9004_v14, %s7075_s8 }
 0x2c1   : > { %v2878_v47 = vpop.permute.xlu1 %2877 }
 0x2c2   : > { %2895 = vst.msk [vmem:[#allocation3 + $0x30] sm:$0xff] %vm648_vm8, %v2878_v47  ;;  %v2880_v56 = vpop.permute.xlu0 %2879 }
 0x2c3   : > { %2896 = vst.msk [vmem:[#allocation3 + $0x38] sm:$0xff] %vm648_vm8, %v2880_v56  ;;  %4206 = vrot.lane.b32.xlu1 %v8523_v57, %s7071_s24 }
 0x2c4   : > { %4208 = vrot.lane.b32.xlu0 %v4191_v24, %s7071_s24 }
 0x2c5   : > { %v3558_v45 = vpop.permute.xlu1 %3557 }
 0x2c6   : > { %3581 = vst.msk [vmem:[#allocation3] sm:$0xff] %vm451_vm4, %v3558_v45  ;;  %v3560_v59 = vpop.permute.xlu0 %3559  ;;  %v2231_v45 = vld [vmem:[#allocation4 + $0x40] sm:$0xff] }
 0x2c7   : > { %3582 = vst.msk [vmem:[#allocation3 + $0x8] sm:$0xff] %vm451_vm4, %v3560_v59  ;;  %3713 = vrot.lane.b32.xlu1 %v3548_v7, %s7076_s9 }
 0x2c8   : > { %3715 = vrot.lane.b32.xlu0 %v8568_v33, %s7076_s9 }
 0x2c9   : > { %v2926_v0 = vpop.permute.xlu1 %2925 }
 0x2ca   : > { %2943 = vst.msk [vmem:[#allocation3 + $0x30] sm:$0xff] %vm697_vm9, %v2926_v0  ;;  %v2928_v1 = vpop.permute.xlu0 %2927  ;;  %v2072_v0 = vld [vmem:[#allocation4 + $0x98] sm:$0xff] }
 0x2cb   : > { %2944 = vst.msk [vmem:[#allocation3 + $0x38] sm:$0xff] %vm697_vm9, %v2928_v1  ;;  %4254 = vrot.lane.b32.xlu1 %v8599_v43, %s7072_s5 }
 0x2cc   : > { %4256 = vrot.lane.b32.xlu0 %v9064_v22, %s7072_s5 }
 0x2cd   : > { %v3606_v57 = vpop.permute.xlu1 %3605 }
 0x2ce   : > { %3629 = vst.msk [vmem:[#allocation3] sm:$0xff] %vm500_vm5, %v3606_v57  ;;  %v3654_v33 = vpop.permute.xlu0 %3653  ;;  %v2234_v57 = vld [vmem:[#allocation4 + $0x58] sm:$0xff] }
 0x2cf   : > { %3677 = vst.msk [vmem:[#allocation3] sm:$0xff] %vm549_vm6, %v3654_v33  ;;  %3761 = vrot.lane.b32.xlu1 %v9002_v46, %s7077_s10 }
 0x2d0   : > { %3763 = vrot.lane.b32.xlu0 %v9072_v51, %s7077_s10 }
 0x2d1   : > { %v3608_v43 = vpop.permute.xlu1 %3607  ;;  %v2951_v29 = vld [vmem:[#allocation3 + $0x30] sm:$0xff] }
 0x2d2   : > { %3630 = vst.msk [vmem:[#allocation3 + $0x8] sm:$0xff] %vm500_vm5, %v3608_v43  ;;  %v3656_v23 = vpop.permute.xlu0 %3655  ;;  %6473 = vmatprep.mubr.msk.f32.mxu0 %vm731_vm10, %v2951_v29  ;;  %6503 = vmatprep.mubr.msk.f32.mxu1 %vm731_vm10, %v2951_v29  ;;  %v2952_v32 = vld [vmem:[#allocation3 + $0x38] sm:$0xff] }
 0x2d3   : > { %3443 = vst.msk [vmem:[#allocation3 + $0x30] sm:$0xff] %vm205_vm0, %v8896_v2  ;;  %4302 = vrot.lane.b32.xlu1 %v9080_v54, %s7073_s6  ;;  %6474 = vmatmul.mubr.msk.f32.gmra.mxu0 %vm731_vm10, %v2952_v32  ;;  %3444 = vst.msk [vmem:[#allocation3 + $0x38] sm:$0xff] %vm205_vm0, %v8971_v17  ;;  %v9100_v2 = vld [vmem:[#allocation2 + $0x92] sm:$0xff]  ;;  %v9183_v17 = vld [vmem:[%s9962_s1 + $0xa0] sm:$0xff] }
 0x2d4   : > { %3678 = vst.msk [vmem:[#allocation3 + $0x8] sm:$0xff] %vm549_vm6, %v3656_v23  ;;  %4304 = vrot.lane.b32.xlu0 %v9082_v5, %s7073_s6  ;;  %6504 = vmatmul.mubr.msk.f32.gmra.mxu1 %vm731_vm10, %v2952_v32 }
 0x2d5   : > { %6524 = vmatprep.mubr.msk.f32.mxu0 %vm731_vm10, %v8807_v41  ;;  %v3466_v48 = vpop.permute.xlu1 %3465 }
 0x2d6   : > { %3487 = vst.msk [vmem:[#allocation3 + $0x10] sm:$0xff] %vm353_vm2, %v3466_v48  ;;  %v3468_v27 = vpop.permute.xlu0 %3467 }
 0x2d7   : > { %3488 = vst.msk [vmem:[#allocation3 + $0x18] sm:$0xff] %vm353_vm2, %v3468_v27  ;;  %3809 = vrot.lane.b32.xlu1 %v9004_v14, %s7078_s29  ;;  %6525 = vmatmul.mubr.msk.f32.vlgmr.msra.gmra.mxu0 %vm731_vm10, %v8825_v36  ;;  %v9129_v36 = vld [vmem:[%s9962_s1 + $0xc0] sm:$0xff] }
 0x2d8   : > { %3811 = vrot.lane.b32.xlu0 %v9100_v2, %s7078_s29  ;;  %6527 = vmatprep.mubr.msk.f32.mxu0 %vm731_vm10, %v8950_v26  ;;  %v9161_v26 = vld [vmem:[%s9962_s1 + $0xb0] sm:$0xff] }
 0x2d9   : > { %v3702_v41 = vpop.permute.xlu1 %3701  ;;  %6567 = vmatpush3.msra.mxu0 %v8912_v16 }
 0x2da   : > { %3725 = vst.msk [vmem:[#allocation3] sm:$0xff] %vm599_vm7, %v3702_v41  ;;  %v3704_v25 = vpop.permute.xlu0 %3703  ;;  %6568 = vmatprep.subr.mxu0 %v9111_v38  ;;  %v2233_v41 = vld [vmem:[#allocation4 + $0x50] sm:$0xff] }
 0x2db   : > { %3726 = vst.msk [vmem:[#allocation3 + $0x8] sm:$0xff] %vm599_vm7, %v3704_v25  ;;  %4350 = vrot.lane.b32.xlu1 %v4191_v24, %s7074_s7  ;;  %6528 = vmatmul.mubr.msk.f32.gmra.mxu0 %vm731_vm10, %v8952_v8  ;;  %v9173_v8 = vld [vmem:[%s9962_s1 + $0xa8] sm:$0xff] }
 0x2dc   : > { %4352 = vrot.lane.b32.xlu0 %v9117_v62, %s7074_s7  ;;  %6530 = vmatprep.mubr.msk.f32.mxu0 %vm731_vm10, %v9018_v15  ;;  %v2074_v25 = vld [vmem:[#allocation4 + $0xa8] sm:$0xff] }
 0x2dd   : > { %v3514_v50 = vpop.permute.xlu1 %3513  ;;  %6569 = vmatpush3.msra.mxu0 %v9111_v38 }
 0x2de   : > { %3535 = vst.msk [vmem:[#allocation3 + $0x10] sm:$0xff] %vm402_vm3, %v3514_v50  ;;  %v3516_v6 = vpop.permute.xlu0 %3515  ;;  %6570 = vmatprep.subr.mxu0 %v9129_v36 }
 0x2df   : > { %3536 = vst.msk [vmem:[#allocation3 + $0x18] sm:$0xff] %vm402_vm3, %v3516_v6  ;;  %4210 = vrot.lane.b32.xlu1 %v9117_v62, %s7071_s24  ;;  %6531 = vmatmul.mubr.msk.f32.gmra.mxu0 %vm731_vm10, %v9020_v19  ;;  %v2232_v19 = vld [vmem:[#allocation4 + $0x48] sm:$0xff]  ;;  %v9291_v6 = vld [vmem:[#allocation2 + $0x52] sm:$0xff] }
 0x2e0   : > { %4212 = vrot.lane.b32.xlu0 %v9135_v13, %s7071_s24  ;;  %6533 = vmatprep.mubr.msk.f32.mxu0 %vm731_vm10, %v2951_v29 }
 0x2e1   : > { %v3750_v40 = vpop.permute.xlu1 %3749  ;;  %6571 = vmatpush3.msra.mxu0 %v9129_v36 }
 0x2e2   : > { %3773 = vst.msk [vmem:[#allocation3] sm:$0xff] %vm648_vm8, %v3750_v40  ;;  %v3752_v3 = vpop.permute.xlu0 %3751  ;;  %6572 = vmatprep.subr.mxu0 %v9148_v61 }
 0x2e3   : > { %3774 = vst.msk [vmem:[#allocation3 + $0x8] sm:$0xff] %vm648_vm8, %v3752_v3  ;;  %4398 = vrot.lane.b32.xlu1 %v9064_v22, %s7075_s8  ;;  %6534 = vmatmul.mubr.msk.f32.gmra.mxu0 %vm731_vm10, %v2952_v32  ;;  %v9276_v32 = vld [vmem:[#allocation2 + $0x42] sm:$0xff] }
 0x2e4   : > { %4400 = vrot.lane.b32.xlu0 %v9153_v63, %s7075_s8  ;;  %6573 = vmatpush3.msra.mxu0 %v9148_v61  ;;  %v2236_v3 = vld [vmem:[#allocation4 + $0x68] sm:$0xff] }
 0x2e5   : > { %v3562_v60 = vpop.permute.xlu1 %3561  ;;  %6574 = vmatprep.subr.mxu0 %v9161_v26 }
 0x2e6   : > { %3583 = vst.msk [vmem:[#allocation3 + $0x10] sm:$0xff] %vm451_vm4, %v3562_v60  ;;  %v3564_v12 = vpop.permute.xlu0 %3563  ;;  %6575 = vmatpush3.msra.mxu0 %v9161_v26 }
 0x2e7   : > { %3584 = vst.msk [vmem:[#allocation3 + $0x18] sm:$0xff] %vm451_vm4, %v3564_v12  ;;  %4258 = vrot.lane.b32.xlu1 %v9153_v63, %s7072_s5  ;;  %6576 = vmatprep.subr.mxu0 %v9173_v8  ;;  %v2235_v12 = vld [vmem:[#allocation4 + $0x60] sm:$0xff] }
 0x2e8   : > { %4260 = vrot.lane.b32.xlu0 %v9175_v9, %s7072_s5  ;;  %6577 = vmatpush3.msra.mxu0 %v9173_v8 }
 0x2e9   : > { %v3798_v52 = vpop.permute.xlu1 %3797  ;;  %6578 = vmatprep.subr.mxu0 %v9183_v17 }
 0x2ea   : > { %3821 = vst.msk [vmem:[#allocation3] sm:$0xff] %vm697_vm9, %v3798_v52  ;;  %v3800_v30 = vpop.permute.xlu0 %3799  ;;  %6579 = vmatpush3.msra.mxu0 %v9183_v17 }
 0x2eb   : > { %3822 = vst.msk [vmem:[#allocation3 + $0x8] sm:$0xff] %vm697_vm9, %v3800_v30  ;;  %4446 = vrot.lane.b32.xlu1 %v9082_v5, %s7076_s9  ;;  %6580 = vmatprep.subr.mxu0 %v9195_v53 }
 0x2ec   : > { %4448 = vrot.lane.b32.xlu0 %v9197_v55, %s7076_s9  ;;  %6581 = vmatpush3.msra.mxu0 %v9195_v53 }
 0x2ed   : > { %v3610_v58 = vpop.permute.xlu1 %3609  ;;  %6582 = vmatprep.subr.mxu0 %v9205_v21 }
 0x2ee   : > { %3631 = vst.msk [vmem:[#allocation3 + $0x10] sm:$0xff] %vm500_vm5, %v3610_v58  ;;  %v3612_v20 = vpop.permute.xlu0 %3611  ;;  %6583 = vmatpush3.msra.mxu0 %v9205_v21 }
 0x2ef   : > { %3632 = vst.msk [vmem:[#allocation3 + $0x18] sm:$0xff] %vm500_vm5, %v3612_v20  ;;  %4306 = vrot.lane.b32.xlu1 %v9197_v55, %s7073_s6 }
 0x2f0   : > { %4308 = vrot.lane.b32.xlu0 %v9214_v42, %s7073_s6 }
 0x2f1   : > { %v3470_v10 = vpop.permute.xlu1 %3469  ;;  %v3829_v7 = vld [vmem:[#allocation3] sm:$0xff] }
 0x2f2   : > { %3489 = vst.msk [vmem:[#allocation3 + $0x20] sm:$0xff] %vm353_vm2, %v3470_v10  ;;  %v3472_v46 = vpop.permute.xlu0 %3471  ;;  %6554 = vmatprep.mubr.msk.f32.mxu1 %vm731_vm10, %v3829_v7  ;;  %6584 = vmatprep.mubr.msk.f32.mxu0 %vm731_vm10, %v3829_v7  ;;  %v3830_v14 = vld [vmem:[#allocation3 + $0x8] sm:$0xff]  ;;  %v2075_v10 = vld [vmem:[#allocation4 + $0xb0] sm:$0xff] }
 0x2f3   : > { %4182 = vst.msk [vmem:[#allocation3] sm:$0xff] %vm205_vm0, %v8805_v18  ;;  %4494 = vrot.lane.b32.xlu1 %v9117_v62, %s7077_s10  ;;  %6555 = vmatmul.mubr.msk.f32.vlgmr.msra.gmra.mxu1 %vm731_vm10, %v3830_v14  ;;  %4183 = vst.msk [vmem:[#allocation3 + $0x8] sm:$0xff] %vm205_vm0, %v9080_v54  ;;  %v2071_v54 = vld [vmem:[#allocation4 + $0x90] sm:$0xff] }
 0x2f4   : > { %3490 = vst.msk [vmem:[#allocation3 + $0x28] sm:$0xff] %vm353_vm2, %v3472_v46  ;;  %4496 = vrot.lane.b32.xlu0 %v9135_v13, %s7077_s10  ;;  %6585 = vmatmul.mubr.msk.f32.vlgmr.msra.gmra.mxu0 %vm731_vm10, %v3830_v14  ;;  %v2238_v46 = vld [vmem:[#allocation4 + $0x78] sm:$0xff] }
 0x2f5   : > { %v3658_v28 = vpop.permute.xlu1 %3657  ;;  %6597 = vmatpush3.msra.mxu1 %v8912_v16 }
 0x2f6   : > { %3679 = vst.msk [vmem:[#allocation3 + $0x10] sm:$0xff] %vm549_vm6, %v3658_v28  ;;  %v3660_v18 = vpop.permute.xlu0 %3659  ;;  %6598 = vmatprep.subr.mxu1 %v9111_v38 }
 0x2f7   : > { %3680 = vst.msk [vmem:[#allocation3 + $0x18] sm:$0xff] %vm549_vm6, %v3660_v18  ;;  %4354 = vrot.lane.b32.xlu1 %v9135_v13, %s7074_s7  ;;  %6599 = vmatpush3.msra.mxu1 %v9111_v38 }
 0x2f8   : > { %4214 = vrot.lane.b32.xlu0 %v9238_v31, %s7071_s24  ;;  %6600 = vmatprep.subr.mxu1 %v9129_v36 }
 0x2f9   : > { %v3518_v34 = vpop.permute.xlu1 %3517  ;;  %6601 = vmatpush3.msra.mxu1 %v9129_v36 }
 0x2fa   : > { %3537 = vst.msk [vmem:[#allocation3 + $0x20] sm:$0xff] %vm402_vm3, %v3518_v34  ;;  %v3520_v16 = vpop.permute.xlu0 %3519  ;;  %6602 = vmatprep.subr.mxu1 %v9148_v61 }
 0x2fb   : > { %3538 = vst.msk [vmem:[#allocation3 + $0x28] sm:$0xff] %vm402_vm3, %v3520_v16  ;;  %4542 = vrot.lane.b32.xlu1 %v9153_v63, %s7078_s29  ;;  %v6376_v15 = vpop.f32.mrf.mxu1  ;;  %v6406_v4 = vpop.f32.mrf.mxu0  ;;  %6603 = vmatpush3.msra.mxu1 %v9148_v61  ;;  %v2073_v61 = vld [vmem:[#allocation4 + $0xa0] sm:$0xff] }
 0x2fc   : > { %4402 = vrot.lane.b32.xlu0 %v9175_v9, %s7075_s8  ;;  %v2216_v44 = vadd.f32 %v6376_v15, %v2070_v11  ;;  %v2354_v37 = vadd.f32 %v6406_v4, %v2232_v19  ;;  %6604 = vmatprep.subr.mxu1 %v9161_v26  ;;  %v2237_v11 = vld [vmem:[#allocation4 + $0x70] sm:$0xff]  ;;  %v9314_v19 = vld [vmem:[#allocation2 + $0x60] sm:$0xff] }
 0x2fd   : > { %v3706_v49 = vpop.permute.xlu1 %3705  ;;  %v2176_v47 = vpop.f32.mrf.mxu1  ;;  %6605 = vmatpush3.msra.mxu1 %v9161_v26 }
 0x2fe   : > { %3727 = vst.msk [vmem:[#allocation3 + $0x10] sm:$0xff] %vm599_vm7, %v3706_v49  ;;  %v3708_v24 = vpop.permute.xlu0 %3707  ;;  %v2215_v56 = vadd.f32 %v2176_v47, %v2069_v35  ;;  %v2314_v59 = vpop.f32.mrf.mxu0  ;;  %6606 = vmatprep.subr.mxu1 %v9173_v8 }
 0x2ff   : > { %2224 = vst.msk [vmem:[#allocation4 + $0x88] sm:$0xff] %vm205_vm0, %v2216_v44  ;;  %2362 = vst.msk [vmem:[#allocation4 + $0x48] sm:$0xff] %vm205_vm0, %v2354_v37  ;;  %4356 = vrot.lane.b32.xlu1 %v9238_v31, %s7074_s7  ;;  %v2353_v22 = vadd.f32 %v2314_v59, %v2231_v45  ;;  %6607 = vmatpush3.msra.mxu1 %v9173_v8  ;;  %v2370_v44 = vld [vmem:[#allocation4 + $0x8] sm:$0xff] }
 0x300   : > { %3728 = vst.msk [vmem:[#allocation3 + $0x18] sm:$0xff] %vm599_vm7, %v3708_v24  ;;  %4216 = vrot.lane.b32.xlu0 %v9260_v39, %s7071_s24  ;;  %v6379_v1 = vpop.f32.mrf.mxu1  ;;  %v6409_v33 = vpop.f32.mrf.mxu0  ;;  %6608 = vmatprep.subr.mxu1 %v9183_v17  ;;  %v2369_v24 = vld [vmem:[#allocation4] sm:$0xff] }
 0x301   : > { %2223 = vst.msk [vmem:[#allocation4 + $0x80] sm:$0xff] %vm205_vm0, %v2215_v56  ;;  %2361 = vst.msk [vmem:[#allocation4 + $0x40] sm:$0xff] %vm205_vm0, %v2353_v22  ;;  %v3566_v43 = vpop.permute.xlu1 %3565  ;;  %v2218_v29 = vadd.f32 %v6379_v1, %v2072_v0  ;;  %v2356_v23 = vadd.f32 %v6409_v33, %v2234_v57  ;;  %6609 = vmatpush3.msra.mxu1 %v9183_v17  ;;  %v2372_v0 = vld [vmem:[#allocation4 + $0x18] sm:$0xff] }
 0x302   : > { %3585 = vst.msk [vmem:[#allocation3 + $0x20] sm:$0xff] %vm451_vm4, %v3566_v43  ;;  %v3568_v48 = vpop.permute.xlu0 %3567  ;;  %v2186_v27 = vpop.f32.mrf.mxu1  ;;  %6610 = vmatprep.subr.mxu1 %v9195_v53  ;;  %v2371_v43 = vld [vmem:[#allocation4 + $0x10] sm:$0xff] }
 0x303   : > { %3586 = vst.msk [vmem:[#allocation3 + $0x28] sm:$0xff] %vm451_vm4, %v3568_v48  ;;  %4544 = vrot.lane.b32.xlu1 %v9175_v9, %s7078_s29  ;;  %v2217_v38 = vadd.f32 %v2186_v27, %v2071_v54  ;;  %v2324_v62 = vpop.f32.mrf.mxu0  ;;  %6611 = vmatpush3.msra.mxu1 %v9195_v53  ;;  %v2076_v53 = vld [vmem:[#allocation4 + $0xb8] sm:$0xff]  ;;  %v9333_v54 = vld [vmem:[#allocation2 + $0x61] sm:$0xff] }
 0x304   : > { %2226 = vst.msk [vmem:[#allocation4 + $0x98] sm:$0xff] %vm205_vm0, %v2218_v29  ;;  %2364 = vst.msk [vmem:[#allocation4 + $0x58] sm:$0xff] %vm205_vm0, %v2356_v23  ;;  %4404 = vrot.lane.b32.xlu0 %v9276_v32, %s7075_s8  ;;  %v2355_v36 = vadd.f32 %v2324_v62, %v2233_v41  ;;  %6612 = vmatprep.subr.mxu1 %v9205_v21  ;;  %v2374_v48 = vld [vmem:[#allocation4 + $0x28] sm:$0xff] }
 0x305   : > { %2225 = vst.msk [vmem:[#allocation4 + $0x90] sm:$0xff] %vm205_vm0, %v2217_v38  ;;  %v3754_v50 = vpop.permute.xlu1 %3753  ;;  %v6382_v13 = vpop.f32.mrf.mxu1  ;;  %6613 = vmatpush3.msra.mxu1 %v9205_v21  ;;  %v9303_v21 = vld [vmem:[#allocation2 + $0x50] sm:$0xff] }
 0x306   : > { %2363 = vst.msk [vmem:[#allocation4 + $0x50] sm:$0xff] %vm205_vm0, %v2355_v36  ;;  %v3756_v40 = vpop.permute.xlu0 %3755  ;;  %v2220_v63 = vadd.f32 %v6382_v13, %v2074_v25  ;;  %v6412_v26 = vpop.f32.mrf.mxu0 }
 0x307   : > { %3775 = vst.msk [vmem:[#allocation3 + $0x10] sm:$0xff] %vm648_vm8, %v3754_v50  ;;  %3776 = vst.msk [vmem:[#allocation3 + $0x18] sm:$0xff] %vm648_vm8, %v3756_v40  ;;  %v2358_v8 = vadd.f32 %v6412_v26, %v2236_v3  ;;  %4262 = vrot.lane.b32.xlu1 %v9276_v32, %s7072_s5  ;;  %v2196_v60 = vpop.f32.mrf.mxu1  ;;  %v2375_v3 = vld [vmem:[#allocation4 + $0x30] sm:$0xff] }
 0x308   : > { %2228 = vst.msk [vmem:[#allocation4 + $0xa8] sm:$0xff] %vm205_vm0, %v2220_v63  ;;  %4264 = vrot.lane.b32.xlu0 %v9291_v6, %s7072_s5  ;;  %v2219_v9 = vadd.f32 %v2196_v60, %v2073_v61  ;;  %v2334_v17 = vpop.f32.mrf.mxu0  ;;  %v4197_v63 = vld [vmem:[#allocation2 + $0x71] sm:$0xff] }
 0x309   : > { %2366 = vst.msk [vmem:[#allocation4 + $0x68] sm:$0xff] %vm205_vm0, %v2358_v8  ;;  %v2357_v52 = vadd.f32 %v2334_v17, %v2235_v12  ;;  %v3614_v30 = vpop.permute.xlu1 %3613  ;;  %v9371_v17 = vld [vmem:[#allocation2 + $0x72] sm:$0xff] }
 0x30a   : > { %2227 = vst.msk [vmem:[#allocation4 + $0xa0] sm:$0xff] %vm205_vm0, %v2219_v9  ;;  %v3474_v58 = vpop.permute.xlu0 %3473  ;;  %v6385_v20 = vpop.f32.mrf.mxu1  ;;  %v4387_v9 = vld [vmem:[#allocation2 + $0x62] sm:$0xff] }
 0x30b   : > { %3633 = vst.msk [vmem:[#allocation3 + $0x20] sm:$0xff] %vm500_vm5, %v3614_v30  ;;  %v2222_v7 = vadd.f32 %v6385_v20, %v2076_v53  ;;  %v6415_v14 = vpop.f32.mrf.mxu0  ;;  %4450 = vrot.lane.b32.xlu1 %v9214_v42, %s7076_s9  ;;  %v9378_v30 = vld [vmem:[#allocation2 + $0x70] sm:$0xff]  ;;  %v4293_v20 = vld [vmem:[#allocation2 + $0x80] sm:$0xff] }
 0x30c   : > { %2365 = vst.msk [vmem:[#allocation4 + $0x60] sm:$0xff] %vm205_vm0, %v2357_v52  ;;  %v2360_v28 = vadd.f32 %v6415_v14, %v2238_v46  ;;  %4452 = vrot.lane.b32.xlu0 %v9303_v21, %s7076_s9  ;;  %v2206_v18 = vpop.f32.mrf.mxu1 }
 0x30d   : > { %3491 = vst.msk [vmem:[#allocation3 + $0x30] sm:$0xff] %vm353_vm2, %v3474_v58  ;;  %v2221_v34 = vadd.f32 %v2206_v18, %v2075_v10  ;;  %v2344_v16 = vpop.f32.mrf.mxu0  ;;  %v3802_v15 = vpop.permute.xlu1 %3801  ;;  %v4341_v18 = vld [vmem:[#allocation2 + $0x81] sm:$0xff] }
 0x30e   : > { %2230 = vst.msk [vmem:[#allocation4 + $0xb8] sm:$0xff] %vm205_vm0, %v2222_v7  ;;  %2368 = vst.msk [vmem:[#allocation4 + $0x78] sm:$0xff] %vm205_vm0, %v2360_v28  ;;  %v2359_v4 = vadd.f32 %v2344_v16, %v2237_v11  ;;  %v3662_v35 = vpop.permute.xlu0 %3661  ;;  %v2955_v16 = vld [vmem:[#allocation4 + $0xc8] sm:$0xff] }
 0x30f   : > { %3823 = vst.msk [vmem:[#allocation3 + $0x10] sm:$0xff] %vm697_vm9, %v3802_v15  ;;  %4310 = vrot.lane.b32.xlu1 %v9303_v21, %s7073_s6  ;;  %v3117_v15 = vld [vmem:[#allocation4 + $0x88] sm:$0xff] }
 0x310   : > { %2229 = vst.msk [vmem:[#allocation4 + $0xb0] sm:$0xff] %vm205_vm0, %v2221_v34  ;;  %2367 = vst.msk [vmem:[#allocation4 + $0x70] sm:$0xff] %vm205_vm0, %v2359_v4  ;;  %4312 = vrot.lane.b32.xlu0 %v9314_v19, %s7073_s6  ;;  %v6436_v37 = vpop.f32.mrf.mxu1 }
 0x311   : > { %3681 = vst.msk [vmem:[#allocation3 + $0x20] sm:$0xff] %vm549_vm6, %v3662_v35  ;;  %v2493_v49 = vadd.f32 %v6436_v37, %v2370_v44  ;;  %v3616_v47 = vpop.permute.xlu1 %3615 }
 0x312   : > { %3634 = vst.msk [vmem:[#allocation3 + $0x28] sm:$0xff] %vm500_vm5, %v3616_v47  ;;  %v2453_v56 = vpop.f32.mrf.mxu1  ;;  %v3476_v45 = vpop.permute.xlu0 %3475  ;;  %v3116_v47 = vld [vmem:[#allocation4 + $0x80] sm:$0xff] }
 0x313   : > { %2501 = vst.msk [vmem:[#allocation4 + $0x8] sm:$0xff] %vm205_vm0, %v2493_v49  ;;  %v2492_v59 = vadd.f32 %v2453_v56, %v2369_v24  ;;  %4498 = vrot.lane.b32.xlu1 %v9238_v31, %s7077_s10 }
 0x314   : > { %3492 = vst.msk [vmem:[#allocation3 + $0x38] sm:$0xff] %vm353_vm2, %v3476_v45  ;;  %4500 = vrot.lane.b32.xlu0 %v9260_v39, %s7077_s10  ;;  %v6439_v22 = vpop.f32.mrf.mxu1 }
 0x315   : > { %2500 = vst.msk [vmem:[#allocation4] sm:$0xff] %vm205_vm0, %v2492_v59  ;;  %v2495_v1 = vadd.f32 %v6439_v22, %v2372_v0  ;;  %v3804_v57 = vpop.permute.xlu1 %3803 }
 0x316   : > { %v3831_v33 = vld [vmem:[#allocation3 + $0x10] sm:$0xff]  ;;  %3824 = vst.msk [vmem:[#allocation3 + $0x18] sm:$0xff] %vm697_vm9, %v3804_v57  ;;  %v2463_v29 = vpop.f32.mrf.mxu1  ;;  %v3664_v23 = vpop.permute.xlu0 %3663 }
 0x317   : > { %6557 = vmatprep.mubr.msk.f32.mxu1 %vm731_vm10, %v3831_v33  ;;  %6587 = vmatprep.mubr.msk.f32.mxu0 %vm731_vm10, %v3831_v33  ;;  %4184 = vst.msk [vmem:[#allocation3 + $0x10] sm:$0xff] %vm205_vm0, %v9082_v5  ;;  %2503 = vst.msk [vmem:[#allocation4 + $0x18] sm:$0xff] %vm205_vm0, %v2495_v1  ;;  %v2494_v31 = vadd.f32 %v2463_v29, %v2371_v43  ;;  %v2373_v5 = vld [vmem:[#allocation4 + $0x20] sm:$0xff] }
 0x318   : > { %3682 = vst.msk [vmem:[#allocation3 + $0x28] sm:$0xff] %vm549_vm6, %v3664_v23  ;;  %4358 = vrot.lane.b32.xlu1 %v9260_v39, %s7074_s7  ;;  %4218 = vrot.lane.b32.xlu0 %v9333_v54, %s7071_s24  ;;  %v6442_v27 = vpop.f32.mrf.mxu1  ;;  %v2376_v39 = vld [vmem:[#allocation4 + $0x38] sm:$0xff]  ;;  %v4389_v1 = vld [vmem:[#allocation2 + $0x82] sm:$0xff] }
 0x319   : > { %2502 = vst.msk [vmem:[#allocation4 + $0x10] sm:$0xff] %vm205_vm0, %v2494_v31  ;;  %v2497_v38 = vadd.f32 %v6442_v27, %v2374_v48  ;;  %v3522_v41 = vpop.permute.xlu1 %3521 }
 0x31a   : > { %3539 = vst.msk [vmem:[#allocation3 + $0x30] sm:$0xff] %vm402_vm3, %v3522_v41  ;;  %v2473_v62 = vpop.f32.mrf.mxu1  ;;  %v3524_v25 = vpop.permute.xlu0 %3523 }
 0x31b   : > { %2505 = vst.msk [vmem:[#allocation4 + $0x28] sm:$0xff] %vm205_vm0, %v2497_v38  ;;  %v2496_v36 = vadd.f32 %v2473_v62, %v2373_v5 }
 0x31c   : > { %3540 = vst.msk [vmem:[#allocation3 + $0x38] sm:$0xff] %vm402_vm3, %v3524_v25  ;;  %4546 = vrot.lane.b32.xlu1 %v9276_v32, %s7078_s29  ;;  %4406 = vrot.lane.b32.xlu0 %v9291_v6, %s7075_s8  ;;  %v6445_v50 = vpop.f32.mrf.mxu1  ;;  %v2957_v25 = vld [vmem:[#allocation4 + $0xd8] sm:$0xff] }
 0x31d   : > { %2504 = vst.msk [vmem:[#allocation4 + $0x20] sm:$0xff] %vm205_vm0, %v2496_v36  ;;  %v2499_v13 = vadd.f32 %v6445_v50, %v2376_v39  ;;  %v3710_v61 = vpop.permute.xlu1 %3709  ;;  %v3832_v40 = vld [vmem:[#allocation3 + $0x18] sm:$0xff] }
 0x31e   : > { %3729 = vst.msk [vmem:[#allocation3 + $0x20] sm:$0xff] %vm599_vm7, %v3710_v61  ;;  %v2483_v26 = vpop.f32.mrf.mxu1  ;;  %v3712_v8 = vpop.permute.xlu0 %3711  ;;  %6558 = vmatmul.mubr.msk.f32.gmra.mxu1 %vm731_vm10, %v3832_v40  ;;  %6588 = vmatmul.mubr.msk.f32.gmra.mxu0 %vm731_vm10, %v3832_v40  ;;  %v3119_v39 = vld [vmem:[#allocation4 + $0x98] sm:$0xff]  ;;  %v2956_v40 = vld [vmem:[#allocation4 + $0xd0] sm:$0xff] }
 0x31f   : > { %4185 = vst.msk [vmem:[#allocation3 + $0x18] sm:$0xff] %vm205_vm0, %v9197_v55  ;;  %2507 = vst.msk [vmem:[#allocation4 + $0x38] sm:$0xff] %vm205_vm0, %v2499_v13  ;;  %v2498_v32 = vadd.f32 %v2483_v26, %v2375_v3 }
 0x320   : > { %3730 = vst.msk [vmem:[#allocation3 + $0x28] sm:$0xff] %vm599_vm7, %v3712_v8  ;;  %4360 = vrot.lane.b32.xlu1 %v9333_v54, %s7074_s7  ;;  %4220 = vrot.lane.b32.xlu0 %v4197_v63, %s7071_s24  ;;  %v4744_v8 = vld [vmem:[#allocation4] sm:$0xff]  ;;  %s6989_s24 = sshll.u32 %s7079_s18, 4  ;;  %s6990_s24 = int_to_ptr.vmem [resolvable:$false] %s6989_s24 }
 0x321   : > { %2506 = vst.msk [vmem:[#allocation4 + $0x30] sm:$0xff] %vm205_vm0, %v2498_v32  ;;  %v3570_v60 = vpop.permute.xlu1 %3569 }
 0x322   : > { %3587 = vst.msk [vmem:[#allocation3 + $0x30] sm:$0xff] %vm451_vm4, %v3570_v60  ;;  %v3572_v12 = vpop.permute.xlu0 %3571 }
 0x323   : > { %3588 = vst.msk [vmem:[#allocation3 + $0x38] sm:$0xff] %vm451_vm4, %v3572_v12 }
 0x324   : > { %4548 = vrot.lane.b32.xlu1 %v9291_v6, %s7078_s29  ;;  %4408 = vrot.lane.b32.xlu0 %v4387_v9, %s7075_s8 }
 0x325   : > { %v3758_v55 = vpop.permute.xlu1 %3757 }
 0x326   : > { %3777 = vst.msk [vmem:[#allocation3 + $0x20] sm:$0xff] %vm648_vm8, %v3758_v55  ;;  %v3760_v53 = vpop.permute.xlu0 %3759  ;;  %v9457_v55 = vld [vmem:[%s9963_s2] ss:$0 sm:$0xff] }
 0x327   : > { %3778 = vst.msk [vmem:[#allocation3 + $0x28] sm:$0xff] %vm648_vm8, %v3760_v53  ;;  %v9462_v53 = vadd.f32 %v9457_v55, %v4744_v8 }
 0x328   : > { %4266 = vrot.lane.b32.xlu1 %v4387_v9, %s7072_s5  ;;  %4268 = vrot.lane.b32.xlu0 %v9371_v17, %s7072_s5  ;;  %s6991_s5 = scalar_lea.vmem %s6990_s24, 4096 }
 0x329   : > { %v3618_v52 = vpop.permute.xlu1 %3617 }
 0x32a   : > { %3635 = vst.msk [vmem:[#allocation3 + $0x30] sm:$0xff] %vm500_vm5, %v3618_v52  ;;  %v3620_v6 = vpop.permute.xlu0 %3619  ;;  %v4746_v52 = vld [vmem:[#allocation4 + $0x10] sm:$0xff] }
 0x32b   : > { %3636 = vst.msk [vmem:[#allocation3 + $0x38] sm:$0xff] %vm500_vm5, %v3620_v6 }
 0x32c   : > { %4454 = vrot.lane.b32.xlu1 %v9314_v19, %s7076_s9  ;;  %4456 = vrot.lane.b32.xlu0 %v9378_v30, %s7076_s9 }
 0x32d   : > { %v3806_v58 = vpop.permute.xlu1 %3805 }
 0x32e   : > { %3825 = vst.msk [vmem:[#allocation3 + $0x20] sm:$0xff] %vm697_vm9, %v3806_v58  ;;  %v3808_v10 = vpop.permute.xlu0 %3807  ;;  %v4767_v58 = vand.u32 2147483647, %v9462_v53 }
 0x32f   : > { %3826 = vst.msk [vmem:[#allocation3 + $0x28] sm:$0xff] %vm697_vm9, %v3808_v10  ;;  %v4747_v10 = vld [vmem:[#allocation4 + $0x18] sm:$0xff] }
 0x330   : > { %4314 = vrot.lane.b32.xlu1 %v9378_v30, %s7073_s6  ;;  %4316 = vrot.lane.b32.xlu0 %v4293_v20, %s7073_s6  ;;  %s5794_s6 = sshll.u32 %s7185_s28, 7 }
 0x331   : > { %v3666_v7 = vpop.permute.xlu1 %3665 }
 0x332   : > { %3683 = vst.msk [vmem:[#allocation3 + $0x30] sm:$0xff] %vm549_vm6, %v3666_v7  ;;  %v3668_v46 = vpop.permute.xlu0 %3667 }
 0x333   : > { %3684 = vst.msk [vmem:[#allocation3 + $0x38] sm:$0xff] %vm549_vm6, %v3668_v46 }
 0x334   : > { %4502 = vrot.lane.b32.xlu1 %v9333_v54, %s7077_s10  ;;  %4504 = vrot.lane.b32.xlu0 %v4197_v63, %s7077_s10  ;;  %v4437_v54 = vld [vmem:[#allocation2 + $0x90] sm:$0xff] }
 0x335   : > { %v4207_v14 = vpop.permute.xlu1 %4206  ;;  %v3833_v28 = vld [vmem:[#allocation3 + $0x20] sm:$0xff] }
 0x336   : > { %4230 = vst.msk [vmem:[#allocation3] sm:$0xff] %vm353_vm2, %v4207_v14  ;;  %v4209_v34 = vpop.permute.xlu0 %4208  ;;  %6560 = vmatprep.mubr.msk.f32.mxu1 %vm731_vm10, %v3833_v28  ;;  %6590 = vmatprep.mubr.msk.f32.mxu0 %vm731_vm10, %v3833_v28  ;;  %v3834_v11 = vld [vmem:[#allocation3 + $0x28] sm:$0xff]  ;;  %v4775_v14 = vsel %vm205_vm0, %v4767_v58, -inf }
 0x337   : > { %4186 = vst.msk [vmem:[#allocation3 + $0x20] sm:$0xff] %vm205_vm0, %v9214_v42  ;;  %6561 = vmatmul.mubr.msk.f32.gmra.mxu1 %vm731_vm10, %v3834_v11  ;;  %4187 = vst.msk [vmem:[#allocation3 + $0x28] sm:$0xff] %vm205_vm0, %v9303_v21  ;;  %6591 = vmatmul.mubr.msk.f32.gmra.mxu0 %vm731_vm10, %v3834_v11  ;;  %v2954_v42 = vld [vmem:[#allocation4 + $0xc0] sm:$0xff]  ;;  %v4749_v11 = vld [vmem:[#allocation4 + $0x28] sm:$0xff] }
 0x338   : > { %4231 = vst.msk [vmem:[#allocation3 + $0x8] sm:$0xff] %vm353_vm2, %v4209_v34  ;;  %4362 = vrot.lane.b32.xlu1 %v4197_v63, %s7074_s7  ;;  %4364 = vrot.lane.b32.xlu0 %v4341_v18, %s7074_s7  ;;  %v6496_v4 = vpop.f32.mrf.mxu1  ;;  %v3118_v63 = vld [vmem:[#allocation4 + $0x90] sm:$0xff]  ;;  %v4745_v34 = vld [vmem:[#allocation4 + $0x8] sm:$0xff]  ;;  %s9678_s7 = scalar_lea.vmem [#allocation8], %s5794_s6 }
 0x339   : > { %v3714_v35 = vpop.permute.xlu1 %3713  ;;  %v3239_v44 = vadd.f32 %v6496_v4, %v3117_v15  ;;  %v6466_v37 = vpop.f32.mrf.mxu0  ;;  %v9480_v15 = vadd.f32 %v9457_v55, %v4745_v34  ;;  %s5689_s22 = sshll.u32 %s9678_s7, 4  ;;  %s9907_s22 = int_to_ptr.vmem [resolvable:$true] %s5689_s22 }
 0x33a   : > { %3731 = vst.msk [vmem:[#allocation3 + $0x30] sm:$0xff] %vm599_vm7, %v3714_v35  ;;  %v3716_v49 = vpop.permute.xlu0 %3715  ;;  %v3199_v24 = vpop.f32.mrf.mxu1  ;;  %v3101_v56 = vadd.f32 %v6466_v37, %v2955_v16  ;;  %v9486_v37 = vadd.f32 %v9457_v55, %v4749_v11  ;;  %v2960_v11 = vld [vmem:[#allocation4 + $0xf0] sm:$0xff]  ;;  %s6985_s11 = scalar_lea.vmem %s9907_s22, 2048  ;;  %p6992_p1 = scmp.lt.s32.totalorder %s9907_s22, %s6990_s24 }
 0x33b   : > { %3732 = vst.msk [vmem:[#allocation3 + $0x38] sm:$0xff] %vm599_vm7, %v3716_v49  ;;  %v3238_v21 = vadd.f32 %v3199_v24, %v3116_v47  ;;  %v3061_v45 = vpop.f32.mrf.mxu0  ;;  %v4748_v49 = vld [vmem:[#allocation4 + $0x20] sm:$0xff]  ;;  %v4768_v24 = vand.u32 2147483647, %v9480_v15  ;;  %p6986_p8 = scmp.ne.s32.totalorder %s9907_s22, %s6985_s11  ;;  %p6993_p3 = scmp.lt.s32.totalorder %s6991_s5, %s6985_s11 }
 0x33c   : > { %4550 = vrot.lane.b32.xlu1 %v4387_v9, %s7078_s29  ;;  %3247 = vst.msk [vmem:[#allocation4 + $0x88] sm:$0xff] %vm205_vm0, %v3239_v44  ;;  %4552 = vrot.lane.b32.xlu0 %v9371_v17, %s7078_s29  ;;  %3109 = vst.msk [vmem:[#allocation4 + $0xc8] sm:$0xff] %vm205_vm0, %v3101_v56  ;;  %v3100_v59 = vadd.f32 %v3061_v45, %v2954_v42  ;;  %v4751_v42 = vld [vmem:[#allocation4 + $0x38] sm:$0xff]  ;;  %v4772_v45 = vand.u32 2147483647, %v9486_v37 }
 0x33d   : > { %v4255_v0 = vpop.permute.xlu1 %4254  ;;  %3246 = vst.msk [vmem:[#allocation4 + $0x80] sm:$0xff] %vm205_vm0, %v3238_v21  ;;  %p6987_p12 = pnand %p6986_p8, %p7152_p9  ;;  %p6994_p5 = por %p6993_p3, %p6992_p1 }
 0x33e   : > { %4278 = vst.msk [vmem:[#allocation3] sm:$0xff] %vm402_vm3, %v4255_v0  ;;  %v4257_v22 = vpop.permute.xlu0 %4256  ;;  %v9497_v0 = vadd.f32 %v9457_v55, %v4748_v49 }
 0x33f   : > { %3108 = vst.msk [vmem:[#allocation4 + $0xc0] sm:$0xff] %vm205_vm0, %v3100_v59  ;;  %v9494_v59 = vadd.f32 %v9457_v55, %v4751_v42  ;;  %p6988_p0 = pneg %p6987_p12 }
 0x340   : > { %4279 = vst.msk [vmem:[#allocation3 + $0x8] sm:$0xff] %vm402_vm3, %v4257_v22  ;;  %4410 = vrot.lane.b32.xlu1 %v9371_v17, %s7075_s8  ;;  %4458 = vrot.lane.b32.xlu0 %v4293_v20, %s7076_s9  ;;  %v9469_v20 = vadd.f32 %v9457_v55, %v4746_v52  ;;  %v4750_v22 = vld [vmem:[#allocation4 + $0x30] sm:$0xff] }
 0x341   : > { %v3762_v57 = vpop.permute.xlu1 %3761  ;;  %p6995_p6 = pnand %p6994_p5, %p6988_p0 }
 0x342   : > { %3779 = vst.msk [vmem:[#allocation3 + $0x30] sm:$0xff] %vm648_vm8, %v3762_v57  ;;  %v3764_v33 = vpop.permute.xlu0 %3763  ;;  %v4769_v28 = vand.u32 2147483647, %v9469_v20  ;;  %v4778_v57 = vsel %vm205_vm0, %v4768_v24, -inf }
 0x343   : > { %3780 = vst.msk [vmem:[#allocation3 + $0x38] sm:$0xff] %vm648_vm8, %v3764_v33 }
 0x344   : > { %4412 = vrot.lane.b32.xlu1 %v4389_v1, %s7075_s8  ;;  %4506 = vrot.lane.b32.xlu0 %v4341_v18, %s7077_s10  ;;  %v9476_v18 = vadd.f32 %v9457_v55, %v4747_v10  ;;  %v4781_v35 = vsel %vm205_vm0, %v4769_v28, -inf }
 0x345   : > { %v4303_v43 = vpop.permute.xlu1 %4302 }
 0x346   : > { %4326 = vst.msk [vmem:[#allocation3] sm:$0xff] %vm451_vm4, %v4303_v43  ;;  %v4305_v29 = vpop.permute.xlu0 %4304  ;;  %v4770_v44 = vand.u32 2147483647, %v9476_v18  ;;  %v4774_v43 = vand.u32 2147483647, %v9494_v59 }
 0x347   : > { %4327 = vst.msk [vmem:[#allocation3 + $0x8] sm:$0xff] %vm451_vm4, %v4305_v29  ;;  %v4771_v29 = vand.u32 2147483647, %v9497_v0 }
 0x348   : > { %4460 = vrot.lane.b32.xlu1 %v4437_v54, %s7076_s9  ;;  %4554 = vrot.lane.b32.xlu0 %v4389_v1, %s7078_s29  ;;  %v4784_v21 = vsel %vm205_vm0, %v4770_v44, -inf  ;;  %v4790_v54 = vsel %vm205_vm0, %v4772_v45, -inf }
 0x349   : > { %v3810_v23 = vpop.permute.xlu1 %3809 }
 0x34a   : > { %3827 = vst.msk [vmem:[#allocation3 + $0x30] sm:$0xff] %vm697_vm9, %v3810_v23  ;;  %v3812_v31 = vpop.permute.xlu0 %3811  ;;  %v9506_v23 = vadd.f32 %v9457_v55, %v4750_v22 }
 0x34b   : > { %3828 = vst.msk [vmem:[#allocation3 + $0x38] sm:$0xff] %vm697_vm9, %v3812_v31  ;;  %v2959_v31 = vld [vmem:[#allocation4 + $0xe8] sm:$0xff] }
 0x34c   : > { %4508 = vrot.lane.b32.xlu1 %v9072_v51, %s7077_s10 }
 0x34d   : > { %v4351_v48 = vpop.permute.xlu1 %4350 }
 0x34e   : > { %4374 = vst.msk [vmem:[#allocation3] sm:$0xff] %vm500_vm5, %v4351_v48  ;;  %v4353_v27 = vpop.permute.xlu0 %4352 }
 0x34f   : > { %4375 = vst.msk [vmem:[#allocation3 + $0x8] sm:$0xff] %vm500_vm5, %v4353_v27 }
 0x350   : > { %4556 = vrot.lane.b32.xlu1 %v9100_v2, %s7078_s29 }
 0x351   : > { %v4211_v38 = vpop.permute.xlu1 %4210  ;;  %v3835_v41 = vld [vmem:[#allocation3 + $0x30] sm:$0xff] }
 0x352   : > { %4232 = vst.msk [vmem:[#allocation3 + $0x10] sm:$0xff] %vm353_vm2, %v4211_v38  ;;  %v4213_v5 = vpop.permute.xlu0 %4212  ;;  %6563 = vmatprep.mubr.msk.f32.mxu1 %vm731_vm10, %v3835_v41  ;;  %6593 = vmatprep.mubr.msk.f32.mxu0 %vm731_vm10, %v3835_v41  ;;  %v3836_v62 = vld [vmem:[#allocation3 + $0x38] sm:$0xff]  ;;  %v3121_v38 = vld [vmem:[#allocation4 + $0xa8] sm:$0xff] }
 0x353   : > { %4188 = vst.msk [vmem:[#allocation3 + $0x30] sm:$0xff] %vm205_vm0, %v9314_v19  ;;  %6564 = vmatmul.mubr.msk.f32.gmra.mxu1 %vm731_vm10, %v3836_v62  ;;  %6594 = vmatmul.mubr.msk.f32.gmra.mxu0 %vm731_vm10, %v3836_v62  ;;  %4189 = vst.msk [vmem:[#allocation3 + $0x38] sm:$0xff] %vm205_vm0, %v9378_v30  ;;  %v4796_v62 = vsel %vm205_vm0, %v4774_v43, -inf  ;;  %v3254_v43 = vld [vmem:[#allocation4 + $0x40] sm:$0xff] }
 0x354   : > { %4233 = vst.msk [vmem:[#allocation3 + $0x18] sm:$0xff] %vm353_vm2, %v4213_v5 }
 0x355   : > { %v4399_v51 = vpop.permute.xlu1 %4398 }
 0x356   : > { %4422 = vst.msk [vmem:[#allocation3] sm:$0xff] %vm549_vm6, %v4399_v51  ;;  %v4401_v2 = vpop.permute.xlu0 %4400 }
 0x357   : > { %4423 = vst.msk [vmem:[#allocation3 + $0x8] sm:$0xff] %vm549_vm6, %v4401_v2  ;;  %v4787_v2 = vsel %vm205_vm0, %v4771_v29, -inf }
 0x359   : > { %v4259_v36 = vpop.permute.xlu1 %4258  ;;  %v6499_v50 = vpop.f32.mrf.mxu1 }
 0x35a   : > { %4280 = vst.msk [vmem:[#allocation3 + $0x10] sm:$0xff] %vm402_vm3, %v4259_v36  ;;  %v4261_v19 = vpop.permute.xlu0 %4260  ;;  %v3241_v13 = vadd.f32 %v6499_v50, %v3119_v39  ;;  %v6469_v61 = vpop.f32.mrf.mxu0  ;;  %v4773_v36 = vand.u32 2147483647, %v9506_v23  ;;  %v2958_v39 = vld [vmem:[#allocation4 + $0xe0] sm:$0xff] }
 0x35b   : > { %4281 = vst.msk [vmem:[#allocation3 + $0x18] sm:$0xff] %vm402_vm3, %v4261_v19  ;;  %v3209_v3 = vpop.f32.mrf.mxu1  ;;  %v3103_v26 = vadd.f32 %v6469_v61, %v2957_v25  ;;  %v3120_v50 = vld [vmem:[#allocation4 + $0xa0] sm:$0xff] }
 0x35c   : > { %3249 = vst.msk [vmem:[#allocation4 + $0x98] sm:$0xff] %vm205_vm0, %v3241_v13  ;;  %v3240_v32 = vadd.f32 %v3209_v3, %v3118_v63  ;;  %v3071_v60 = vpop.f32.mrf.mxu0  ;;  %v4793_v8 = vsel %vm205_vm0, %v4773_v36, -inf }
 0x35d   : > { %v4447_v9 = vpop.permute.xlu1 %4446  ;;  %3111 = vst.msk [vmem:[#allocation4 + $0xd8] sm:$0xff] %vm205_vm0, %v3103_v26  ;;  %v3102_v12 = vadd.f32 %v3071_v60, %v2956_v40 }
 0x35e   : > { %4470 = vst.msk [vmem:[#allocation3] sm:$0xff] %vm599_vm7, %v4447_v9  ;;  %v4449_v17 = vpop.permute.xlu0 %4448 }
 0x35f   : > { %3248 = vst.msk [vmem:[#allocation4 + $0x90] sm:$0xff] %vm205_vm0, %v3240_v32  ;;  %3110 = vst.msk [vmem:[#allocation4 + $0xd0] sm:$0xff] %vm205_vm0, %v3102_v12 }
 0x360   : > { %4471 = vst.msk [vmem:[#allocation3 + $0x8] sm:$0xff] %vm599_vm7, %v4449_v17 }
 0x361   : > { %v4307_v30 = vpop.permute.xlu1 %4306 }
 0x362   : > { %4328 = vst.msk [vmem:[#allocation3 + $0x10] sm:$0xff] %vm451_vm4, %v4307_v30  ;;  %v4309_v6 = vpop.permute.xlu0 %4308 }
 0x363   : > { %4329 = vst.msk [vmem:[#allocation3 + $0x18] sm:$0xff] %vm451_vm4, %v4309_v6 }
 0x365   : > { %v4495_v7 = vpop.permute.xlu1 %4494 }
 0x366   : > { %4518 = vst.msk [vmem:[#allocation3] sm:$0xff] %vm648_vm8, %v4495_v7  ;;  %v4497_v46 = vpop.permute.xlu0 %4496 }
 0x367   : > { %4519 = vst.msk [vmem:[#allocation3 + $0x8] sm:$0xff] %vm648_vm8, %v4497_v46  ;;  %4776 = vmax.xlane.f32.xlu0 %v4775_v14  ;;  %v2961_v14 = vld [vmem:[#allocation4 + $0xf8] sm:$0xff] }
 0x369   : > { %v4355_v16 = vpop.permute.xlu1 %4354 }
 0x36a   : > { %4376 = vst.msk [vmem:[#allocation3 + $0x10] sm:$0xff] %vm500_vm5, %v4355_v16  ;;  %v4215_v4 = vpop.permute.xlu0 %4214 }
 0x36b   : > { %4234 = vst.msk [vmem:[#allocation3 + $0x20] sm:$0xff] %vm353_vm2, %v4215_v4  ;;  %4782 = vmax.xlane.f32.xlu0 %v4781_v35  ;;  %v3123_v4 = vld [vmem:[#allocation4 + $0xb8] sm:$0xff] }
 0x36d   : > { %v4543_v47 = vpop.permute.xlu1 %4542 }
 0x36e   : > { %4566 = vst.msk [vmem:[#allocation3] sm:$0xff] %vm697_vm9, %v4543_v47  ;;  %v4403_v56 = vpop.permute.xlu0 %4402 }
 0x36f   : > { %4424 = vst.msk [vmem:[#allocation3 + $0x10] sm:$0xff] %vm549_vm6, %v4403_v56  ;;  %4785 = vmax.xlane.f32.xlu0 %v4784_v21  ;;  %v3122_v56 = vld [vmem:[#allocation4 + $0xb0] sm:$0xff] }
 0x371   : > { %v4357_v1 = vpop.permute.xlu1 %4356 }
 0x372   : > { %4377 = vst.msk [vmem:[#allocation3 + $0x18] sm:$0xff] %vm500_vm5, %v4357_v1  ;;  %v4217_v33 = vpop.permute.xlu0 %4216  ;;  %v3255_v1 = vld [vmem:[#allocation4 + $0x48] sm:$0xff] }
 0x373   : > { %4235 = vst.msk [vmem:[#allocation3 + $0x28] sm:$0xff] %vm353_vm2, %v4217_v33  ;;  %4791 = vmax.xlane.f32.xlu0 %v4790_v54 }
 0x374   : > { %4779 = vmax.xlane.f32.xlu1 %v4778_v57 }
 0x375   : > { %v4545_v48 = vpop.permute.xlu1 %4544  ;;  %v4574_v27 = vld [vmem:[#allocation3] sm:$0xff]  ;;  %v6472_v25 = vpop.f32.mrf.mxu0 }
 0x376   : > { %v6502_v41 = vpop.f32.mrf.mxu1  ;;  %4567 = vst.msk [vmem:[#allocation3 + $0x8] sm:$0xff] %vm697_vm9, %v4545_v48  ;;  %v4405_v5 = vpop.permute.xlu0 %4404  ;;  %6614 = vmatprep.mubr.msk.f32.mxu1 %vm731_vm10, %v4574_v27  ;;  %v3105_v13 = vadd.f32 %v6472_v25, %v2959_v31  ;;  %v3257_v27 = vld [vmem:[#allocation4 + $0x58] sm:$0xff] }
 0x377   : > { %v3243_v51 = vadd.f32 %v6502_v41, %v3121_v38  ;;  %4425 = vst.msk [vmem:[#allocation3 + $0x18] sm:$0xff] %vm549_vm6, %v4405_v5  ;;  %4797 = vmax.xlane.f32.xlu0 %v4796_v62  ;;  %v3081_v40 = vpop.f32.mrf.mxu0  ;;  %v3256_v62 = vld [vmem:[#allocation4 + $0x50] sm:$0xff] }
 0x378   : > { %4788 = vmax.xlane.f32.xlu1 %v4787_v2  ;;  %v3219_v19 = vpop.f32.mrf.mxu1  ;;  %3113 = vst.msk [vmem:[#allocation4 + $0xe8] sm:$0xff] %vm205_vm0, %v3105_v13  ;;  %v3104_v3 = vadd.f32 %v3081_v40, %v2958_v39  ;;  %v3259_v39 = vld [vmem:[#allocation4 + $0x68] sm:$0xff] }
 0x379   : > { %3251 = vst.msk [vmem:[#allocation4 + $0xa8] sm:$0xff] %vm205_vm0, %v3243_v51  ;;  %v3242_v61 = vadd.f32 %v3219_v19, %v3120_v50  ;;  %v4263_v63 = vpop.permute.xlu1 %4262 }
 0x37a   : > { %4282 = vst.msk [vmem:[#allocation3 + $0x20] sm:$0xff] %vm402_vm3, %v4263_v63  ;;  %v4265_v26 = vpop.permute.xlu0 %4264 }
 0x37b   : > { %3250 = vst.msk [vmem:[#allocation4 + $0xa0] sm:$0xff] %vm205_vm0, %v3242_v61  ;;  %3112 = vst.msk [vmem:[#allocation4 + $0xe0] sm:$0xff] %vm205_vm0, %v3104_v3  ;;  %v3258_v61 = vld [vmem:[#allocation4 + $0x60] sm:$0xff] }
 0x37c   : > { %4283 = vst.msk [vmem:[#allocation3 + $0x28] sm:$0xff] %vm402_vm3, %v4265_v26  ;;  %4794 = vmax.xlane.f32.xlu1 %v4793_v8 }
 0x37d   : > { %v4451_v32 = vpop.permute.xlu1 %4450  ;;  %v4575_v60 = vld [vmem:[#allocation3 + $0x8] sm:$0xff] }
 0x37e   : > { %4472 = vst.msk [vmem:[#allocation3 + $0x10] sm:$0xff] %vm599_vm7, %v4451_v32  ;;  %v4453_v9 = vpop.permute.xlu0 %4452  ;;  %6615 = vmatmul.mubr.msk.f32.vlgmr.msra.gmra.mxu1 %vm731_vm10, %v4575_v60  ;;  %v3261_v32 = vld [vmem:[#allocation4 + $0x78] sm:$0xff] }
 0x37f   : > { %4473 = vst.msk [vmem:[#allocation3 + $0x18] sm:$0xff] %vm599_vm7, %v4453_v9 }
 0x381   : > { %v4311_v12 = vpop.permute.xlu1 %4310 }
 0x382   : > { %4330 = vst.msk [vmem:[#allocation3 + $0x20] sm:$0xff] %vm451_vm4, %v4311_v12  ;;  %v4313_v17 = vpop.permute.xlu0 %4312 }
 0x383   : > { %4331 = vst.msk [vmem:[#allocation3 + $0x28] sm:$0xff] %vm451_vm4, %v4313_v17 }
 0x385   : > { %v4499_v52 = vpop.permute.xlu1 %4498 }
 0x386   : > { %4520 = vst.msk [vmem:[#allocation3 + $0x10] sm:$0xff] %vm648_vm8, %v4499_v52  ;;  %v4501_v30 = vpop.permute.xlu0 %4500 }
 0x387   : > { %4521 = vst.msk [vmem:[#allocation3 + $0x18] sm:$0xff] %vm648_vm8, %v4501_v30 }
 0x38a   : > { %v4359_v6 = vpop.permute.xlu1 %4358  ;;  %v4219_v58 = vpop.permute.xlu0 %4218 }
 0x38b   : > { %4378 = vst.msk [vmem:[#allocation3 + $0x20] sm:$0xff] %vm500_vm5, %v4359_v6  ;;  %v3260_v6 = vld [vmem:[#allocation4 + $0x70] sm:$0xff] }
 0x38c   : > { %4236 = vst.msk [vmem:[#allocation3 + $0x30] sm:$0xff] %vm353_vm2, %v4219_v58 }
 0x38e   : > { %v4547_v10 = vpop.permute.xlu1 %4546  ;;  %v4407_v7 = vpop.permute.xlu0 %4406 }
 0x38f   : > { %4568 = vst.msk [vmem:[#allocation3 + $0x10] sm:$0xff] %vm697_vm9, %v4547_v10 }
 0x390   : > { %4426 = vst.msk [vmem:[#allocation3 + $0x20] sm:$0xff] %vm549_vm6, %v4407_v7 }
 0x392   : > { %v4361_v46 = vpop.permute.xlu1 %4360  ;;  %v4221_v28 = vpop.permute.xlu0 %4220 }
 0x393   : > { %4379 = vst.msk [vmem:[#allocation3 + $0x28] sm:$0xff] %vm500_vm5, %v4361_v46  ;;  %v6475_v34 = vpop.f32.mrf.mxu0 }
 0x394   : > { %4237 = vst.msk [vmem:[#allocation3 + $0x38] sm:$0xff] %vm353_vm2, %v4221_v28  ;;  %v3107_v16 = vadd.f32 %v6475_v34, %v2961_v14  ;;  %v6505_v35 = vpop.f32.mrf.mxu1 }
 0x395   : > { %v3245_v44 = vadd.f32 %v6505_v35, %v3123_v4  ;;  %v3091_v49 = vpop.f32.mrf.mxu0 }
 0x396   : > { %v4549_v42 = vpop.permute.xlu1 %4548  ;;  %v4576_v47 = vld [vmem:[#allocation3 + $0x10] sm:$0xff]  ;;  %3115 = vst.msk [vmem:[#allocation4 + $0xf8] sm:$0xff] %vm205_vm0, %v3107_v16  ;;  %v3106_v24 = vadd.f32 %v3091_v49, %v2960_v11  ;;  %v3229_v21 = vpop.f32.mrf.mxu1 }
 0x397   : > { %4569 = vst.msk [vmem:[#allocation3 + $0x18] sm:$0xff] %vm697_vm9, %v4549_v42  ;;  %v4409_v45 = vpop.permute.xlu0 %4408  ;;  %6617 = vmatprep.mubr.msk.f32.mxu1 %vm731_vm10, %v4576_v47  ;;  %v3244_v22 = vadd.f32 %v3229_v21, %v3122_v56  ;;  %v6526_v57 = vpop.f32.mrf.mxu0 }
 0x398   : > { %3253 = vst.msk [vmem:[#allocation4 + $0xb8] sm:$0xff] %vm205_vm0, %v3245_v44  ;;  %3114 = vst.msk [vmem:[#allocation4 + $0xf0] sm:$0xff] %vm205_vm0, %v3106_v24  ;;  %v3377_v33 = vadd.f32 %v6526_v57, %v3255_v1 }
 0x399   : > { %4427 = vst.msk [vmem:[#allocation3 + $0x28] sm:$0xff] %vm549_vm6, %v4409_v45  ;;  %v3337_v29 = vpop.f32.mrf.mxu0 }
 0x39a   : > { %3252 = vst.msk [vmem:[#allocation4 + $0xb0] sm:$0xff] %vm205_vm0, %v3244_v22  ;;  %v4267_v54 = vpop.permute.xlu1 %4266  ;;  %3385 = vst.msk [vmem:[#allocation4 + $0x48] sm:$0xff] %vm205_vm0, %v3377_v33  ;;  %v3376_v31 = vadd.f32 %v3337_v29, %v3254_v43 }
 0x39b   : > { %4284 = vst.msk [vmem:[#allocation3 + $0x30] sm:$0xff] %vm402_vm3, %v4267_v54  ;;  %v4269_v48 = vpop.permute.xlu0 %4268  ;;  %v6529_v38 = vpop.f32.mrf.mxu0 }
 0x39c   : > { %4285 = vst.msk [vmem:[#allocation3 + $0x38] sm:$0xff] %vm402_vm3, %v4269_v48  ;;  %v3379_v41 = vadd.f32 %v6529_v38, %v3257_v27 }
 0x39d   : > { %3384 = vst.msk [vmem:[#allocation4 + $0x40] sm:$0xff] %vm205_vm0, %v3376_v31  ;;  %v3347_v51 = vpop.f32.mrf.mxu0 }
 0x39e   : > { %v4455_v5 = vpop.permute.xlu1 %4454  ;;  %v4577_v2 = vld [vmem:[#allocation3 + $0x18] sm:$0xff]  ;;  %3387 = vst.msk [vmem:[#allocation4 + $0x58] sm:$0xff] %vm205_vm0, %v3379_v41  ;;  %v3378_v25 = vadd.f32 %v3347_v51, %v3256_v62 }
 0x39f   : > { %4474 = vst.msk [vmem:[#allocation3 + $0x20] sm:$0xff] %vm599_vm7, %v4455_v5  ;;  %v4457_v36 = vpop.permute.xlu0 %4456  ;;  %6618 = vmatmul.mubr.msk.f32.gmra.mxu1 %vm731_vm10, %v4577_v2  ;;  %v6532_v50 = vpop.f32.mrf.mxu0 }
 0x3a0   : > { %4475 = vst.msk [vmem:[#allocation3 + $0x28] sm:$0xff] %vm599_vm7, %v4457_v36  ;;  %v3381_v19 = vadd.f32 %v6532_v50, %v3259_v39  ;;  %v4000_v50 = vld [vmem:[#allocation4 + $0x88] sm:$0xff] }
 0x3a1   : > { %3386 = vst.msk [vmem:[#allocation4 + $0x50] sm:$0xff] %vm205_vm0, %v3378_v25  ;;  %v3357_v40 = vpop.f32.mrf.mxu0  ;;  %v4977_v63 = vld [vmem:[#allocation4 + $0x48] sm:$0xff] }
 0x3a2   : > { %v4315_v13 = vpop.permute.xlu1 %4314  ;;  %3389 = vst.msk [vmem:[#allocation4 + $0x68] sm:$0xff] %vm205_vm0, %v3381_v19  ;;  %v3380_v3 = vadd.f32 %v3357_v40, %v3258_v61  ;;  %v9554_v8 = vadd.f32 %v9457_v55, %v4977_v63  ;;  %v3838_v25 = vld [vmem:[#allocation4 + $0xc8] sm:$0xff]  ;;  %v3837_v63 = vld [vmem:[#allocation4 + $0xc0] sm:$0xff] }
 0x3a3   : > { %4332 = vst.msk [vmem:[#allocation3 + $0x30] sm:$0xff] %vm451_vm4, %v4315_v13  ;;  %v4317_v26 = vpop.permute.xlu0 %4316  ;;  %v6535_v60 = vpop.f32.mrf.mxu0 }
 0x3a4   : > { %4333 = vst.msk [vmem:[#allocation3 + $0x38] sm:$0xff] %vm451_vm4, %v4317_v26  ;;  %v4976_v9 = vld [vmem:[#allocation4 + $0x40] sm:$0xff]  ;;  %v3383_v12 = vadd.f32 %v6535_v60, %v3261_v32  ;;  %v5000_v17 = vand.u32 2147483647, %v9554_v8 }
 0x3a5   : > { %3388 = vst.msk [vmem:[#allocation4 + $0x60] sm:$0xff] %vm205_vm0, %v3380_v3  ;;  %v9560_v52 = vadd.f32 %v9457_v55, %v4976_v9  ;;  %v3367_v58 = vpop.f32.mrf.mxu0  ;;  %v4979_v10 = vld [vmem:[#allocation4 + $0x58] sm:$0xff]  ;;  %v3999_v60 = vld [vmem:[#allocation4 + $0x80] sm:$0xff] }
 0x3a6   : > { %v4503_v30 = vpop.permute.xlu1 %4502  ;;  %3391 = vst.msk [vmem:[#allocation4 + $0x78] sm:$0xff] %vm205_vm0, %v3383_v12  ;;  %v3382_v7 = vadd.f32 %v3367_v58, %v3260_v6  ;;  %v5010_v14 = vsel %vm205_vm0, %v5000_v17, -inf  ;;  %v9567_v34 = vadd.f32 %v9457_v55, %v4979_v10 }
 0x3a7   : > { %4522 = vst.msk [vmem:[#allocation3 + $0x20] sm:$0xff] %vm648_vm8, %v4503_v30  ;;  %v4505_v46 = vpop.permute.xlu0 %4504  ;;  %v4999_v28 = vand.u32 2147483647, %v9560_v52  ;;  %5011 = vmax.xlane.f32.xlu0 %v5010_v14 }
 0x3a8   : > { %4523 = vst.msk [vmem:[#allocation3 + $0x28] sm:$0xff] %vm648_vm8, %v4505_v46  ;;  %v4978_v11 = vld [vmem:[#allocation4 + $0x50] sm:$0xff]  ;;  %v5002_v4 = vand.u32 2147483647, %v9567_v34 }
 0x3a9   : > { %3390 = vst.msk [vmem:[#allocation4 + $0x70] sm:$0xff] %vm205_vm0, %v3382_v7  ;;  %v5007_v16 = vsel %vm205_vm0, %v4999_v28, -inf  ;;  %v9574_v35 = vadd.f32 %v9457_v55, %v4978_v11  ;;  %v4981_v42 = vld [vmem:[#allocation4 + $0x68] sm:$0xff] }
 0x3aa   : > { %v4363_v44 = vpop.permute.xlu1 %4362  ;;  %5008 = vmax.xlane.f32.xlu1 %v5007_v16  ;;  %v5016_v47 = vsel %vm205_vm0, %v5002_v4, -inf  ;;  %v9580_v56 = vadd.f32 %v9457_v55, %v4981_v42 }
 0x3ab   : > { %4380 = vst.msk [vmem:[#allocation3 + $0x30] sm:$0xff] %vm500_vm5, %v4363_v44  ;;  %v4365_v49 = vpop.permute.xlu0 %4364  ;;  %v5001_v24 = vand.u32 2147483647, %v9574_v35  ;;  %5017 = vmax.xlane.f32.xlu0 %v5016_v47 }
 0x3ac   : > { %4381 = vst.msk [vmem:[#allocation3 + $0x38] sm:$0xff] %vm500_vm5, %v4365_v49  ;;  %v4980_v21 = vld [vmem:[#allocation4 + $0x60] sm:$0xff]  ;;  %v5004_v22 = vand.u32 2147483647, %v9580_v56 }
 0x3ad   : > { %v5013_v45 = vsel %vm205_vm0, %v5001_v24, -inf  ;;  %v9586_v1 = vadd.f32 %v9457_v55, %v4980_v21  ;;  %v4983_v33 = vld [vmem:[#allocation4 + $0x78] sm:$0xff] }
 0x3ae   : > { %v4551_v57 = vpop.permute.xlu1 %4550  ;;  %5014 = vmax.xlane.f32.xlu1 %v5013_v45  ;;  %v5022_v43 = vsel %vm205_vm0, %v5004_v22, -inf  ;;  %v9592_v31 = vadd.f32 %v9457_v55, %v4983_v33  ;;  %v3840_v24 = vld [vmem:[#allocation4 + $0xd8] sm:$0xff] }
 0x3af   : > { %4570 = vst.msk [vmem:[#allocation3 + $0x20] sm:$0xff] %vm697_vm9, %v4551_v57  ;;  %v4553_v54 = vpop.permute.xlu0 %4552  ;;  %v5003_v29 = vand.u32 2147483647, %v9586_v1  ;;  %5023 = vmax.xlane.f32.xlu0 %v5022_v43  ;;  %v4002_v45 = vld [vmem:[#allocation4 + $0x98] sm:$0xff] }
 0x3b0   : > { %4571 = vst.msk [vmem:[#allocation3 + $0x28] sm:$0xff] %vm697_vm9, %v4553_v54  ;;  %v4982_v48 = vld [vmem:[#allocation4 + $0x70] sm:$0xff]  ;;  %v5006_v38 = vand.u32 2147483647, %v9592_v31 }
 0x3b1   : > { %v5019_v27 = vsel %vm205_vm0, %v5003_v29, -inf  ;;  %v9598_v41 = vadd.f32 %v9457_v55, %v4982_v48  ;;  %v3839_v54 = vld [vmem:[#allocation4 + $0xd0] sm:$0xff] }
 0x3b2   : > { %v4411_v5 = vpop.permute.xlu1 %4410  ;;  %5020 = vmax.xlane.f32.xlu1 %v5019_v27  ;;  %v5028_v62 = vsel %vm205_vm0, %v5006_v38, -inf  ;;  %v4001_v29 = vld [vmem:[#allocation4 + $0x90] sm:$0xff] }
 0x3b3   : > { %4428 = vst.msk [vmem:[#allocation3 + $0x30] sm:$0xff] %vm549_vm6, %v4411_v5  ;;  %v5005_v51 = vand.u32 2147483647, %v9598_v41  ;;  %v4459_v2 = vpop.permute.xlu0 %4458  ;;  %v6556_v36 = vpop.f32.mrf.mxu1  ;;  %5029 = vmax.xlane.f32.xlu0 %v5028_v62 }
 0x3b4   : > { %4476 = vst.msk [vmem:[#allocation3 + $0x30] sm:$0xff] %vm599_vm7, %v4459_v2  ;;  %v3984_v39 = vadd.f32 %v6556_v36, %v3838_v25  ;;  %v6586_v19 = vpop.f32.mrf.mxu0 }
 0x3b5   : > { %v5025_v13 = vsel %vm205_vm0, %v5005_v51, -inf  ;;  %v4122_v61 = vadd.f32 %v6586_v19, %v4000_v50  ;;  %v3944_v3 = vpop.f32.mrf.mxu1 }
 0x3b6   : > { %v4413_v40 = vpop.permute.xlu1 %4412  ;;  %5026 = vmax.xlane.f32.xlu1 %v5025_v13  ;;  %v4578_v26 = vld [vmem:[#allocation3 + $0x20] sm:$0xff]  ;;  %3992 = vst.msk [vmem:[#allocation4 + $0xc8] sm:$0xff] %vm205_vm0, %v3984_v39  ;;  %v3983_v32 = vadd.f32 %v3944_v3, %v3837_v63  ;;  %v4082_v9 = vpop.f32.mrf.mxu0 }
 0x3b7   : > { %4429 = vst.msk [vmem:[#allocation3 + $0x38] sm:$0xff] %vm549_vm6, %v4413_v40  ;;  %6620 = vmatprep.mubr.msk.f32.mxu1 %vm731_vm10, %v4578_v26  ;;  %v4579_v12 = vld [vmem:[#allocation3 + $0x28] sm:$0xff]  ;;  %v4507_v17 = vpop.permute.xlu0 %4506  ;;  %v4121_v30 = vadd.f32 %v4082_v9, %v3999_v60 }
 0x3b8   : > { %4130 = vst.msk [vmem:[#allocation4 + $0x88] sm:$0xff] %vm205_vm0, %v4122_v61  ;;  %6621 = vmatmul.mubr.msk.f32.gmra.mxu1 %vm731_vm10, %v4579_v12  ;;  %3991 = vst.msk [vmem:[#allocation4 + $0xc0] sm:$0xff] %vm205_vm0, %v3983_v32  ;;  %v3842_v32 = vld [vmem:[#allocation4 + $0xe8] sm:$0xff] }
 0x3b9   : > { %4524 = vst.msk [vmem:[#allocation3 + $0x30] sm:$0xff] %vm648_vm8, %v4507_v17  ;;  %v4004_v17 = vld [vmem:[#allocation4 + $0xa8] sm:$0xff] }
 0x3ba   : > { %4129 = vst.msk [vmem:[#allocation4 + $0x80] sm:$0xff] %vm205_vm0, %v4121_v30  ;;  %v4461_v6 = vpop.permute.xlu1 %4460 }
 0x3bb   : > { %4477 = vst.msk [vmem:[#allocation3 + $0x38] sm:$0xff] %vm599_vm7, %v4461_v6  ;;  %v4555_v58 = vpop.permute.xlu0 %4554  ;;  %vm4967_vm7 = vcmask 60416  }
 0x3bc   : > { %4572 = vst.msk [vmem:[#allocation3 + $0x30] sm:$0xff] %vm697_vm9, %v4555_v58 }
 0x3be   : > { %v4509_v10 = vpop.permute.xlu1 %4508 }
 0x3bf   : > { %4525 = vst.msk [vmem:[#allocation3 + $0x38] sm:$0xff] %vm648_vm8, %v4509_v10  ;;  %v5209_v7 = vld [vmem:[#allocation4 + $0x88] sm:$0xff] }
 0x3c0   : > { %v9617_v46 = vadd.f32 %v9457_v55, %v5209_v7 }
 0x3c1   : > { %v5208_v14 = vld [vmem:[#allocation4 + $0x80] sm:$0xff] }
 0x3c2   : > { %v4557_v28 = vpop.permute.xlu1 %4556  ;;  %v5232_v11 = vand.u32 2147483647, %v9617_v46  ;;  %v9621_v16 = vadd.f32 %v9457_v55, %v5208_v14  ;;  %v3841_v14 = vld [vmem:[#allocation4 + $0xe0] sm:$0xff] }
 0x3c3   : > { %4573 = vst.msk [vmem:[#allocation3 + $0x38] sm:$0xff] %vm697_vm9, %v4557_v28  ;;  %v4580_v4 = vld [vmem:[#allocation3 + $0x30] sm:$0xff] }
 0x3c4   : > { %v5242_v44 = vsel %vm205_vm0, %v5232_v11, -inf  ;;  %v5231_v42 = vand.u32 2147483647, %v9621_v16  ;;  %6623 = vmatprep.mubr.msk.f32.mxu1 %vm731_vm10, %v4580_v4 }
 0x3c5   : > { %5243 = vmax.xlane.f32.xlu0 %v5242_v44 }
 0x3c6   : > { %v5239_v49 = vsel %vm205_vm0, %v5231_v42, -inf }
 0x3c7   : > { %5240 = vmax.xlane.f32.xlu1 %v5239_v49 }
 0x3ca   : > { %v4581_v47 = vld [vmem:[#allocation3 + $0x38] sm:$0xff] }
 0x3cb   : > { %6624 = vmatmul.mubr.msk.f32.gmra.mxu1 %vm731_vm10, %v4581_v47  ;;  %v4003_v47 = vld [vmem:[#allocation4 + $0xa0] sm:$0xff] }
 0x3de   : > { %v6559_v21 = vpop.f32.mrf.mxu1  ;;  %v6589_v22 = vpop.f32.mrf.mxu0 }
 0x3df   : > { %v3986_v57 = vadd.f32 %v6559_v21, %v3840_v24  ;;  %v4124_v33 = vadd.f32 %v6589_v22, %v4002_v45 }
 0x3e0   : > { %v3954_v43 = vpop.f32.mrf.mxu1  ;;  %v4092_v48 = vpop.f32.mrf.mxu0 }
 0x3e1   : > { %3994 = vst.msk [vmem:[#allocation4 + $0xd8] sm:$0xff] %vm205_vm0, %v3986_v57  ;;  %4132 = vst.msk [vmem:[#allocation4 + $0x98] sm:$0xff] %vm205_vm0, %v4124_v33  ;;  %v3985_v27 = vadd.f32 %v3954_v43, %v3839_v54  ;;  %v4123_v38 = vadd.f32 %v4092_v48, %v4001_v29 }
 0x3e3   : > { %3993 = vst.msk [vmem:[#allocation4 + $0xd0] sm:$0xff] %vm205_vm0, %v3985_v27  ;;  %4131 = vst.msk [vmem:[#allocation4 + $0x90] sm:$0xff] %vm205_vm0, %v4123_v38 }
 0x3e8   : > { %v5211_v5 = vld [vmem:[#allocation4 + $0x98] sm:$0xff] }
 0x3e9   : > { %v9634_v62 = vadd.f32 %v9457_v55, %v5211_v5 }
 0x3ea   : > { %v5210_v51 = vld [vmem:[#allocation4 + $0x90] sm:$0xff] }
 0x3eb   : > { %v5234_v2 = vand.u32 2147483647, %v9634_v62  ;;  %v9638_v25 = vadd.f32 %v9457_v55, %v5210_v51 }
 0x3ed   : > { %v5248_v36 = vsel %vm205_vm0, %v5234_v2, -inf  ;;  %v5233_v39 = vand.u32 2147483647, %v9638_v25 }
 0x3ee   : > { %5249 = vmax.xlane.f32.xlu0 %v5248_v36 }
 0x3ef   : > { %v5245_v50 = vsel %vm205_vm0, %v5233_v39, -inf }
 0x3f0   : > { %v4777_v19 = vpop.xlane.xlu0 %4776  ;;  %5246 = vmax.xlane.f32.xlu1 %v5245_v50 }
 0x3f1   : > { %v4807_v13 = vshra.s32 %v4777_v19, 23 }
 0x3f3   : > { %v5996_v61 = vadd.s32 4294967169, %v4807_v13 }
 0x3f4   : > { %v4783_v40 = vpop.xlane.xlu0 %4782 }
 0x3f5   : > { %vm4823_vm11 = vcmp.gt.s32.totalorder %v5996_v61, 4294967288  ;;  %v4809_v63 = vshra.s32 %v4783_v40, 23 }
 0x3f6   : > { %v4824_v3 = vsel %vm4823_vm11, %v5996_v61, 4294967288 }
 0x3f7   : > { %vm4839_vm12 = vcmp.lt.s32.totalorder %v4824_v3, 7  ;;  %v5998_v26 = vadd.s32 4294967169, %v4809_v63  ;;  %v6562_v60 = vpop.f32.mrf.mxu1  ;;  %v6592_v30 = vpop.f32.mrf.mxu0 }
 0x3f8   : > { %v4840_v9 = vsel %vm4839_vm12, %v4824_v3, 7  ;;  %v3988_v12 = vadd.f32 %v6562_v60, %v3842_v32  ;;  %v4786_v6 = vpop.xlane.xlu0 %4785  ;;  %v4126_v10 = vadd.f32 %v6592_v30, %v4004_v17 }
 0x3f9   : > { %v4855_v58 = vsub.s32 6, %v4840_v9  ;;  %vm4827_vm13 = vcmp.gt.s32.totalorder %v5998_v26, 4294967288  ;;  %v4810_v7 = vshra.s32 %v4786_v6, 23  ;;  %v3964_v28 = vpop.f32.mrf.mxu1  ;;  %v4102_v44 = vpop.f32.mrf.mxu0 }
 0x3fa   : > { %v4828_v11 = vsel %vm4827_vm13, %v5998_v26, 4294967288  ;;  %3996 = vst.msk [vmem:[#allocation4 + $0xe8] sm:$0xff] %vm205_vm0, %v3988_v12  ;;  %v3987_v4 = vadd.f32 %v3964_v28, %v3841_v14  ;;  %4134 = vst.msk [vmem:[#allocation4 + $0xa8] sm:$0xff] %vm205_vm0, %v4126_v10  ;;  %v4125_v21 = vadd.f32 %v4102_v44, %v4003_v47 }
 0x3fb   : > { %v4863_v42 = vadd.s32 127, %v4855_v58  ;;  %vm4843_vm14 = vcmp.lt.s32.totalorder %v4828_v11, 7  ;;  %v5999_v49 = vadd.s32 4294967169, %v4810_v7  ;;  %v9646_v54 = vsub.s32 127, %v4855_v58 }
 0x3fc   : > { %v4844_v24 = vsel %vm4843_vm14, %v4828_v11, 7  ;;  %3995 = vst.msk [vmem:[#allocation4 + $0xe0] sm:$0xff] %vm205_vm0, %v3987_v4  ;;  %v4792_v45 = vpop.xlane.xlu0 %4791  ;;  %4133 = vst.msk [vmem:[#allocation4 + $0xa0] sm:$0xff] %vm205_vm0, %v4125_v21 }
 0x3fd   : > { %v4780_v22 = vpop.xlane.xlu1 %4779  ;;  %v4871_v57 = vshll.u32 %v4863_v42, 23  ;;  %v4857_v33 = vsub.s32 6, %v4844_v24  ;;  %vm4829_vm15 = vcmp.gt.s32.totalorder %v5999_v49, 4294967288  ;;  %v4812_v29 = vshra.s32 %v4792_v45, 23 }
 0x3fe   : > { %v4830_v43 = vsel %vm4829_vm15, %v5999_v49, 4294967288  ;;  %v4808_v48 = vshra.s32 %v4780_v22, 23  ;;  %v4895_v19 = vshll.u32 %v9646_v54, 23 }
 0x3ff   : > { %v4911_v27 = vmul.f32 %v4871_v57, %v9462_v53  ;;  %v4865_v38 = vadd.s32 127, %v4857_v33  ;;  %vm4845_vm1 = vcmp.lt.s32.totalorder %v4830_v43, 7  ;;  %v6001_v51 = vadd.s32 4294967169, %v4812_v29 }
 0x400   : > { %v4846_v5 = vsel %vm4845_vm1, %v4830_v43, 7  ;;  %v5997_v2 = vadd.s32 4294967169, %v4808_v48  ;;  %v9650_v50 = vsub.s32 127, %v4857_v33  ;;  %v4798_v30 = vpop.xlane.xlu0 %4797 }
 0x401   : > { %v6628_v36 = vcvt.f32.s32 %v4911_v27  ;;  %v4873_v39 = vshll.u32 %v4865_v38, 23  ;;  %v4858_v13 = vsub.s32 6, %v4846_v5  ;;  %vm4833_vm2 = vcmp.gt.s32.totalorder %v6001_v51, 4294967288  ;;  %v4789_v28 = vpop.xlane.xlu1 %4788 }
 0x402   : > { %vm4825_vm3 = vcmp.gt.s32.totalorder %v5997_v2, 4294967288  ;;  %v6626_v61 = vand.u32 2147483647, %v4911_v27  ;;  %v4834_v3 = vsel %vm4833_vm2, %v6001_v51, 4294967288  ;;  %v6631_v53 = vand.u32 2147483648, %v4911_v27 }
 0x403   : > { %v6629_v40 = vcvt.s32.f32 %v6628_v36  ;;  %v4913_v63 = vmul.f32 %v4873_v39, %v9469_v20  ;;  %v4866_v26 = vadd.s32 127, %v4858_v13  ;;  %vm4849_vm4 = vcmp.lt.s32.totalorder %v4834_v3, 7 }
 0x404   : > { %v4826_v32 = vsel %vm4825_vm3, %v5997_v2, 4294967288  ;;  %v4897_v9 = vshll.u32 %v9650_v50, 23  ;;  %v9655_v17 = vsub.s32 127, %v4858_v13  ;;  %v4850_v10 = vsel %vm4849_vm4, %v4834_v3, 7 }
 0x405   : > { %v6630_v60 = vand.u32 2147483647, %v6629_v40  ;;  %v6644_v12 = vcvt.f32.s32 %v4913_v63  ;;  %v6642_v6 = vand.u32 2147483647, %v4913_v63  ;;  %v4874_v58 = vshll.u32 %v4866_v26, 23 }
 0x406   : > { %vm4841_vm5 = vcmp.lt.s32.totalorder %v4826_v32, 7  ;;  %vm6627_vm6 = vcmp.lt.f32.partialorder %v6626_v61, 8388608.0  ;;  %v4860_v20 = vsub.s32 6, %v4850_v10  ;;  %v6647_v11 = vand.u32 2147483648, %v4913_v63 }
 0x407   : > { %v6632_v7 = vor.u32 %v6631_v53, %v6630_v60  ;;  %v6645_v14 = vcvt.s32.f32 %v6644_v12  ;;  %v4914_v4 = vmul.f32 %v4874_v58, %v9476_v18  ;;  %v9658_v44 = vsel %vm4841_vm5, %v4826_v32, 7 }
 0x408   : > { %v4814_v42 = vshra.s32 %v4798_v30, 23  ;;  %v4898_v24 = vshll.u32 %v9655_v17, 23  ;;  %v4868_v21 = vadd.s32 127, %v4860_v20  ;;  %vm9661_vm8 = vcmp.lt.f32.partialorder %v6642_v6, 8388608.0 }
 0x409   : > { %v6633_v49 = vsel %vm6627_vm6, %v6632_v7, %v4911_v27  ;;  %v6646_v47 = vand.u32 2147483647, %v6645_v14  ;;  %v6652_v57 = vcvt.f32.s32 %v4914_v4  ;;  %v4811_v33 = vshra.s32 %v4789_v28, 23  ;;  %v4795_v28 = vpop.xlane.xlu1 %4794 }
 0x40a   : > { %v4927_v45 = vmax.f32 %v6633_v49, -128.0  ;;  %v4876_v43 = vshll.u32 %v4868_v21, 23  ;;  %v9665_v18 = vsub.s32 127, %v4860_v20  ;;  %v4856_v29 = vsub.s32 6, %v9658_v44 }
 0x40b   : > { %v6648_v54 = vor.u32 %v6647_v11, %v6646_v47  ;;  %v6650_v27 = vand.u32 2147483647, %v4914_v4  ;;  %v6653_v38 = vcvt.s32.f32 %v6652_v57  ;;  %v6003_v5 = vadd.s32 4294967169, %v4814_v42 }
 0x40c   : > { %v4935_v48 = vmin.f32 %v4927_v45, 127.0  ;;  %v6655_v2 = vand.u32 2147483648, %v4914_v4  ;;  %v4916_v36 = vmul.f32 %v4876_v43, %v9486_v37  ;;  %v4864_v39 = vadd.s32 127, %v4856_v29 }
 0x40d   : > { %v6649_v51 = vsel %vm9661_vm8, %v6648_v54, %v4913_v63  ;;  %v6654_v61 = vand.u32 2147483647, %v6653_v38  ;;  %vm4837_vm9 = vcmp.gt.s32.totalorder %v6003_v5, 4294967288  ;;  %v4900_v40 = vshll.u32 %v9665_v18, 23  ;;  %v5213_v38 = vld [vmem:[#allocation4 + $0xa8] sm:$0xff] }
 0x40e   : > { %v4943_v50 = vmul.f32 %v4935_v48, %v4895_v19  ;;  %v4929_v13 = vmax.f32 %v6649_v51, -128.0  ;;  %v6666_v3 = vand.u32 2147483647, %v4916_v36  ;;  %v6668_v53 = vcvt.f32.s32 %v4916_v36 }
 0x40f   : > { %v4872_v26 = vshll.u32 %v4864_v39, 23  ;;  %vm6651_vm10 = vcmp.lt.f32.partialorder %v6650_v27, 8388608.0  ;;  %v6656_v12 = vor.u32 %v6655_v2, %v6654_v61  ;;  %v6671_v63 = vand.u32 2147483648, %v4916_v36 }
 0x410   : > { %v4951_v32 = vmax.f32 %v4943_v50, 0.0  ;;  %v4937_v60 = vmin.f32 %v4929_v13, 127.0  ;;  %v6669_v17 = vcvt.s32.f32 %v6668_v53  ;;  %v4838_v37 = vsel %vm4837_vm9, %v6003_v5, 4294967288  ;;  %v5212_v13 = vld [vmem:[#allocation4 + $0xa0] sm:$0xff] }
 0x411   : > { %v4912_v30 = vmul.f32 %v4872_v26, %v9480_v15  ;;  %v6657_v19 = vsel %vm6651_vm10, %v6656_v12, %v4914_v4  ;;  %vm4853_vm11 = vcmp.lt.s32.totalorder %v4838_v37, 7  ;;  %vm9674_vm12 = vcmp.lt.f32.partialorder %v6666_v3, 8388608.0 }
 0x412   : > { %v4959_v6 = vpack.c.bf16 %v4951_v32, %v4951_v32  ;;  %v4945_v58 = vmul.f32 %v4937_v60, %v4897_v9  ;;  %v4930_v10 = vmax.f32 %v6657_v19, -128.0  ;;  %v6670_v14 = vand.u32 2147483647, %v6669_v17 }
 0x413   : > { %v6636_v20 = vcvt.f32.s32 %v4912_v30  ;;  %v6634_v15 = vand.u32 2147483647, %v4912_v30  ;;  %v9682_v44 = vsel %vm4853_vm11, %v4838_v37, 7  ;;  %v6000_v9 = vadd.s32 4294967169, %v4811_v33 }
 0x414   : > { %4968 = vst.msk [vmem:[%s9678_s7] sm:$0xf] %vm4967_vm7, %v4959_v6  ;;  %v4953_v11 = vmax.f32 %v4945_v58, 0.0  ;;  %v4938_v4 = vmin.f32 %v4930_v10, 127.0  ;;  %v6672_v42 = vor.u32 %v6671_v63, %v6670_v14  ;;  %v6639_v47 = vand.u32 2147483648, %v4912_v30 }
 0x415   : > { %v6637_v49 = vcvt.s32.f32 %v6636_v20  ;;  %v4862_v45 = vsub.s32 6, %v9682_v44  ;;  %vm4831_vm13 = vcmp.gt.s32.totalorder %v6000_v9, 4294967288  ;;  %v4813_v22 = vshra.s32 %v4795_v28, 23 }
 0x416   : > { %v4961_v21 = vpack.c.bf16 %v4953_v11, %v4953_v11  ;;  %v4946_v57 = vmul.f32 %v4938_v4, %v4898_v24  ;;  %v6673_v54 = vsel %vm9674_vm12, %v6672_v42, %v4916_v36  ;;  %v4832_v18 = vsel %vm4831_vm13, %v6000_v9, 4294967288  ;;  %v3844_v4 = vld [vmem:[#allocation4 + $0xf8] sm:$0xff] }
 0x417   : > { %v6638_v43 = vand.u32 2147483647, %v6637_v49  ;;  %v4932_v48 = vmax.f32 %v6673_v54, -128.0  ;;  %v4888_v27 = vsub.s32 127, %v4856_v29  ;;  %v4870_v33 = vadd.s32 127, %v4862_v45 }
 0x418   : > { %4970 = vst.msk [vmem:[%s9678_s7 + $0x8] sm:$0xf] %vm4967_vm7, %v4961_v21  ;;  %vm4847_vm14 = vcmp.lt.s32.totalorder %v4832_v18, 7  ;;  %v4954_v5 = vmax.f32 %v4946_v57, 0.0  ;;  %v6002_v24 = vadd.s32 4294967169, %v4813_v22  ;;  %vm6635_vm15 = vcmp.lt.f32.partialorder %v6634_v15, 8388608.0 }
 0x419   : > { %v6640_v51 = vor.u32 %v6639_v47, %v6638_v43  ;;  %v9691_v2 = vsel %vm4847_vm14, %v4832_v18, 7  ;;  %v4940_v39 = vmin.f32 %v4932_v48, 127.0  ;;  %v4878_v36 = vshll.u32 %v4870_v33, 23  ;;  %v4006_v33 = vld [vmem:[#allocation4 + $0xb8] sm:$0xff] }
 0x41a   : > { %v4859_v50 = vsub.s32 6, %v9691_v2  ;;  %v4962_v61 = vpack.c.bf16 %v4954_v5, %v4954_v5  ;;  %vm4835_vm1 = vcmp.gt.s32.totalorder %v6002_v24, 4294967288  ;;  %v9695_v29 = vadd.f32 %v9457_v55, %v5213_v38  ;;  %v3843_v38 = vld [vmem:[#allocation4 + $0xf0] sm:$0xff]  ;;  %v6956_v2 = vld [vmem:[%s9963_s2] ss:$0 sm:$0xff] }
 0x41b   : > { %v6641_v3 = vsel %vm6635_vm15, %v6640_v51, %v4912_v30  ;;  %v4948_v53 = vmul.f32 %v4940_v39, %v4900_v40  ;;  %v4918_v32 = vmul.f32 %v4878_v36, %v9494_v59  ;;  %v4836_v12 = vsel %vm4835_vm1, %v6002_v24, 4294967288  ;;  %v6565_v40 = vpop.f32.mrf.mxu1  ;;  %v6595_v59 = vpop.f32.mrf.mxu0  ;;  %v4005_v39 = vld [vmem:[#allocation4 + $0xb0] sm:$0xff] }
 0x41c   : > { %v4928_v26 = vmax.f32 %v6641_v3, -128.0  ;;  %v4867_v60 = vadd.s32 127, %v4859_v50  ;;  %4971 = vst.msk [vmem:[%s9678_s7 + $0xc] sm:$0xf] %vm4967_vm7, %v4962_v61  ;;  %v5236_v17 = vand.u32 2147483647, %v9695_v29  ;;  %v9704_v63 = vadd.f32 %v9457_v55, %v5212_v13 }
 0x41d   : > { %v4956_v30 = vmax.f32 %v4948_v53, 0.0  ;;  %v4896_v37 = vshll.u32 %v4888_v27, 23  ;;  %v6684_v58 = vcvt.f32.s32 %v4918_v32  ;;  %v6682_v19 = vand.u32 2147483647, %v4918_v32  ;;  %v3974_v22 = vpop.f32.mrf.mxu1  ;;  %v4112_v43 = vpop.f32.mrf.mxu0 }
 0x41e   : > { %v4936_v6 = vmin.f32 %v4928_v26, 127.0  ;;  %v4875_v10 = vshll.u32 %v4867_v60, 23  ;;  %vm4851_vm2 = vcmp.lt.s32.totalorder %v4836_v12, 7  ;;  %v6687_v28 = vand.u32 2147483648, %v4918_v32 }
 0x41f   : > { %v4964_v7 = vpack.c.bf16 %v4956_v30, %v4956_v30  ;;  %v6685_v20 = vcvt.s32.f32 %v6684_v58  ;;  %v4852_v15 = vsel %vm4851_vm2, %v4836_v12, 7  ;;  %v5254_v55 = vsel %vm205_vm0, %v5236_v17, -inf }
 0x420   : > { %v4944_v14 = vmul.f32 %v4936_v6, %v4896_v37  ;;  %v4915_v11 = vmul.f32 %v4875_v10, %v9497_v0  ;;  %v5235_v9 = vand.u32 2147483647, %v9704_v63  ;;  %v4861_v47 = vsub.s32 6, %v4852_v15  ;;  %5255 = vmax.xlane.f32.xlu0 %v5254_v55 }
 0x421   : > { %4973 = vst.msk [vmem:[%s9678_s7 + $0x14] sm:$0xf] %vm4967_vm7, %v4964_v7  ;;  %v6686_v49 = vand.u32 2147483647, %v6685_v20  ;;  %v3990_v21 = vadd.f32 %v6565_v40, %v3844_v4  ;;  %v4894_v18 = vsub.s32 127, %v4862_v45  ;;  %vm6683_vm3 = vcmp.lt.f32.partialorder %v6682_v19, 8388608.0 }
 0x422   : > { %v4952_v42 = vmax.f32 %v4944_v14, 0.0  ;;  %v6660_v57 = vcvt.f32.s32 %v4915_v11  ;;  %v5251_v54 = vsel %vm205_vm0, %v5235_v9, -inf  ;;  %v4869_v27 = vadd.s32 127, %v4861_v47 }
 0x423   : > { %v6688_v48 = vor.u32 %v6687_v28, %v6686_v49  ;;  %5252 = vmax.xlane.f32.xlu1 %v5251_v54  ;;  %3998 = vst.msk [vmem:[#allocation4 + $0xf8] sm:$0xff] %vm205_vm0, %v3990_v21  ;;  %v4128_v51 = vadd.f32 %v6595_v59, %v4006_v33  ;;  %v3989_v24 = vadd.f32 %v3974_v22, %v3843_v38  ;;  %v6658_v13 = vand.u32 2147483647, %v4915_v11 }
 0x424   : > { %v4960_v0 = vpack.c.bf16 %v4952_v42, %v4952_v42  ;;  %v6661_v5 = vcvt.s32.f32 %v6660_v57  ;;  %v4877_v61 = vshll.u32 %v4869_v27, 23  ;;  %v4127_v3 = vadd.f32 %v4112_v43, %v4005_v39 }
 0x425   : > { %v6689_v36 = vsel %vm6683_vm3, %v6688_v48, %v4918_v32  ;;  %v6663_v53 = vand.u32 2147483648, %v4915_v11  ;;  %4136 = vst.msk [vmem:[#allocation4 + $0xb8] sm:$0xff] %vm205_vm0, %v4128_v51  ;;  %3997 = vst.msk [vmem:[#allocation4 + $0xf0] sm:$0xff] %vm205_vm0, %v3989_v24  ;;  %v4902_v60 = vshll.u32 %v4894_v18, 23  ;;  %v4891_v32 = vsub.s32 127, %v4859_v50 }
 0x426   : > { %4969 = vst.msk [vmem:[%s9678_s7 + $0x4] sm:$0xf] %vm4967_vm7, %v4960_v0  ;;  %v4934_v44 = vmax.f32 %v6689_v36, -128.0  ;;  %v6662_v45 = vand.u32 2147483647, %v6661_v5  ;;  %v4917_v26 = vmul.f32 %v4877_v61, %v9506_v23  ;;  %vm6659_vm4 = vcmp.lt.f32.partialorder %v6658_v13, 8388608.0 }
 0x427   : > { %4135 = vst.msk [vmem:[#allocation4 + $0xb0] sm:$0xff] %vm205_vm0, %v4127_v3  ;;  %v4899_v59 = vshll.u32 %v4891_v32, 23 }
 0x428   : > { %v4942_v12 = vmin.f32 %v4934_v44, 127.0  ;;  %v6664_v17 = vor.u32 %v6663_v53, %v6662_v45  ;;  %v6676_v30 = vcvt.f32.s32 %v4917_v26  ;;  %v6674_v10 = vand.u32 2147483647, %v4917_v26 }
 0x429   : > { %v6679_v14 = vand.u32 2147483648, %v4917_v26 }
 0x42a   : > { %v4950_v37 = vmul.f32 %v4942_v12, %v4902_v60  ;;  %v6665_v6 = vsel %vm6659_vm4, %v6664_v17, %v4915_v11  ;;  %v6677_v40 = vcvt.s32.f32 %v6676_v30  ;;  %v4893_v11 = vsub.s32 127, %v4861_v47 }
 0x42b   : > { %v4931_v58 = vmax.f32 %v6665_v6, -128.0  ;;  %vm6675_vm5 = vcmp.lt.f32.partialorder %v6674_v10, 8388608.0 }
 0x42c   : > { %v4958_v19 = vmax.f32 %v4950_v37, 0.0  ;;  %v6678_v23 = vand.u32 2147483647, %v6677_v40  ;;  %v5215_v20 = vld [vmem:[#allocation4 + $0xb8] sm:$0xff]  ;;  %v4901_v33 = vshll.u32 %v4893_v11, 23 }
 0x42d   : > { %v4939_v7 = vmin.f32 %v4931_v58, 127.0  ;;  %v9726_v50 = vadd.f32 %v6956_v2, %v5215_v20 }
 0x42e   : > { %v4966_v28 = vpack.c.bf16 %v4958_v19, %v4958_v19  ;;  %v5214_v15 = vld [vmem:[#allocation4 + $0xb0] sm:$0xff]  ;;  %v6680_v9 = vor.u32 %v6679_v14, %v6678_v23 }
 0x42f   : > { %v4947_v55 = vmul.f32 %v4939_v7, %v4899_v59  ;;  %v9728_v4 = vadd.f32 %v6956_v2, %v5214_v15  ;;  %v5238_v49 = vand.u32 2147483647, %v9726_v50 }
 0x430   : > { %v5012_v42 = vpop.xlane.xlu0 %5011  ;;  %4975 = vst.msk [vmem:[%s9678_s7 + $0x1c] sm:$0xf] %vm4967_vm7, %v4966_v28  ;;  %v6681_v57 = vsel %vm6675_vm5, %v6680_v9, %v4917_v26 }
 0x431   : > { %v5040_v21 = vshra.s32 %v5012_v42, 23  ;;  %v4955_v22 = vmax.f32 %v4947_v55, 0.0  ;;  %v5237_v54 = vand.u32 2147483647, %v9728_v4  ;;  %v4933_v0 = vmax.f32 %v6681_v57, -128.0 }
 0x432   : > { %v5260_v18 = vsel %vm205_vm0, %v5238_v49, -inf }
 0x433   : > { %v5009_v43 = vpop.xlane.xlu1 %5008  ;;  %v6006_v47 = vadd.s32 4294967169, %v5040_v21  ;;  %v4963_v27 = vpack.c.bf16 %v4955_v22, %v4955_v22  ;;  %5261 = vmax.xlane.f32.xlu0 %v5260_v18  ;;  %v5257_v38 = vsel %vm205_vm0, %v5237_v54, -inf  ;;  %v4941_v51 = vmin.f32 %v4933_v0, 127.0 }
 0x434   : > { %v5039_v48 = vshra.s32 %v5009_v43, 23  ;;  %v5018_v5 = vpop.xlane.xlu0 %5017  ;;  %5258 = vmax.xlane.f32.xlu1 %v5257_v38 }
 0x435   : > { %vm5057_vm6 = vcmp.gt.s32.totalorder %v6006_v47, 4294967288  ;;  %v5042_v39 = vshra.s32 %v5018_v5, 23  ;;  %4972 = vst.msk [vmem:[%s9678_s7 + $0x10] sm:$0xf] %vm4967_vm7, %v4963_v27  ;;  %v4949_v61 = vmul.f32 %v4941_v51, %v4901_v33 }
 0x436   : > { %v6005_v24 = vadd.s32 4294967169, %v5039_v48  ;;  %v5058_v36 = vsel %vm5057_vm6, %v6006_v47, 4294967288 }
 0x437   : > { %v5015_v13 = vpop.xlane.xlu1 %5014  ;;  %vm5073_vm8 = vcmp.lt.s32.totalorder %v5058_v36, 7  ;;  %v6008_v3 = vadd.s32 4294967169, %v5042_v39  ;;  %v4957_v60 = vmax.f32 %v4949_v61, 0.0 }
 0x438   : > { %vm5055_vm9 = vcmp.gt.s32.totalorder %v6005_v24, 4294967288  ;;  %v5074_v44 = vsel %vm5073_vm8, %v5058_v36, 7  ;;  %v5041_v53 = vshra.s32 %v5015_v13, 23  ;;  %v5024_v26 = vpop.xlane.xlu0 %5023 }
 0x439   : > { %v5056_v45 = vsel %vm5055_vm9, %v6005_v24, 4294967288  ;;  %v5088_v12 = vsub.s32 6, %v5074_v44  ;;  %vm5061_vm11 = vcmp.gt.s32.totalorder %v6008_v3, 4294967288  ;;  %v5044_v37 = vshra.s32 %v5024_v26, 23 }
 0x43a   : > { %vm5071_vm10 = vcmp.lt.s32.totalorder %v5056_v45, 7  ;;  %v5062_v32 = vsel %vm5061_vm11, %v6008_v3, 4294967288  ;;  %v6007_v30 = vadd.s32 4294967169, %v5041_v53  ;;  %v4965_v58 = vpack.c.bf16 %v4957_v60, %v4957_v60 }
 0x43b   : > { %v5072_v17 = vsel %vm5071_vm10, %v5056_v45, 7  ;;  %v5021_v6 = vpop.xlane.xlu1 %5020  ;;  %v5096_v40 = vadd.s32 127, %v5088_v12  ;;  %v9738_v19 = vsub.s32 127, %v5088_v12  ;;  %vm5077_vm12 = vcmp.lt.s32.totalorder %v5062_v32, 7 }
 0x43c   : > { %v5087_v10 = vsub.s32 6, %v5072_v17  ;;  %vm5059_vm13 = vcmp.gt.s32.totalorder %v6007_v30, 4294967288  ;;  %v6010_v59 = vadd.s32 4294967169, %v5044_v37  ;;  %v5043_v7 = vshra.s32 %v5021_v6, 23  ;;  %4974 = vst.msk [vmem:[%s9678_s7 + $0x18] sm:$0xf] %vm4967_vm7, %v4965_v58  ;;  %v5030_v21 = vpop.xlane.xlu0 %5029 }
 0x43d   : > { %v5104_v23 = vshll.u32 %v5096_v40, 23  ;;  %v5078_v28 = vsel %vm5077_vm12, %v5062_v32, 7  ;;  %v5060_v2 = vsel %vm5059_vm13, %v6007_v30, 4294967288  ;;  %v5128_v42 = vshll.u32 %v9738_v19, 23 }
 0x43e   : > { %v5095_v14 = vadd.s32 127, %v5087_v10  ;;  %v9742_v20 = vsub.s32 127, %v5087_v10  ;;  %vm5065_vm14 = vcmp.gt.s32.totalorder %v6010_v59, 4294967288  ;;  %v6009_v15 = vadd.s32 4294967169, %v5043_v7 }
 0x43f   : > { %v5144_v55 = vmul.f32 %v5104_v23, %v9554_v8  ;;  %v5090_v9 = vsub.s32 6, %v5078_v28  ;;  %vm5075_vm15 = vcmp.lt.s32.totalorder %v5060_v2, 7  ;;  %v5066_v49 = vsel %vm5065_vm14, %v6010_v59, 4294967288 }
 0x440   : > { %v5103_v11 = vshll.u32 %v5095_v14, 23  ;;  %v5127_v54 = vshll.u32 %v9742_v20, 23  ;;  %v5076_v18 = vsel %vm5075_vm15, %v5060_v2, 7  ;;  %vm5081_vm1 = vcmp.lt.s32.totalorder %v5066_v49, 7 }
 0x441   : > { %v6698_v22 = vand.u32 2147483647, %v5144_v55  ;;  %v6700_v57 = vcvt.f32.s32 %v5144_v55  ;;  %v5098_v0 = vadd.s32 127, %v5090_v9  ;;  %vm5063_vm2 = vcmp.gt.s32.totalorder %v6009_v15, 4294967288 }
 0x442   : > { %v5143_v43 = vmul.f32 %v5103_v11, %v9560_v52  ;;  %v9748_v8 = vsub.s32 127, %v5090_v9  ;;  %v5046_v27 = vshra.s32 %v5030_v21, 23  ;;  %v6703_v33 = vand.u32 2147483648, %v5144_v55 }
 0x443   : > { %v6701_v47 = vcvt.s32.f32 %v6700_v57  ;;  %v5106_v5 = vshll.u32 %v5098_v0, 23  ;;  %v5089_v51 = vsub.s32 6, %v5076_v18  ;;  %vm9750_vm3 = vcmp.lt.f32.partialorder %v6698_v22, 8388608.0 }
 0x444   : > { %v6692_v48 = vcvt.f32.s32 %v5143_v43  ;;  %v6690_v38 = vand.u32 2147483647, %v5143_v43  ;;  %v5082_v52 = vsel %vm5081_vm1, %v5066_v49, 7  ;;  %v6695_v13 = vand.u32 2147483648, %v5143_v43 }
 0x445   : > { %v6702_v39 = vand.u32 2147483647, %v6701_v47  ;;  %v5146_v61 = vmul.f32 %v5106_v5, %v9567_v34  ;;  %v5097_v3 = vadd.s32 127, %v5089_v51  ;;  %v5092_v44 = vsub.s32 6, %v5082_v52 }
 0x446   : > { %v6693_v36 = vcvt.s32.f32 %v6692_v48  ;;  %v5130_v26 = vshll.u32 %v9748_v8, 23  ;;  %v9756_v60 = vsub.s32 127, %v5089_v51  ;;  %vm9758_vm4 = vcmp.lt.f32.partialorder %v6690_v38, 8388608.0 }
 0x447   : > { %v6704_v45 = vor.u32 %v6703_v33, %v6702_v39  ;;  %v6714_v17 = vand.u32 2147483647, %v5146_v61  ;;  %v6716_v32 = vcvt.f32.s32 %v5146_v61  ;;  %v5105_v30 = vshll.u32 %v5097_v3, 23 }
 0x448   : > { %v6694_v53 = vand.u32 2147483647, %v6693_v36  ;;  %v5100_v34 = vadd.s32 127, %v5092_v44  ;;  %v5064_v58 = vsel %vm5063_vm2, %v6009_v15, 4294967288  ;;  %v6012_v59 = vadd.s32 4294967169, %v5046_v27  ;;  %v6616_v36 = vpop.f32.mrf.mxu1 }
 0x449   : > { %v6705_v37 = vsel %vm9750_vm3, %v6704_v45, %v5144_v55  ;;  %v6717_v19 = vcvt.s32.f32 %v6716_v32  ;;  %v5145_v10 = vmul.f32 %v5105_v30, %v9574_v35  ;;  %v6719_v23 = vand.u32 2147483648, %v5146_v61  ;;  %v5027_v45 = vpop.xlane.xlu1 %5026 }
 0x44a   : > { %v6696_v6 = vor.u32 %v6695_v13, %v6694_v53  ;;  %v5160_v40 = vmax.f32 %v6705_v37, -128.0  ;;  %v5129_v14 = vshll.u32 %v9756_v60, 23  ;;  %v5108_v20 = vshll.u32 %v5100_v34, 23  ;;  %v4583_v34 = vld [vmem:[#allocation4 + $0xc8] sm:$0xff] }
 0x44b   : > { %vm9769_vm5 = vcmp.lt.f32.partialorder %v6714_v17, 8388608.0  ;;  %v6718_v11 = vand.u32 2147483647, %v6717_v19  ;;  %v6708_v15 = vcvt.f32.s32 %v5145_v10  ;;  %v9773_v9 = vsub.s32 127, %v5092_v44 }
 0x44c   : > { %v6697_v7 = vsel %vm9758_vm4, %v6696_v6, %v5143_v43  ;;  %v5168_v28 = vmin.f32 %v5160_v40, 127.0  ;;  %v5148_v35 = vmul.f32 %v5108_v20, %v9580_v56  ;;  %vm5079_vm6 = vcmp.lt.s32.totalorder %v5064_v58, 7 }
 0x44d   : > { %v5159_v2 = vmax.f32 %v6697_v7, -128.0  ;;  %v6720_v22 = vor.u32 %v6719_v23, %v6718_v11  ;;  %v6706_v57 = vand.u32 2147483647, %v5145_v10  ;;  %v6709_v43 = vcvt.s32.f32 %v6708_v15 }
 0x44e   : > { %v5176_v49 = vmul.f32 %v5168_v28, %v5128_v42  ;;  %v6711_v0 = vand.u32 2147483648, %v5145_v10  ;;  %v6730_v18 = vand.u32 2147483647, %v5148_v35  ;;  %v6732_v47 = vcvt.f32.s32 %v5148_v35  ;;  %v4582_v28 = vld [vmem:[#allocation4 + $0xc0] sm:$0xff] }
 0x44f   : > { %v5167_v21 = vmin.f32 %v5159_v2, 127.0  ;;  %v6721_v27 = vsel %vm9769_vm5, %v6720_v22, %v5146_v61  ;;  %v5080_v33 = vsel %vm5079_vm6, %v5064_v58, 7  ;;  %v6710_v5 = vand.u32 2147483647, %v6709_v43  ;;  %v4689_v58 = vpop.f32.mrf.mxu1  ;;  %v5244_v22 = vpop.xlane.xlu0 %5243 }
 0x450   : > { %v5184_v48 = vmax.f32 %v5176_v49, 0.0  ;;  %v5162_v38 = vmax.f32 %v6721_v27, -128.0  ;;  %v6733_v51 = vcvt.s32.f32 %v6732_v47  ;;  %v6735_v56 = vand.u32 2147483648, %v5148_v35 }
 0x451   : > { %v5175_v8 = vmul.f32 %v5167_v21, %v5127_v54  ;;  %v5091_v39 = vsub.s32 6, %v5080_v33  ;;  %vm5069_vm8 = vcmp.gt.s32.totalorder %v6012_v59, 4294967288  ;;  %v6712_v13 = vor.u32 %v6711_v0, %v6710_v5 }
 0x452   : > { %v5192_v24 = vpack.c.bf16 %v5184_v48, %v5184_v48  ;;  %v5170_v52 = vmin.f32 %v5162_v38, 127.0  ;;  %v6734_v3 = vand.u32 2147483647, %v6733_v51  ;;  %v5070_v44 = vsel %vm5069_vm8, %v6012_v59, 4294967288 }
 0x453   : > { %v5183_v42 = vmax.f32 %v5175_v8, 0.0  ;;  %vm6707_vm9 = vcmp.lt.f32.partialorder %v6706_v57, 8388608.0  ;;  %v5099_v61 = vadd.s32 127, %v5091_v39  ;;  %vm5085_vm10 = vcmp.lt.s32.totalorder %v5070_v44, 7  ;;  %v5241_v57 = vpop.xlane.xlu1 %5240 }
 0x454   : > { %6014 = vst.msk [vmem:[%s9678_s7 + $0x24] sm:$0xf] %vm4967_vm7, %v5192_v24  ;;  %v5178_v53 = vmul.f32 %v5170_v52, %v5130_v26  ;;  %v6713_v12 = vsel %vm6707_vm9, %v6712_v13, %v5145_v10  ;;  %v6736_v17 = vor.u32 %v6735_v56, %v6734_v3  ;;  %v5086_v32 = vsel %vm5085_vm10, %v5070_v44, 7 }
 0x455   : > { %v5191_v54 = vpack.c.bf16 %v5183_v42, %v5183_v42  ;;  %v5161_v30 = vmax.f32 %v6713_v12, -128.0  ;;  %vm6731_vm11 = vcmp.lt.f32.partialorder %v6730_v18, 8388608.0  ;;  %v5107_v37 = vshll.u32 %v5099_v61, 23 }
 0x456   : > { %v5094_v6 = vsub.s32 6, %v5086_v32  ;;  %v5186_v40 = vmax.f32 %v5178_v53, 0.0  ;;  %v6737_v19 = vsel %vm6731_vm11, %v6736_v17, %v5148_v35  ;;  %v4729_v59 = vadd.f32 %v6616_v36, %v4583_v34 }
 0x457   : > { %6013 = vst.msk [vmem:[%s9678_s7 + $0x20] sm:$0xf] %vm4967_vm7, %v5191_v54  ;;  %v5045_v7 = vshra.s32 %v5027_v45, 23  ;;  %v5169_v23 = vmin.f32 %v5161_v30, 127.0  ;;  %v5164_v20 = vmax.f32 %v6737_v19, -128.0  ;;  %v5147_v26 = vmul.f32 %v5107_v37, %v9586_v1 }
 0x458   : > { %v5102_v10 = vadd.s32 127, %v5094_v6  ;;  %v5194_v2 = vpack.c.bf16 %v5186_v40, %v5186_v40  ;;  %4737 = vst.msk [vmem:[#allocation4 + $0xc8] sm:$0xff] %vm205_vm0, %v4729_v59  ;;  %v4728_v11 = vadd.f32 %v4689_v58, %v4582_v28  ;;  %v5132_v49 = vshll.u32 %v9773_v9, 23 }
 0x459   : > { %v6011_v55 = vadd.s32 4294967169, %v5045_v7  ;;  %v5177_v15 = vmul.f32 %v5169_v23, %v5129_v14  ;;  %v5172_v35 = vmin.f32 %v5164_v20, 127.0  ;;  %v6724_v21 = vcvt.f32.s32 %v5147_v26 }
 0x45a   : > { %6016 = vst.msk [vmem:[%s9678_s7 + $0x2c] sm:$0xf] %vm4967_vm7, %v5194_v2  ;;  %v5123_v43 = vsub.s32 127, %v5091_v39  ;;  %v6722_v1 = vand.u32 2147483647, %v5147_v26  ;;  %v5110_v0 = vshll.u32 %v5102_v10, 23 }
 0x45b   : > { %vm5067_vm12 = vcmp.gt.s32.totalorder %v6011_v55, 4294967288  ;;  %4736 = vst.msk [vmem:[#allocation4 + $0xc0] sm:$0xff] %vm205_vm0, %v4728_v11  ;;  %v5185_v18 = vmax.f32 %v5177_v15, 0.0  ;;  %v5180_v47 = vmul.f32 %v5172_v35, %v5132_v49  ;;  %v6725_v48 = vcvt.s32.f32 %v6724_v21 }
 0x45c   : > { %v6727_v60 = vand.u32 2147483648, %v5147_v26  ;;  %v5150_v14 = vmul.f32 %v5110_v0, %v9592_v31  ;;  %v5068_v9 = vsel %vm5067_vm12, %v6011_v55, 4294967288  ;;  %v5272_v8 = vshra.s32 %v5244_v22, 23  ;;  %v9796_v31 = vld [vmem:[%s9963_s2] ss:$0 sm:$0xff] }
 0x45d   : > { %v5271_v27 = vshra.s32 %v5241_v57, 23  ;;  %v5193_v33 = vpack.c.bf16 %v5185_v18, %v5185_v18  ;;  %v5188_v38 = vmax.f32 %v5180_v47, 0.0  ;;  %v6726_v5 = vand.u32 2147483647, %v6725_v48 }
 0x45e   : > { %vm5083_vm13 = vcmp.lt.s32.totalorder %v5068_v9, 7  ;;  %v5131_v51 = vshll.u32 %v5123_v43, 23  ;;  %v5126_v56 = vsub.s32 127, %v5094_v6  ;;  %v6748_v24 = vcvt.f32.s32 %v5150_v14 }
 0x45f   : > { %v5084_v42 = vsel %vm5083_vm13, %v5068_v9, 7  ;;  %6015 = vst.msk [vmem:[%s9678_s7 + $0x28] sm:$0xf] %vm4967_vm7, %v5193_v33  ;;  %v5196_v39 = vpack.c.bf16 %v5188_v38, %v5188_v38  ;;  %v6728_v36 = vor.u32 %v6727_v60, %v6726_v5  ;;  %v6023_v13 = vadd.s32 4294967169, %v5272_v8  ;;  %v5441_v61 = vld [vmem:[#allocation4 + $0xc8] sm:$0xff]  ;;  %v6619_v2 = vpop.f32.mrf.mxu1 }
 0x460   : > { %v5093_v52 = vsub.s32 6, %v5084_v42  ;;  %vm6723_vm14 = vcmp.lt.f32.partialorder %v6722_v1, 8388608.0  ;;  %v6746_v3 = vand.u32 2147483647, %v5150_v14  ;;  %v6749_v44 = vcvt.s32.f32 %v6748_v24 }
 0x461   : > { %v6022_v54 = vadd.s32 4294967169, %v5271_v27  ;;  %6018 = vst.msk [vmem:[%s9678_s7 + $0x34] sm:$0xf] %vm4967_vm7, %v5196_v39  ;;  %v6729_v45 = vsel %vm6723_vm14, %v6728_v36, %v5147_v26  ;;  %v6751_v53 = vand.u32 2147483648, %v5150_v14  ;;  %vm5289_vm15 = vcmp.gt.s32.totalorder %v6023_v13, 4294967288  ;;  %v4699_v48 = vpop.f32.mrf.mxu1  ;;  %v4585_v27 = vld [vmem:[#allocation4 + $0xd8] sm:$0xff] }
 0x462   : > { %v5101_v12 = vadd.s32 127, %v5093_v52  ;;  %v5163_v17 = vmax.f32 %v6729_v45, -128.0  ;;  %v6750_v32 = vand.u32 2147483647, %v6749_v44  ;;  %v5290_v30 = vsel %vm5289_vm15, %v6023_v13, 4294967288  ;;  %v5440_v28 = vld [vmem:[#allocation4 + $0xc0] sm:$0xff] }
 0x463   : > { %vm5287_vm1 = vcmp.gt.s32.totalorder %v6022_v54, 4294967288  ;;  %vm5305_vm2 = vcmp.lt.s32.totalorder %v5290_v30, 7  ;;  %v9801_v34 = vadd.f32 %v9796_v31, %v5441_v61  ;;  %vm6747_vm4 = vcmp.lt.f32.partialorder %v6746_v3, 8388608.0 }
 0x464   : > { %v5109_v37 = vshll.u32 %v5101_v12, 23  ;;  %v5288_v6 = vsel %vm5287_vm1, %v6022_v54, 4294967288  ;;  %v5171_v58 = vmin.f32 %v5163_v17, 127.0  ;;  %v6752_v40 = vor.u32 %v6751_v53, %v6750_v32 }
 0x465   : > { %v5306_v19 = vsel %vm5305_vm2, %v5290_v30, 7  ;;  %vm5303_vm3 = vcmp.lt.s32.totalorder %v5288_v6, 7  ;;  %v5464_v15 = vand.u32 2147483647, %v9801_v34  ;;  %v5134_v22 = vshll.u32 %v5126_v56, 23  ;;  %v4584_v56 = vld [vmem:[#allocation4 + $0xd0] sm:$0xff] }
 0x466   : > { %v5149_v59 = vmul.f32 %v5109_v37, %v9598_v41  ;;  %v5320_v7 = vsub.s32 6, %v5306_v19  ;;  %v9804_v23 = vsel %vm5303_vm3, %v5288_v6, 7  ;;  %v5179_v20 = vmul.f32 %v5171_v58, %v5131_v51 }
 0x467   : > { %v6753_v26 = vsel %vm6747_vm4, %v6752_v40, %v5150_v14  ;;  %v5319_v10 = vsub.s32 6, %v9804_v23  ;;  %v9809_v43 = vadd.f32 %v9796_v31, %v5440_v28  ;;  %v5474_v8 = vsel %vm205_vm0, %v5464_v15, -inf }
 0x468   : > { %v5166_v55 = vmax.f32 %v6753_v26, -128.0  ;;  %v6740_v11 = vcvt.f32.s32 %v5149_v59  ;;  %v5187_v49 = vmax.f32 %v5179_v20, 0.0  ;;  %v5328_v35 = vadd.s32 127, %v5320_v7  ;;  %5475 = vmax.xlane.f32.xlu0 %v5474_v8 }
 0x469   : > { %v5327_v21 = vadd.s32 127, %v5319_v10  ;;  %v6738_v0 = vand.u32 2147483647, %v5149_v59  ;;  %v6743_v9 = vand.u32 2147483648, %v5149_v59  ;;  %v5125_v33 = vsub.s32 127, %v5093_v52 }
 0x46a   : > { %v5174_v57 = vmin.f32 %v5166_v55, 127.0  ;;  %v6741_v41 = vcvt.s32.f32 %v6740_v11  ;;  %v5195_v1 = vpack.c.bf16 %v5187_v49, %v5187_v49  ;;  %v5336_v18 = vshll.u32 %v5328_v35, 23  ;;  %v4587_v11 = vld [vmem:[#allocation4 + $0xe8] sm:$0xff] }
 0x46b   : > { %v5335_v47 = vshll.u32 %v5327_v21, 23  ;;  %v4731_v51 = vadd.f32 %v6619_v2, %v4585_v27  ;;  %v5463_v39 = vand.u32 2147483647, %v9809_v43  ;;  %v4730_v36 = vadd.f32 %v4699_v48, %v4584_v56 }
 0x46c   : > { %v5182_v60 = vmul.f32 %v5174_v57, %v5134_v22  ;;  %v6742_v14 = vand.u32 2147483647, %v6741_v41  ;;  %6017 = vst.msk [vmem:[%s9678_s7 + $0x30] sm:$0xf] %vm4967_vm7, %v5195_v1  ;;  %v5376_v38 = vmul.f32 %v5336_v18, %v9617_v46  ;;  %vm6739_vm5 = vcmp.lt.f32.partialorder %v6738_v0, 8388608.0  ;;  %v4586_v18 = vld [vmem:[#allocation4 + $0xe0] sm:$0xff] }
 0x46d   : > { %v5375_v5 = vmul.f32 %v5335_v47, %v9621_v16  ;;  %4739 = vst.msk [vmem:[#allocation4 + $0xd8] sm:$0xff] %vm205_vm0, %v4731_v51  ;;  %4738 = vst.msk [vmem:[#allocation4 + $0xd0] sm:$0xff] %vm205_vm0, %v4730_v36  ;;  %v5133_v46 = vshll.u32 %v5125_v33, 23  ;;  %v5352_v61 = vsub.s32 127, %v5320_v7  ;;  %v5471_v12 = vsel %vm205_vm0, %v5463_v39, -inf }
 0x46e   : > { %v5190_v24 = vmax.f32 %v5182_v60, 0.0  ;;  %v6744_v42 = vor.u32 %v6743_v9, %v6742_v14  ;;  %v6764_v13 = vcvt.f32.s32 %v5376_v38  ;;  %v6762_v45 = vand.u32 2147483647, %v5376_v38  ;;  %5472 = vmax.xlane.f32.xlu1 %v5471_v12 }
 0x46f   : > { %v6756_v52 = vcvt.f32.s32 %v5375_v5  ;;  %v6767_v30 = vand.u32 2147483648, %v5376_v38  ;;  %v6754_v37 = vand.u32 2147483647, %v5375_v5  ;;  %v6759_v58 = vand.u32 2147483648, %v5375_v5 }
 0x470   : > { %v5198_v3 = vpack.c.bf16 %v5190_v24, %v5190_v24  ;;  %v6745_v44 = vsel %vm6739_vm5, %v6744_v42, %v5149_v59  ;;  %v6765_v54 = vcvt.s32.f32 %v6764_v13  ;;  %v5360_v59 = vshll.u32 %v5352_v61, 23 }
 0x471   : > { %v5165_v16 = vmax.f32 %v6745_v44, -128.0  ;;  %v6757_v53 = vcvt.s32.f32 %v6756_v52  ;;  %vm6763_vm6 = vcmp.lt.f32.partialorder %v6762_v45, 8388608.0  ;;  %v5351_v23 = vsub.s32 127, %v5319_v10 }
 0x472   : > { %6020 = vst.msk [vmem:[%s9678_s7 + $0x3c] sm:$0xf] %vm4967_vm7, %v5198_v3  ;;  %v6766_v32 = vand.u32 2147483647, %v6765_v54  ;;  %vm6755_vm8 = vcmp.lt.f32.partialorder %v6754_v37, 8388608.0 }
 0x473   : > { %v5173_v17 = vmin.f32 %v5165_v16, 127.0  ;;  %v6758_v6 = vand.u32 2147483647, %v6757_v53  ;;  %v5359_v27 = vshll.u32 %v5351_v23, 23 }
 0x474   : > { %v6768_v19 = vor.u32 %v6767_v30, %v6766_v32  ;;  %v5443_v26 = vld [vmem:[#allocation4 + $0xd8] sm:$0xff]  ;;  %v5442_v55 = vld [vmem:[#allocation4 + $0xd0] sm:$0xff] }
 0x475   : > { %v5181_v40 = vmul.f32 %v5173_v17, %v5133_v46  ;;  %v6760_v20 = vor.u32 %v6759_v58, %v6758_v6  ;;  %v9823_v2 = vadd.f32 %v9796_v31, %v5443_v26  ;;  %v9826_v22 = vadd.f32 %v9796_v31, %v5442_v55 }
 0x476   : > { %v6769_v7 = vsel %vm6763_vm6, %v6768_v19, %v5376_v38 }
 0x477   : > { %v5189_v28 = vmax.f32 %v5181_v40, 0.0  ;;  %v5250_v49 = vpop.xlane.xlu0 %5249  ;;  %v5392_v35 = vmax.f32 %v6769_v7, -128.0  ;;  %v6761_v21 = vsel %vm6755_vm8, %v6760_v20, %v5375_v5  ;;  %v5466_v1 = vand.u32 2147483647, %v9823_v2  ;;  %v4589_v7 = vld [vmem:[#allocation4 + $0xf8] sm:$0xff] }
 0x478   : > { %v6622_v15 = vpop.f32.mrf.mxu1  ;;  %v5391_v41 = vmax.f32 %v6761_v21, -128.0  ;;  %v5274_v0 = vshra.s32 %v5250_v49, 23  ;;  %v5465_v14 = vand.u32 2147483647, %v9826_v22  ;;  %v4588_v21 = vld [vmem:[#allocation4 + $0xf0] sm:$0xff] }
 0x479   : > { %v4733_v57 = vadd.f32 %v6622_v15, %v4587_v11  ;;  %v5197_v10 = vpack.c.bf16 %v5189_v28, %v5189_v28  ;;  %v5247_v48 = vpop.xlane.xlu1 %5246  ;;  %v5400_v60 = vmin.f32 %v5392_v35, 127.0  ;;  %v5480_v38 = vsel %vm205_vm0, %v5466_v1, -inf }
 0x47a   : > { %v4709_v47 = vpop.f32.mrf.mxu1  ;;  %v5273_v8 = vshra.s32 %v5247_v48, 23  ;;  %v5399_v33 = vmin.f32 %v5391_v41, 127.0  ;;  %v6025_v5 = vadd.s32 4294967169, %v5274_v0  ;;  %5481 = vmax.xlane.f32.xlu0 %v5480_v38  ;;  %v5477_v56 = vsel %vm205_vm0, %v5465_v14, -inf }
 0x47b   : > { %4741 = vst.msk [vmem:[#allocation4 + $0xe8] sm:$0xff] %vm205_vm0, %v4733_v57  ;;  %v4732_v9 = vadd.f32 %v4709_v47, %v4586_v18  ;;  %v5408_v51 = vmul.f32 %v5400_v60, %v5360_v59  ;;  %5478 = vmax.xlane.f32.xlu1 %v5477_v56 }
 0x47c   : > { %6019 = vst.msk [vmem:[%s9678_s7 + $0x38] sm:$0xf] %vm4967_vm7, %v5197_v10  ;;  %v6024_v24 = vadd.s32 4294967169, %v5273_v8  ;;  %v5407_v42 = vmul.f32 %v5399_v33, %v5359_v27  ;;  %vm5293_vm9 = vcmp.gt.s32.totalorder %v6025_v5, 4294967288 }
 0x47d   : > { %4740 = vst.msk [vmem:[#allocation4 + $0xe0] sm:$0xff] %vm205_vm0, %v4732_v9  ;;  %v5416_v39 = vmax.f32 %v5408_v51, 0.0  ;;  %v5294_v36 = vsel %vm5293_vm9, %v6025_v5, 4294967288 }
 0x47e   : > { %vm5291_vm10 = vcmp.gt.s32.totalorder %v6024_v24, 4294967288  ;;  %v5415_v13 = vmax.f32 %v5407_v42, 0.0  ;;  %vm5309_vm11 = vcmp.lt.s32.totalorder %v5294_v36, 7 }
 0x47f   : > { %v5292_v3 = vsel %vm5291_vm10, %v6024_v24, 4294967288  ;;  %v5424_v44 = vpack.c.bf16 %v5416_v39, %v5416_v39  ;;  %v5310_v52 = vsel %vm5309_vm11, %v5294_v36, 7 }
 0x480   : > { %vm5307_vm12 = vcmp.lt.s32.totalorder %v5292_v3, 7  ;;  %v5423_v46 = vpack.c.bf16 %v5415_v13, %v5415_v13  ;;  %v5322_v16 = vsub.s32 6, %v5310_v52 }
 0x481   : > { %v5308_v54 = vsel %vm5307_vm12, %v5292_v3, 7  ;;  %6031 = vst.msk [vmem:[%s9678_s7 + $0x44] sm:$0xf] %vm4967_vm7, %v5424_v44 }
 0x482   : > { %v5445_v61 = vld [vmem:[#allocation4 + $0xe8] sm:$0xff]  ;;  %v5321_v45 = vsub.s32 6, %v5308_v54  ;;  %6030 = vst.msk [vmem:[%s9678_s7 + $0x40] sm:$0xf] %vm4967_vm7, %v5423_v46  ;;  %v5330_v12 = vadd.s32 127, %v5322_v16  ;;  %v5354_v47 = vsub.s32 127, %v5322_v16 }
 0x483   : > { %v9839_v53 = vadd.f32 %v9796_v31, %v5445_v61 }
 0x484   : > { %v5444_v17 = vld [vmem:[#allocation4 + $0xe0] sm:$0xff]  ;;  %v5329_v32 = vadd.s32 127, %v5321_v45  ;;  %v5338_v6 = vshll.u32 %v5330_v12, 23  ;;  %v5353_v14 = vsub.s32 127, %v5321_v45  ;;  %v5362_v33 = vshll.u32 %v5354_v47, 23 }
 0x485   : > { %v5468_v30 = vand.u32 2147483647, %v9839_v53  ;;  %v9845_v37 = vadd.f32 %v9796_v31, %v5444_v17 }
 0x486   : > { %v5337_v58 = vshll.u32 %v5329_v32, 23  ;;  %v5378_v59 = vmul.f32 %v5338_v6, %v9634_v62  ;;  %v5361_v51 = vshll.u32 %v5353_v14, 23 }
 0x487   : > { %v5486_v40 = vsel %vm205_vm0, %v5468_v30, -inf  ;;  %v5467_v19 = vand.u32 2147483647, %v9845_v37 }
 0x488   : > { %5487 = vmax.xlane.f32.xlu0 %v5486_v40  ;;  %v5377_v23 = vmul.f32 %v5337_v58, %v9638_v25  ;;  %v6780_v26 = vcvt.f32.s32 %v5378_v59  ;;  %v6778_v49 = vand.u32 2147483647, %v5378_v59  ;;  %v6783_v41 = vand.u32 2147483648, %v5378_v59 }
 0x489   : > { %v5483_v20 = vsel %vm205_vm0, %v5467_v19, -inf }
 0x48a   : > { %5484 = vmax.xlane.f32.xlu1 %v5483_v20  ;;  %v6772_v28 = vcvt.f32.s32 %v5377_v23  ;;  %v6781_v11 = vcvt.s32.f32 %v6780_v26  ;;  %v6770_v1 = vand.u32 2147483647, %v5377_v23  ;;  %v6775_v0 = vand.u32 2147483648, %v5377_v23 }
 0x48b   : > { %v6625_v55 = vpop.f32.mrf.mxu1  ;;  %vm6779_vm13 = vcmp.lt.f32.partialorder %v6778_v49, 8388608.0 }
 0x48c   : > { %v4735_v15 = vadd.f32 %v6625_v55, %v4589_v7  ;;  %v6773_v35 = vcvt.s32.f32 %v6772_v28  ;;  %v6782_v10 = vand.u32 2147483647, %v6781_v11  ;;  %vm6771_vm14 = vcmp.lt.f32.partialorder %v6770_v1, 8388608.0 }
 0x48d   : > { %v4719_v57 = vpop.f32.mrf.mxu1 }
 0x48e   : > { %4743 = vst.msk [vmem:[#allocation4 + $0xf8] sm:$0xff] %vm205_vm0, %v4735_v15  ;;  %v4734_v62 = vadd.f32 %v4719_v57, %v4588_v21  ;;  %v6774_v25 = vand.u32 2147483647, %v6773_v35  ;;  %v6784_v18 = vor.u32 %v6783_v41, %v6782_v10 }
 0x490   : > { %4742 = vst.msk [vmem:[#allocation4 + $0xf0] sm:$0xff] %vm205_vm0, %v4734_v62  ;;  %v6776_v48 = vor.u32 %v6775_v0, %v6774_v25  ;;  %v6785_v60 = vsel %vm6779_vm13, %v6784_v18, %v5378_v59 }
 0x491   : > { %v5394_v9 = vmax.f32 %v6785_v60, -128.0 }
 0x492   : > { %v6777_v8 = vsel %vm6771_vm14, %v6776_v48, %v5377_v23 }
 0x493   : > { %v5393_v27 = vmax.f32 %v6777_v8, -128.0  ;;  %v5402_v38 = vmin.f32 %v5394_v9, 127.0 }
 0x495   : > { %v5447_v5 = vld [vmem:[#allocation4 + $0xf8] sm:$0xff]  ;;  %v5401_v56 = vmin.f32 %v5393_v27, 127.0  ;;  %v5410_v42 = vmul.f32 %v5402_v38, %v5362_v33 }
 0x496   : > { %v9855_v24 = vadd.f32 %v9796_v31, %v5447_v5 }
 0x497   : > { %v5446_v39 = vld [vmem:[#allocation4 + $0xf0] sm:$0xff]  ;;  %v5409_v36 = vmul.f32 %v5401_v56, %v5361_v51  ;;  %v5418_v44 = vmax.f32 %v5410_v42, 0.0 }
 0x498   : > { %v5470_v13 = vand.u32 2147483647, %v9855_v24  ;;  %v9859_v3 = vadd.f32 %v9796_v31, %v5446_v39 }
 0x499   : > { %v5417_v52 = vmax.f32 %v5409_v36, 0.0  ;;  %v5426_v54 = vpack.c.bf16 %v5418_v44, %v5418_v44 }
 0x49a   : > { %v5492_v46 = vsel %vm205_vm0, %v5470_v13, -inf  ;;  %v5469_v16 = vand.u32 2147483647, %v9859_v3 }
 0x49b   : > { %5493 = vmax.xlane.f32.xlu0 %v5492_v46  ;;  %v5425_v61 = vpack.c.bf16 %v5417_v52, %v5417_v52  ;;  %6033 = vst.msk [vmem:[%s9678_s7 + $0x4c] sm:$0xf] %vm4967_vm7, %v5426_v54 }
 0x49c   : > { %v5489_v45 = vsel %vm205_vm0, %v5469_v16, -inf }
 0x49d   : > { %5490 = vmax.xlane.f32.xlu1 %v5489_v45  ;;  %6032 = vst.msk [vmem:[%s9678_s7 + $0x48] sm:$0xf] %vm4967_vm7, %v5425_v61 }
 0x4a9   : > { %v5256_v12 = vpop.xlane.xlu0 %5255 }
 0x4aa   : > { %v5276_v17 = vshra.s32 %v5256_v12, 23 }
 0x4ac   : > { %v5253_v31 = vpop.xlane.xlu1 %5252  ;;  %v6027_v32 = vadd.s32 4294967169, %v5276_v17 }
 0x4ad   : > { %v5275_v30 = vshra.s32 %v5253_v31, 23 }
 0x4ae   : > { %vm5297_vm15 = vcmp.gt.s32.totalorder %v6027_v32, 4294967288 }
 0x4af   : > { %v6026_v6 = vadd.s32 4294967169, %v5275_v30  ;;  %v5298_v58 = vsel %vm5297_vm15, %v6027_v32, 4294967288 }
 0x4b0   : > { %vm5313_vm1 = vcmp.lt.s32.totalorder %v5298_v58, 7 }
 0x4b1   : > { %vm5295_vm2 = vcmp.gt.s32.totalorder %v6026_v6, 4294967288  ;;  %v5314_v40 = vsel %vm5313_vm1, %v5298_v58, 7 }
 0x4b2   : > { %v5296_v19 = vsel %vm5295_vm2, %v6026_v6, 4294967288  ;;  %v5324_v59 = vsub.s32 6, %v5314_v40 }
 0x4b3   : > { %vm5311_vm3 = vcmp.lt.s32.totalorder %v5296_v19, 7 }
 0x4b4   : > { %v5312_v23 = vsel %vm5311_vm3, %v5296_v19, 7  ;;  %v5332_v20 = vadd.s32 127, %v5324_v59  ;;  %v5356_v14 = vsub.s32 127, %v5324_v59 }
 0x4b5   : > { %v5323_v26 = vsub.s32 6, %v5312_v23 }
 0x4b6   : > { %v5340_v28 = vshll.u32 %v5332_v20, 23  ;;  %v5364_v56 = vshll.u32 %v5356_v14, 23 }
 0x4b7   : > { %v5331_v7 = vadd.s32 127, %v5323_v26  ;;  %v5355_v27 = vsub.s32 127, %v5323_v26 }
 0x4b8   : > { %v5380_v55 = vmul.f32 %v5340_v28, %v9695_v29 }
 0x4b9   : > { %v5339_v11 = vshll.u32 %v5331_v7, 23  ;;  %v5363_v54 = vshll.u32 %v5355_v27, 23 }
 0x4ba   : > { %v6796_v15 = vcvt.f32.s32 %v5380_v55  ;;  %v6794_v41 = vand.u32 2147483647, %v5380_v55  ;;  %v6799_v0 = vand.u32 2147483648, %v5380_v55 }
 0x4bb   : > { %v5379_v49 = vmul.f32 %v5339_v11, %v9704_v63 }
 0x4bc   : > { %v5262_v35 = vpop.xlane.xlu0 %5261  ;;  %v6797_v21 = vcvt.s32.f32 %v6796_v15  ;;  %vm6795_vm0 = vcmp.lt.f32.partialorder %v6794_v41, 8388608.0 }
 0x4bd   : > { %v6788_v57 = vcvt.f32.s32 %v5379_v49  ;;  %v5259_v10 = vpop.xlane.xlu1 %5258  ;;  %v5278_v1 = vshra.s32 %v5262_v35, 23  ;;  %v6786_v47 = vand.u32 2147483647, %v5379_v49  ;;  %v6791_v8 = vand.u32 2147483648, %v5379_v49 }
 0x4be   : > { %v5277_v62 = vshra.s32 %v5259_v10, 23  ;;  %v6798_v25 = vand.u32 2147483647, %v6797_v21 }
 0x4bf   : > { %v6789_v18 = vcvt.s32.f32 %v6788_v57  ;;  %v6029_v48 = vadd.s32 4294967169, %v5278_v1  ;;  %vm6787_vm6 = vcmp.lt.f32.partialorder %v6786_v47, 8388608.0 }
 0x4c0   : > { %v6028_v60 = vadd.s32 4294967169, %v5277_v62  ;;  %v6800_v9 = vor.u32 %v6799_v0, %v6798_v25 }
 0x4c1   : > { %v6790_v29 = vand.u32 2147483647, %v6789_v18  ;;  %vm5301_vm4 = vcmp.gt.s32.totalorder %v6029_v48, 4294967288 }
 0x4c2   : > { %vm5299_vm5 = vcmp.gt.s32.totalorder %v6028_v60, 4294967288  ;;  %v6801_v63 = vsel %vm6795_vm0, %v6800_v9, %v5380_v55  ;;  %v5302_v38 = vsel %vm5301_vm4, %v6029_v48, 4294967288 }
 0x4c3   : > { %v6792_v33 = vor.u32 %v6791_v8, %v6790_v29  ;;  %v5300_v5 = vsel %vm5299_vm5, %v6028_v60, 4294967288  ;;  %v5396_v51 = vmax.f32 %v6801_v63, -128.0  ;;  %vm5317_vm8 = vcmp.lt.s32.totalorder %v5302_v38, 7 }
 0x4c4   : > { %vm5315_vm9 = vcmp.lt.s32.totalorder %v5300_v5, 7  ;;  %v5318_v39 = vsel %vm5317_vm8, %v5302_v38, 7 }
 0x4c5   : > { %v6793_v42 = vsel %vm6787_vm6, %v6792_v33, %v5379_v49  ;;  %v5316_v36 = vsel %vm5315_vm9, %v5300_v5, 7  ;;  %v5404_v13 = vmin.f32 %v5396_v51, 127.0  ;;  %v5326_v52 = vsub.s32 6, %v5318_v39 }
 0x4c6   : > { %v5395_v44 = vmax.f32 %v6793_v42, -128.0  ;;  %v5325_v46 = vsub.s32 6, %v5316_v36 }
 0x4c7   : > { %v5412_v16 = vmul.f32 %v5404_v13, %v5364_v56  ;;  %v5334_v45 = vadd.s32 127, %v5326_v52  ;;  %v5358_v57 = vsub.s32 127, %v5326_v52 }
 0x4c8   : > { %v5403_v61 = vmin.f32 %v5395_v44, 127.0  ;;  %v5333_v12 = vadd.s32 127, %v5325_v46  ;;  %v5357_v10 = vsub.s32 127, %v5325_v46 }
 0x4c9   : > { %v5420_v17 = vmax.f32 %v5412_v16, 0.0  ;;  %v5342_v32 = vshll.u32 %v5334_v45, 23  ;;  %v5366_v25 = vshll.u32 %v5358_v57, 23 }
 0x4ca   : > { %v5411_v31 = vmul.f32 %v5403_v61, %v5363_v54  ;;  %v5341_v30 = vshll.u32 %v5333_v12, 23  ;;  %v5365_v18 = vshll.u32 %v5357_v10, 23 }
 0x4cb   : > { %v5428_v6 = vpack.c.bf16 %v5420_v17, %v5420_v17  ;;  %v5382_v40 = vmul.f32 %v5342_v32, %v9726_v50 }
 0x4cc   : > { %v5419_v58 = vmax.f32 %v5411_v31, 0.0  ;;  %v5381_v19 = vmul.f32 %v5341_v30, %v9728_v4 }
 0x4cd   : > { %6035 = vst.msk [vmem:[%s9678_s7 + $0x54] sm:$0xf] %vm4967_vm7, %v5428_v6  ;;  %v6812_v23 = vcvt.f32.s32 %v5382_v40  ;;  %v6810_v28 = vand.u32 2147483647, %v5382_v40  ;;  %v6815_v11 = vand.u32 2147483648, %v5382_v40 }
 0x4ce   : > { %v5427_v59 = vpack.c.bf16 %v5419_v58, %v5419_v58  ;;  %v6804_v20 = vcvt.f32.s32 %v5381_v19  ;;  %v6802_v15 = vand.u32 2147483647, %v5381_v19  ;;  %v6807_v35 = vand.u32 2147483648, %v5381_v19 }
 0x4cf   : > { %v6813_v26 = vcvt.s32.f32 %v6812_v23  ;;  %vm6811_vm10 = vcmp.lt.f32.partialorder %v6810_v28, 8388608.0 }
 0x4d0   : > { %6034 = vst.msk [vmem:[%s9678_s7 + $0x50] sm:$0xf] %vm4967_vm7, %v5427_v59  ;;  %v6805_v7 = vcvt.s32.f32 %v6804_v20  ;;  %vm6803_vm11 = vcmp.lt.f32.partialorder %v6802_v15, 8388608.0 }
 0x4d1   : > { %v6814_v55 = vand.u32 2147483647, %v6813_v26 }
 0x4d2   : > { %v6806_v49 = vand.u32 2147483647, %v6805_v7 }
 0x4d3   : > { %v6816_v21 = vor.u32 %v6815_v11, %v6814_v55 }
 0x4d4   : > { %v6808_v50 = vor.u32 %v6807_v35, %v6806_v49 }
 0x4d5   : > { %v6817_v4 = vsel %vm6811_vm10, %v6816_v21, %v5382_v40 }
 0x4d6   : > { %v5398_v41 = vmax.f32 %v6817_v4, -128.0  ;;  %v6809_v1 = vsel %vm6803_vm11, %v6808_v50, %v5381_v19 }
 0x4d7   : > { %v5397_v62 = vmax.f32 %v6809_v1, -128.0 }
 0x4d8   : > { %v5406_v0 = vmin.f32 %v5398_v41, 127.0 }
 0x4d9   : > { %v5405_v47 = vmin.f32 %v5397_v62, 127.0 }
 0x4da   : > { %v5414_v48 = vmul.f32 %v5406_v0, %v5366_v25 }
 0x4db   : > { %v5413_v60 = vmul.f32 %v5405_v47, %v5365_v18 }
 0x4dc   : > { %v5422_v14 = vmax.f32 %v5414_v48, 0.0 }
 0x4dd   : > { %v5421_v9 = vmax.f32 %v5413_v60, 0.0 }
 0x4de   : > { %v5430_v29 = vpack.c.bf16 %v5422_v14, %v5422_v14 }
 0x4df   : > { %v5429_v8 = vpack.c.bf16 %v5421_v9, %v5421_v9 }
 0x4e0   : > { %6037 = vst.msk [vmem:[%s9678_s7 + $0x5c] sm:$0xf] %vm4967_vm7, %v5430_v29 }
 0x4e1   : > { %6036 = vst.msk [vmem:[%s9678_s7 + $0x58] sm:$0xf] %vm4967_vm7, %v5429_v8 }
 0x4f1   : > { %v5476_v27 = vpop.xlane.xlu0 %5475 }
 0x4f2   : > { %v5504_v63 = vshra.s32 %v5476_v27, 23 }
 0x4f4   : > { %v6040_v33 = vadd.s32 4294967169, %v5504_v63 }
 0x4f6   : > { %vm5521_vm12 = vcmp.gt.s32.totalorder %v6040_v33, 4294967288 }
 0x4f7   : > { %v5522_v38 = vsel %vm5521_vm12, %v6040_v33, 4294967288  ;;  %v5473_v5 = vpop.xlane.xlu1 %5472 }
 0x4f8   : > { %vm5537_vm13 = vcmp.lt.s32.totalorder %v5522_v38, 7  ;;  %v5503_v51 = vshra.s32 %v5473_v5, 23 }
 0x4f9   : > { %v5538_v56 = vsel %vm5537_vm13, %v5522_v38, 7 }
 0x4fa   : > { %v5552_v42 = vsub.s32 6, %v5538_v56  ;;  %v6039_v39 = vadd.s32 4294967169, %v5503_v51 }
 0x4fc   : > { %v5560_v36 = vadd.s32 127, %v5552_v42  ;;  %vm5519_vm14 = vcmp.gt.s32.totalorder %v6039_v39, 4294967288  ;;  %v5584_v28 = vsub.s32 127, %v5552_v42 }
 0x4fd   : > { %v5520_v13 = vsel %vm5519_vm14, %v6039_v39, 4294967288 }
 0x4fe   : > { %v5568_v44 = vshll.u32 %v5560_v36, 23  ;;  %vm5535_vm15 = vcmp.lt.s32.totalorder %v5520_v13, 7  ;;  %v5592_v41 = vshll.u32 %v5584_v28, 23 }
 0x4ff   : > { %v5536_v52 = vsel %vm5535_vm15, %v5520_v13, 7 }
 0x500   : > { %v5608_v46 = vmul.f32 %v5568_v44, %v9801_v34  ;;  %v5551_v16 = vsub.s32 6, %v5536_v52 }
 0x502   : > { %v6828_v12 = vcvt.f32.s32 %v5608_v46  ;;  %v5559_v17 = vadd.s32 127, %v5551_v16  ;;  %v6826_v58 = vand.u32 2147483647, %v5608_v46  ;;  %v6831_v59 = vand.u32 2147483648, %v5608_v46 }
 0x503   : > { %v5482_v54 = vpop.xlane.xlu0 %5481  ;;  %v5583_v18 = vsub.s32 127, %v5551_v16 }
 0x504   : > { %v5506_v61 = vshra.s32 %v5482_v54, 23  ;;  %v5479_v45 = vpop.xlane.xlu1 %5478  ;;  %v6829_v30 = vcvt.s32.f32 %v6828_v12  ;;  %v5567_v6 = vshll.u32 %v5559_v17, 23  ;;  %vm6827_vm0 = vcmp.lt.f32.partialorder %v6826_v58, 8388608.0 }
 0x505   : > { %v5505_v32 = vshra.s32 %v5479_v45, 23  ;;  %v5591_v51 = vshll.u32 %v5583_v18, 23 }
 0x506   : > { %v6042_v31 = vadd.s32 4294967169, %v5506_v61  ;;  %v6830_v19 = vand.u32 2147483647, %v6829_v30  ;;  %v5607_v23 = vmul.f32 %v5567_v6, %v9809_v43 }
 0x507   : > { %v6041_v40 = vadd.s32 4294967169, %v5505_v32 }
 0x508   : > { %vm5525_vm1 = vcmp.gt.s32.totalorder %v6042_v31, 4294967288  ;;  %v6832_v34 = vor.u32 %v6831_v59, %v6830_v19  ;;  %v6820_v26 = vcvt.f32.s32 %v5607_v23  ;;  %v6818_v21 = vand.u32 2147483647, %v5607_v23 }
 0x509   : > { %v5526_v20 = vsel %vm5525_vm1, %v6042_v31, 4294967288  ;;  %vm5523_vm3 = vcmp.gt.s32.totalorder %v6041_v40, 4294967288  ;;  %v6823_v4 = vand.u32 2147483648, %v5607_v23 }
 0x50a   : > { %vm5541_vm2 = vcmp.lt.s32.totalorder %v5526_v20, 7  ;;  %v5524_v55 = vsel %vm5523_vm3, %v6041_v40, 4294967288  ;;  %v6833_v11 = vsel %vm6827_vm0, %v6832_v34, %v5608_v46  ;;  %v6821_v15 = vcvt.s32.f32 %v6820_v26 }
 0x50b   : > { %v5542_v7 = vsel %vm5541_vm2, %v5526_v20, 7  ;;  %v5624_v35 = vmax.f32 %v6833_v11, -128.0  ;;  %vm5539_vm4 = vcmp.lt.s32.totalorder %v5524_v55, 7  ;;  %vm6819_vm5 = vcmp.lt.f32.partialorder %v6818_v21, 8388608.0 }
 0x50c   : > { %v5554_v49 = vsub.s32 6, %v5542_v7  ;;  %v6822_v50 = vand.u32 2147483647, %v6821_v15  ;;  %v5540_v43 = vsel %vm5539_vm4, %v5524_v55, 7 }
 0x50d   : > { %v5632_v1 = vmin.f32 %v5624_v35, 127.0  ;;  %v5553_v62 = vsub.s32 6, %v5540_v43 }
 0x50e   : > { %v5562_v10 = vadd.s32 127, %v5554_v49  ;;  %v6824_v47 = vor.u32 %v6823_v4, %v6822_v50  ;;  %v5586_v17 = vsub.s32 127, %v5554_v49 }
 0x50f   : > { %v5640_v14 = vmul.f32 %v5632_v1, %v5592_v41  ;;  %v5561_v9 = vadd.s32 127, %v5553_v62  ;;  %v5585_v28 = vsub.s32 127, %v5553_v62 }
 0x510   : > { %v5570_v48 = vshll.u32 %v5562_v10, 23  ;;  %v6825_v8 = vsel %vm6819_vm5, %v6824_v47, %v5607_v23  ;;  %v5594_v55 = vshll.u32 %v5586_v17, 23 }
 0x511   : > { %v5488_v57 = vpop.xlane.xlu0 %5487  ;;  %v5648_v33 = vmax.f32 %v5640_v14, 0.0  ;;  %v5623_v38 = vmax.f32 %v6825_v8, -128.0  ;;  %v5569_v5 = vshll.u32 %v5561_v9, 23  ;;  %v5593_v10 = vshll.u32 %v5585_v28, 23 }
 0x512   : > { %v5508_v25 = vshra.s32 %v5488_v57, 23  ;;  %v5610_v27 = vmul.f32 %v5570_v48, %v9823_v2 }
 0x513   : > { %v5485_v0 = vpop.xlane.xlu1 %5484  ;;  %v5656_v42 = vpack.c.bf16 %v5648_v33, %v5648_v33  ;;  %v5631_v39 = vmin.f32 %v5623_v38, 127.0  ;;  %v5609_v36 = vmul.f32 %v5569_v5, %v9826_v22 }
 0x514   : > { %v5507_v60 = vshra.s32 %v5485_v0, 23  ;;  %v6044_v29 = vadd.s32 4294967169, %v5508_v25  ;;  %v6844_v56 = vcvt.f32.s32 %v5610_v27  ;;  %v6842_v44 = vand.u32 2147483647, %v5610_v27 }
 0x515   : > { %6048 = vst.msk [vmem:[%s9678_s7 + $0x64] sm:$0xf] %vm4967_vm7, %v5656_v42  ;;  %v5639_v2 = vmul.f32 %v5631_v39, %v5591_v51  ;;  %v6836_v46 = vcvt.f32.s32 %v5609_v36  ;;  %v6847_v54 = vand.u32 2147483648, %v5610_v27  ;;  %v6834_v30 = vand.u32 2147483647, %v5609_v36 }
 0x516   : > { %v6043_v63 = vadd.s32 4294967169, %v5507_v60  ;;  %vm5529_vm6 = vcmp.gt.s32.totalorder %v6044_v29, 4294967288  ;;  %v6845_v52 = vcvt.s32.f32 %v6844_v56  ;;  %vm6843_vm10 = vcmp.lt.f32.partialorder %v6842_v44, 8388608.0 }
 0x517   : > { %v5530_v13 = vsel %vm5529_vm6, %v6044_v29, 4294967288  ;;  %v5647_v12 = vmax.f32 %v5639_v2, 0.0  ;;  %v6837_v31 = vcvt.s32.f32 %v6836_v46  ;;  %v6839_v40 = vand.u32 2147483648, %v5609_v36 }
 0x518   : > { %vm5545_vm8 = vcmp.lt.s32.totalorder %v5530_v13, 7  ;;  %vm5527_vm9 = vcmp.gt.s32.totalorder %v6043_v63, 4294967288  ;;  %v6846_v16 = vand.u32 2147483647, %v6845_v52  ;;  %vm6835_vm12 = vcmp.lt.f32.partialorder %v6834_v30, 8388608.0 }
 0x519   : > { %v5546_v61 = vsel %vm5545_vm8, %v5530_v13, 7  ;;  %v5528_v45 = vsel %vm5527_vm9, %v6043_v63, 4294967288  ;;  %v5655_v6 = vpack.c.bf16 %v5647_v12, %v5647_v12  ;;  %v6838_v58 = vand.u32 2147483647, %v6837_v31 }
 0x51a   : > { %v5556_v32 = vsub.s32 6, %v5546_v61  ;;  %v6848_v22 = vor.u32 %v6847_v54, %v6846_v16  ;;  %vm5543_vm11 = vcmp.lt.s32.totalorder %v5528_v45, 7 }
 0x51b   : > { %v5544_v23 = vsel %vm5543_vm11, %v5528_v45, 7  ;;  %6047 = vst.msk [vmem:[%s9678_s7 + $0x60] sm:$0xf] %vm4967_vm7, %v5655_v6  ;;  %v6840_v34 = vor.u32 %v6839_v40, %v6838_v58 }
 0x51c   : > { %v5564_v19 = vadd.s32 127, %v5556_v32  ;;  %v6849_v59 = vsel %vm6843_vm10, %v6848_v22, %v5610_v27  ;;  %v5555_v7 = vsub.s32 6, %v5544_v23  ;;  %v5588_v63 = vsub.s32 127, %v5556_v32 }
 0x51d   : > { %v5626_v20 = vmax.f32 %v6849_v59, -128.0  ;;  %v6841_v15 = vsel %vm6835_vm12, %v6840_v34, %v5609_v36 }
 0x51e   : > { %v5572_v26 = vshll.u32 %v5564_v19, 23  ;;  %v5625_v35 = vmax.f32 %v6841_v15, -128.0  ;;  %v5563_v21 = vadd.s32 127, %v5555_v7  ;;  %v5596_v16 = vshll.u32 %v5588_v63, 23 }
 0x51f   : > { %v5634_v11 = vmin.f32 %v5626_v20, 127.0  ;;  %v5587_v12 = vsub.s32 127, %v5555_v7 }
 0x520   : > { %v5612_v49 = vmul.f32 %v5572_v26, %v9839_v53  ;;  %v5633_v43 = vmin.f32 %v5625_v35, 127.0  ;;  %v5571_v41 = vshll.u32 %v5563_v21, 23 }
 0x521   : > { %v5642_v50 = vmul.f32 %v5634_v11, %v5594_v55  ;;  %v5595_v19 = vshll.u32 %v5587_v12, 23 }
 0x522   : > { %v6860_v4 = vcvt.f32.s32 %v5612_v49  ;;  %v6858_v62 = vand.u32 2147483647, %v5612_v49  ;;  %v5641_v48 = vmul.f32 %v5633_v43, %v5593_v10  ;;  %v5611_v60 = vmul.f32 %v5571_v41, %v9845_v37 }
 0x523   : > { %v5650_v0 = vmax.f32 %v5642_v50, 0.0  ;;  %v6863_v29 = vand.u32 2147483648, %v5612_v49 }
 0x524   : > { %v5494_v57 = vpop.xlane.xlu0 %5493  ;;  %v6861_v18 = vcvt.s32.f32 %v6860_v4  ;;  %v5649_v27 = vmax.f32 %v5641_v48, 0.0  ;;  %v6852_v33 = vcvt.f32.s32 %v5611_v60  ;;  %vm6859_vm13 = vcmp.lt.f32.partialorder %v6858_v62, 8388608.0 }
 0x525   : > { %v5510_v1 = vshra.s32 %v5494_v57, 23  ;;  %v5658_v53 = vpack.c.bf16 %v5650_v0, %v5650_v0  ;;  %v6850_v51 = vand.u32 2147483647, %v5611_v60  ;;  %v6855_v39 = vand.u32 2147483648, %v5611_v60 }
 0x526   : > { %v5491_v25 = vpop.xlane.xlu1 %5490  ;;  %v6862_v9 = vand.u32 2147483647, %v6861_v18  ;;  %v5657_v5 = vpack.c.bf16 %v5649_v27, %v5649_v27  ;;  %v6853_v56 = vcvt.s32.f32 %v6852_v33 }
 0x527   : > { %v5509_v47 = vshra.s32 %v5491_v25, 23  ;;  %v6046_v14 = vadd.s32 4294967169, %v5510_v1  ;;  %6050 = vst.msk [vmem:[%s9678_s7 + $0x6c] sm:$0xf] %vm4967_vm7, %v5658_v53  ;;  %vm6851_vm3 = vcmp.lt.f32.partialorder %v6850_v51, 8388608.0 }
 0x528   : > { %v6864_v38 = vor.u32 %v6863_v29, %v6862_v9  ;;  %6049 = vst.msk [vmem:[%s9678_s7 + $0x68] sm:$0xf] %vm4967_vm7, %v5657_v5  ;;  %v6854_v44 = vand.u32 2147483647, %v6853_v56 }
 0x529   : > { %v6045_v8 = vadd.s32 4294967169, %v5509_v47  ;;  %vm5533_vm14 = vcmp.gt.s32.totalorder %v6046_v14, 4294967288 }
 0x52a   : > { %v5534_v42 = vsel %vm5533_vm14, %v6046_v14, 4294967288  ;;  %v6865_v37 = vsel %vm6859_vm13, %v6864_v38, %v5612_v49  ;;  %v6856_v61 = vor.u32 %v6855_v39, %v6854_v44 }
 0x52b   : > { %vm5531_vm15 = vcmp.gt.s32.totalorder %v6045_v8, 4294967288  ;;  %vm5549_vm1 = vcmp.lt.s32.totalorder %v5534_v42, 7  ;;  %v5628_v13 = vmax.f32 %v6865_v37, -128.0 }
 0x52c   : > { %v5532_v36 = vsel %vm5531_vm15, %v6045_v8, 4294967288  ;;  %v5550_v52 = vsel %vm5549_vm1, %v5534_v42, 7  ;;  %v6857_v32 = vsel %vm6851_vm3, %v6856_v61, %v5611_v60 }
 0x52d   : > { %vm5547_vm2 = vcmp.lt.s32.totalorder %v5532_v36, 7  ;;  %v5558_v2 = vsub.s32 6, %v5550_v52  ;;  %v5636_v54 = vmin.f32 %v5628_v13, 127.0  ;;  %v5627_v30 = vmax.f32 %v6857_v32, -128.0 }
 0x52e   : > { %v5548_v46 = vsel %vm5547_vm2, %v5532_v36, 7 }
 0x52f   : > { %v5557_v45 = vsub.s32 6, %v5548_v46  ;;  %v5566_v17 = vadd.s32 127, %v5558_v2  ;;  %v5644_v31 = vmul.f32 %v5636_v54, %v5596_v16  ;;  %v5635_v59 = vmin.f32 %v5627_v30, 127.0 }
 0x531   : > { %v5565_v22 = vadd.s32 127, %v5557_v45  ;;  %v5574_v6 = vshll.u32 %v5566_v17, 23  ;;  %v5652_v58 = vmax.f32 %v5644_v31, 0.0  ;;  %v5643_v26 = vmul.f32 %v5635_v59, %v5595_v19 }
 0x532   : > { %v5589_v1 = vsub.s32 127, %v5557_v45 }
 0x533   : > { %v5573_v40 = vshll.u32 %v5565_v22, 23  ;;  %v5614_v23 = vmul.f32 %v5574_v6, %v9855_v24  ;;  %v5660_v20 = vpack.c.bf16 %v5652_v58, %v5652_v58  ;;  %v5651_v55 = vmax.f32 %v5643_v26, 0.0 }
 0x534   : > { %v5597_v48 = vshll.u32 %v5589_v1, 23 }
 0x535   : > { %v5613_v34 = vmul.f32 %v5573_v40, %v9859_v3  ;;  %v6876_v28 = vcvt.f32.s32 %v5614_v23  ;;  %6052 = vst.msk [vmem:[%s9678_s7 + $0x74] sm:$0xf] %vm4967_vm7, %v5660_v20  ;;  %v6874_v15 = vand.u32 2147483647, %v5614_v23  ;;  %v5659_v35 = vpack.c.bf16 %v5651_v55, %v5651_v55 }
 0x536   : > { %v6879_v57 = vand.u32 2147483648, %v5614_v23  ;;  %v5590_v3 = vsub.s32 127, %v5558_v2 }
 0x537   : > { %v6868_v7 = vcvt.f32.s32 %v5613_v34  ;;  %v6877_v11 = vcvt.s32.f32 %v6876_v28  ;;  %v6866_v50 = vand.u32 2147483647, %v5613_v34  ;;  %v6871_v10 = vand.u32 2147483648, %v5613_v34  ;;  %6051 = vst.msk [vmem:[%s9678_s7 + $0x70] sm:$0xf] %vm4967_vm7, %v5659_v35 }
 0x538   : > { %vm6875_vm0 = vcmp.lt.f32.partialorder %v6874_v15, 8388608.0  ;;  %v5598_v18 = vshll.u32 %v5590_v3, 23 }
 0x539   : > { %v6869_v49 = vcvt.s32.f32 %v6868_v7  ;;  %v6878_v21 = vand.u32 2147483647, %v6877_v11  ;;  %vm6867_vm4 = vcmp.lt.f32.partialorder %v6866_v50, 8388608.0 }
 0x53b   : > { %v6870_v4 = vand.u32 2147483647, %v6869_v49  ;;  %v6880_v24 = vor.u32 %v6879_v57, %v6878_v21 }
 0x53d   : > { %v6872_v43 = vor.u32 %v6871_v10, %v6870_v4  ;;  %v6881_v41 = vsel %vm6875_vm0, %v6880_v24, %v5614_v23 }
 0x53e   : > { %v5630_v25 = vmax.f32 %v6881_v41, -128.0 }
 0x53f   : > { %v6873_v0 = vsel %vm6867_vm4, %v6872_v43, %v5613_v34 }
 0x540   : > { %v5629_v62 = vmax.f32 %v6873_v0, -128.0  ;;  %v5638_v47 = vmin.f32 %v5630_v25, 127.0 }
 0x542   : > { %v5637_v60 = vmin.f32 %v5629_v62, 127.0  ;;  %v5646_v14 = vmul.f32 %v5638_v47, %v5598_v18 }
 0x544   : > { %v5645_v53 = vmul.f32 %v5637_v60, %v5597_v48  ;;  %v5654_v9 = vmax.f32 %v5646_v14, 0.0 }
 0x546   : > { %v5653_v29 = vmax.f32 %v5645_v53, 0.0  ;;  %v5662_v8 = vpack.c.bf16 %v5654_v9, %v5654_v9 }
 0x548   : > { %v5661_v27 = vpack.c.bf16 %v5653_v29, %v5653_v29  ;;  %6054 = vst.msk [vmem:[%s9678_s7 + $0x7c] sm:$0xf] %vm4967_vm7, %v5662_v8 }
 0x54a   : > { %6053 = vst.msk [vmem:[%s9678_s7 + $0x78] sm:$0xf] %vm4967_vm7, %v5661_v27 }
 0x54b   : > { %6998 = shalt.err (!%p6995_p6)
}
 0x54c   : > { %s6999_s6 = scalar_lea.hbm %s9905_s30, 2048  ;;  %s7003_s9 = scalar_lea.hbm %s9964_s3, 4096 }
 0x54d   : > { %p7000_p7 = scmp.ne.s32.totalorder %s9905_s30, %s6999_s6  ;;  %p7004_p13 = scmp.lt.s32.totalorder %s9905_s30, %s9964_s3 }
 0x54e   : > { %p7005_p2 = scmp.lt.s32.totalorder %s7003_s9, %s6999_s6 }
 0x54f   : > { %p7001_p10 = pnand %p7000_p7, %p7152_p9 }
 0x550   : > { %p7006_p8 = por %p7005_p2, %p7004_p13 }
 0x551   : > { %p7002_p4 = pneg %p7001_p10 }
 0x553   : > { %p7007_p12 = pnand %p7006_p8, %p7002_p4 }
 0x555   : > { %7010 = shalt.err (!%p7007_p12)
}
 0x556   : > { %s7080_s21 = smov 4  }
 0x557   : > { %6884 = dma.vmem_to_hbm [thread:$0]  (%p7152_p9), %s9907_s22, 2048, %s9905_s30, %s5673_s15, %s7078_s29, %s7078_s29, %s7080_s21  }
 0x558 PF: > { %s5704_s23 = sand.u32 1, %s7045_s12   ;;  %p9980_p0 = scmp.ge.s32.totalorder %s7065_s17, 2 }
 0x559   : > { %s5705_s4 = scalar_lea.sflag [#allocation7], %s5704_s23 }
 0x55a   : > { %p6891_p1 = pnand %p9980_p0, %p7159_p11 }
 0x55c   : > { %p6892_p3 = pneg %p6891_p1 }
 0x55e   : > { %7040 = dma.done.wait (%p6892_p3), %s5705_s4, 2048  }
 0x55f   : > { %7042 = vsyncadd (%p6892_p3), %s5705_s4, 4294965248  ;;  %s19_s17 = sadd.s32 1, %s7065_s17   ;;  %s9981_s12 = smov %s7049_s13 }
 0x560   : > { %p16_p5 = scmp.ge.s32.totalorder %s19_s17, 4   ;;  %s9982_s13 = smov %s7053_s14 }
 0x561   : > { %s9983_s14 = smov %s7157_s26  ;;  %s9984_s15 = smov %s7061_s16 }
 0x562   : > { %s9985_s16 = smov %s9987_s20  ;;  %18 = sbr.rel (!%p16_p5) target bundleno = 6 (0x6), region = 93 }
 0x567   :  { %5710 = vsyncpa [#allocation6], 1 }
 0x568   :  { %5712 = vsyncpa [#allocation6 + $0x1], 1 }
 0x569   :  { %5713 = vsyncpa [#allocation7], 1 }
 0x56a   :  { %5715 = vsyncpa [#allocation7 + $0x1], 1 }

</bundles_post_ra>
